<compile_context>
chip_gen: v6e
topology: v6e:2x2x1
jax: 0.10.0
libtpu: 0.0.40
codegen_flags: <defaults>
</compile_context>

<pallas_src>
import jax
import jax.numpy as jnp
from jax.experimental import pallas as pl
from jax.experimental.pallas import tpu as pltpu


# ============================== fused kernel ==================================

def _generator_kernel(
    z_ref, mask_ref, m_ref, ba0_ref,
    ul1_ref, ur1_ref, ul2_ref, ur2_ref, ul3_ref, ur3_ref, ul13_ref, ur13_ref,
    sm8_ref, sp8_ref, sm16_ref, sp16_ref, sm32_ref, sp32_ref,
    t11_ref, b11_ref, t12_ref, b12_ref,
    t21_ref, b21_ref, t22_ref, b22_ref,
    t31_ref, b31_ref, t32_ref, b32_ref,
    trgb_ref, brgb_ref,
    ksc1_ref, bsc1_ref, ksc2_ref, bsc2_ref,
    kskip20_ref, bskip20_ref, kskip30_ref, bskip30_ref, kskip31_ref, bskip31_ref,
    bnscale_ref, bnshift_ref,
    o_ref,
):
    """One grid step = one batch element.  Activations are (H, W*C) matrices."""

    def dot(a, b):
        return jnp.dot(a, b, preferred_element_type=jnp.float32)

    def relu(v):
        return jnp.maximum(v, 0.0)

    def upsample(x, ul_ref, ur_ref):
        # x: (Hin, Win*C) -> (Hout, Wout*C); UL = row-interp, UR = kron(Uw^T, I_C)
        return dot(dot(ul_ref[...], x), ur_ref[...])

    def conv3x3(x, sm, sp, t_ref, b_ref, relu_in=False):
        # Zero-padded 3x3 conv: row shifts (with zero boundary rows) + three
        # banded (W*Cin, W*Cout) matrices that fold the kx taps and the
        # channel mixing into single matmuls.
        if relu_in:
            x = relu(x)                       # relu(0)=0, so padding stays correct
        xu = dot(sm, x)                       # row y <- x[y-1]   (ky = 0 tap)
        xd = dot(sp, x)                       # row y <- x[y+1]   (ky = 2 tap)
        return (dot(xu, t_ref[0]) + dot(x, t_ref[1]) + dot(xd, t_ref[2])
                + b_ref[...])

    # ---- l1: Linear(z) laid out directly as (H0, W0*C) rows -----------------
    z = z_ref[0]                                   # (1, latent)
    a0 = ba0_ref[...]                              # bias, already in layout
    for h in range(mask_ref.shape[0]):             # static unroll over bottom rows
        a0 = a0 + mask_ref[h] * dot(z, m_ref[h])   # place row h via one-hot rows

    sm8, sp8 = sm8_ref[...], sp8_ref[...]
    sm16, sp16 = sm16_ref[...], sp16_ref[...]
    sm32, sp32 = sm32_ref[...], sp32_ref[...]

    # ---- cell1: nearest x2, no skip-in, inner shortcut -----------------------
    a0_up = upsample(a0, ul1_ref, ur1_ref)                        # up(x), nearest
    # nearest-up commutes with relu, so conv(relu(up(x))) == conv(up(relu(x)))
    h1_skip = conv3x3(a0_up, sm8, sp8, t11_ref, b11_ref, relu_in=True)
    h1 = conv3x3(h1_skip, sm8, sp8, t12_ref, b12_ref, relu_in=True)
    h1 = h1 + dot(a0_up, ksc1_ref[...]) + bsc1_ref[...]           # conv1x1(up(x))

    # ---- cell2: bilinear x2, skip-in = (h1_skip,), inner shortcut ------------
    h1r_up = upsample(relu(h1), ul2_ref, ur2_ref)     # relu BEFORE bilinear up
    h2_skip = conv3x3(h1r_up, sm16, sp16, t21_ref, b21_ref)
    ft0 = upsample(h1_skip, ul2_ref, ur2_ref)         # bilinear resize skip 8->16
    h2 = h2_skip + dot(ft0, kskip20_ref[...]) + bskip20_ref[...]
    h2f = conv3x3(h2, sm16, sp16, t22_ref, b22_ref, relu_in=True)
    h1_up = upsample(h1, ul2_ref, ur2_ref)            # shortcut: no relu
    h2f = h2f + dot(h1_up, ksc2_ref[...]) + bsc2_ref[...]

    # ---- cell3: nearest x2, skip-in = (h1_skip, h2_skip), no shortcut --------
    h2r_up = upsample(relu(h2f), ul3_ref, ur3_ref)
    h3 = conv3x3(h2r_up, sm32, sp32, t31_ref, b31_ref)
    ft1 = upsample(h1_skip, ul13_ref, ur13_ref)       # nearest 8 -> 32
    ft2 = upsample(h2_skip, ul3_ref, ur3_ref)         # nearest 16 -> 32
    h3 = h3 + dot(ft1, kskip30_ref[...]) + bskip30_ref[...]
    h3 = h3 + dot(ft2, kskip31_ref[...]) + bskip31_ref[...]
    h3f = conv3x3(h3, sm32, sp32, t32_ref, b32_ref, relu_in=True)

    # ---- to_rgb: BN (eval stats) -> ReLU -> conv3x3 -> tanh -------------------
    # TODO(synk): BN uses eval-mode running statistics (train-mode batch stats
    # are not modeled).
    h3bn = h3f * bnscale_ref[...] + bnshift_ref[...]
    rgb = conv3x3(h3bn, sm32, sp32, trgb_ref, brgb_ref, relu_in=True)
    o_ref[...] = jnp.tanh(rgb).astype(o_ref.dtype)


# ======================== host-side operator construction =====================

def build_operators(params, latent_dim, ch, bw):
    """Precompute the structured matrices that turn every spatial op into a
    matmul inside the fused kernel.  All tiny; built once outside the kernel."""
    f32 = jnp.float32
    s0, s1, s2, s3 = bw, 2 * bw, 4 * bw, 8 * bw

    def eye(n, k=0):
        return jnp.eye(n, k=k, dtype=f32)

    def onehot(idx, n):
        return (idx[:, None] == jnp.arange(n)[None, :]).astype(f32)

    def nearest_mat(n_in, n_out):                    # (n_out, n_in)
        idx = (jnp.arange(n_out) * n_in) // n_out    # PyTorch 'nearest'
        return onehot(idx, n_in)

    def bilinear_mat(n_in, n_out):                   # PyTorch align_corners=False
        scale = n_in / n_out
        dst = jnp.arange(n_out, dtype=f32)
        src = jnp.maximum((dst + 0.5) * scale - 0.5, 0.0)
        i0 = jnp.minimum(jnp.floor(src).astype(jnp.int32), n_in - 1)
        i1 = jnp.minimum(i0 + 1, n_in - 1)
        w1 = src - i0.astype(f32)
        return onehot(i0, n_in) * (1.0 - w1)[:, None] + onehot(i1, n_in) * w1[:, None]

    def up_right(U):                                 # (Win*C, Wout*C)
        return jnp.kron(U.T, jnp.eye(ch, dtype=f32))

    def conv3_ops(w, b, S):
        # w: (3, 3, Cin, Cout) -> T[ky]: (S*Cin, S*Cout) banded; bias row (1, S*Cout)
        mats = []
        for ky in range(3):
            t = jnp.zeros((S * w.shape[2], S * w.shape[3]), f32)
            for kx in range(3):
                t = t + jnp.kron(eye(S, 1 - kx), w[ky, kx].astype(f32))
            mats.append(t)
        return jnp.stack(mats), jnp.tile(b.astype(f32), S)[None, :]

    def conv1_ops(w, b, S):
        return jnp.kron(eye(S), w.astype(f32)), jnp.tile(b.astype(f32), S)[None, :]

    # Linear layer -> (H0, W0*C) layout pieces (column order of l1_w is the
    # PyTorch view order (c, h, w); re-index into (h, k, w*C + c)).
    masks = jnp.stack([jnp.zeros((s0, s0 * ch), f32).at[h].set(1.0)
                       for h in range(s0)])                          # (s0, s0, s0*ch)
    mstack = (params["l1_w"].reshape(latent_dim, ch, s0, s0)
              .transpose(2, 0, 3, 1).reshape(s0, latent_dim, s0 * ch))
    ba0 = (params["l1_b"].reshape(ch, s0, s0)
           .transpose(1, 2, 0).reshape(s0, s0 * ch))

    U1, U2 = nearest_mat(s0, s1), bilinear_mat(s1, s2)
    U3, U13 = nearest_mat(s2, s3), nearest_mat(s1, s3)
    ul1, ur1 = U1, up_right(U1)
    ul2, ur2 = U2, up_right(U2)
    ul3, ur3 = U3, up_right(U3)
    ul13, ur13 = U13, up_right(U13)

    sm8, sp8 = eye(s1, -1), eye(s1, 1)
    sm16, sp16 = eye(s2, -1), eye(s2, 1)
    sm32, sp32 = eye(s3, -1), eye(s3, 1)

    c1, c2, c3 = params["cell1"], params["cell2"], params["cell3"]
    t11, b11 = conv3_ops(c1["c1_w"], c1["c1_b"], s1)
    t12, b12 = conv3_ops(c1["c2_w"], c1["c2_b"], s1)
    t21, b21 = conv3_ops(c2["c1_w"], c2["c1_b"], s2)
    t22, b22 = conv3_ops(c2["c2_w"], c2["c2_b"], s2)
    t31, b31 = conv3_ops(c3["c1_w"], c3["c1_b"], s3)
    t32, b32 = conv3_ops(c3["c2_w"], c3["c2_b"], s3)
    trgb, brgb = conv3_ops(params["rgb_w"], params["rgb_b"], s3)

    ksc1, bsc1 = conv1_ops(c1["sc_w"], c1["sc_b"], s1)
    ksc2, bsc2 = conv1_ops(c2["sc_w"], c2["sc_b"], s2)
    kskip20, bskip20 = conv1_ops(c2["skip0_w"], c2["skip0_b"], s2)
    kskip30, bskip30 = conv1_ops(c3["skip0_w"], c3["skip0_b"], s3)
    kskip31, bskip31 = conv1_ops(c3["skip1_w"], c3["skip1_b"], s3)

    scale = params["bn_gamma"] * jax.lax.rsqrt(params["bn_var"] + 1e-5)
    shift = params["bn_beta"] - params["bn_mean"] * scale
    bn_scale = jnp.tile(scale, s3)[None, :]
    bn_shift = jnp.tile(shift, s3)[None, :]

    return [masks, mstack, ba0,
            ul1, ur1, ul2, ur2, ul3, ur3, ul13, ur13,
            sm8, sp8, sm16, sp16, sm32, sp32,
            t11, b11, t12, b12, t21, b21, t22, b22, t31, b31, t32, b32,
            trgb, brgb,
            ksc1, bsc1, ksc2, bsc2, kskip20, bskip20,
            kskip30, bskip30, kskip31, bskip31,
            bn_scale, bn_shift]


# ============================== forward wrapper ================================

def generator_forward(z, ops, *, latent_dim, bw):
    B = z.shape[0]
    s3 = 8 * bw
    z3 = z.reshape(B, 1, latent_dim).astype(jnp.float32)

    def const_spec(a):
        nd = a.ndim
        return pl.BlockSpec(a.shape, lambda b, _n=nd: (0,) * _n)

    out_rows = pl.pallas_call(
        _generator_kernel,
        out_shape=jax.ShapeDtypeStruct((B * s3, s3 * 3), jnp.float32),
        grid=(B,),
        in_specs=[pl.BlockSpec((1, 1, latent_dim), lambda b: (b, 0, 0))]
                 + [const_spec(a) for a in ops],
        out_specs=pl.BlockSpec((s3, s3 * 3), lambda b: (b, 0)),
        compiler_params=pltpu.CompilerParams(
            dimension_semantics=("parallel",)),      # megacore sharding on v7x
    )(z3, *ops)

    # (B*H, W*3) with col = w*3 + c  ->  NCHW to match PyTorch
    return out_rows.reshape(B, s3, s3, 3).transpose(0, 3, 1, 2)


# ========================= plain-JAX reference (check) =========================

def reference_forward(z, params, ch, bw):
    HI = jax.lax.Precision.HIGHEST
    B = z.shape[0]
    h = jnp.dot(z, params["l1_w"], precision=HI) + params["l1_b"]
    h = h.reshape(B, ch, bw, bw).transpose(0, 2, 3, 1)            # NHWC

    def conv3(x, w, b):
        y = jax.lax.conv_general_dilated(
            x, w, window_strides=(1, 1), padding=((1, 1), (1, 1)),
            dimension_numbers=("NHWC", "HWIO", "NHWC"), precision=HI)
        return y + b

    def conv1(x, w, b):
        return jnp.einsum("bhwc,cd->bhwd", x, w, precision=HI) + b

    def up_nearest(x, f):
        return jnp.repeat(jnp.repeat(x, f, axis=1), f, axis=2)

    def up_bilinear(x, oh, ow):
        _, H, W, _ = x.shape

        def iw(n_in, n_out):
            scale = n_in / n_out
            dst = jnp.arange(n_out, dtype=jnp.float32)
            src = jnp.maximum((dst + 0.5) * scale - 0.5, 0.0)
            i0 = jnp.minimum(jnp.floor(src).astype(jnp.int32), n_in - 1)
            i1 = jnp.minimum(i0 + 1, n_in - 1)
            w1 = src - i0.astype(jnp.float32)
            return i0, i1, 1.0 - w1, w1

        i0, i1, a0, a1 = iw(H, oh)
        x = x[:, i0] * a0[None, :, None, None] + x[:, i1] * a1[None, :, None, None]
        j0, j1, c0, c1 = iw(W, ow)
        x = x[:, :, j0] * c0[None, None, :, None] + x[:, :, j1] * c1[None, None, :, None]
        return x

    def up(x, mode, oh, ow):
        if mode == "nearest":
            return up_nearest(x, oh // x.shape[1])
        return up_bilinear(x, oh, ow)

    def cell(x, p, mode, skips, short_cut):
        oh, ow = 2 * x.shape[1], 2 * x.shape[2]
        hh = conv3(up(jnp.maximum(x, 0.0), mode, oh, ow), p["c1_w"], p["c1_b"])
        h_skip = hh
        for i, ft in enumerate(skips):
            hh = hh + conv1(up(ft, mode, oh, ow), p[f"skip{i}_w"], p[f"skip{i}_b"])
        out = conv3(jnp.maximum(hh, 0.0), p["c2_w"], p["c2_b"])
        if short_cut:
            out = out + conv1(up(x, mode, oh, ow), p["sc_w"], p["sc_b"])
        return h_skip, out

    h1s, h1 = cell(h, params["cell1"], "nearest", (), True)
    h2s, h2 = cell(h1, params["cell2"], "bilinear", (h1s,), True)
    _, h3 = cell(h2, params["cell3"], "nearest", (h1s, h2s), False)

    scale = params["bn_gamma"] * jax.lax.rsqrt(params["bn_var"] + 1e-5)
    shift = params["bn_beta"] - params["bn_mean"] * scale
    h3 = h3 * scale + shift
    out = conv3(jnp.maximum(h3, 0.0), params["rgb_w"], params["rgb_b"])
    return jnp.tanh(out).transpose(0, 3, 1, 2)


# ============================ deterministic params =============================

def init_params(key, latent_dim, ch, bw):
    keys = iter(jax.random.split(key, 64))

    def nrm(shape, std=0.05):
        return jax.random.normal(next(keys), shape, jnp.float32) * std

    def cell_params(num_skip, short_cut):
        p = {"c1_w": nrm((3, 3, ch, ch)), "c1_b": nrm((ch,)),
             "c2_w": nrm((3, 3, ch, ch)), "c2_b": nrm((ch,))}
        if short_cut:
            p["sc_w"] = nrm((ch, ch))
            p["sc_b"] = nrm((ch,))
        for i in range(num_skip):
            p[f"skip{i}_w"] = nrm((ch, ch))
            p[f"skip{i}_b"] = nrm((ch,))
        return p

    return {
        "l1_w": nrm((latent_dim, bw * bw * ch)),
        "l1_b": nrm((bw * bw * ch,)),
        "cell1": cell_params(0, True),
        "cell2": cell_params(1, True),
        "cell3": cell_params(2, False),
        "bn_gamma": jnp.ones((ch,), jnp.float32),
        "bn_beta": jnp.zeros((ch,), jnp.float32),
        "bn_mean": jnp.zeros((ch,), jnp.float32),
        "bn_var": jnp.ones((ch,), jnp.float32),
        "rgb_w": nrm((3, 3, ch, 3)),
        "rgb_b": nrm((3,)),
    }


# ==================================== main =====================================

if __name__ == "__main__":
    LATENT_DIM, GF_DIM, BOTTOM_WIDTH, BATCH = 16, 8, 4, 2

    key = jax.random.PRNGKey(0)
    pkey, zkey = jax.random.split(key)
    params = init_params(pkey, LATENT_DIM, GF_DIM, BOTTOM_WIDTH)
    z = jax.random.normal(zkey, (BATCH, LATENT_DIM), jnp.float32)

    ops = build_operators(params, LATENT_DIM, GF_DIM, BOTTOM_WIDTH)
    fwd = jax.jit(lambda zz, oo: generator_forward(
        zz, oo, latent_dim=LATENT_DIM, bw=BOTTOM_WIDTH))

    out = jax.block_until_ready(fwd(z, ops))

    S = 8 * BOTTOM_WIDTH
    assert out.shape == (BATCH, 3, S, S), out.shape
    assert bool(jnp.all(jnp.isfinite(out)))
    assert bool(jnp.all(jnp.abs(out) <= 1.0))       # tanh output range

    ref = reference_forward(z, params, GF_DIM, BOTTOM_WIDTH)
    max_err = float(jnp.max(jnp.abs(out - ref)))
    assert max_err < 5e-2, f"mismatch vs reference: {max_err}"

    print("KERNEL_OK")
</pallas_src>

<mosaic_0001>
module attributes {stable_mosaic.version = 11 : i64} {
  func.func @_generator_kernel(%arg0: i32, %arg1: memref<1x1x16xf32, #tpu.memory_space<vmem>>, %arg2: memref<4x4x32xf32, #tpu.memory_space<vmem>>, %arg3: memref<4x16x32xf32, #tpu.memory_space<vmem>>, %arg4: memref<4x32xf32, #tpu.memory_space<vmem>>, %arg5: memref<8x4xf32, #tpu.memory_space<vmem>>, %arg6: memref<32x64xf32, #tpu.memory_space<vmem>>, %arg7: memref<16x8xf32, #tpu.memory_space<vmem>>, %arg8: memref<64x128xf32, #tpu.memory_space<vmem>>, %arg9: memref<32x16xf32, #tpu.memory_space<vmem>>, %arg10: memref<128x256xf32, #tpu.memory_space<vmem>>, %arg11: memref<32x8xf32, #tpu.memory_space<vmem>>, %arg12: memref<64x256xf32, #tpu.memory_space<vmem>>, %arg13: memref<8x8xf32, #tpu.memory_space<vmem>>, %arg14: memref<8x8xf32, #tpu.memory_space<vmem>>, %arg15: memref<16x16xf32, #tpu.memory_space<vmem>>, %arg16: memref<16x16xf32, #tpu.memory_space<vmem>>, %arg17: memref<32x32xf32, #tpu.memory_space<vmem>>, %arg18: memref<32x32xf32, #tpu.memory_space<vmem>>, %arg19: memref<3x64x64xf32, #tpu.memory_space<vmem>>, %arg20: memref<1x64xf32, #tpu.memory_space<vmem>>, %arg21: memref<3x64x64xf32, #tpu.memory_space<vmem>>, %arg22: memref<1x64xf32, #tpu.memory_space<vmem>>, %arg23: memref<3x128x128xf32, #tpu.memory_space<vmem>>, %arg24: memref<1x128xf32, #tpu.memory_space<vmem>>, %arg25: memref<3x128x128xf32, #tpu.memory_space<vmem>>, %arg26: memref<1x128xf32, #tpu.memory_space<vmem>>, %arg27: memref<3x256x256xf32, #tpu.memory_space<vmem>>, %arg28: memref<1x256xf32, #tpu.memory_space<vmem>>, %arg29: memref<3x256x256xf32, #tpu.memory_space<vmem>>, %arg30: memref<1x256xf32, #tpu.memory_space<vmem>>, %arg31: memref<3x256x96xf32, #tpu.memory_space<vmem>>, %arg32: memref<1x96xf32, #tpu.memory_space<vmem>>, %arg33: memref<64x64xf32, #tpu.memory_space<vmem>>, %arg34: memref<1x64xf32, #tpu.memory_space<vmem>>, %arg35: memref<128x128xf32, #tpu.memory_space<vmem>>, %arg36: memref<1x128xf32, #tpu.memory_space<vmem>>, %arg37: memref<128x128xf32, #tpu.memory_space<vmem>>, %arg38: memref<1x128xf32, #tpu.memory_space<vmem>>, %arg39: memref<256x256xf32, #tpu.memory_space<vmem>>, %arg40: memref<1x256xf32, #tpu.memory_space<vmem>>, %arg41: memref<256x256xf32, #tpu.memory_space<vmem>>, %arg42: memref<1x256xf32, #tpu.memory_space<vmem>>, %arg43: memref<1x256xf32, #tpu.memory_space<vmem>>, %arg44: memref<1x256xf32, #tpu.memory_space<vmem>>, %arg45: memref<32x96xf32, #tpu.memory_space<vmem>>) attributes {dimension_semantics = [#tpu.dimension_semantics<parallel>], iteration_bounds = array<i64: 2>, scalar_prefetch = 0 : i64, scratch_operands = 0 : i64, tpu.core_type = #tpu.core_type<tc>, window_params = [{transform_indices = @transform_0, window_bounds = array<i64: 1, 1, 16>}, {pipeline_mode = #tpu.pipeline_mode<synchronous>, transform_indices = @transform_1, window_bounds = array<i64: 4, 4, 32>}, {pipeline_mode = #tpu.pipeline_mode<synchronous>, transform_indices = @transform_2, window_bounds = array<i64: 4, 16, 32>}, {pipeline_mode = #tpu.pipeline_mode<synchronous>, transform_indices = @transform_3, window_bounds = array<i64: 4, 32>}, {pipeline_mode = #tpu.pipeline_mode<synchronous>, transform_indices = @transform_4, window_bounds = array<i64: 8, 4>}, {pipeline_mode = #tpu.pipeline_mode<synchronous>, transform_indices = @transform_5, window_bounds = array<i64: 32, 64>}, {pipeline_mode = #tpu.pipeline_mode<synchronous>, transform_indices = @transform_6, window_bounds = array<i64: 16, 8>}, {pipeline_mode = #tpu.pipeline_mode<synchronous>, transform_indices = @transform_7, window_bounds = array<i64: 64, 128>}, {pipeline_mode = #tpu.pipeline_mode<synchronous>, transform_indices = @transform_8, window_bounds = array<i64: 32, 16>}, {pipeline_mode = #tpu.pipeline_mode<synchronous>, transform_indices = @transform_9, window_bounds = array<i64: 128, 256>}, {pipeline_mode = #tpu.pipeline_mode<synchronous>, transform_indices = @transform_10, window_bounds = array<i64: 32, 8>}, {pipeline_mode = #tpu.pipeline_mode<synchronous>, transform_indices = @transform_11, window_bounds = array<i64: 64, 256>}, {pipeline_mode = #tpu.pipeline_mode<synchronous>, transform_indices = @transform_12, window_bounds = array<i64: 8, 8>}, {pipeline_mode = #tpu.pipeline_mode<synchronous>, transform_indices = @transform_13, window_bounds = array<i64: 8, 8>}, {pipeline_mode = #tpu.pipeline_mode<synchronous>, transform_indices = @transform_14, window_bounds = array<i64: 16, 16>}, {pipeline_mode = #tpu.pipeline_mode<synchronous>, transform_indices = @transform_15, window_bounds = array<i64: 16, 16>}, {pipeline_mode = #tpu.pipeline_mode<synchronous>, transform_indices = @transform_16, window_bounds = array<i64: 32, 32>}, {pipeline_mode = #tpu.pipeline_mode<synchronous>, transform_indices = @transform_17, window_bounds = array<i64: 32, 32>}, {pipeline_mode = #tpu.pipeline_mode<synchronous>, transform_indices = @transform_18, window_bounds = array<i64: 3, 64, 64>}, {pipeline_mode = #tpu.pipeline_mode<synchronous>, transform_indices = @transform_19, window_bounds = array<i64: 1, 64>}, {pipeline_mode = #tpu.pipeline_mode<synchronous>, transform_indices = @transform_20, window_bounds = array<i64: 3, 64, 64>}, {pipeline_mode = #tpu.pipeline_mode<synchronous>, transform_indices = @transform_21, window_bounds = array<i64: 1, 64>}, {pipeline_mode = #tpu.pipeline_mode<synchronous>, transform_indices = @transform_22, window_bounds = array<i64: 3, 128, 128>}, {pipeline_mode = #tpu.pipeline_mode<synchronous>, transform_indices = @transform_23, window_bounds = array<i64: 1, 128>}, {pipeline_mode = #tpu.pipeline_mode<synchronous>, transform_indices = @transform_24, window_bounds = array<i64: 3, 128, 128>}, {pipeline_mode = #tpu.pipeline_mode<synchronous>, transform_indices = @transform_25, window_bounds = array<i64: 1, 128>}, {pipeline_mode = #tpu.pipeline_mode<synchronous>, transform_indices = @transform_26, window_bounds = array<i64: 3, 256, 256>}, {pipeline_mode = #tpu.pipeline_mode<synchronous>, transform_indices = @transform_27, window_bounds = array<i64: 1, 256>}, {pipeline_mode = #tpu.pipeline_mode<synchronous>, transform_indices = @transform_28, window_bounds = array<i64: 3, 256, 256>}, {pipeline_mode = #tpu.pipeline_mode<synchronous>, transform_indices = @transform_29, window_bounds = array<i64: 1, 256>}, {pipeline_mode = #tpu.pipeline_mode<synchronous>, transform_indices = @transform_30, window_bounds = array<i64: 3, 256, 96>}, {pipeline_mode = #tpu.pipeline_mode<synchronous>, transform_indices = @transform_31, window_bounds = array<i64: 1, 96>}, {pipeline_mode = #tpu.pipeline_mode<synchronous>, transform_indices = @transform_32, window_bounds = array<i64: 64, 64>}, {pipeline_mode = #tpu.pipeline_mode<synchronous>, transform_indices = @transform_33, window_bounds = array<i64: 1, 64>}, {pipeline_mode = #tpu.pipeline_mode<synchronous>, transform_indices = @transform_34, window_bounds = array<i64: 128, 128>}, {pipeline_mode = #tpu.pipeline_mode<synchronous>, transform_indices = @transform_35, window_bounds = array<i64: 1, 128>}, {pipeline_mode = #tpu.pipeline_mode<synchronous>, transform_indices = @transform_36, window_bounds = array<i64: 128, 128>}, {pipeline_mode = #tpu.pipeline_mode<synchronous>, transform_indices = @transform_37, window_bounds = array<i64: 1, 128>}, {pipeline_mode = #tpu.pipeline_mode<synchronous>, transform_indices = @transform_38, window_bounds = array<i64: 256, 256>}, {pipeline_mode = #tpu.pipeline_mode<synchronous>, transform_indices = @transform_39, window_bounds = array<i64: 1, 256>}, {pipeline_mode = #tpu.pipeline_mode<synchronous>, transform_indices = @transform_40, window_bounds = array<i64: 256, 256>}, {pipeline_mode = #tpu.pipeline_mode<synchronous>, transform_indices = @transform_41, window_bounds = array<i64: 1, 256>}, {pipeline_mode = #tpu.pipeline_mode<synchronous>, transform_indices = @transform_42, window_bounds = array<i64: 1, 256>}, {pipeline_mode = #tpu.pipeline_mode<synchronous>, transform_indices = @transform_43, window_bounds = array<i64: 1, 256>}, {transform_indices = @transform_44, window_bounds = array<i64: 32, 96>}]} {
    %c0 = arith.constant 0 : index
    %c0_0 = arith.constant 0 : index
    %c0_1 = arith.constant 0 : index
    %0 = vector.load %arg1[%c0, %c0_0, %c0_1] : memref<1x1x16xf32, #tpu.memory_space<vmem>>, vector<1x1x16xf32>
    %1 = vector.shape_cast %0 : vector<1x1x16xf32> to vector<1x16xf32>
    %c0_2 = arith.constant 0 : index
    %c0_3 = arith.constant 0 : index
    %2 = vector.load %arg4[%c0_2, %c0_3] : memref<4x32xf32, #tpu.memory_space<vmem>>, vector<4x32xf32>
    %c0_4 = arith.constant 0 : index
    %c0_5 = arith.constant 0 : index
    %c0_6 = arith.constant 0 : index
    %3 = vector.load %arg2[%c0_4, %c0_5, %c0_6] : memref<4x4x32xf32, #tpu.memory_space<vmem>>, vector<1x4x32xf32>
    %4 = vector.shape_cast %3 : vector<1x4x32xf32> to vector<4x32xf32>
    %c0_7 = arith.constant 0 : index
    %c0_8 = arith.constant 0 : index
    %c0_9 = arith.constant 0 : index
    %5 = vector.load %arg3[%c0_7, %c0_8, %c0_9] : memref<4x16x32xf32, #tpu.memory_space<vmem>>, vector<1x16x32xf32>
    %6 = vector.shape_cast %5 : vector<1x16x32xf32> to vector<16x32xf32>
    %cst = arith.constant dense<0.000000e+00> : vector<1x32xf32>
    %7 = tpu.matmul %1, %6, %cst {dimension_numbers = #tpu.dot_dimension_numbers<[1], [0], [0], [1], [0, 0, 1, 1], [], []>} : vector<1x16xf32>, vector<16x32xf32>, vector<1x32xf32> -> vector<1x32xf32>
    %8 = vector.broadcast %7 : vector<1x32xf32> to vector<4x32xf32>
    %9 = arith.mulf %4, %8 : vector<4x32xf32>
    %10 = arith.addf %2, %9 : vector<4x32xf32>
    %c1 = arith.constant 1 : index
    %c0_10 = arith.constant 0 : index
    %c0_11 = arith.constant 0 : index
    %11 = vector.load %arg2[%c1, %c0_10, %c0_11] : memref<4x4x32xf32, #tpu.memory_space<vmem>>, vector<1x4x32xf32>
    %12 = vector.shape_cast %11 : vector<1x4x32xf32> to vector<4x32xf32>
    %c1_12 = arith.constant 1 : index
    %c0_13 = arith.constant 0 : index
    %c0_14 = arith.constant 0 : index
    %13 = vector.load %arg3[%c1_12, %c0_13, %c0_14] : memref<4x16x32xf32, #tpu.memory_space<vmem>>, vector<1x16x32xf32>
    %14 = vector.shape_cast %13 : vector<1x16x32xf32> to vector<16x32xf32>
    %cst_15 = arith.constant dense<0.000000e+00> : vector<1x32xf32>
    %15 = tpu.matmul %1, %14, %cst_15 {dimension_numbers = #tpu.dot_dimension_numbers<[1], [0], [0], [1], [0, 0, 1, 1], [], []>} : vector<1x16xf32>, vector<16x32xf32>, vector<1x32xf32> -> vector<1x32xf32>
    %16 = vector.broadcast %15 : vector<1x32xf32> to vector<4x32xf32>
    %17 = arith.mulf %12, %16 : vector<4x32xf32>
    %18 = arith.addf %10, %17 : vector<4x32xf32>
    %c2 = arith.constant 2 : index
    %c0_16 = arith.constant 0 : index
    %c0_17 = arith.constant 0 : index
    %19 = vector.load %arg2[%c2, %c0_16, %c0_17] : memref<4x4x32xf32, #tpu.memory_space<vmem>>, vector<1x4x32xf32>
    %20 = vector.shape_cast %19 : vector<1x4x32xf32> to vector<4x32xf32>
    %c2_18 = arith.constant 2 : index
    %c0_19 = arith.constant 0 : index
    %c0_20 = arith.constant 0 : index
    %21 = vector.load %arg3[%c2_18, %c0_19, %c0_20] : memref<4x16x32xf32, #tpu.memory_space<vmem>>, vector<1x16x32xf32>
    %22 = vector.shape_cast %21 : vector<1x16x32xf32> to vector<16x32xf32>
    %cst_21 = arith.constant dense<0.000000e+00> : vector<1x32xf32>
    %23 = tpu.matmul %1, %22, %cst_21 {dimension_numbers = #tpu.dot_dimension_numbers<[1], [0], [0], [1], [0, 0, 1, 1], [], []>} : vector<1x16xf32>, vector<16x32xf32>, vector<1x32xf32> -> vector<1x32xf32>
    %24 = vector.broadcast %23 : vector<1x32xf32> to vector<4x32xf32>
    %25 = arith.mulf %20, %24 : vector<4x32xf32>
    %26 = arith.addf %18, %25 : vector<4x32xf32>
    %c3 = arith.constant 3 : index
    %c0_22 = arith.constant 0 : index
    %c0_23 = arith.constant 0 : index
    %27 = vector.load %arg2[%c3, %c0_22, %c0_23] : memref<4x4x32xf32, #tpu.memory_space<vmem>>, vector<1x4x32xf32>
    %28 = vector.shape_cast %27 : vector<1x4x32xf32> to vector<4x32xf32>
    %c3_24 = arith.constant 3 : index
    %c0_25 = arith.constant 0 : index
    %c0_26 = arith.constant 0 : index
    %29 = vector.load %arg3[%c3_24, %c0_25, %c0_26] : memref<4x16x32xf32, #tpu.memory_space<vmem>>, vector<1x16x32xf32>
    %30 = vector.shape_cast %29 : vector<1x16x32xf32> to vector<16x32xf32>
    %cst_27 = arith.constant dense<0.000000e+00> : vector<1x32xf32>
    %31 = tpu.matmul %1, %30, %cst_27 {dimension_numbers = #tpu.dot_dimension_numbers<[1], [0], [0], [1], [0, 0, 1, 1], [], []>} : vector<1x16xf32>, vector<16x32xf32>, vector<1x32xf32> -> vector<1x32xf32>
    %32 = vector.broadcast %31 : vector<1x32xf32> to vector<4x32xf32>
    %33 = arith.mulf %28, %32 : vector<4x32xf32>
    %34 = arith.addf %26, %33 : vector<4x32xf32>
    %c0_28 = arith.constant 0 : index
    %c0_29 = arith.constant 0 : index
    %35 = vector.load %arg13[%c0_28, %c0_29] : memref<8x8xf32, #tpu.memory_space<vmem>>, vector<8x8xf32>
    %c0_30 = arith.constant 0 : index
    %c0_31 = arith.constant 0 : index
    %36 = vector.load %arg14[%c0_30, %c0_31] : memref<8x8xf32, #tpu.memory_space<vmem>>, vector<8x8xf32>
    %c0_32 = arith.constant 0 : index
    %c0_33 = arith.constant 0 : index
    %37 = vector.load %arg15[%c0_32, %c0_33] : memref<16x16xf32, #tpu.memory_space<vmem>>, vector<16x16xf32>
    %c0_34 = arith.constant 0 : index
    %c0_35 = arith.constant 0 : index
    %38 = vector.load %arg16[%c0_34, %c0_35] : memref<16x16xf32, #tpu.memory_space<vmem>>, vector<16x16xf32>
    %c0_36 = arith.constant 0 : index
    %c0_37 = arith.constant 0 : index
    %39 = vector.load %arg17[%c0_36, %c0_37] : memref<32x32xf32, #tpu.memory_space<vmem>>, vector<32x32xf32>
    %c0_38 = arith.constant 0 : index
    %c0_39 = arith.constant 0 : index
    %40 = vector.load %arg18[%c0_38, %c0_39] : memref<32x32xf32, #tpu.memory_space<vmem>>, vector<32x32xf32>
    %c0_40 = arith.constant 0 : index
    %c0_41 = arith.constant 0 : index
    %41 = vector.load %arg5[%c0_40, %c0_41] : memref<8x4xf32, #tpu.memory_space<vmem>>, vector<8x4xf32>
    %cst_42 = arith.constant dense<0.000000e+00> : vector<8x32xf32>
    %42 = tpu.matmul %41, %34, %cst_42 {dimension_numbers = #tpu.dot_dimension_numbers<[1], [0], [0], [1], [0, 0, 1, 1], [], []>} : vector<8x4xf32>, vector<4x32xf32>, vector<8x32xf32> -> vector<8x32xf32>
    %c0_43 = arith.constant 0 : index
    %c0_44 = arith.constant 0 : index
    %43 = vector.load %arg6[%c0_43, %c0_44] : memref<32x64xf32, #tpu.memory_space<vmem>>, vector<32x64xf32>
    %cst_45 = arith.constant dense<0.000000e+00> : vector<8x64xf32>
    %44 = tpu.matmul %42, %43, %cst_45 {dimension_numbers = #tpu.dot_dimension_numbers<[1], [0], [0], [1], [0, 0, 1, 1], [], []>} : vector<8x32xf32>, vector<32x64xf32>, vector<8x64xf32> -> vector<8x64xf32>
    %cst_46 = arith.constant 0.000000e+00 : f32
    %45 = vector.broadcast %cst_46 : f32 to vector<8x64xf32>
    %46 = arith.maximumf %44, %45 : vector<8x64xf32>
    %cst_47 = arith.constant dense<0.000000e+00> : vector<8x64xf32>
    %47 = tpu.matmul %35, %46, %cst_47 {dimension_numbers = #tpu.dot_dimension_numbers<[1], [0], [0], [1], [0, 0, 1, 1], [], []>} : vector<8x8xf32>, vector<8x64xf32>, vector<8x64xf32> -> vector<8x64xf32>
    %cst_48 = arith.constant dense<0.000000e+00> : vector<8x64xf32>
    %48 = tpu.matmul %36, %46, %cst_48 {dimension_numbers = #tpu.dot_dimension_numbers<[1], [0], [0], [1], [0, 0, 1, 1], [], []>} : vector<8x8xf32>, vector<8x64xf32>, vector<8x64xf32> -> vector<8x64xf32>
    %c0_49 = arith.constant 0 : index
    %c0_50 = arith.constant 0 : index
    %c0_51 = arith.constant 0 : index
    %49 = vector.load %arg19[%c0_49, %c0_50, %c0_51] : memref<3x64x64xf32, #tpu.memory_space<vmem>>, vector<1x64x64xf32>
    %50 = vector.shape_cast %49 : vector<1x64x64xf32> to vector<64x64xf32>
    %cst_52 = arith.constant dense<0.000000e+00> : vector<8x64xf32>
    %51 = tpu.matmul %47, %50, %cst_52 {dimension_numbers = #tpu.dot_dimension_numbers<[1], [0], [0], [1], [0, 0, 1, 1], [], []>} : vector<8x64xf32>, vector<64x64xf32>, vector<8x64xf32> -> vector<8x64xf32>
    %c1_53 = arith.constant 1 : index
    %c0_54 = arith.constant 0 : index
    %c0_55 = arith.constant 0 : index
    %52 = vector.load %arg19[%c1_53, %c0_54, %c0_55] : memref<3x64x64xf32, #tpu.memory_space<vmem>>, vector<1x64x64xf32>
    %53 = vector.shape_cast %52 : vector<1x64x64xf32> to vector<64x64xf32>
    %cst_56 = arith.constant dense<0.000000e+00> : vector<8x64xf32>
    %54 = tpu.matmul %46, %53, %cst_56 {dimension_numbers = #tpu.dot_dimension_numbers<[1], [0], [0], [1], [0, 0, 1, 1], [], []>} : vector<8x64xf32>, vector<64x64xf32>, vector<8x64xf32> -> vector<8x64xf32>
    %55 = arith.addf %51, %54 : vector<8x64xf32>
    %c2_57 = arith.constant 2 : index
    %c0_58 = arith.constant 0 : index
    %c0_59 = arith.constant 0 : index
    %56 = vector.load %arg19[%c2_57, %c0_58, %c0_59] : memref<3x64x64xf32, #tpu.memory_space<vmem>>, vector<1x64x64xf32>
    %57 = vector.shape_cast %56 : vector<1x64x64xf32> to vector<64x64xf32>
    %cst_60 = arith.constant dense<0.000000e+00> : vector<8x64xf32>
    %58 = tpu.matmul %48, %57, %cst_60 {dimension_numbers = #tpu.dot_dimension_numbers<[1], [0], [0], [1], [0, 0, 1, 1], [], []>} : vector<8x64xf32>, vector<64x64xf32>, vector<8x64xf32> -> vector<8x64xf32>
    %59 = arith.addf %55, %58 : vector<8x64xf32>
    %c0_61 = arith.constant 0 : index
    %c0_62 = arith.constant 0 : index
    %60 = vector.load %arg20[%c0_61, %c0_62] : memref<1x64xf32, #tpu.memory_space<vmem>>, vector<1x64xf32>
    %61 = vector.broadcast %60 : vector<1x64xf32> to vector<8x64xf32>
    %62 = arith.addf %59, %61 : vector<8x64xf32>
    %cst_63 = arith.constant 0.000000e+00 : f32
    %63 = vector.broadcast %cst_63 : f32 to vector<8x64xf32>
    %64 = arith.maximumf %62, %63 : vector<8x64xf32>
    %cst_64 = arith.constant dense<0.000000e+00> : vector<8x64xf32>
    %65 = tpu.matmul %35, %64, %cst_64 {dimension_numbers = #tpu.dot_dimension_numbers<[1], [0], [0], [1], [0, 0, 1, 1], [], []>} : vector<8x8xf32>, vector<8x64xf32>, vector<8x64xf32> -> vector<8x64xf32>
    %cst_65 = arith.constant dense<0.000000e+00> : vector<8x64xf32>
    %66 = tpu.matmul %36, %64, %cst_65 {dimension_numbers = #tpu.dot_dimension_numbers<[1], [0], [0], [1], [0, 0, 1, 1], [], []>} : vector<8x8xf32>, vector<8x64xf32>, vector<8x64xf32> -> vector<8x64xf32>
    %c0_66 = arith.constant 0 : index
    %c0_67 = arith.constant 0 : index
    %c0_68 = arith.constant 0 : index
    %67 = vector.load %arg21[%c0_66, %c0_67, %c0_68] : memref<3x64x64xf32, #tpu.memory_space<vmem>>, vector<1x64x64xf32>
    %68 = vector.shape_cast %67 : vector<1x64x64xf32> to vector<64x64xf32>
    %cst_69 = arith.constant dense<0.000000e+00> : vector<8x64xf32>
    %69 = tpu.matmul %65, %68, %cst_69 {dimension_numbers = #tpu.dot_dimension_numbers<[1], [0], [0], [1], [0, 0, 1, 1], [], []>} : vector<8x64xf32>, vector<64x64xf32>, vector<8x64xf32> -> vector<8x64xf32>
    %c1_70 = arith.constant 1 : index
    %c0_71 = arith.constant 0 : index
    %c0_72 = arith.constant 0 : index
    %70 = vector.load %arg21[%c1_70, %c0_71, %c0_72] : memref<3x64x64xf32, #tpu.memory_space<vmem>>, vector<1x64x64xf32>
    %71 = vector.shape_cast %70 : vector<1x64x64xf32> to vector<64x64xf32>
    %cst_73 = arith.constant dense<0.000000e+00> : vector<8x64xf32>
    %72 = tpu.matmul %64, %71, %cst_73 {dimension_numbers = #tpu.dot_dimension_numbers<[1], [0], [0], [1], [0, 0, 1, 1], [], []>} : vector<8x64xf32>, vector<64x64xf32>, vector<8x64xf32> -> vector<8x64xf32>
    %73 = arith.addf %69, %72 : vector<8x64xf32>
    %c2_74 = arith.constant 2 : index
    %c0_75 = arith.constant 0 : index
    %c0_76 = arith.constant 0 : index
    %74 = vector.load %arg21[%c2_74, %c0_75, %c0_76] : memref<3x64x64xf32, #tpu.memory_space<vmem>>, vector<1x64x64xf32>
    %75 = vector.shape_cast %74 : vector<1x64x64xf32> to vector<64x64xf32>
    %cst_77 = arith.constant dense<0.000000e+00> : vector<8x64xf32>
    %76 = tpu.matmul %66, %75, %cst_77 {dimension_numbers = #tpu.dot_dimension_numbers<[1], [0], [0], [1], [0, 0, 1, 1], [], []>} : vector<8x64xf32>, vector<64x64xf32>, vector<8x64xf32> -> vector<8x64xf32>
    %77 = arith.addf %73, %76 : vector<8x64xf32>
    %c0_78 = arith.constant 0 : index
    %c0_79 = arith.constant 0 : index
    %78 = vector.load %arg22[%c0_78, %c0_79] : memref<1x64xf32, #tpu.memory_space<vmem>>, vector<1x64xf32>
    %79 = vector.broadcast %78 : vector<1x64xf32> to vector<8x64xf32>
    %80 = arith.addf %77, %79 : vector<8x64xf32>
    %c0_80 = arith.constant 0 : index
    %c0_81 = arith.constant 0 : index
    %81 = vector.load %arg33[%c0_80, %c0_81] : memref<64x64xf32, #tpu.memory_space<vmem>>, vector<64x64xf32>
    %cst_82 = arith.constant dense<0.000000e+00> : vector<8x64xf32>
    %82 = tpu.matmul %44, %81, %cst_82 {dimension_numbers = #tpu.dot_dimension_numbers<[1], [0], [0], [1], [0, 0, 1, 1], [], []>} : vector<8x64xf32>, vector<64x64xf32>, vector<8x64xf32> -> vector<8x64xf32>
    %83 = arith.addf %80, %82 : vector<8x64xf32>
    %c0_83 = arith.constant 0 : index
    %c0_84 = arith.constant 0 : index
    %84 = vector.load %arg34[%c0_83, %c0_84] : memref<1x64xf32, #tpu.memory_space<vmem>>, vector<1x64xf32>
    %85 = vector.broadcast %84 : vector<1x64xf32> to vector<8x64xf32>
    %86 = arith.addf %83, %85 : vector<8x64xf32>
    %cst_85 = arith.constant 0.000000e+00 : f32
    %87 = vector.broadcast %cst_85 : f32 to vector<8x64xf32>
    %88 = arith.maximumf %86, %87 : vector<8x64xf32>
    %c0_86 = arith.constant 0 : index
    %c0_87 = arith.constant 0 : index
    %89 = vector.load %arg7[%c0_86, %c0_87] : memref<16x8xf32, #tpu.memory_space<vmem>>, vector<16x8xf32>
    %cst_88 = arith.constant dense<0.000000e+00> : vector<16x64xf32>
    %90 = tpu.matmul %89, %88, %cst_88 {dimension_numbers = #tpu.dot_dimension_numbers<[1], [0], [0], [1], [0, 0, 1, 1], [], []>} : vector<16x8xf32>, vector<8x64xf32>, vector<16x64xf32> -> vector<16x64xf32>
    %c0_89 = arith.constant 0 : index
    %c0_90 = arith.constant 0 : index
    %91 = vector.load %arg8[%c0_89, %c0_90] : memref<64x128xf32, #tpu.memory_space<vmem>>, vector<64x128xf32>
    %cst_91 = arith.constant dense<0.000000e+00> : vector<16x128xf32>
    %92 = tpu.matmul %90, %91, %cst_91 {dimension_numbers = #tpu.dot_dimension_numbers<[1], [0], [0], [1], [0, 0, 1, 1], [], []>} : vector<16x64xf32>, vector<64x128xf32>, vector<16x128xf32> -> vector<16x128xf32>
    %cst_92 = arith.constant dense<0.000000e+00> : vector<16x128xf32>
    %93 = tpu.matmul %37, %92, %cst_92 {dimension_numbers = #tpu.dot_dimension_numbers<[1], [0], [0], [1], [0, 0, 1, 1], [], []>} : vector<16x16xf32>, vector<16x128xf32>, vector<16x128xf32> -> vector<16x128xf32>
    %cst_93 = arith.constant dense<0.000000e+00> : vector<16x128xf32>
    %94 = tpu.matmul %38, %92, %cst_93 {dimension_numbers = #tpu.dot_dimension_numbers<[1], [0], [0], [1], [0, 0, 1, 1], [], []>} : vector<16x16xf32>, vector<16x128xf32>, vector<16x128xf32> -> vector<16x128xf32>
    %c0_94 = arith.constant 0 : index
    %c0_95 = arith.constant 0 : index
    %c0_96 = arith.constant 0 : index
    %95 = vector.load %arg23[%c0_94, %c0_95, %c0_96] : memref<3x128x128xf32, #tpu.memory_space<vmem>>, vector<1x128x128xf32>
    %96 = vector.shape_cast %95 : vector<1x128x128xf32> to vector<128x128xf32>
    %cst_97 = arith.constant dense<0.000000e+00> : vector<16x128xf32>
    %97 = tpu.matmul %93, %96, %cst_97 {dimension_numbers = #tpu.dot_dimension_numbers<[1], [0], [0], [1], [0, 0, 1, 1], [], []>} : vector<16x128xf32>, vector<128x128xf32>, vector<16x128xf32> -> vector<16x128xf32>
    %c1_98 = arith.constant 1 : index
    %c0_99 = arith.constant 0 : index
    %c0_100 = arith.constant 0 : index
    %98 = vector.load %arg23[%c1_98, %c0_99, %c0_100] : memref<3x128x128xf32, #tpu.memory_space<vmem>>, vector<1x128x128xf32>
    %99 = vector.shape_cast %98 : vector<1x128x128xf32> to vector<128x128xf32>
    %cst_101 = arith.constant dense<0.000000e+00> : vector<16x128xf32>
    %100 = tpu.matmul %92, %99, %cst_101 {dimension_numbers = #tpu.dot_dimension_numbers<[1], [0], [0], [1], [0, 0, 1, 1], [], []>} : vector<16x128xf32>, vector<128x128xf32>, vector<16x128xf32> -> vector<16x128xf32>
    %101 = arith.addf %97, %100 : vector<16x128xf32>
    %c2_102 = arith.constant 2 : index
    %c0_103 = arith.constant 0 : index
    %c0_104 = arith.constant 0 : index
    %102 = vector.load %arg23[%c2_102, %c0_103, %c0_104] : memref<3x128x128xf32, #tpu.memory_space<vmem>>, vector<1x128x128xf32>
    %103 = vector.shape_cast %102 : vector<1x128x128xf32> to vector<128x128xf32>
    %cst_105 = arith.constant dense<0.000000e+00> : vector<16x128xf32>
    %104 = tpu.matmul %94, %103, %cst_105 {dimension_numbers = #tpu.dot_dimension_numbers<[1], [0], [0], [1], [0, 0, 1, 1], [], []>} : vector<16x128xf32>, vector<128x128xf32>, vector<16x128xf32> -> vector<16x128xf32>
    %105 = arith.addf %101, %104 : vector<16x128xf32>
    %c0_106 = arith.constant 0 : index
    %c0_107 = arith.constant 0 : index
    %106 = vector.load %arg24[%c0_106, %c0_107] : memref<1x128xf32, #tpu.memory_space<vmem>>, vector<1x128xf32>
    %107 = vector.broadcast %106 : vector<1x128xf32> to vector<16x128xf32>
    %108 = arith.addf %105, %107 : vector<16x128xf32>
    %c0_108 = arith.constant 0 : index
    %c0_109 = arith.constant 0 : index
    %109 = vector.load %arg7[%c0_108, %c0_109] : memref<16x8xf32, #tpu.memory_space<vmem>>, vector<16x8xf32>
    %cst_110 = arith.constant dense<0.000000e+00> : vector<16x64xf32>
    %110 = tpu.matmul %109, %62, %cst_110 {dimension_numbers = #tpu.dot_dimension_numbers<[1], [0], [0], [1], [0, 0, 1, 1], [], []>} : vector<16x8xf32>, vector<8x64xf32>, vector<16x64xf32> -> vector<16x64xf32>
    %c0_111 = arith.constant 0 : index
    %c0_112 = arith.constant 0 : index
    %111 = vector.load %arg8[%c0_111, %c0_112] : memref<64x128xf32, #tpu.memory_space<vmem>>, vector<64x128xf32>
    %cst_113 = arith.constant dense<0.000000e+00> : vector<16x128xf32>
    %112 = tpu.matmul %110, %111, %cst_113 {dimension_numbers = #tpu.dot_dimension_numbers<[1], [0], [0], [1], [0, 0, 1, 1], [], []>} : vector<16x64xf32>, vector<64x128xf32>, vector<16x128xf32> -> vector<16x128xf32>
    %c0_114 = arith.constant 0 : index
    %c0_115 = arith.constant 0 : index
    %113 = vector.load %arg37[%c0_114, %c0_115] : memref<128x128xf32, #tpu.memory_space<vmem>>, vector<128x128xf32>
    %cst_116 = arith.constant dense<0.000000e+00> : vector<16x128xf32>
    %114 = tpu.matmul %112, %113, %cst_116 {dimension_numbers = #tpu.dot_dimension_numbers<[1], [0], [0], [1], [0, 0, 1, 1], [], []>} : vector<16x128xf32>, vector<128x128xf32>, vector<16x128xf32> -> vector<16x128xf32>
    %115 = arith.addf %108, %114 : vector<16x128xf32>
    %c0_117 = arith.constant 0 : index
    %c0_118 = arith.constant 0 : index
    %116 = vector.load %arg38[%c0_117, %c0_118] : memref<1x128xf32, #tpu.memory_space<vmem>>, vector<1x128xf32>
    %117 = vector.broadcast %116 : vector<1x128xf32> to vector<16x128xf32>
    %118 = arith.addf %115, %117 : vector<16x128xf32>
    %cst_119 = arith.constant 0.000000e+00 : f32
    %119 = vector.broadcast %cst_119 : f32 to vector<16x128xf32>
    %120 = arith.maximumf %118, %119 : vector<16x128xf32>
    %cst_120 = arith.constant dense<0.000000e+00> : vector<16x128xf32>
    %121 = tpu.matmul %37, %120, %cst_120 {dimension_numbers = #tpu.dot_dimension_numbers<[1], [0], [0], [1], [0, 0, 1, 1], [], []>} : vector<16x16xf32>, vector<16x128xf32>, vector<16x128xf32> -> vector<16x128xf32>
    %cst_121 = arith.constant dense<0.000000e+00> : vector<16x128xf32>
    %122 = tpu.matmul %38, %120, %cst_121 {dimension_numbers = #tpu.dot_dimension_numbers<[1], [0], [0], [1], [0, 0, 1, 1], [], []>} : vector<16x16xf32>, vector<16x128xf32>, vector<16x128xf32> -> vector<16x128xf32>
    %c0_122 = arith.constant 0 : index
    %c0_123 = arith.constant 0 : index
    %c0_124 = arith.constant 0 : index
    %123 = vector.load %arg25[%c0_122, %c0_123, %c0_124] : memref<3x128x128xf32, #tpu.memory_space<vmem>>, vector<1x128x128xf32>
    %124 = vector.shape_cast %123 : vector<1x128x128xf32> to vector<128x128xf32>
    %cst_125 = arith.constant dense<0.000000e+00> : vector<16x128xf32>
    %125 = tpu.matmul %121, %124, %cst_125 {dimension_numbers = #tpu.dot_dimension_numbers<[1], [0], [0], [1], [0, 0, 1, 1], [], []>} : vector<16x128xf32>, vector<128x128xf32>, vector<16x128xf32> -> vector<16x128xf32>
    %c1_126 = arith.constant 1 : index
    %c0_127 = arith.constant 0 : index
    %c0_128 = arith.constant 0 : index
    %126 = vector.load %arg25[%c1_126, %c0_127, %c0_128] : memref<3x128x128xf32, #tpu.memory_space<vmem>>, vector<1x128x128xf32>
    %127 = vector.shape_cast %126 : vector<1x128x128xf32> to vector<128x128xf32>
    %cst_129 = arith.constant dense<0.000000e+00> : vector<16x128xf32>
    %128 = tpu.matmul %120, %127, %cst_129 {dimension_numbers = #tpu.dot_dimension_numbers<[1], [0], [0], [1], [0, 0, 1, 1], [], []>} : vector<16x128xf32>, vector<128x128xf32>, vector<16x128xf32> -> vector<16x128xf32>
    %129 = arith.addf %125, %128 : vector<16x128xf32>
    %c2_130 = arith.constant 2 : index
    %c0_131 = arith.constant 0 : index
    %c0_132 = arith.constant 0 : index
    %130 = vector.load %arg25[%c2_130, %c0_131, %c0_132] : memref<3x128x128xf32, #tpu.memory_space<vmem>>, vector<1x128x128xf32>
    %131 = vector.shape_cast %130 : vector<1x128x128xf32> to vector<128x128xf32>
    %cst_133 = arith.constant dense<0.000000e+00> : vector<16x128xf32>
    %132 = tpu.matmul %122, %131, %cst_133 {dimension_numbers = #tpu.dot_dimension_numbers<[1], [0], [0], [1], [0, 0, 1, 1], [], []>} : vector<16x128xf32>, vector<128x128xf32>, vector<16x128xf32> -> vector<16x128xf32>
    %133 = arith.addf %129, %132 : vector<16x128xf32>
    %c0_134 = arith.constant 0 : index
    %c0_135 = arith.constant 0 : index
    %134 = vector.load %arg26[%c0_134, %c0_135] : memref<1x128xf32, #tpu.memory_space<vmem>>, vector<1x128xf32>
    %135 = vector.broadcast %134 : vector<1x128xf32> to vector<16x128xf32>
    %136 = arith.addf %133, %135 : vector<16x128xf32>
    %c0_136 = arith.constant 0 : index
    %c0_137 = arith.constant 0 : index
    %137 = vector.load %arg7[%c0_136, %c0_137] : memref<16x8xf32, #tpu.memory_space<vmem>>, vector<16x8xf32>
    %cst_138 = arith.constant dense<0.000000e+00> : vector<16x64xf32>
    %138 = tpu.matmul %137, %86, %cst_138 {dimension_numbers = #tpu.dot_dimension_numbers<[1], [0], [0], [1], [0, 0, 1, 1], [], []>} : vector<16x8xf32>, vector<8x64xf32>, vector<16x64xf32> -> vector<16x64xf32>
    %c0_139 = arith.constant 0 : index
    %c0_140 = arith.constant 0 : index
    %139 = vector.load %arg8[%c0_139, %c0_140] : memref<64x128xf32, #tpu.memory_space<vmem>>, vector<64x128xf32>
    %cst_141 = arith.constant dense<0.000000e+00> : vector<16x128xf32>
    %140 = tpu.matmul %138, %139, %cst_141 {dimension_numbers = #tpu.dot_dimension_numbers<[1], [0], [0], [1], [0, 0, 1, 1], [], []>} : vector<16x64xf32>, vector<64x128xf32>, vector<16x128xf32> -> vector<16x128xf32>
    %c0_142 = arith.constant 0 : index
    %c0_143 = arith.constant 0 : index
    %141 = vector.load %arg35[%c0_142, %c0_143] : memref<128x128xf32, #tpu.memory_space<vmem>>, vector<128x128xf32>
    %cst_144 = arith.constant dense<0.000000e+00> : vector<16x128xf32>
    %142 = tpu.matmul %140, %141, %cst_144 {dimension_numbers = #tpu.dot_dimension_numbers<[1], [0], [0], [1], [0, 0, 1, 1], [], []>} : vector<16x128xf32>, vector<128x128xf32>, vector<16x128xf32> -> vector<16x128xf32>
    %143 = arith.addf %136, %142 : vector<16x128xf32>
    %c0_145 = arith.constant 0 : index
    %c0_146 = arith.constant 0 : index
    %144 = vector.load %arg36[%c0_145, %c0_146] : memref<1x128xf32, #tpu.memory_space<vmem>>, vector<1x128xf32>
    %145 = vector.broadcast %144 : vector<1x128xf32> to vector<16x128xf32>
    %146 = arith.addf %143, %145 : vector<16x128xf32>
    %cst_147 = arith.constant 0.000000e+00 : f32
    %147 = vector.broadcast %cst_147 : f32 to vector<16x128xf32>
    %148 = arith.maximumf %146, %147 : vector<16x128xf32>
    %c0_148 = arith.constant 0 : index
    %c0_149 = arith.constant 0 : index
    %149 = vector.load %arg9[%c0_148, %c0_149] : memref<32x16xf32, #tpu.memory_space<vmem>>, vector<32x16xf32>
    %cst_150 = arith.constant dense<0.000000e+00> : vector<32x128xf32>
    %150 = tpu.matmul %149, %148, %cst_150 {dimension_numbers = #tpu.dot_dimension_numbers<[1], [0], [0], [1], [0, 0, 1, 1], [], []>} : vector<32x16xf32>, vector<16x128xf32>, vector<32x128xf32> -> vector<32x128xf32>
    %c0_151 = arith.constant 0 : index
    %c0_152 = arith.constant 0 : index
    %151 = vector.load %arg10[%c0_151, %c0_152] : memref<128x256xf32, #tpu.memory_space<vmem>>, vector<128x256xf32>
    %cst_153 = arith.constant dense<0.000000e+00> : vector<32x256xf32>
    %152 = tpu.matmul %150, %151, %cst_153 {dimension_numbers = #tpu.dot_dimension_numbers<[1], [0], [0], [1], [0, 0, 1, 1], [], []>} : vector<32x128xf32>, vector<128x256xf32>, vector<32x256xf32> -> vector<32x256xf32>
    %cst_154 = arith.constant dense<0.000000e+00> : vector<32x256xf32>
    %153 = tpu.matmul %39, %152, %cst_154 {dimension_numbers = #tpu.dot_dimension_numbers<[1], [0], [0], [1], [0, 0, 1, 1], [], []>} : vector<32x32xf32>, vector<32x256xf32>, vector<32x256xf32> -> vector<32x256xf32>
    %cst_155 = arith.constant dense<0.000000e+00> : vector<32x256xf32>
    %154 = tpu.matmul %40, %152, %cst_155 {dimension_numbers = #tpu.dot_dimension_numbers<[1], [0], [0], [1], [0, 0, 1, 1], [], []>} : vector<32x32xf32>, vector<32x256xf32>, vector<32x256xf32> -> vector<32x256xf32>
    %c0_156 = arith.constant 0 : index
    %c0_157 = arith.constant 0 : index
    %c0_158 = arith.constant 0 : index
    %155 = vector.load %arg27[%c0_156, %c0_157, %c0_158] : memref<3x256x256xf32, #tpu.memory_space<vmem>>, vector<1x256x256xf32>
    %156 = vector.shape_cast %155 : vector<1x256x256xf32> to vector<256x256xf32>
    %cst_159 = arith.constant dense<0.000000e+00> : vector<32x256xf32>
    %157 = tpu.matmul %153, %156, %cst_159 {dimension_numbers = #tpu.dot_dimension_numbers<[1], [0], [0], [1], [0, 0, 1, 1], [], []>} : vector<32x256xf32>, vector<256x256xf32>, vector<32x256xf32> -> vector<32x256xf32>
    %c1_160 = arith.constant 1 : index
    %c0_161 = arith.constant 0 : index
    %c0_162 = arith.constant 0 : index
    %158 = vector.load %arg27[%c1_160, %c0_161, %c0_162] : memref<3x256x256xf32, #tpu.memory_space<vmem>>, vector<1x256x256xf32>
    %159 = vector.shape_cast %158 : vector<1x256x256xf32> to vector<256x256xf32>
    %cst_163 = arith.constant dense<0.000000e+00> : vector<32x256xf32>
    %160 = tpu.matmul %152, %159, %cst_163 {dimension_numbers = #tpu.dot_dimension_numbers<[1], [0], [0], [1], [0, 0, 1, 1], [], []>} : vector<32x256xf32>, vector<256x256xf32>, vector<32x256xf32> -> vector<32x256xf32>
    %161 = arith.addf %157, %160 : vector<32x256xf32>
    %c2_164 = arith.constant 2 : index
    %c0_165 = arith.constant 0 : index
    %c0_166 = arith.constant 0 : index
    %162 = vector.load %arg27[%c2_164, %c0_165, %c0_166] : memref<3x256x256xf32, #tpu.memory_space<vmem>>, vector<1x256x256xf32>
    %163 = vector.shape_cast %162 : vector<1x256x256xf32> to vector<256x256xf32>
    %cst_167 = arith.constant dense<0.000000e+00> : vector<32x256xf32>
    %164 = tpu.matmul %154, %163, %cst_167 {dimension_numbers = #tpu.dot_dimension_numbers<[1], [0], [0], [1], [0, 0, 1, 1], [], []>} : vector<32x256xf32>, vector<256x256xf32>, vector<32x256xf32> -> vector<32x256xf32>
    %165 = arith.addf %161, %164 : vector<32x256xf32>
    %c0_168 = arith.constant 0 : index
    %c0_169 = arith.constant 0 : index
    %166 = vector.load %arg28[%c0_168, %c0_169] : memref<1x256xf32, #tpu.memory_space<vmem>>, vector<1x256xf32>
    %167 = vector.broadcast %166 : vector<1x256xf32> to vector<32x256xf32>
    %168 = arith.addf %165, %167 : vector<32x256xf32>
    %c0_170 = arith.constant 0 : index
    %c0_171 = arith.constant 0 : index
    %169 = vector.load %arg11[%c0_170, %c0_171] : memref<32x8xf32, #tpu.memory_space<vmem>>, vector<32x8xf32>
    %cst_172 = arith.constant dense<0.000000e+00> : vector<32x64xf32>
    %170 = tpu.matmul %169, %62, %cst_172 {dimension_numbers = #tpu.dot_dimension_numbers<[1], [0], [0], [1], [0, 0, 1, 1], [], []>} : vector<32x8xf32>, vector<8x64xf32>, vector<32x64xf32> -> vector<32x64xf32>
    %c0_173 = arith.constant 0 : index
    %c0_174 = arith.constant 0 : index
    %171 = vector.load %arg12[%c0_173, %c0_174] : memref<64x256xf32, #tpu.memory_space<vmem>>, vector<64x256xf32>
    %cst_175 = arith.constant dense<0.000000e+00> : vector<32x256xf32>
    %172 = tpu.matmul %170, %171, %cst_175 {dimension_numbers = #tpu.dot_dimension_numbers<[1], [0], [0], [1], [0, 0, 1, 1], [], []>} : vector<32x64xf32>, vector<64x256xf32>, vector<32x256xf32> -> vector<32x256xf32>
    %c0_176 = arith.constant 0 : index
    %c0_177 = arith.constant 0 : index
    %173 = vector.load %arg9[%c0_176, %c0_177] : memref<32x16xf32, #tpu.memory_space<vmem>>, vector<32x16xf32>
    %cst_178 = arith.constant dense<0.000000e+00> : vector<32x128xf32>
    %174 = tpu.matmul %173, %108, %cst_178 {dimension_numbers = #tpu.dot_dimension_numbers<[1], [0], [0], [1], [0, 0, 1, 1], [], []>} : vector<32x16xf32>, vector<16x128xf32>, vector<32x128xf32> -> vector<32x128xf32>
    %c0_179 = arith.constant 0 : index
    %c0_180 = arith.constant 0 : index
    %175 = vector.load %arg10[%c0_179, %c0_180] : memref<128x256xf32, #tpu.memory_space<vmem>>, vector<128x256xf32>
    %cst_181 = arith.constant dense<0.000000e+00> : vector<32x256xf32>
    %176 = tpu.matmul %174, %175, %cst_181 {dimension_numbers = #tpu.dot_dimension_numbers<[1], [0], [0], [1], [0, 0, 1, 1], [], []>} : vector<32x128xf32>, vector<128x256xf32>, vector<32x256xf32> -> vector<32x256xf32>
    %c0_182 = arith.constant 0 : index
    %c0_183 = arith.constant 0 : index
    %177 = vector.load %arg39[%c0_182, %c0_183] : memref<256x256xf32, #tpu.memory_space<vmem>>, vector<256x256xf32>
    %cst_184 = arith.constant dense<0.000000e+00> : vector<32x256xf32>
    %178 = tpu.matmul %172, %177, %cst_184 {dimension_numbers = #tpu.dot_dimension_numbers<[1], [0], [0], [1], [0, 0, 1, 1], [], []>} : vector<32x256xf32>, vector<256x256xf32>, vector<32x256xf32> -> vector<32x256xf32>
    %179 = arith.addf %168, %178 : vector<32x256xf32>
    %c0_185 = arith.constant 0 : index
    %c0_186 = arith.constant 0 : index
    %180 = vector.load %arg40[%c0_185, %c0_186] : memref<1x256xf32, #tpu.memory_space<vmem>>, vector<1x256xf32>
    %181 = vector.broadcast %180 : vector<1x256xf32> to vector<32x256xf32>
    %182 = arith.addf %179, %181 : vector<32x256xf32>
    %c0_187 = arith.constant 0 : index
    %c0_188 = arith.constant 0 : index
    %183 = vector.load %arg41[%c0_187, %c0_188] : memref<256x256xf32, #tpu.memory_space<vmem>>, vector<256x256xf32>
    %cst_189 = arith.constant dense<0.000000e+00> : vector<32x256xf32>
    %184 = tpu.matmul %176, %183, %cst_189 {dimension_numbers = #tpu.dot_dimension_numbers<[1], [0], [0], [1], [0, 0, 1, 1], [], []>} : vector<32x256xf32>, vector<256x256xf32>, vector<32x256xf32> -> vector<32x256xf32>
    %185 = arith.addf %182, %184 : vector<32x256xf32>
    %c0_190 = arith.constant 0 : index
    %c0_191 = arith.constant 0 : index
    %186 = vector.load %arg42[%c0_190, %c0_191] : memref<1x256xf32, #tpu.memory_space<vmem>>, vector<1x256xf32>
    %187 = vector.broadcast %186 : vector<1x256xf32> to vector<32x256xf32>
    %188 = arith.addf %185, %187 : vector<32x256xf32>
    %cst_192 = arith.constant 0.000000e+00 : f32
    %189 = vector.broadcast %cst_192 : f32 to vector<32x256xf32>
    %190 = arith.maximumf %188, %189 : vector<32x256xf32>
    %cst_193 = arith.constant dense<0.000000e+00> : vector<32x256xf32>
    %191 = tpu.matmul %39, %190, %cst_193 {dimension_numbers = #tpu.dot_dimension_numbers<[1], [0], [0], [1], [0, 0, 1, 1], [], []>} : vector<32x32xf32>, vector<32x256xf32>, vector<32x256xf32> -> vector<32x256xf32>
    %cst_194 = arith.constant dense<0.000000e+00> : vector<32x256xf32>
    %192 = tpu.matmul %40, %190, %cst_194 {dimension_numbers = #tpu.dot_dimension_numbers<[1], [0], [0], [1], [0, 0, 1, 1], [], []>} : vector<32x32xf32>, vector<32x256xf32>, vector<32x256xf32> -> vector<32x256xf32>
    %c0_195 = arith.constant 0 : index
    %c0_196 = arith.constant 0 : index
    %c0_197 = arith.constant 0 : index
    %193 = vector.load %arg29[%c0_195, %c0_196, %c0_197] : memref<3x256x256xf32, #tpu.memory_space<vmem>>, vector<1x256x256xf32>
    %194 = vector.shape_cast %193 : vector<1x256x256xf32> to vector<256x256xf32>
    %cst_198 = arith.constant dense<0.000000e+00> : vector<32x256xf32>
    %195 = tpu.matmul %191, %194, %cst_198 {dimension_numbers = #tpu.dot_dimension_numbers<[1], [0], [0], [1], [0, 0, 1, 1], [], []>} : vector<32x256xf32>, vector<256x256xf32>, vector<32x256xf32> -> vector<32x256xf32>
    %c1_199 = arith.constant 1 : index
    %c0_200 = arith.constant 0 : index
    %c0_201 = arith.constant 0 : index
    %196 = vector.load %arg29[%c1_199, %c0_200, %c0_201] : memref<3x256x256xf32, #tpu.memory_space<vmem>>, vector<1x256x256xf32>
    %197 = vector.shape_cast %196 : vector<1x256x256xf32> to vector<256x256xf32>
    %cst_202 = arith.constant dense<0.000000e+00> : vector<32x256xf32>
    %198 = tpu.matmul %190, %197, %cst_202 {dimension_numbers = #tpu.dot_dimension_numbers<[1], [0], [0], [1], [0, 0, 1, 1], [], []>} : vector<32x256xf32>, vector<256x256xf32>, vector<32x256xf32> -> vector<32x256xf32>
    %199 = arith.addf %195, %198 : vector<32x256xf32>
    %c2_203 = arith.constant 2 : index
    %c0_204 = arith.constant 0 : index
    %c0_205 = arith.constant 0 : index
    %200 = vector.load %arg29[%c2_203, %c0_204, %c0_205] : memref<3x256x256xf32, #tpu.memory_space<vmem>>, vector<1x256x256xf32>
    %201 = vector.shape_cast %200 : vector<1x256x256xf32> to vector<256x256xf32>
    %cst_206 = arith.constant dense<0.000000e+00> : vector<32x256xf32>
    %202 = tpu.matmul %192, %201, %cst_206 {dimension_numbers = #tpu.dot_dimension_numbers<[1], [0], [0], [1], [0, 0, 1, 1], [], []>} : vector<32x256xf32>, vector<256x256xf32>, vector<32x256xf32> -> vector<32x256xf32>
    %203 = arith.addf %199, %202 : vector<32x256xf32>
    %c0_207 = arith.constant 0 : index
    %c0_208 = arith.constant 0 : index
    %204 = vector.load %arg30[%c0_207, %c0_208] : memref<1x256xf32, #tpu.memory_space<vmem>>, vector<1x256xf32>
    %205 = vector.broadcast %204 : vector<1x256xf32> to vector<32x256xf32>
    %206 = arith.addf %203, %205 : vector<32x256xf32>
    %c0_209 = arith.constant 0 : index
    %c0_210 = arith.constant 0 : index
    %207 = vector.load %arg43[%c0_209, %c0_210] : memref<1x256xf32, #tpu.memory_space<vmem>>, vector<1x256xf32>
    %208 = vector.broadcast %207 : vector<1x256xf32> to vector<32x256xf32>
    %209 = arith.mulf %206, %208 : vector<32x256xf32>
    %c0_211 = arith.constant 0 : index
    %c0_212 = arith.constant 0 : index
    %210 = vector.load %arg44[%c0_211, %c0_212] : memref<1x256xf32, #tpu.memory_space<vmem>>, vector<1x256xf32>
    %211 = vector.broadcast %210 : vector<1x256xf32> to vector<32x256xf32>
    %212 = arith.addf %209, %211 : vector<32x256xf32>
    %cst_213 = arith.constant 0.000000e+00 : f32
    %213 = vector.broadcast %cst_213 : f32 to vector<32x256xf32>
    %214 = arith.maximumf %212, %213 : vector<32x256xf32>
    %cst_214 = arith.constant dense<0.000000e+00> : vector<32x256xf32>
    %215 = tpu.matmul %39, %214, %cst_214 {dimension_numbers = #tpu.dot_dimension_numbers<[1], [0], [0], [1], [0, 0, 1, 1], [], []>} : vector<32x32xf32>, vector<32x256xf32>, vector<32x256xf32> -> vector<32x256xf32>
    %cst_215 = arith.constant dense<0.000000e+00> : vector<32x256xf32>
    %216 = tpu.matmul %40, %214, %cst_215 {dimension_numbers = #tpu.dot_dimension_numbers<[1], [0], [0], [1], [0, 0, 1, 1], [], []>} : vector<32x32xf32>, vector<32x256xf32>, vector<32x256xf32> -> vector<32x256xf32>
    %c0_216 = arith.constant 0 : index
    %c0_217 = arith.constant 0 : index
    %c0_218 = arith.constant 0 : index
    %217 = vector.load %arg31[%c0_216, %c0_217, %c0_218] : memref<3x256x96xf32, #tpu.memory_space<vmem>>, vector<1x256x96xf32>
    %218 = vector.shape_cast %217 : vector<1x256x96xf32> to vector<256x96xf32>
    %cst_219 = arith.constant dense<0.000000e+00> : vector<32x96xf32>
    %219 = tpu.matmul %215, %218, %cst_219 {dimension_numbers = #tpu.dot_dimension_numbers<[1], [0], [0], [1], [0, 0, 1, 1], [], []>} : vector<32x256xf32>, vector<256x96xf32>, vector<32x96xf32> -> vector<32x96xf32>
    %c1_220 = arith.constant 1 : index
    %c0_221 = arith.constant 0 : index
    %c0_222 = arith.constant 0 : index
    %220 = vector.load %arg31[%c1_220, %c0_221, %c0_222] : memref<3x256x96xf32, #tpu.memory_space<vmem>>, vector<1x256x96xf32>
    %221 = vector.shape_cast %220 : vector<1x256x96xf32> to vector<256x96xf32>
    %cst_223 = arith.constant dense<0.000000e+00> : vector<32x96xf32>
    %222 = tpu.matmul %214, %221, %cst_223 {dimension_numbers = #tpu.dot_dimension_numbers<[1], [0], [0], [1], [0, 0, 1, 1], [], []>} : vector<32x256xf32>, vector<256x96xf32>, vector<32x96xf32> -> vector<32x96xf32>
    %223 = arith.addf %219, %222 : vector<32x96xf32>
    %c2_224 = arith.constant 2 : index
    %c0_225 = arith.constant 0 : index
    %c0_226 = arith.constant 0 : index
    %224 = vector.load %arg31[%c2_224, %c0_225, %c0_226] : memref<3x256x96xf32, #tpu.memory_space<vmem>>, vector<1x256x96xf32>
    %225 = vector.shape_cast %224 : vector<1x256x96xf32> to vector<256x96xf32>
    %cst_227 = arith.constant dense<0.000000e+00> : vector<32x96xf32>
    %226 = tpu.matmul %216, %225, %cst_227 {dimension_numbers = #tpu.dot_dimension_numbers<[1], [0], [0], [1], [0, 0, 1, 1], [], []>} : vector<32x256xf32>, vector<256x96xf32>, vector<32x96xf32> -> vector<32x96xf32>
    %227 = arith.addf %223, %226 : vector<32x96xf32>
    %c0_228 = arith.constant 0 : index
    %c0_229 = arith.constant 0 : index
    %228 = vector.load %arg32[%c0_228, %c0_229] : memref<1x96xf32, #tpu.memory_space<vmem>>, vector<1x96xf32>
    %229 = vector.broadcast %228 : vector<1x96xf32> to vector<32x96xf32>
    %230 = arith.addf %227, %229 : vector<32x96xf32>
    %231 = math.tanh %230 : vector<32x96xf32>
    %c0_230 = arith.constant 0 : index
    %c0_231 = arith.constant 0 : index
    %232 = vector.load %arg45[%c0_230, %c0_231] : memref<32x96xf32, #tpu.memory_space<vmem>>, vector<32x96xf32>
    tpu.vector_store %arg45[%c0_230, %c0_231], %231 {strides = array<i32>} : memref<32x96xf32, #tpu.memory_space<vmem>>, vector<32x96xf32>,
    return
  }
  func.func @transform_0(%arg0: i32) -> (i32, i32, i32) {
    %c0_i32 = arith.constant 0 : i32
    %c0_i32_0 = arith.constant 0 : i32
    %c0_i32_1 = arith.constant 0 : i32
    return %arg0, %c0_i32, %c0_i32_0 : i32, i32, i32
  }
  func.func @transform_1(%arg0: i32) -> (i32, i32, i32) {
    %c0_i32 = arith.constant 0 : i32
    %c0_i32_0 = arith.constant 0 : i32
    %c0_i32_1 = arith.constant 0 : i32
    %c0_i32_2 = arith.constant 0 : i32
    return %c0_i32, %c0_i32_0, %c0_i32_1 : i32, i32, i32
  }
  func.func @transform_2(%arg0: i32) -> (i32, i32, i32) {
    %c0_i32 = arith.constant 0 : i32
    %c0_i32_0 = arith.constant 0 : i32
    %c0_i32_1 = arith.constant 0 : i32
    %c0_i32_2 = arith.constant 0 : i32
    return %c0_i32, %c0_i32_0, %c0_i32_1 : i32, i32, i32
  }
  func.func @transform_3(%arg0: i32) -> (i32, i32) {
    %c0_i32 = arith.constant 0 : i32
    %c0_i32_0 = arith.constant 0 : i32
    %c0_i32_1 = arith.constant 0 : i32
    return %c0_i32, %c0_i32_0 : i32, i32
  }
  func.func @transform_4(%arg0: i32) -> (i32, i32) {
    %c0_i32 = arith.constant 0 : i32
    %c0_i32_0 = arith.constant 0 : i32
    %c0_i32_1 = arith.constant 0 : i32
    return %c0_i32, %c0_i32_0 : i32, i32
  }
  func.func @transform_5(%arg0: i32) -> (i32, i32) {
    %c0_i32 = arith.constant 0 : i32
    %c0_i32_0 = arith.constant 0 : i32
    %c0_i32_1 = arith.constant 0 : i32
    return %c0_i32, %c0_i32_0 : i32, i32
  }
  func.func @transform_6(%arg0: i32) -> (i32, i32) {
    %c0_i32 = arith.constant 0 : i32
    %c0_i32_0 = arith.constant 0 : i32
    %c0_i32_1 = arith.constant 0 : i32
    return %c0_i32, %c0_i32_0 : i32, i32
  }
  func.func @transform_7(%arg0: i32) -> (i32, i32) {
    %c0_i32 = arith.constant 0 : i32
    %c0_i32_0 = arith.constant 0 : i32
    %c0_i32_1 = arith.constant 0 : i32
    return %c0_i32, %c0_i32_0 : i32, i32
  }
  func.func @transform_8(%arg0: i32) -> (i32, i32) {
    %c0_i32 = arith.constant 0 : i32
    %c0_i32_0 = arith.constant 0 : i32
    %c0_i32_1 = arith.constant 0 : i32
    return %c0_i32, %c0_i32_0 : i32, i32
  }
  func.func @transform_9(%arg0: i32) -> (i32, i32) {
    %c0_i32 = arith.constant 0 : i32
    %c0_i32_0 = arith.constant 0 : i32
    %c0_i32_1 = arith.constant 0 : i32
    return %c0_i32, %c0_i32_0 : i32, i32
  }
  func.func @transform_10(%arg0: i32) -> (i32, i32) {
    %c0_i32 = arith.constant 0 : i32
    %c0_i32_0 = arith.constant 0 : i32
    %c0_i32_1 = arith.constant 0 : i32
    return %c0_i32, %c0_i32_0 : i32, i32
  }
  func.func @transform_11(%arg0: i32) -> (i32, i32) {
    %c0_i32 = arith.constant 0 : i32
    %c0_i32_0 = arith.constant 0 : i32
    %c0_i32_1 = arith.constant 0 : i32
    return %c0_i32, %c0_i32_0 : i32, i32
  }
  func.func @transform_12(%arg0: i32) -> (i32, i32) {
    %c0_i32 = arith.constant 0 : i32
    %c0_i32_0 = arith.constant 0 : i32
    %c0_i32_1 = arith.constant 0 : i32
    return %c0_i32, %c0_i32_0 : i32, i32
  }
  func.func @transform_13(%arg0: i32) -> (i32, i32) {
    %c0_i32 = arith.constant 0 : i32
    %c0_i32_0 = arith.constant 0 : i32
    %c0_i32_1 = arith.constant 0 : i32
    return %c0_i32, %c0_i32_0 : i32, i32
  }
  func.func @transform_14(%arg0: i32) -> (i32, i32) {
    %c0_i32 = arith.constant 0 : i32
    %c0_i32_0 = arith.constant 0 : i32
    %c0_i32_1 = arith.constant 0 : i32
    return %c0_i32, %c0_i32_0 : i32, i32
  }
  func.func @transform_15(%arg0: i32) -> (i32, i32) {
    %c0_i32 = arith.constant 0 : i32
    %c0_i32_0 = arith.constant 0 : i32
    %c0_i32_1 = arith.constant 0 : i32
    return %c0_i32, %c0_i32_0 : i32, i32
  }
  func.func @transform_16(%arg0: i32) -> (i32, i32) {
    %c0_i32 = arith.constant 0 : i32
    %c0_i32_0 = arith.constant 0 : i32
    %c0_i32_1 = arith.constant 0 : i32
    return %c0_i32, %c0_i32_0 : i32, i32
  }
  func.func @transform_17(%arg0: i32) -> (i32, i32) {
    %c0_i32 = arith.constant 0 : i32
    %c0_i32_0 = arith.constant 0 : i32
    %c0_i32_1 = arith.constant 0 : i32
    return %c0_i32, %c0_i32_0 : i32, i32
  }
  func.func @transform_18(%arg0: i32) -> (i32, i32, i32) {
    %c0_i32 = arith.constant 0 : i32
    %c0_i32_0 = arith.constant 0 : i32
    %c0_i32_1 = arith.constant 0 : i32
    %c0_i32_2 = arith.constant 0 : i32
    return %c0_i32, %c0_i32_0, %c0_i32_1 : i32, i32, i32
  }
  func.func @transform_19(%arg0: i32) -> (i32, i32) {
    %c0_i32 = arith.constant 0 : i32
    %c0_i32_0 = arith.constant 0 : i32
    %c0_i32_1 = arith.constant 0 : i32
    return %c0_i32, %c0_i32_0 : i32, i32
  }
  func.func @transform_20(%arg0: i32) -> (i32, i32, i32) {
    %c0_i32 = arith.constant 0 : i32
    %c0_i32_0 = arith.constant 0 : i32
    %c0_i32_1 = arith.constant 0 : i32
    %c0_i32_2 = arith.constant 0 : i32
    return %c0_i32, %c0_i32_0, %c0_i32_1 : i32, i32, i32
  }
  func.func @transform_21(%arg0: i32) -> (i32, i32) {
    %c0_i32 = arith.constant 0 : i32
    %c0_i32_0 = arith.constant 0 : i32
    %c0_i32_1 = arith.constant 0 : i32
    return %c0_i32, %c0_i32_0 : i32, i32
  }
  func.func @transform_22(%arg0: i32) -> (i32, i32, i32) {
    %c0_i32 = arith.constant 0 : i32
    %c0_i32_0 = arith.constant 0 : i32
    %c0_i32_1 = arith.constant 0 : i32
    %c0_i32_2 = arith.constant 0 : i32
    return %c0_i32, %c0_i32_0, %c0_i32_1 : i32, i32, i32
  }
  func.func @transform_23(%arg0: i32) -> (i32, i32) {
    %c0_i32 = arith.constant 0 : i32
    %c0_i32_0 = arith.constant 0 : i32
    %c0_i32_1 = arith.constant 0 : i32
    return %c0_i32, %c0_i32_0 : i32, i32
  }
  func.func @transform_24(%arg0: i32) -> (i32, i32, i32) {
    %c0_i32 = arith.constant 0 : i32
    %c0_i32_0 = arith.constant 0 : i32
    %c0_i32_1 = arith.constant 0 : i32
    %c0_i32_2 = arith.constant 0 : i32
    return %c0_i32, %c0_i32_0, %c0_i32_1 : i32, i32, i32
  }
  func.func @transform_25(%arg0: i32) -> (i32, i32) {
    %c0_i32 = arith.constant 0 : i32
    %c0_i32_0 = arith.constant 0 : i32
    %c0_i32_1 = arith.constant 0 : i32
    return %c0_i32, %c0_i32_0 : i32, i32
  }
  func.func @transform_26(%arg0: i32) -> (i32, i32, i32) {
    %c0_i32 = arith.constant 0 : i32
    %c0_i32_0 = arith.constant 0 : i32
    %c0_i32_1 = arith.constant 0 : i32
    %c0_i32_2 = arith.constant 0 : i32
    return %c0_i32, %c0_i32_0, %c0_i32_1 : i32, i32, i32
  }
  func.func @transform_27(%arg0: i32) -> (i32, i32) {
    %c0_i32 = arith.constant 0 : i32
    %c0_i32_0 = arith.constant 0 : i32
    %c0_i32_1 = arith.constant 0 : i32
    return %c0_i32, %c0_i32_0 : i32, i32
  }
  func.func @transform_28(%arg0: i32) -> (i32, i32, i32) {
    %c0_i32 = arith.constant 0 : i32
    %c0_i32_0 = arith.constant 0 : i32
    %c0_i32_1 = arith.constant 0 : i32
    %c0_i32_2 = arith.constant 0 : i32
    return %c0_i32, %c0_i32_0, %c0_i32_1 : i32, i32, i32
  }
  func.func @transform_29(%arg0: i32) -> (i32, i32) {
    %c0_i32 = arith.constant 0 : i32
    %c0_i32_0 = arith.constant 0 : i32
    %c0_i32_1 = arith.constant 0 : i32
    return %c0_i32, %c0_i32_0 : i32, i32
  }
  func.func @transform_30(%arg0: i32) -> (i32, i32, i32) {
    %c0_i32 = arith.constant 0 : i32
    %c0_i32_0 = arith.constant 0 : i32
    %c0_i32_1 = arith.constant 0 : i32
    %c0_i32_2 = arith.constant 0 : i32
    return %c0_i32, %c0_i32_0, %c0_i32_1 : i32, i32, i32
  }
  func.func @transform_31(%arg0: i32) -> (i32, i32) {
    %c0_i32 = arith.constant 0 : i32
    %c0_i32_0 = arith.constant 0 : i32
    %c0_i32_1 = arith.constant 0 : i32
    return %c0_i32, %c0_i32_0 : i32, i32
  }
  func.func @transform_32(%arg0: i32) -> (i32, i32) {
    %c0_i32 = arith.constant 0 : i32
    %c0_i32_0 = arith.constant 0 : i32
    %c0_i32_1 = arith.constant 0 : i32
    return %c0_i32, %c0_i32_0 : i32, i32
  }
  func.func @transform_33(%arg0: i32) -> (i32, i32) {
    %c0_i32 = arith.constant 0 : i32
    %c0_i32_0 = arith.constant 0 : i32
    %c0_i32_1 = arith.constant 0 : i32
    return %c0_i32, %c0_i32_0 : i32, i32
  }
  func.func @transform_34(%arg0: i32) -> (i32, i32) {
    %c0_i32 = arith.constant 0 : i32
    %c0_i32_0 = arith.constant 0 : i32
    %c0_i32_1 = arith.constant 0 : i32
    return %c0_i32, %c0_i32_0 : i32, i32
  }
  func.func @transform_35(%arg0: i32) -> (i32, i32) {
    %c0_i32 = arith.constant 0 : i32
    %c0_i32_0 = arith.constant 0 : i32
    %c0_i32_1 = arith.constant 0 : i32
    return %c0_i32, %c0_i32_0 : i32, i32
  }
  func.func @transform_36(%arg0: i32) -> (i32, i32) {
    %c0_i32 = arith.constant 0 : i32
    %c0_i32_0 = arith.constant 0 : i32
    %c0_i32_1 = arith.constant 0 : i32
    return %c0_i32, %c0_i32_0 : i32, i32
  }
  func.func @transform_37(%arg0: i32) -> (i32, i32) {
    %c0_i32 = arith.constant 0 : i32
    %c0_i32_0 = arith.constant 0 : i32
    %c0_i32_1 = arith.constant 0 : i32
    return %c0_i32, %c0_i32_0 : i32, i32
  }
  func.func @transform_38(%arg0: i32) -> (i32, i32) {
    %c0_i32 = arith.constant 0 : i32
    %c0_i32_0 = arith.constant 0 : i32
    %c0_i32_1 = arith.constant 0 : i32
    return %c0_i32, %c0_i32_0 : i32, i32
  }
  func.func @transform_39(%arg0: i32) -> (i32, i32) {
    %c0_i32 = arith.constant 0 : i32
    %c0_i32_0 = arith.constant 0 : i32
    %c0_i32_1 = arith.constant 0 : i32
    return %c0_i32, %c0_i32_0 : i32, i32
  }
  func.func @transform_40(%arg0: i32) -> (i32, i32) {
    %c0_i32 = arith.constant 0 : i32
    %c0_i32_0 = arith.constant 0 : i32
    %c0_i32_1 = arith.constant 0 : i32
    return %c0_i32, %c0_i32_0 : i32, i32
  }
  func.func @transform_41(%arg0: i32) -> (i32, i32) {
    %c0_i32 = arith.constant 0 : i32
    %c0_i32_0 = arith.constant 0 : i32
    %c0_i32_1 = arith.constant 0 : i32
    return %c0_i32, %c0_i32_0 : i32, i32
  }
  func.func @transform_42(%arg0: i32) -> (i32, i32) {
    %c0_i32 = arith.constant 0 : i32
    %c0_i32_0 = arith.constant 0 : i32
    %c0_i32_1 = arith.constant 0 : i32
    return %c0_i32, %c0_i32_0 : i32, i32
  }
  func.func @transform_43(%arg0: i32) -> (i32, i32) {
    %c0_i32 = arith.constant 0 : i32
    %c0_i32_0 = arith.constant 0 : i32
    %c0_i32_1 = arith.constant 0 : i32
    return %c0_i32, %c0_i32_0 : i32, i32
  }
  func.func @transform_44(%arg0: i32) -> (i32, i32) {
    %c0_i32 = arith.constant 0 : i32
    %c0_i32_0 = arith.constant 0 : i32
    return %arg0, %c0_i32 : i32, i32
  }
}

</mosaic_0001>

<bundles_post_ra>
// kernel: _lambda_.1
= control target key start
LH: loop header
LB: loop body
LE: loop exit
PB: predicated region body
PF: predicated region fallthrough
CT: control target
= control target key end

     0   :  { %s10012_s6 = smov 1   ;;  %s10013_s10 = smov 2   ;;  %s11472_s0 = inlined_call_operand.smem [shape: u32[45], index: -1, kind: input, shape index: {}] }
   0x1   :  { %s10090_s5 = sld [smem:[%s11472_s0]]   ;;  %s10014_s14 = smov 3  }
   0x2   :  { %s10095_s9 = sld [smem:[%s11472_s0 + %s10012_s6]]   ;;  %s10015_s18 = smov 4  }
   0x3   :  { %s10100_s13 = sld [smem:[%s11472_s0 + %s10013_s10]]   ;;  %s10016_s22 = smov 5  }
   0x4   :  { %s10105_s17 = sld [smem:[%s11472_s0 + %s10014_s14]]   ;;  %s10017_s26 = smov 6  }
   0x5   :  { %s10110_s21 = sld [smem:[%s11472_s0 + %s10015_s18]]   ;;  %s10018_s30 = smov 7  }
   0x6   :  { %s10115_s25 = sld [smem:[%s11472_s0 + %s10016_s22]]   ;;  %s10019_s4 = smov 8  }
   0x7   :  { %11497 = sst [smem:[#allocation44_spill]] %s10090_s5  ;;  %s10020_s10 = smov 9  }
   0x8   :  { %11498 = sst [smem:[#allocation45_spill]] %s10095_s9  ;;  %s10021_s15 = smov 10  }
   0x9   :  { %11499 = sst [smem:[#allocation46_spill]] %s10100_s13  ;;  %s10022_s20 = smov 11  }
   0xa   :  { %s10120_s29 = sld [smem:[%s11472_s0 + %s10017_s26]]   ;;  %s10023_s26 = smov 12  }
   0xb   :  { %11500 = sst [smem:[#allocation47_spill]] %s10110_s21  ;;  %s10024_s1 = smov 13  }
   0xc   :  { %s10125_s3 = sld [smem:[%s11472_s0 + %s10018_s30]]   ;;  %s10025_s7 = smov 14  }
   0xd   :  { %s10130_s8 = sld [smem:[%s11472_s0 + %s10019_s4]]   ;;  %s10027_s22 = smov 16  }
   0xe   :  { %s10135_s14 = sld [smem:[%s11472_s0 + %s10020_s10]]   ;;  %s10028_s28 = smov 17  }
   0xf   :  { %s10140_s19 = sld [smem:[%s11472_s0 + %s10021_s15]]   ;;  %s10026_s15 = smov 15  }
  0x10   :  { %11501 = sst [smem:[#allocation48_spill]] %s10120_s29 }
  0x11   :  { %s10145_s24 = sld [smem:[%s11472_s0 + %s10022_s20]]  }
  0x12   :  { %11502 = sst [smem:[#allocation49_spill]] %s10125_s3 }
  0x13   :  { %11503 = sst [smem:[#allocation50_spill]] %s10130_s8 }
  0x14   :  { %11504 = sst [smem:[#allocation51_spill]] %s10135_s14 }
  0x15   :  { %11505 = sst [smem:[#allocation52_spill]] %s10140_s19 }
  0x16   :  { %s10150_s30 = sld [smem:[%s11472_s0 + %s10023_s26]]  }
  0x17   :  { %s10155_s6 = sld [smem:[%s11472_s0 + %s10024_s1]]  }
  0x18   :  { %s10160_s12 = sld [smem:[%s11472_s0 + %s10025_s7]]   ;;  %s10029_s7 = smov 18  }
  0x19   :  { %s10165_s20 = sld [smem:[%s11472_s0 + %s10026_s15]]   ;;  %s10030_s15 = smov 19  }
  0x1a   :  { %s10170_s27 = sld [smem:[%s11472_s0 + %s10027_s22]]   ;;  %s10031_s22 = smov 20  }
  0x1b   :  { %s10175_s4 = sld [smem:[%s11472_s0 + %s10028_s28]]   ;;  %s10032_s28 = smov 21  }
  0x1c   :  { %s10180_s19 = sld [smem:[%s11472_s0 + %s10029_s7]]   ;;  %s10033_s7 = smov 22  }
  0x1d   :  { %s10185_s8 = sld [smem:[%s11472_s0 + %s10030_s15]]   ;;  %s10034_s15 = smov 23  }
  0x1e   :  { %11506 = sst [smem:[#allocation53_spill]] %s10160_s12 }
  0x1f   :  { %s10190_s29 = sld [smem:[%s11472_s0 + %s10031_s22]]   ;;  %s10035_s22 = smov 24  }
  0x20   :  { %s10195_s21 = sld [smem:[%s11472_s0 + %s10032_s28]]   ;;  %s10036_s28 = smov 25  }
  0x21   :  { %11507 = sst [smem:[#allocation54_spill]] %s10175_s4 }
  0x22   :  { %s10200_s9 = sld [smem:[%s11472_s0 + %s10033_s7]]   ;;  %s10037_s7 = smov 26  }
  0x23   :  { %11508 = sst [smem:[#allocation55_spill]] %s10185_s8 }
  0x24   :  { %s10205_s8 = sld [smem:[%s11472_s0 + %s10034_s15]]   ;;  %s10038_s15 = smov 27  }
  0x25   :  { %11509 = sst [smem:[#allocation56_spill]] %s10190_s29 }
  0x26   :  { %11510 = sst [smem:[#allocation57_spill]] %s10195_s21 }
  0x27   :  { %s10210_s5 = sld [smem:[%s11472_s0 + %s10035_s22]]   ;;  %s10039_s22 = smov 28  }
  0x28   :  { %11511 = sst [smem:[#allocation58_spill]] %s10200_s9 }
  0x29   :  { %s10215_s21 = sld [smem:[%s11472_s0 + %s10036_s28]]   ;;  %s10040_s28 = smov 29  }
  0x2a   :  { %11512 = sst [smem:[#allocation59_spill]] %s10205_s8 }
  0x2b   :  { %s10220_s9 = sld [smem:[%s11472_s0 + %s10037_s7]]   ;;  %s10041_s7 = smov 30  }
  0x2c   :  { %s10225_s8 = sld [smem:[%s11472_s0 + %s10038_s15]]   ;;  %s10042_s15 = smov 31  }
  0x2d   :  { %11513 = sst [smem:[#allocation60_spill]] %s10210_s5 }
  0x2e   :  { %s10230_s29 = sld [smem:[%s11472_s0 + %s10039_s22]]   ;;  %s10043_s22 = smov 32  }
  0x2f   :  { %11514 = sst [smem:[#allocation61_spill]] %s10215_s21 }
  0x30   :  { %s10235_s21 = sld [smem:[%s11472_s0 + %s10040_s28]]   ;;  %s10044_s28 = smov 33  }
  0x31   :  { %11515 = sst [smem:[#allocation62_spill]] %s10220_s9 }
  0x32   :  { %11516 = sst [smem:[#allocation63_spill]] %s10225_s8 }
  0x33   :  { %s10240_s9 = sld [smem:[%s11472_s0 + %s10041_s7]]   ;;  %s10045_s7 = smov 34  }
  0x34   :  { %s10245_s8 = sld [smem:[%s11472_s0 + %s10042_s15]]   ;;  %s10046_s15 = smov 35  }
  0x35   :  { %s10250_s4 = sld [smem:[%s11472_s0 + %s10043_s22]]   ;;  %s10047_s22 = smov 36  }
  0x36   :  { %11517 = sst [smem:[#allocation64_spill]] %s10235_s21 }
  0x37   :  { %s10255_s21 = sld [smem:[%s11472_s0 + %s10044_s28]]   ;;  %s10048_s28 = smov 37  }
  0x39   :  { %11518 = sst [smem:[#allocation65_spill]] %s10240_s9 }
  0x3a   :  { %11519 = sst [smem:[#allocation66_spill]] %s10245_s8 }
  0x3b   :  { %11520 = sst [smem:[#allocation67_spill]] %s10250_s4 }
  0x3c   :  { %s10260_s9 = sld [smem:[%s11472_s0 + %s10045_s7]]   ;;  %s10049_s7 = smov 38  }
  0x3d   :  { %11521 = sst [smem:[#allocation68_spill]] %s10255_s21 }
  0x3e   :  { %s10265_s8 = sld [smem:[%s11472_s0 + %s10046_s15]]   ;;  %s10050_s15 = smov 39  }
  0x3f   :  { %s10270_s4 = sld [smem:[%s11472_s0 + %s10047_s22]]   ;;  %s10051_s22 = smov 40  }
  0x40   :  { %s10275_s21 = sld [smem:[%s11472_s0 + %s10048_s28]]   ;;  %s10052_s28 = smov 41  }
  0x42   :  { %11522 = sst [smem:[#allocation69_spill]] %s10260_s9 }
  0x43   :  { %s10280_s9 = sld [smem:[%s11472_s0 + %s10049_s7]]   ;;  %s10053_s7 = smov 42  }
  0x44   :  { %11523 = sst [smem:[#allocation70_spill]] %s10265_s8 }
  0x45   :  { %11524 = sst [smem:[#allocation71_spill]] %s10270_s4 }
  0x46   :  { %11525 = sst [smem:[#allocation72_spill]] %s10275_s21 }
  0x47   :  { %s10285_s8 = sld [smem:[%s11472_s0 + %s10050_s15]]   ;;  %s10054_s15 = smov 43  }
  0x48   :  { %s10290_s4 = sld [smem:[%s11472_s0 + %s10051_s22]]   ;;  %s10055_s22 = smov 44  }
  0x49   :  { %11526 = sst [smem:[#allocation73_spill]] %s10280_s9 }
  0x4a   :  { %s10295_s21 = sld [smem:[%s11472_s0 + %s10052_s28]]  }
  0x4b   :  { %s10300_s9 = sld [smem:[%s11472_s0 + %s10053_s7]]  }
  0x4d   :  { %11527 = sst [smem:[#allocation74_spill]] %s10285_s8 }
  0x4e   :  { %11528 = sst [smem:[#allocation75_spill]] %s10290_s4 }
  0x4f   :  { %s10305_s8 = sld [smem:[%s11472_s0 + %s10054_s15]]  }
  0x50   :  { %s10310_s4 = sld [smem:[%s11472_s0 + %s10055_s22]]  }
  0x55   :  { %11529 = sst [smem:[#allocation76_spill]] %s10305_s8 }
  0x56   :  { %11530 = sst [smem:[#allocation77_spill]] %s10310_s4 }
  0x57   :  { %94 = vsyncpa [#allocation3], 0 }
  0x58   :  { %96 = vsyncpa [#allocation3 + $0x1], 0 }
  0x59   :  { %97 = vsyncpa [#allocation5], 0 }
  0x5a   :  { %98 = vsyncpa [#allocation8], 0 }
  0x5b   :  { %99 = vsyncpa [#allocation11], 0 }
  0x5c   :  { %100 = vsyncpa [#allocation14], 0 }
  0x5d   :  { %101 = vsyncpa [#allocation17], 0 }
  0x5e   :  { %102 = vsyncpa [#allocation20], 0 }
  0x5f   :  { %103 = vsyncpa [#allocation23], 0 }
  0x60   :  { %104 = vsyncpa [#allocation26], 0 }
  0x61   :  { %105 = vsyncpa [#allocation29], 0 }
  0x62   :  { %106 = vsyncpa [#allocation32], 0  ;;  %s10312_s28 = smov 0   ;;  %s10314_s1 = smov 0  }
  0x63   :  { %s10316_s2 = smov 0   ;;  %s10318_s0 = smov 0  }
  0x64 LB: > { %s10056_s7 = smov [#allocation4]   ;;  %s11483_s11 = sadd.s32 4294967295, %s10010_s0   ;;  %s10010_s0 = sphi %s10318_s0, %s11584_s0   ;;  %s10006_s2 = sphi %s10316_s2, %s11583_s2   ;;  %s10002_s1 = sphi %s10314_s1, %s11582_s1   ;;  %s9998_s28 = sphi %s10312_s28, %s11581_s28  }
  0x65   : > { %s1087_s10 = sshll.u32 %s10056_s7, 4  ;;  %p7808_p0 = scmp.ge.s32.totalorder %s10010_s0, 1  ;;  %s1088_s10 = int_to_ptr.vmem [resolvable:$true] %s1087_s10 }
  0x66   : > { %p10336_p1 = scmp.eq.s32.totalorder %s11483_s11, 0  ;;  %p1072_p2 = scmp.lt.s32.totalorder %s10010_s0, 3 }
  0x67   : > { %s10057_s18 = smov [#allocation7]   ;;  %s10058_s26 = smov [#allocation10]  }
  0x68   : > { %s11531_s15 = scalar_select %p10336_p1, 1, 0 }
  0x69   : > { %p10341_p3 = pnand %p7808_p0, %p1072_p2  ;;  %s1114_s22 = sshll.u32 %s10057_s18, 4  ;;  %s10353_s22 = int_to_ptr.vmem [resolvable:$true] %s1114_s22 }
  0x6a   : > { %s1146_s7 = sshll.u32 %s10058_s26, 4  ;;  %s9425_s4 = scalar_lea.vmem %s1088_s10, 1024  ;;  %s10355_s7 = int_to_ptr.vmem [resolvable:$true] %s1146_s7 }
  0x6b   : > { %s11532_s16 = scalar_select %p10341_p3, 1, 0 }
  0x6c   : > { %p9160_p4 = pneg %p10341_p3  ;;  %p9426_p7 = scmp.ne.s32.totalorder %s1088_s10, %s9425_s4 }
  0x6d   : > { %p9433_p10 = scmp.lt.s32.totalorder %s1088_s10, %s1088_s10  ;;  %p9434_p11 = scmp.lt.s32.totalorder %s9425_s4, %s9425_s4 }
  0x6e   : > { %p10349_p5 = pnand %p9160_p4, %p10336_p1 }
  0x6f   : > { %p9435_p12 = por %p9434_p11, %p9433_p10 }
  0x70   : > { %p10359_p6 = pneg %p10349_p5 }
  0x72   : > { %p9428_p8 = pnand %p9426_p7, %p10359_p6 }
  0x74   : > { %p9429_p9 = pneg %p9428_p8 }
  0x76   : > { %p9436_p13 = pnand %p9435_p12, %p9429_p9 }
  0x78   : > { %9439 = shalt.err (!%p9436_p13)
}
  0x79   : > { %s11484_s18 = smov 128   ;;  %s11535_s13 = sld [smem:[#allocation46_spill]] }
  0x7a   : > { %s11486_s26 = smov 8   ;;  %s9451_s8 = scalar_lea.vmem %s10353_s22, 512 }
  0x7b   : > { %p9452_p0 = scmp.ne.s32.totalorder %s10353_s22, %s9451_s8  ;;  %p9459_p7 = scmp.lt.s32.totalorder %s10353_s22, %s10353_s22 }
  0x7c   : > { %p9460_p8 = scmp.lt.s32.totalorder %s9451_s8, %s9451_s8 }
  0x7d   : > { %p9454_p2 = pnand %p9452_p0, %p10359_p6 }
  0x7e   : > { %p9461_p9 = por %p9460_p8, %p9459_p7 }
  0x7f   : > { %9163 = dma.hbm_to_vmem [thread:$0]  (!%p10349_p5), %s11535_s13, 1024, %s1088_s10, [#allocation5], %s11484_s18, %s11484_s18, %s11486_s26  }
  0x80   : > { %p9455_p4 = pneg %p9454_p2 }
  0x82   : > { %p9462_p10 = pnand %p9461_p9, %p9455_p4 }
  0x84   : > { %9465 = shalt.err (!%p9462_p10)
}
  0x85   : > { %9169 = dma.hbm_to_vmem [thread:$0]  (!%p10349_p5), %s10115_s25, 512, %s10353_s22, [#allocation8], %s11484_s18, %s11484_s18, %s11486_s26  }
  0x86   : > { %s9477_s4 = scalar_lea.vmem %s10355_s7, 4096  ;;  %p9485_p0 = scmp.lt.s32.totalorder %s10355_s7, %s10355_s7 }
  0x87   : > { %p9478_p11 = scmp.ne.s32.totalorder %s10355_s7, %s9477_s4  ;;  %p9486_p2 = scmp.lt.s32.totalorder %s9477_s4, %s9477_s4 }
  0x89   : > { %p9480_p12 = pnand %p9478_p11, %p10359_p6  ;;  %p9487_p4 = por %p9486_p2, %p9485_p0 }
  0x8b   : > { %p9481_p13 = pneg %p9480_p12 }
  0x8d   : > { %p9488_p7 = pnand %p9487_p4, %p9481_p13 }
  0x8f   : > { %9491 = shalt.err (!%p9488_p7)
}
  0x90   : > { %s11491_s8 = smov 256   ;;  %s11536_s14 = sld [smem:[#allocation51_spill]] }
  0x91   : > { %s11493_s10 = smov 16   ;;  %s10063_s22 = smov [#allocation13]  }
  0x92   : > { %s1176_s18 = sshll.u32 %s10063_s22, 4  ;;  %s10064_s26 = smov [#allocation16]   ;;  %s1177_s18 = int_to_ptr.vmem [resolvable:$true] %s1176_s18 }
  0x93   : > { %s1197_s13 = sshll.u32 %s10064_s26, 4  ;;  %s9503_s4 = scalar_lea.vmem %s1177_s18, 128  ;;  %s1198_s13 = int_to_ptr.vmem [resolvable:$true] %s1197_s13 }
  0x94   : > { %p9504_p8 = scmp.ne.s32.totalorder %s1177_s18, %s9503_s4  ;;  %p9511_p11 = scmp.lt.s32.totalorder %s1177_s18, %s1177_s18 }
  0x95   : > { %p9512_p12 = scmp.lt.s32.totalorder %s9503_s4, %s9503_s4 }
  0x96   : > { %9175 = dma.hbm_to_vmem [thread:$0]  (!%p10349_p5), %s11536_s14, 4096, %s10355_s7, [#allocation11], %s11491_s8, %s11491_s8, %s11493_s10  }
  0x97   : > { %p9506_p9 = pnand %p9504_p8, %p10359_p6  ;;  %p9513_p13 = por %p9512_p12, %p9511_p11 }
  0x99   : > { %p9507_p10 = pneg %p9506_p9 }
  0x9b   : > { %p9514_p0 = pnand %p9513_p13, %p9507_p10 }
  0x9d   : > { %9517 = shalt.err (!%p9514_p0)
}
  0x9e   : > { %9181 = dma.hbm_to_vmem [thread:$0]  (!%p10349_p5), %s10150_s30, 128, %s1177_s18, [#allocation14]  }
  0x9f   : > { %s9529_s7 = scalar_lea.vmem %s1198_s13, 256  ;;  %p9537_p3 = scmp.lt.s32.totalorder %s1198_s13, %s1198_s13 }
  0xa0   : > { %p9530_p2 = scmp.ne.s32.totalorder %s1198_s13, %s9529_s7  ;;  %p9538_p1 = scmp.lt.s32.totalorder %s9529_s7, %s9529_s7 }
  0xa2   : > { %p9532_p4 = pnand %p9530_p2, %p10359_p6  ;;  %p9539_p8 = por %p9538_p1, %p9537_p3 }
  0xa4   : > { %p9533_p7 = pneg %p9532_p4 }
  0xa6   : > { %p9540_p9 = pnand %p9539_p8, %p9533_p7 }
  0xa8   : > { %9543 = shalt.err (!%p9540_p9)
}
  0xa9   : > { %s11537_s26 = smov 8   ;;  %s11538_s22 = smov 128  }
  0xaa   : > { %s11539_s12 = sld [smem:[#allocation53_spill]]  ;;  %s10065_s18 = smov [#allocation19]  }
  0xab   : > { %s1223_s4 = sshll.u32 %s10065_s18, 4  ;;  %s10066_s8 = smov [#allocation22]   ;;  %s1224_s4 = int_to_ptr.vmem [resolvable:$true] %s1223_s4 }
  0xac   : > { %s1249_s10 = sshll.u32 %s10066_s8, 4  ;;  %s9555_s14 = scalar_lea.vmem %s1224_s4, 512  ;;  %s1250_s10 = int_to_ptr.vmem [resolvable:$true] %s1249_s10 }
  0xad   : > { %p9556_p10 = scmp.ne.s32.totalorder %s1224_s4, %s9555_s14  ;;  %p9563_p3 = scmp.lt.s32.totalorder %s1224_s4, %s1224_s4 }
  0xae   : > { %p9564_p12 = scmp.lt.s32.totalorder %s9555_s14, %s9555_s14 }
  0xaf   : > { %p9558_p11 = pnand %p9556_p10, %p10359_p6 }
  0xb0   : > { %9187 = dma.hbm_to_vmem [thread:$0]  (!%p10349_p5), %s11539_s12, 256, %s1198_s13, [#allocation17], %s11538_s22, %s11538_s22, %s11537_s26  }
  0xb1   : > { %p9559_p1 = pneg %p9558_p11  ;;  %p9565_p13 = por %p9564_p12, %p9563_p3 }
  0xb3   : > { %p9566_p0 = pnand %p9565_p13, %p9559_p1 }
  0xb5   : > { %9569 = shalt.err (!%p9566_p0)
}
  0xb6   : > { %9193 = dma.hbm_to_vmem [thread:$0]  (!%p10349_p5), %s10170_s27, 512, %s1224_s4, [#allocation20], %s11538_s22, %s11538_s22, %s11537_s26  }
  0xb7   : > { %s9581_s13 = scalar_lea.vmem %s1250_s10, 3072  ;;  %p9589_p8 = scmp.lt.s32.totalorder %s1250_s10, %s1250_s10 }
  0xb8   : > { %p9582_p2 = scmp.ne.s32.totalorder %s1250_s10, %s9581_s13  ;;  %p9590_p9 = scmp.lt.s32.totalorder %s9581_s13, %s9581_s13 }
  0xba   : > { %p9584_p4 = pnand %p9582_p2, %p10359_p6  ;;  %p9591_p10 = por %p9590_p9, %p9589_p8 }
  0xbc   : > { %p9585_p7 = pneg %p9584_p4 }
  0xbe   : > { %p9592_p11 = pnand %p9591_p10, %p9585_p7 }
  0xc0   : > { %9595 = shalt.err (!%p9592_p11)
}
  0xc1   : > { %9199 = dma.hbm_to_vmem [thread:$0]  (!%p10349_p5), %s10180_s19, 3072, %s1250_s10, [#allocation23], %s11538_s22, %s11538_s22, %s11537_s26  }
  0xc2   : > { %s10067_s14 = smov [#allocation25]   ;;  %s10068_s7 = smov [#allocation28]  }
  0xc3   : > { %s1287_s8 = sshll.u32 %s10067_s14, 4  ;;  %s1319_s18 = sshll.u32 %s10068_s7, 4  ;;  %s1288_s8 = int_to_ptr.vmem [resolvable:$true] %s1287_s8  ;;  %s1320_s18 = int_to_ptr.vmem [resolvable:$true] %s1319_s18 }
  0xc4   : > { %s9607_s4 = scalar_lea.vmem %s1288_s8, 6144  ;;  %p9615_p13 = scmp.lt.s32.totalorder %s1288_s8, %s1288_s8 }
  0xc5   : > { %p9608_p1 = scmp.ne.s32.totalorder %s1288_s8, %s9607_s4  ;;  %p9616_p0 = scmp.lt.s32.totalorder %s9607_s4, %s9607_s4 }
  0xc7   : > { %p9610_p3 = pnand %p9608_p1, %p10359_p6  ;;  %p9617_p2 = por %p9616_p0, %p9615_p13 }
  0xc9   : > { %p9611_p12 = pneg %p9610_p3 }
  0xcb   : > { %p9618_p4 = pnand %p9617_p2, %p9611_p12 }
  0xcd   : > { %9621 = shalt.err (!%p9618_p4)
}
  0xce   : > { %s11540_s5 = sld [smem:[#allocation60_spill]]  ;;  %s9633_s10 = scalar_lea.vmem %s1320_s18, 24576 }
  0xcf   : > { %p9634_p7 = scmp.ne.s32.totalorder %s1320_s18, %s9633_s10  ;;  %p9641_p10 = scmp.lt.s32.totalorder %s1320_s18, %s1320_s18 }
  0xd0   : > { %p9642_p11 = scmp.lt.s32.totalorder %s9633_s10, %s9633_s10 }
  0xd1   : > { %p9636_p8 = pnand %p9634_p7, %p10359_p6 }
  0xd2   : > { %p9643_p1 = por %p9642_p11, %p9641_p10 }
  0xd3   : > { %p9637_p9 = pneg %p9636_p8 }
  0xd4   : > { %9205 = dma.hbm_to_vmem [thread:$0]  (!%p10349_p5), %s11540_s5, 6144, %s1288_s8, [#allocation26], %s11538_s22, %s11538_s22, %s11537_s26  }
  0xd5   : > { %p9644_p3 = pnand %p9643_p1, %p9637_p9 }
  0xd7   : > { %9647 = shalt.err (!%p9644_p3)
}
  0xd8   : > { %s11541_s13 = smov 16   ;;  %s11542_s14 = smov 256  }
  0xd9   : > { %9211 = dma.hbm_to_vmem [thread:$0]  (!%p10349_p5), %s10230_s29, 24576, %s1320_s18, [#allocation29], %s11542_s14, %s11542_s14, %s11541_s13  }
  0xda   : > { %s10069_s8 = smov [#allocation6]   ;;  %s10070_s4 = smov [#allocation9]  }
  0xdb   : > { %s1101_s7 = sshll.u32 %s10069_s8, 4  ;;  %s1130_s5 = sshll.u32 %s10070_s4, 4  ;;  %s1102_s7 = int_to_ptr.vmem [resolvable:$true] %s1101_s7  ;;  %s1131_s5 = int_to_ptr.vmem [resolvable:$true] %s1130_s5 }
  0xdc   : > { %s9659_s12 = scalar_lea.vmem %s1102_s7, 64  ;;  %p9667_p2 = scmp.lt.s32.totalorder %s1102_s7, %s1102_s7 }
  0xdd   : > { %p9660_p12 = scmp.ne.s32.totalorder %s1102_s7, %s9659_s12  ;;  %p9668_p4 = scmp.lt.s32.totalorder %s9659_s12, %s9659_s12 }
  0xdf   : > { %p9662_p13 = pnand %p9660_p12, %p10359_p6  ;;  %p9669_p7 = por %p9668_p4, %p9667_p2 }
  0xe1   : > { %p9663_p0 = pneg %p9662_p13 }
  0xe3   : > { %p9670_p8 = pnand %p9669_p7, %p9663_p0 }
  0xe5   : > { %9673 = shalt.err (!%p9670_p8)
}
  0xe6   : > { %9166 = dma.hbm_to_vmem [thread:$0]  (!%p10349_p5), %s10105_s17, 64, %s1102_s7, [#allocation5]  }
  0xe7   : > { %s9685_s18 = scalar_lea.vmem %s1131_s5, 1024  ;;  %p9693_p1 = scmp.lt.s32.totalorder %s1131_s5, %s1131_s5 }
  0xe8   : > { %p9686_p9 = scmp.ne.s32.totalorder %s1131_s5, %s9685_s18  ;;  %p9694_p3 = scmp.lt.s32.totalorder %s9685_s18, %s9685_s18 }
  0xea   : > { %p9688_p10 = pnand %p9686_p9, %p10359_p6  ;;  %p9695_p12 = por %p9694_p3, %p9693_p1 }
  0xec   : > { %p9689_p11 = pneg %p9688_p10 }
  0xee   : > { %p9696_p13 = pnand %p9695_p12, %p9689_p11 }
  0xf0   : > { %9699 = shalt.err (!%p9696_p13)
}
  0xf1   : > { %s11543_s3 = sld [smem:[#allocation49_spill]]  ;;  %s10071_s12 = smov [#allocation12]  }
  0xf2   : > { %s1162_s10 = sshll.u32 %s10071_s12, 4  ;;  %s10072_s8 = smov [#allocation15]   ;;  %s1163_s10 = int_to_ptr.vmem [resolvable:$true] %s1162_s10 }
  0xf3   : > { %s1187_s7 = sshll.u32 %s10072_s8, 4  ;;  %s9711_s4 = scalar_lea.vmem %s1163_s10, 2048  ;;  %s1188_s7 = int_to_ptr.vmem [resolvable:$true] %s1187_s7 }
  0xf4   : > { %p9712_p0 = scmp.ne.s32.totalorder %s1163_s10, %s9711_s4  ;;  %p9719_p7 = scmp.lt.s32.totalorder %s1163_s10, %s1163_s10 }
  0xf5   : > { %p9720_p8 = scmp.lt.s32.totalorder %s9711_s4, %s9711_s4 }
  0xf6   : > { %p9714_p2 = pnand %p9712_p0, %p10359_p6 }
  0xf7   : > { %9172 = dma.hbm_to_vmem [thread:$0]  (!%p10349_p5), %s11543_s3, 1024, %s1131_s5, [#allocation8], %s11538_s22, %s11538_s22, %s11537_s26  }
  0xf8   : > { %p9715_p4 = pneg %p9714_p2  ;;  %p9721_p9 = por %p9720_p8, %p9719_p7 }
  0xfa   : > { %p9722_p10 = pnand %p9721_p9, %p9715_p4 }
  0xfc   : > { %9725 = shalt.err (!%p9722_p10)
}
  0xfd   : > { %9178 = dma.hbm_to_vmem [thread:$0]  (!%p10349_p5), %s10145_s24, 2048, %s1163_s10, [#allocation11], %s11542_s14, %s11542_s14, %s11541_s13  }
  0xfe   : > { %s9737_s5 = scalar_lea.vmem %s1188_s7, 128  ;;  %p9745_p12 = scmp.lt.s32.totalorder %s1188_s7, %s1188_s7 }
  0xff   : > { %p9738_p11 = scmp.ne.s32.totalorder %s1188_s7, %s9737_s5  ;;  %p9746_p13 = scmp.lt.s32.totalorder %s9737_s5, %s9737_s5 }
 0x101   : > { %p9740_p1 = pnand %p9738_p11, %p10359_p6  ;;  %p9747_p0 = por %p9746_p13, %p9745_p12 }
 0x103   : > { %p9741_p3 = pneg %p9740_p1 }
 0x105   : > { %p9748_p2 = pnand %p9747_p0, %p9741_p3 }
 0x107   : > { %9751 = shalt.err (!%p9748_p2)
}
 0x108   : > { %9184 = dma.hbm_to_vmem [thread:$0]  (!%p10349_p5), %s10155_s6, 128, %s1188_s7, [#allocation14]  }
 0x109   : > { %s10073_s18 = smov [#allocation18]   ;;  %s10074_s10 = smov [#allocation21]  }
 0x10a   : > { %s1210_s12 = sshll.u32 %s10073_s18, 4  ;;  %s1236_s8 = sshll.u32 %s10074_s10, 4  ;;  %s1211_s12 = int_to_ptr.vmem [resolvable:$true] %s1210_s12  ;;  %s1237_s8 = int_to_ptr.vmem [resolvable:$true] %s1236_s8 }
 0x10b   : > { %s9763_s4 = scalar_lea.vmem %s1211_s12, 256  ;;  %p9771_p9 = scmp.lt.s32.totalorder %s1211_s12, %s1211_s12 }
 0x10c   : > { %p9764_p4 = scmp.ne.s32.totalorder %s1211_s12, %s9763_s4  ;;  %p9772_p10 = scmp.lt.s32.totalorder %s9763_s4, %s9763_s4 }
 0x10e   : > { %p9766_p7 = pnand %p9764_p4, %p10359_p6  ;;  %p9773_p11 = por %p9772_p10, %p9771_p9 }
 0x110   : > { %p9767_p8 = pneg %p9766_p7 }
 0x112   : > { %p9774_p1 = pnand %p9773_p11, %p9767_p8 }
 0x114   : > { %9777 = shalt.err (!%p9774_p1)
}
 0x115   : > { %9190 = dma.hbm_to_vmem [thread:$0]  (!%p10349_p5), %s10165_s20, 256, %s1211_s12, [#allocation17], %s11538_s22, %s11538_s22, %s11537_s26  }
 0x116   : > { %s9789_s7 = scalar_lea.vmem %s1237_s8, 512  ;;  %p9797_p0 = scmp.lt.s32.totalorder %s1237_s8, %s1237_s8 }
 0x117   : > { %p9790_p3 = scmp.ne.s32.totalorder %s1237_s8, %s9789_s7  ;;  %p9798_p2 = scmp.lt.s32.totalorder %s9789_s7, %s9789_s7 }
 0x119   : > { %p9792_p12 = pnand %p9790_p3, %p10359_p6  ;;  %p9799_p4 = por %p9798_p2, %p9797_p0 }
 0x11b   : > { %p9793_p13 = pneg %p9792_p12 }
 0x11d   : > { %p9800_p7 = pnand %p9799_p4, %p9793_p13 }
 0x11f   : > { %9803 = shalt.err (!%p9800_p7)
}
 0x120   : > { %s11544_s5 = sld [smem:[#allocation54_spill]]  ;;  %s10075_s18 = smov [#allocation24]  }
 0x121   : > { %s1265_s12 = sshll.u32 %s10075_s18, 4  ;;  %s10076_s10 = smov [#allocation27]   ;;  %s1266_s12 = int_to_ptr.vmem [resolvable:$true] %s1265_s12 }
 0x122   : > { %s1303_s4 = sshll.u32 %s10076_s10, 4  ;;  %s9815_s3 = scalar_lea.vmem %s1266_s12, 3072  ;;  %s1304_s4 = int_to_ptr.vmem [resolvable:$true] %s1303_s4 }
 0x123   : > { %p9816_p8 = scmp.ne.s32.totalorder %s1266_s12, %s9815_s3  ;;  %p9823_p11 = scmp.lt.s32.totalorder %s1266_s12, %s1266_s12 }
 0x124   : > { %p9824_p1 = scmp.lt.s32.totalorder %s9815_s3, %s9815_s3 }
 0x125   : > { %p9818_p9 = pnand %p9816_p8, %p10359_p6 }
 0x126   : > { %9196 = dma.hbm_to_vmem [thread:$0]  (!%p10349_p5), %s11544_s5, 512, %s1237_s8, [#allocation20], %s11538_s22, %s11538_s22, %s11537_s26  }
 0x127   : > { %p9819_p10 = pneg %p9818_p9  ;;  %p9825_p3 = por %p9824_p1, %p9823_p11 }
 0x129   : > { %p9826_p12 = pnand %p9825_p3, %p9819_p10 }
 0x12b   : > { %9829 = shalt.err (!%p9826_p12)
}
 0x12c   : > { %s11545_s8 = sld [smem:[#allocation56_spill]]  ;;  %s9841_s7 = scalar_lea.vmem %s1304_s4, 24576 }
 0x12d   : > { %p9842_p13 = scmp.ne.s32.totalorder %s1304_s4, %s9841_s7  ;;  %p9849_p4 = scmp.lt.s32.totalorder %s1304_s4, %s1304_s4 }
 0x12e   : > { %p9850_p7 = scmp.lt.s32.totalorder %s9841_s7, %s9841_s7 }
 0x12f   : > { %p9844_p0 = pnand %p9842_p13, %p10359_p6 }
 0x130   : > { %p9851_p8 = por %p9850_p7, %p9849_p4 }
 0x131   : > { %p9845_p2 = pneg %p9844_p0 }
 0x132   : > { %9202 = dma.hbm_to_vmem [thread:$0]  (!%p10349_p5), %s11545_s8, 3072, %s1266_s12, [#allocation23], %s11538_s22, %s11538_s22, %s11537_s26  }
 0x133   : > { %p9852_p9 = pnand %p9851_p8, %p9845_p2 }
 0x135   : > { %9855 = shalt.err (!%p9852_p9)
}
 0x136   : > { %s11546_s3 = sld [smem:[#allocation62_spill]]  ;;  %s10077_s5 = smov [#allocation30]  }
 0x137   : > { %s1347_s18 = sshll.u32 %s10077_s5, 4  ;;  %s10078_s12 = smov [#allocation31]   ;;  %s1348_s18 = int_to_ptr.vmem [resolvable:$true] %s1347_s18 }
 0x138   : > { %s1363_s10 = sshll.u32 %s10078_s12, 4  ;;  %s9867_s8 = scalar_lea.vmem %s1348_s18, 2048  ;;  %s1364_s10 = int_to_ptr.vmem [resolvable:$true] %s1363_s10 }
 0x139   : > { %p9868_p10 = scmp.ne.s32.totalorder %s1348_s18, %s9867_s8  ;;  %p9875_p3 = scmp.lt.s32.totalorder %s1348_s18, %s1348_s18 }
 0x13a   : > { %p9876_p12 = scmp.lt.s32.totalorder %s9867_s8, %s9867_s8 }
 0x13b   : > { %p9870_p11 = pnand %p9868_p10, %p10359_p6 }
 0x13c   : > { %9208 = dma.hbm_to_vmem [thread:$0]  (!%p10349_p5), %s11546_s3, 24576, %s1304_s4, [#allocation26], %s11542_s14, %s11542_s14, %s11541_s13  }
 0x13d   : > { %p9871_p1 = pneg %p9870_p11  ;;  %p9877_p13 = por %p9876_p12, %p9875_p3 }
 0x13f   : > { %p9878_p0 = pnand %p9877_p13, %p9871_p1 }
 0x141   : > { %9881 = shalt.err (!%p9878_p0)
}
 0x142   : > { %s11547_s13 = sld [smem:[#allocation69_spill]]  ;;  %s9893_s14 = scalar_lea.vmem %s1364_s10, 2048 }
 0x143   : > { %p9894_p2 = scmp.ne.s32.totalorder %s1364_s10, %s9893_s14  ;;  %p9901_p8 = scmp.lt.s32.totalorder %s1364_s10, %s1364_s10 }
 0x144   : > { %p9902_p9 = scmp.lt.s32.totalorder %s9893_s14, %s9893_s14 }
 0x145   : > { %p9896_p4 = pnand %p9894_p2, %p10359_p6 }
 0x146   : > { %p9903_p10 = por %p9902_p9, %p9901_p8 }
 0x147   : > { %p9897_p7 = pneg %p9896_p4 }
 0x148   : > { %9214 = dma.hbm_to_vmem [thread:$0]  (!%p10349_p5), %s11547_s13, 2048, %s1348_s18, [#allocation29], %s11538_s22, %s11538_s22, %s11537_s26  }
 0x149   : > { %p9904_p11 = pnand %p9903_p10, %p9897_p7 }
 0x14b   : > { %9907 = shalt.err (!%p9904_p11)
}
 0x14c   : > { %s11548_s4 = sld [smem:[#allocation71_spill]]  ;;  %s10517_s23 = sadd.s32 1, %s10010_s0  }
 0x14d   : > { %s11549_s11 = sld [smem:[#allocation44_spill]]  ;;  %s116_s7 = ssub.s32 %s10010_s0, %s10517_s23 }
 0x14e   : > { %s119_s3 = sadd.s32 1, %s10006_s2  ;;  %p117_p6 = scmp.eq.s32.totalorder %s116_s7, 0 }
 0x14f   : > { %p126_p1 = scmp.ne.s32.totalorder %s10006_s2, %s10002_s1  ;;  %p127_p3 = scmp.eq.s32.totalorder %s10010_s0, 0 }
 0x150   : > { %p132_p12 = scmp.ne.s32.totalorder %s10002_s1, %s9998_s28  ;;  %p11550_p0 = scmp.ne.s32.totalorder %s11531_s15, 0 }
 0x151   : > { %s10528_s5 = scalar_select %p117_p6, %s10006_s2, %s119_s3  }
 0x152   : > { %9217 = dma.hbm_to_vmem [thread:$0]  (!%p10349_p5), %s11548_s4, 2048, %s1364_s10, [#allocation32], %s11538_s22, %s11538_s22, %s11537_s26  }
 0x153   : > { %p128_p13 = por %p127_p3, %p126_p1  ;;  %p10532_p2 = por %p11550_p0, %p132_p12 }
 0x154   : > { %p9241_p5 = scmp.lt.s32.totalorder %s10010_s0, 2  ;;  %s1398_s26 = sand.u32 1, %s10006_s2  }
 0x155   : > { %s11551_s18 = scalar_select %p10532_p2, 1, 0 }
 0x156   : > { %s7829_s22 = sshll.u32 %s10010_s0, 4  ;;  %s1401_s12 = scalar_lea.vmem [#allocation2], %s1398_s26 }
 0x157   : > { %s1408_s10 = sshll.u32 %s1401_s12, 4  ;;  %s10540_s8 = scalar_lea.hbm %s11549_s11, %s7829_s22  ;;  %s1409_s10 = int_to_ptr.vmem [resolvable:$true] %s1408_s10 }
 0x158   : > { %p10542_p4 = pnand %p9241_p5, %p128_p13  ;;  %s1399_s13 = scalar_lea.sflag [#allocation3], %s1398_s26 }
 0x159   : > { %s9908_s14 = scalar_lea.hbm %s10540_s8, 16  ;;  %s9913_s4 = scalar_lea.hbm %s11549_s11, 32 }
 0x15a   : > { %s11552_s28 = scalar_select %p10542_p4, 1, 0 }
 0x15b   : > { %p9909_p7 = scmp.ne.s32.totalorder %s10540_s8, %s9908_s14  ;;  %p9910_p8 = pneg %p10542_p4 }
 0x15c   : > { %p9914_p11 = scmp.lt.s32.totalorder %s10540_s8, %s11549_s11  ;;  %p9915_p6 = scmp.lt.s32.totalorder %s9913_s4, %s9908_s14 }
 0x15d   : > { %p9911_p9 = pnand %p9910_p8, %p9909_p7 }
 0x15e   : > { %p9916_p1 = por %p9915_p6, %p9914_p11 }
 0x15f   : > { %p9912_p10 = pneg %p9911_p9 }
 0x161   : > { %p9917_p3 = pnand %p9916_p1, %p9912_p10 }
 0x163   : > { %9920 = shalt.err (!%p9917_p3)
}
 0x164   : > { %s9921_s7 = scalar_lea.vmem %s1409_s10, 16  ;;  %s10079_s3 = smov [#allocation2]  }
 0x165   : > { %p9922_p12 = scmp.ne.s32.totalorder %s1409_s10, %s9921_s7  ;;  %s9926_s22 = sshll.u32 %s10079_s3, 4  ;;  %s9927_s22 = int_to_ptr.vmem [resolvable:$false] %s9926_s22 }
 0x166   : > { %s9928_s26 = scalar_lea.vmem %s9927_s22, 32  ;;  %p9929_p5 = scmp.lt.s32.totalorder %s1409_s10, %s9927_s22 }
 0x167   : > { %p9924_p13 = pnand %p9922_p12, %p9910_p8  ;;  %p9930_p2 = scmp.lt.s32.totalorder %s9928_s26, %s9921_s7 }
 0x169   : > { %p9925_p0 = pneg %p9924_p13  ;;  %p9931_p4 = por %p9930_p2, %p9929_p5 }
 0x16b   : > { %p9932_p7 = pnand %p9931_p4, %p9925_p0 }
 0x16d   : > { %9935 = shalt.err (!%p9932_p7)
}
 0x16e   : > { %p11553_p9 = scmp.ne.s32.totalorder %s11552_s28, 0  ;;  %p11554_p10 = scmp.ne.s32.totalorder %s11532_s16, 0 }
 0x16f   : > { %s1419_s12 = sand.u32 (!%p11554_p10), 1, %s10002_s1   ;;  %p11555_p8 = scmp.ne.s32.totalorder (!%p11554_p10), %s11551_s18, 0 }
 0x170   : > { %9221 = dma.hbm_to_vmem [thread:$0]  (!%p11553_p9), %s10540_s8, 16, %s1409_s10, %s1399_s13  }
 0x171   : > { %1417 = sbr.rel (%p11554_p10) target bundleno = 6111 (0x17df), region = 196  ;;  %s1420_s14 = scalar_lea.sflag (!%p11554_p10), [#allocation3], %s1419_s12 }
 0x172   : > { %s10559_s4 = scalar_lea.vmem (!%p11554_p10), [#allocation2], %s1419_s12 }
 0x176   : > { %9953 = dma.done.wait (%p11555_p8), %s1420_s14, 16  }
 0x177   : > { %9955 = vsyncadd (%p11555_p8), %s1420_s14, 4294967280  ;;  %p11556_p2 = scmp.ne.s32.totalorder %s11531_s15, 0 }
 0x179   : > { %9957 = dma.done.wait (%p11556_p2), [#allocation5], 1088  }
 0x17a   : > { %9959 = vsyncadd (%p11556_p2), [#allocation5], 4294966208 }
 0x17b   : > { %9961 = dma.done.wait (%p11556_p2), [#allocation8], 1536  }
 0x17c   : > { %9963 = vsyncadd (%p11556_p2), [#allocation8], 4294965760 }
 0x17d   : > { %9965 = dma.done.wait (%p11556_p2), [#allocation11], 6144  }
 0x17e   : > { %9967 = vsyncadd (%p11556_p2), [#allocation11], 4294961152 }
 0x17f   : > { %9969 = dma.done.wait (%p11556_p2), [#allocation14], 256  }
 0x180   : > { %9971 = vsyncadd (%p11556_p2), [#allocation14], 4294967040 }
 0x181   : > { %9973 = dma.done.wait (%p11556_p2), [#allocation17], 512  }
 0x182   : > { %9975 = vsyncadd (%p11556_p2), [#allocation17], 4294966784 }
 0x183   : > { %9977 = dma.done.wait (%p11556_p2), [#allocation20], 1024  }
 0x184   : > { %9979 = vsyncadd (%p11556_p2), [#allocation20], 4294966272 }
 0x185   : > { %9981 = dma.done.wait (%p11556_p2), [#allocation23], 6144  }
 0x186   : > { %9983 = vsyncadd (%p11556_p2), [#allocation23], 4294961152 }
 0x187   : > { %9985 = dma.done.wait (%p11556_p2), [#allocation26], 30720  }
 0x188   : > { %9987 = vsyncadd (%p11556_p2), [#allocation26], 4294936576 }
 0x189   : > { %9989 = dma.done.wait (%p11556_p2), [#allocation29], 26624  }
 0x18a   : > { %9991 = vsyncadd (%p11556_p2), [#allocation29], 4294940672 }
 0x18b   : > { %9993 = dma.done.wait (%p11556_p2), [#allocation32], 2048  }
 0x18c   : > { %9995 = vsyncadd (%p11556_p2), [#allocation32], 4294965248  ;;  %v10080_v0 = vmov 0.0   ;;  %vm10081_vm0 = vmmov 0   ;;  %v1612_v1 = vld [vmem:[#allocation4 + $0x8] sm:$0xff]  ;;  %v1697_v2 = vld [vmem:[#allocation4 + $0x18] sm:$0xff]  ;;  %v1687_v13 = vlaneseq }
 0x18d   : > { %8477 = vmatprep.subr.mxu0 %v10080_v0  ;;  %8484 = vmatprep.subr.mxu1 %v10080_v0  ;;  %v1611_v3 = vld [vmem:[#allocation4] sm:$0xff]  ;;  %v1696_v4 = vld [vmem:[#allocation4 + $0x10] sm:$0xff]  ;;  %v1608_v5 = vld [vmem:[%s10559_s4] sm:$0x1]  ;;  %vm1613_vm1 = vcmask 130048   ;;  %s11557_s15 = sld [smem:[#allocation45_spill]] }
 0x18e   : > { %8481 = vmatprep.mubr.msk.f32.mxu0 %vm10081_vm0, %v10080_v0  ;;  %8488 = vmatprep.mubr.msk.f32.mxu1 %vm10081_vm0, %v10080_v0  ;;  %v1778_v6 = vld [vmem:[#allocation4 + $0x28] sm:$0xff]  ;;  %v1859_v7 = vld [vmem:[#allocation4 + $0x38] sm:$0xff]  ;;  %v1777_v8 = vld [vmem:[#allocation4 + $0x20] sm:$0xff]  ;;  %v10635_v14 = vshrl.u32 %v1687_v13, 7  ;;  %s11558_s16 = sld [smem:[#allocation47_spill]]  ;;  %vm1955_vm2 = vcmask 1043456  }
 0x18f   : > { %8478 = vmatpush3.msra.mxu0 %v1612_v1  ;;  %8485 = vmatpush3.msra.mxu1 %v1697_v2  ;;  %v1858_v9 = vld [vmem:[#allocation4 + $0x30] sm:$0xff]  ;;  %v2032_v10 = vld [vmem:[#allocation7 + $0x18] sm:$0xff]  ;;  %vm1951_vm3 = vcmask 31744   ;;  %v2029_v42 = vld [vmem:[#allocation7] sm:$0xff]  ;;  %vm2033_vm4 = vcmask 261120   ;;  %vm2272_vm5 = vcmask 523264  }
 0x190   : > { %8479 = vmatprep.subr.mxu0 %v10080_v0  ;;  %8486 = vmatprep.subr.mxu1 %v10080_v0  ;;  %v2031_v11 = vld [vmem:[#allocation7 + $0x10] sm:$0xff]  ;;  %v2030_v12 = vld [vmem:[#allocation7 + $0x8] sm:$0xff]  ;;  %v10638_v15 = vsub.s32 0, %v10635_v14  ;;  %v1609_v22 = vld [vmem:[#allocation6] sm:$0xf]  ;;  %vm2108_vm6 = vcmask 64512  }
 0x191   : > { %8480 = vmatpush3.msra.mxu0 %v1611_v3  ;;  %8487 = vmatpush3.msra.mxu1 %v1696_v4  ;;  %v2271_v43 = vld [vmem:[#allocation22 + $0x78] sm:$0xff]  ;;  %v2270_v45 = vld [vmem:[#allocation22 + $0x70] sm:$0xff]  ;;  %v2269_v47 = vld [vmem:[#allocation22 + $0x68] sm:$0xff]  ;;  %s11559_s18 = sld [smem:[#allocation55_spill]]  ;;  %vm7512_vm7 = vcmask 785408  }
 0x192   : > { %8482 = vmatmul.mubr.msk.f32.vlgmr.msra.gmra.mxu0 %vm1613_vm1, %v1608_v5  ;;  %8489 = vmatmul.mubr.msk.f32.vlgmr.msra.gmra.mxu1 %vm1613_vm1, %v1608_v5  ;;  %v2268_v48 = vld [vmem:[#allocation22 + $0x60] sm:$0xff]  ;;  %v2267_v49 = vld [vmem:[#allocation22 + $0x58] sm:$0xff]  ;;  %v2266_v50 = vld [vmem:[#allocation22 + $0x50] sm:$0xff]  ;;  %s11560_s10 = sld [smem:[#allocation67_spill]] }
 0x193   : > { %8491 = vmatprep.subr.mxu0 %v10080_v0  ;;  %8498 = vmatprep.subr.mxu1 %v10080_v0  ;;  %v1610_v16 = vld [vmem:[%s11557_s15] sm:$0xf]  ;;  %v7853_v18 = vld [vmem:[%s11557_s15 + $0x4] sm:$0xf]  ;;  %v7855_v28 = vld [vmem:[%s11557_s15 + $0x8] sm:$0xf] }
 0x194   : > { %8492 = vmatpush3.msra.mxu0 %v1778_v6  ;;  %8499 = vmatpush3.msra.mxu1 %v1859_v7  ;;  %v7857_v30 = vld [vmem:[%s11557_s15 + $0xc] sm:$0xf]  ;;  %v1950_v41 = vld [vmem:[%s11558_s16] sm:$0xff]  ;;  %v2264_v52 = vld [vmem:[#allocation22 + $0x40] sm:$0xff]  ;;  %s11561_s8 = sld [smem:[#allocation48_spill]] }
 0x195   : > { %8493 = vmatprep.subr.mxu0 %v10080_v0  ;;  %8500 = vmatprep.subr.mxu1 %v10080_v0  ;;  %v2265_v51 = vld [vmem:[#allocation22 + $0x48] sm:$0xff]  ;;  %v10667_v55 = vld [vmem:[#allocation13] sm:$0xff]  ;;  %v2427_v57 = vld [vmem:[#allocation22 + $0xb8] sm:$0xff]  ;;  %s11562_s28 = sld [smem:[#allocation57_spill]] }
 0x196   : > { %8494 = vmatpush3.msra.mxu0 %v1777_v8  ;;  %8495 = vmatprep.mubr.msk.f32.mxu0 %vm10081_vm0, %v10080_v0  ;;  %v10675_v58 = vld [vmem:[#allocation15] sm:$0xff]  ;;  %v2426_v59 = vld [vmem:[#allocation22 + $0xb0] sm:$0xff]  ;;  %v2425_v61 = vld [vmem:[#allocation22 + $0xa8] sm:$0xff]  ;;  %s11563_s13 = sld [smem:[#allocation68_spill]] }
 0x197   : > { %8501 = vmatpush3.msra.mxu1 %v1858_v9  ;;  %8502 = vmatprep.mubr.msk.f32.mxu1 %vm10081_vm0, %v10080_v0  ;;  %v2262_v60 = vld [vmem:[#allocation22 + $0x38] sm:$0xff]  ;;  %v2261_v62 = vld [vmem:[#allocation22 + $0x30] sm:$0xff]  ;;  %v2424_v63 = vld [vmem:[#allocation22 + $0xa0] sm:$0xff]  ;;  %s11564_s7 = sld [smem:[#allocation58_spill]] }
 0x198   : > { %8496 = vmatmul.mubr.msk.f32.vlgmr.msra.gmra.mxu0 %vm1613_vm1, %v1608_v5  ;;  %8503 = vmatmul.mubr.msk.f32.vlgmr.msra.gmra.mxu1 %vm1613_vm1, %v1608_v5  ;;  %v2260_v1 = vld [vmem:[#allocation22 + $0x28] sm:$0xff]  ;;  %v2423_v2 = vld [vmem:[#allocation22 + $0x98] sm:$0xff]  ;;  %v2259_v3 = vld [vmem:[#allocation22 + $0x20] sm:$0xff]  ;;  %s11565_s3 = sld [smem:[#allocation59_spill]] }
 0x199   : > { %8505 = vmatprep.subr.mxu0 %v10080_v0  ;;  %8507 = vmatprep.mubr.msk.f32.mxu0 %vm10081_vm0, %v10080_v0  ;;  %v2258_v4 = vld [vmem:[#allocation22 + $0x18] sm:$0xff]  ;;  %v2257_v5 = vld [vmem:[#allocation22 + $0x10] sm:$0xff]  ;;  %v2256_v6 = vld [vmem:[#allocation22 + $0x8] sm:$0xff]  ;;  %s11566_s22 = sld [smem:[#allocation72_spill]] }
 0x19a   : > { %8510 = vmatprep.subr.mxu1 %v10080_v0  ;;  %8518 = vmatprep.mubr.msk.f32.mxu1 %vm10081_vm0, %v10080_v0  ;;  %v2255_v7 = vld [vmem:[#allocation22] sm:$0xff]  ;;  %v2422_v8 = vld [vmem:[#allocation22 + $0x90] sm:$0xff]  ;;  %v2421_v9 = vld [vmem:[#allocation22 + $0x88] sm:$0xff]  ;;  %s11567_s26 = sld [smem:[#allocation50_spill]] }
 0x19b   : > { %8511 = vmatpush3.msra.mxu1 %v2032_v10  ;;  %v2420_v10 = vld [vmem:[#allocation22 + $0x80] sm:$0xff]  ;;  %s11568_s12 = sld [smem:[#allocation61_spill]] }
 0x19c   : > { %8512 = vmatprep.subr.mxu1 %v10080_v0  ;;  %s11569_s14 = sld [smem:[#allocation70_spill]] }
 0x19d   : > { %8513 = vmatpush3.msra.mxu1 %v2031_v11  ;;  %s11570_s4 = sld [smem:[#allocation52_spill]] }
 0x19e   : > { %8514 = vmatprep.subr.mxu1 %v10080_v0  ;;  %s11571_s16 = sld [smem:[#allocation73_spill]] }
 0x19f   : > { %8515 = vmatpush3.msra.mxu1 %v2030_v12 }
 0x1a0   : > { %8516 = vmatprep.subr.mxu1 %v10080_v0 }
 0x1a1   : > { %8517 = vmatpush3.msra.mxu1 %v2029_v42  ;;  %v2661_v42 = vld [vmem:[#allocation24 + $0x48] sm:$0xff] }
 0x1a2   : > { %8531 = vmatprep.subr.mxu1 %v10080_v0 }
 0x252   : > { %v1683_v17 = vpop.f32.mrf.mxu0  ;;  %v1764_v19 = vpop.f32.mrf.mxu1 }
 0x253   : > { %v1690_v20 = vrot.slane %v1683_v17, %v10638_v15  ;;  %v1771_v21 = vrot.slane %v1764_v19, %v10638_v15  ;;  %v2658_v19 = vld [vmem:[#allocation24 + $0x38] sm:$0xff] }
 0x254   : > { %v8483_v23 = vpop.f32.mrf.mxu0  ;;  %v8490_v24 = vpop.f32.mrf.mxu1 }
 0x255   : > { %v1691_v25 = vmul.f32 %v1690_v20, %v1610_v16  ;;  %v1772_v26 = vmul.f32 %v7853_v18, %v1771_v21  ;;  %v2657_v20 = vld [vmem:[#allocation24 + $0x30] sm:$0xff]  ;;  %v2656_v21 = vld [vmem:[#allocation24 + $0x28] sm:$0xff]  ;;  %v2654_v23 = vld [vmem:[#allocation24 + $0x18] sm:$0xff] }
 0x256   : > { %v2653_v24 = vld [vmem:[#allocation24 + $0x10] sm:$0xff] }
 0x257   : > { %v1692_v27 = vadd.f32 %v1691_v25, %v1609_v22  ;;  %v2655_v22 = vld [vmem:[#allocation24 + $0x20] sm:$0xff]  ;;  %v2652_v25 = vld [vmem:[#allocation24 + $0x8] sm:$0xff] }
 0x258   : > { %v1845_v29 = vpop.f32.mrf.mxu0  ;;  %v1926_v31 = vpop.f32.mrf.mxu1 }
 0x259   : > { %v1773_v32 = vadd.f32 %v1772_v26, %v1692_v27  ;;  %v1852_v33 = vrot.slane %v1845_v29, %v10638_v15  ;;  %v1933_v34 = vrot.slane %v1926_v31, %v10638_v15  ;;  %v2651_v26 = vld [vmem:[#allocation24] sm:$0xff]  ;;  %v7867_v31 = vld [vmem:[%s11559_s18] ss:$0 sm:$0xff]  ;;  %s11572_s18 = sld [smem:[#allocation75_spill]] }
 0x25a   : > { %v8497_v35 = vpop.f32.mrf.mxu0  ;;  %v8504_v36 = vpop.f32.mrf.mxu1 }
 0x25b   : > { %v1853_v37 = vmul.f32 %v7855_v28, %v1852_v33  ;;  %v1934_v38 = vmul.f32 %v7857_v30, %v1933_v34  ;;  %v2667_v36 = vld [vmem:[#allocation24 + $0x78] sm:$0xff] }
 0x25d   : > { %v1854_v39 = vadd.f32 %v1853_v37, %v1773_v32  ;;  %v2666_v37 = vld [vmem:[#allocation24 + $0x70] sm:$0xff] }
 0x25f   : > { %v1935_v40 = vadd.f32 %v1934_v38, %v1854_v39  ;;  %v2665_v38 = vld [vmem:[#allocation24 + $0x68] sm:$0xff]  ;;  %v2664_v39 = vld [vmem:[#allocation24 + $0x60] sm:$0xff] }
 0x261   : > { %8506 = vmatpush3.msk.msra.mxu0 %vm1955_vm2, %v1935_v40  ;;  %v2663_v40 = vld [vmem:[#allocation24 + $0x58] sm:$0xff] }
 0x262   : > { %8508 = vmatmul.mubr.msk.f32.vlgmr.msra.gmra.mxu0 %vm1951_vm3, %v1950_v41  ;;  %8521 = vmatprep.subr.mxu0 %v10080_v0  ;;  %v2662_v41 = vld [vmem:[#allocation24 + $0x50] sm:$0xff] }
 0x263   : > { %8523 = vmatprep.mubr.msk.f32.mxu0 %vm10081_vm0, %v10080_v0 }
 0x322   : > { %v2025_v44 = vpop.f32.mrf.mxu0 }
 0x323   : > { %8519 = vmatmul.mubr.msk.f32.vlgmr.msra.gmra.mxu1 %vm2033_vm4, %v2025_v44  ;;  %v2822_v44 = vld [vmem:[#allocation24 + $0xb8] sm:$0xff] }
 0x324   : > { %v8509_v46 = vpop.f32.mrf.mxu0  ;;  %8532 = vmatpush3.msra.mxu1 %v2271_v43  ;;  %8547 = vmatprep.mubr.msk.f32.mxu1 %vm10081_vm0, %v10080_v0  ;;  %v2660_v43 = vld [vmem:[#allocation24 + $0x40] sm:$0xff] }
 0x325   : > { %8533 = vmatprep.subr.mxu1 %v10080_v0  ;;  %v2820_v46 = vld [vmem:[#allocation24 + $0xa8] sm:$0xff] }
 0x326   : > { %8534 = vmatpush3.msra.mxu1 %v2270_v45  ;;  %v2821_v45 = vld [vmem:[#allocation24 + $0xb0] sm:$0xff] }
 0x327   : > { %8535 = vmatprep.subr.mxu1 %v10080_v0 }
 0x328   : > { %8536 = vmatpush3.msra.mxu1 %v2269_v47  ;;  %v2819_v47 = vld [vmem:[#allocation24 + $0xa0] sm:$0xff] }
 0x329   : > { %8537 = vmatprep.subr.mxu1 %v10080_v0 }
 0x32a   : > { %8538 = vmatpush3.msra.mxu1 %v2268_v48  ;;  %v2818_v48 = vld [vmem:[#allocation24 + $0x98] sm:$0xff] }
 0x32b   : > { %8539 = vmatprep.subr.mxu1 %v10080_v0 }
 0x32c   : > { %8540 = vmatpush3.msra.mxu1 %v2267_v49  ;;  %v2817_v49 = vld [vmem:[#allocation24 + $0x90] sm:$0xff] }
 0x32d   : > { %8541 = vmatprep.subr.mxu1 %v10080_v0 }
 0x32e   : > { %8542 = vmatpush3.msra.mxu1 %v2266_v50  ;;  %v2816_v50 = vld [vmem:[#allocation24 + $0x88] sm:$0xff] }
 0x32f   : > { %8543 = vmatprep.subr.mxu1 %v10080_v0 }
 0x330   : > { %8544 = vmatpush3.msra.mxu1 %v2265_v51  ;;  %v2815_v51 = vld [vmem:[#allocation24 + $0x80] sm:$0xff] }
 0x331   : > { %8545 = vmatprep.subr.mxu1 %v10080_v0 }
 0x332   : > { %8546 = vmatpush3.msra.mxu1 %v2264_v52  ;;  %v2912_v52 = vld [vmem:[%s11560_s10 + $0x38] sm:$0xff] }
 0x333   : > { %8569 = vmatprep.subr.mxu1 %v10080_v0 }
 0x3e3   : > { %v10664_v53 = vpop.f32.mrf.mxu1 }
 0x3e4   : > { %v2107_v54 = vmax.f32 %v10664_v53, 0.0 }
 0x3e5   : > { %v8520_v56 = vpop.f32.mrf.mxu1 }
 0x3e6   : > { %8522 = vmatpush3.msra.mxu0 %v2107_v54  ;;  %8548 = vmatmul.mubr.msk.f32.vlgmr.msra.gmra.mxu1 %vm2272_vm5, %v2107_v54 }
 0x3e7   : > { %8524 = vmatmul.mubr.msk.f32.vlgmr.msra.gmra.mxu0 %vm2108_vm6, %v10667_v55  ;;  %8526 = vmatprep.subr.mxu0 %v10080_v0 }
 0x3e8   : > { %8527 = vmatpush3.msra.mxu0 %v2107_v54  ;;  %8528 = vmatprep.mubr.msk.f32.mxu0 %vm10081_vm0, %v10080_v0 }
 0x3e9   : > { %8550 = vmatprep.subr.mxu0 %v10080_v0  ;;  %8570 = vmatpush3.msra.mxu1 %v2427_v57  ;;  %v2910_v57 = vld [vmem:[%s11560_s10 + $0x28] sm:$0xff] }
 0x3ea   : > { %8571 = vmatprep.subr.mxu1 %v10080_v0  ;;  %8585 = vmatprep.mubr.msk.f32.mxu1 %vm10081_vm0, %v10080_v0 }
 0x3eb   : > { %8529 = vmatmul.mubr.msk.f32.vlgmr.msra.gmra.mxu0 %vm2108_vm6, %v10675_v58  ;;  %8572 = vmatpush3.msra.mxu1 %v2426_v59  ;;  %v2909_v59 = vld [vmem:[%s11560_s10 + $0x20] sm:$0xff] }
 0x3ec   : > { %8551 = vmatpush3.msra.mxu0 %v2262_v60  ;;  %8573 = vmatprep.subr.mxu1 %v10080_v0 }
 0x3ed   : > { %8552 = vmatprep.subr.mxu0 %v10080_v0  ;;  %8574 = vmatpush3.msra.mxu1 %v2425_v61  ;;  %v2908_v61 = vld [vmem:[%s11560_s10 + $0x18] sm:$0xff] }
 0x3ee   : > { %8553 = vmatpush3.msra.mxu0 %v2261_v62  ;;  %8575 = vmatprep.subr.mxu1 %v10080_v0  ;;  %v2907_v62 = vld [vmem:[%s11560_s10 + $0x10] sm:$0xff] }
 0x3ef   : > { %8554 = vmatprep.subr.mxu0 %v10080_v0  ;;  %8576 = vmatpush3.msra.mxu1 %v2424_v63  ;;  %v2906_v63 = vld [vmem:[%s11560_s10 + $0x8] sm:$0xff] }
 0x3f0   : > { %8555 = vmatpush3.msra.mxu0 %v2260_v1  ;;  %8577 = vmatprep.subr.mxu1 %v10080_v0  ;;  %v2905_v1 = vld [vmem:[%s11560_s10] sm:$0xff] }
 0x3f1   : > { %8556 = vmatprep.subr.mxu0 %v10080_v0  ;;  %8578 = vmatpush3.msra.mxu1 %v2423_v2 }
 0x3f2   : > { %8557 = vmatpush3.msra.mxu0 %v2259_v3  ;;  %8579 = vmatprep.subr.mxu1 %v10080_v0 }
 0x3f3   : > { %8558 = vmatprep.subr.mxu0 %v10080_v0  ;;  %8566 = vmatprep.mubr.msk.f32.mxu0 %vm10081_vm0, %v10080_v0 }
 0x3f4   : > { %8559 = vmatpush3.msra.mxu0 %v2258_v4  ;;  %8580 = vmatpush3.msra.mxu1 %v2422_v8  ;;  %v10768_v4 = vld [vmem:[%s11561_s8] sm:$0xff] }
 0x3f5   : > { %8560 = vmatprep.subr.mxu0 %v10080_v0  ;;  %8581 = vmatprep.subr.mxu1 %v10080_v0 }
 0x3f6   : > { %8561 = vmatpush3.msra.mxu0 %v2257_v5  ;;  %8582 = vmatpush3.msra.mxu1 %v2421_v9 }
 0x3f7   : > { %8562 = vmatprep.subr.mxu0 %v10080_v0  ;;  %8583 = vmatprep.subr.mxu1 %v10080_v0 }
 0x3f8   : > { %8563 = vmatpush3.msra.mxu0 %v2256_v6  ;;  %8584 = vmatpush3.msra.mxu1 %v2420_v10 }
 0x3f9   : > { %8564 = vmatprep.subr.mxu0 %v10080_v0  ;;  %8617 = vmatprep.subr.mxu1 %v10080_v0 }
 0x3fa   : > { %8565 = vmatpush3.msra.mxu0 %v2255_v7 }
 0x3fb   : > { %8588 = vmatprep.subr.mxu0 %v10080_v0 }
 0x4a6   : > { %v2342_v11 = vpop.f32.mrf.mxu1 }
 0x4a7   : > { %v2178_v12 = vpop.f32.mrf.mxu0 }
 0x4a8   : > { %v8549_v13 = vpop.f32.mrf.mxu1  ;;  %8567 = vmatmul.mubr.msk.f32.vlgmr.msra.gmra.mxu0 %vm2272_vm5, %v2178_v12 }
 0x4a9   : > { %v8525_v16 = vpop.f32.mrf.mxu0  ;;  %8590 = vmatprep.mubr.msk.f32.mxu0 %vm10081_vm0, %v10080_v0 }
 0x4aa   : > { %v7875_v16 = vld [vmem:[%s11563_s13] ss:$0 sm:$0xff]  ;;  %s11574_s13 = sld [smem:[#allocation74_spill]] }
 0x4ab   : > { %v2251_v17 = vpop.f32.mrf.mxu0 }
 0x4ac   : > { %8586 = vmatmul.mubr.msk.f32.vlgmr.msra.gmra.mxu1 %vm2272_vm5, %v2251_v17 }
 0x4ad   : > { %v8530_v18 = vpop.f32.mrf.mxu0  ;;  %8633 = vmatprep.mubr.msk.f32.mxu1 %vm10081_vm0, %v10080_v0  ;;  %8618 = vmatpush3.msra.mxu1 %v2658_v19 }
 0x4ae   : > { %8619 = vmatprep.subr.mxu1 %v10080_v0 }
 0x4af   : > { %8620 = vmatpush3.msra.mxu1 %v2657_v20  ;;  %v10778_v20 = vld [vmem:[%s11561_s8 + $0x8] sm:$0xff] }
 0x4b0   : > { %8621 = vmatprep.subr.mxu1 %v10080_v0 }
 0x4b1   : > { %8622 = vmatpush3.msra.mxu1 %v2656_v21  ;;  %v10780_v21 = vld [vmem:[#allocation9 + $0x38] sm:$0xff] }
 0x4b2   : > { %8623 = vmatprep.subr.mxu1 %v10080_v0 }
 0x4b3   : > { %8624 = vmatpush3.msra.mxu1 %v2655_v22  ;;  %v10782_v22 = vld [vmem:[#allocation9 + $0x30] sm:$0xff] }
 0x4b4   : > { %8625 = vmatprep.subr.mxu1 %v10080_v0 }
 0x4b5   : > { %8626 = vmatpush3.msra.mxu1 %v2654_v23  ;;  %v10788_v23 = vld [vmem:[#allocation9 + $0x28] sm:$0xff] }
 0x4b6   : > { %8627 = vmatprep.subr.mxu1 %v10080_v0 }
 0x4b7   : > { %8628 = vmatpush3.msra.mxu1 %v2653_v24  ;;  %v10792_v24 = vld [vmem:[#allocation9 + $0x20] sm:$0xff] }
 0x4b8   : > { %8629 = vmatprep.subr.mxu1 %v10080_v0 }
 0x4b9   : > { %8630 = vmatpush3.msra.mxu1 %v2652_v25  ;;  %v10796_v25 = vld [vmem:[#allocation9 + $0x18] sm:$0xff] }
 0x4ba   : > { %8631 = vmatprep.subr.mxu1 %v10080_v0 }
 0x4bb   : > { %8632 = vmatpush3.msra.mxu1 %v2651_v26  ;;  %v10800_v26 = vld [vmem:[#allocation9 + $0x10] sm:$0xff] }
 0x4bc   : > { %8655 = vmatprep.subr.mxu1 %v10080_v0 }
 0x568   : > { %v2415_v27 = vpop.f32.mrf.mxu0 }
 0x569   : > { %v2416_v29 = vadd.f32 %v2415_v27, %v2342_v11  ;;  %v7873_v11 = vld [vmem:[%s11562_s28] ss:$0 sm:$0xff]  ;;  %v10804_v27 = vld [vmem:[#allocation9 + $0x8] sm:$0xff]  ;;  %s11573_s28 = sld [smem:[#allocation63_spill]] }
 0x56a   : > { %v8568_v28 = vpop.f32.mrf.mxu0 }
 0x56b   : > { %v10810_v28 = vld [vmem:[#allocation9] sm:$0xff] }
 0x56c   : > { %v2497_v30 = vpop.f32.mrf.mxu1 }
 0x56d   : > { %v2501_v32 = vadd.f32 %v2497_v30, %v2416_v29  ;;  %v3345_v29 = vld [vmem:[%s11564_s7 + $0x78] sm:$0xff] }
 0x56e   : > { %v8587_v33 = vpop.f32.mrf.mxu1 }
 0x56f   : > { %v10715_v34 = vadd.f32 %v7867_v31, %v2501_v32  ;;  %v3344_v32 = vld [vmem:[%s11564_s7 + $0x70] sm:$0xff]  ;;  %v3343_v33 = vld [vmem:[%s11564_s7 + $0x68] sm:$0xff] }
 0x571   : > { %v2510_v35 = vmax.f32 %v10715_v34, 0.0 }
 0x573   : > { %8589 = vmatpush3.msra.mxu0 %v2510_v35 }
 0x574   : > { %8591 = vmatmul.mubr.msk.f32.vlgmr.msra.gmra.mxu0 %vm2108_vm6, %v10667_v55  ;;  %8593 = vmatprep.subr.mxu0 %v10080_v0  ;;  %v2911_v55 = vld [vmem:[%s11560_s10 + $0x30] sm:$0xff] }
 0x575   : > { %8594 = vmatpush3.msra.mxu0 %v2510_v35  ;;  %8595 = vmatprep.mubr.msk.f32.mxu0 %vm10081_vm0, %v10080_v0 }
 0x576   : > { %8598 = vmatprep.subr.mxu0 %v10080_v0 }
 0x578   : > { %8596 = vmatmul.mubr.msk.f32.vlgmr.msra.gmra.mxu0 %vm2108_vm6, %v10675_v58 }
 0x579   : > { %8599 = vmatpush3.msra.mxu0 %v2667_v36  ;;  %8614 = vmatprep.mubr.msk.f32.mxu0 %vm10081_vm0, %v10080_v0  ;;  %v3341_v36 = vld [vmem:[%s11564_s7 + $0x58] sm:$0xff] }
 0x57a   : > { %8600 = vmatprep.subr.mxu0 %v10080_v0 }
 0x57b   : > { %8601 = vmatpush3.msra.mxu0 %v2666_v37  ;;  %v3340_v37 = vld [vmem:[%s11564_s7 + $0x50] sm:$0xff] }
 0x57c   : > { %8602 = vmatprep.subr.mxu0 %v10080_v0 }
 0x57d   : > { %8603 = vmatpush3.msra.mxu0 %v2665_v38  ;;  %v3339_v38 = vld [vmem:[%s11564_s7 + $0x48] sm:$0xff] }
 0x57e   : > { %8604 = vmatprep.subr.mxu0 %v10080_v0 }
 0x57f   : > { %8605 = vmatpush3.msra.mxu0 %v2664_v39  ;;  %v3338_v39 = vld [vmem:[%s11564_s7 + $0x40] sm:$0xff] }
 0x580   : > { %8606 = vmatprep.subr.mxu0 %v10080_v0 }
 0x581   : > { %8607 = vmatpush3.msra.mxu0 %v2663_v40  ;;  %v3337_v40 = vld [vmem:[%s11564_s7 + $0x38] sm:$0xff] }
 0x582   : > { %8608 = vmatprep.subr.mxu0 %v10080_v0 }
 0x583   : > { %8609 = vmatpush3.msra.mxu0 %v2662_v41  ;;  %v3336_v41 = vld [vmem:[%s11564_s7 + $0x30] sm:$0xff] }
 0x584   : > { %8610 = vmatprep.subr.mxu0 %v10080_v0 }
 0x585   : > { %8611 = vmatpush3.msra.mxu0 %v2661_v42  ;;  %v3335_v42 = vld [vmem:[%s11564_s7 + $0x28] sm:$0xff] }
 0x586   : > { %8612 = vmatprep.subr.mxu0 %v10080_v0 }
 0x587   : > { %8613 = vmatpush3.msra.mxu0 %v2660_v43  ;;  %v3334_v43 = vld [vmem:[%s11564_s7 + $0x20] sm:$0xff] }
 0x588   : > { %8615 = vmatmul.mubr.msk.f32.vlgmr.msra.gmra.mxu0 %vm2272_vm5, %v2510_v35  ;;  %8636 = vmatprep.subr.mxu0 %v10080_v0  ;;  %v3342_v35 = vld [vmem:[%s11564_s7 + $0x60] sm:$0xff] }
 0x589   : > { %8637 = vmatpush3.msra.mxu0 %v2822_v44  ;;  %8652 = vmatprep.mubr.msk.f32.mxu0 %vm10081_vm0, %v10080_v0  ;;  %v3333_v44 = vld [vmem:[%s11564_s7 + $0x18] sm:$0xff] }
 0x58a   : > { %8638 = vmatprep.subr.mxu0 %v10080_v0 }
 0x58b   : > { %8639 = vmatpush3.msra.mxu0 %v2821_v45  ;;  %v3332_v45 = vld [vmem:[%s11564_s7 + $0x10] sm:$0xff] }
 0x58c   : > { %8640 = vmatprep.subr.mxu0 %v10080_v0 }
 0x58d   : > { %8641 = vmatpush3.msra.mxu0 %v2820_v46  ;;  %v3331_v46 = vld [vmem:[%s11564_s7 + $0x8] sm:$0xff] }
 0x58e   : > { %8642 = vmatprep.subr.mxu0 %v10080_v0 }
 0x58f   : > { %8643 = vmatpush3.msra.mxu0 %v2819_v47  ;;  %v3330_v47 = vld [vmem:[%s11564_s7] sm:$0xff] }
 0x590   : > { %8644 = vmatprep.subr.mxu0 %v10080_v0 }
 0x591   : > { %8645 = vmatpush3.msra.mxu0 %v2818_v48  ;;  %v10833_v48 = vld [vmem:[#allocation16] sm:$0xff] }
 0x592   : > { %8646 = vmatprep.subr.mxu0 %v10080_v0 }
 0x593   : > { %8647 = vmatpush3.msra.mxu0 %v2817_v49 }
 0x594   : > { %8648 = vmatprep.subr.mxu0 %v10080_v0 }
 0x595   : > { %8649 = vmatpush3.msra.mxu0 %v2816_v50 }
 0x596   : > { %8650 = vmatprep.subr.mxu0 %v10080_v0 }
 0x597   : > { %8651 = vmatpush3.msra.mxu0 %v2815_v51  ;;  %v10841_v51 = vld [vmem:[#allocation16 + $0x8] sm:$0xff] }
 0x634   : > { %v2577_v54 = vpop.f32.mrf.mxu0 }
 0x635   : > { %8634 = vmatmul.mubr.msk.f32.vlgmr.msra.gmra.mxu1 %vm2272_vm5, %v2577_v54  ;;  %v10851_v54 = vld [vmem:[#allocation18 + $0x8] sm:$0xff] }
 0x636   : > { %8656 = vmatpush3.msra.mxu1 %v2912_v52  ;;  %v8592_v56 = vpop.f32.mrf.mxu0  ;;  %8671 = vmatprep.mubr.msk.f32.mxu1 %vm10081_vm0, %v10080_v0  ;;  %v10843_v52 = vld [vmem:[#allocation18] sm:$0xff] }
 0x637   : > { %8657 = vmatprep.subr.mxu1 %v10080_v0  ;;  %v7898_v56 = vld [vmem:[%s11564_s7 + $0xf0] sm:$0xff] }
 0x638   : > { %8658 = vmatpush3.msra.mxu1 %v2911_v55  ;;  %v2647_v58 = vpop.f32.mrf.mxu0  ;;  %v7899_v55 = vld [vmem:[%s11564_s7 + $0xf8] sm:$0xff] }
 0x639   : > { %8659 = vmatprep.subr.mxu1 %v10080_v0  ;;  %8653 = vmatmul.mubr.msk.f32.vlgmr.msra.gmra.mxu0 %vm2272_vm5, %v2647_v58  ;;  %v7896_v58 = vld [vmem:[%s11564_s7 + $0xe0] sm:$0xff] }
 0x63a   : > { %8660 = vmatpush3.msra.mxu1 %v2910_v57  ;;  %v8597_v60 = vpop.f32.mrf.mxu0  ;;  %8676 = vmatprep.mubr.msk.f32.mxu0 %vm2108_vm6, %v10768_v4  ;;  %v7897_v57 = vld [vmem:[%s11564_s7 + $0xe8] sm:$0xff] }
 0x63b   : > { %8661 = vmatprep.subr.mxu1 %v10080_v0  ;;  %v7894_v60 = vld [vmem:[%s11564_s7 + $0xd0] sm:$0xff] }
 0x63c   : > { %8662 = vmatpush3.msra.mxu1 %v2909_v59  ;;  %v7895_v59 = vld [vmem:[%s11564_s7 + $0xd8] sm:$0xff] }
 0x63d   : > { %8663 = vmatprep.subr.mxu1 %v10080_v0 }
 0x63e   : > { %8664 = vmatpush3.msra.mxu1 %v2908_v61  ;;  %v7893_v61 = vld [vmem:[%s11564_s7 + $0xc8] sm:$0xff] }
 0x63f   : > { %8665 = vmatprep.subr.mxu1 %v10080_v0 }
 0x640   : > { %8666 = vmatpush3.msra.mxu1 %v2907_v62  ;;  %v7892_v62 = vld [vmem:[%s11564_s7 + $0xc0] sm:$0xff] }
 0x641   : > { %8667 = vmatprep.subr.mxu1 %v10080_v0 }
 0x642   : > { %8668 = vmatpush3.msra.mxu1 %v2906_v63  ;;  %v7891_v63 = vld [vmem:[%s11564_s7 + $0xb8] sm:$0xff] }
 0x643   : > { %8669 = vmatprep.subr.mxu1 %v10080_v0 }
 0x644   : > { %8670 = vmatpush3.msra.mxu1 %v2905_v1  ;;  %v7890_v1 = vld [vmem:[%s11564_s7 + $0xb0] sm:$0xff] }
 0x645   : > { %8672 = vmatmul.mubr.msk.f32.vlgmr.msra.gmra.mxu1 %vm2272_vm5, %v10664_v53 }
 0x646   : > { %8702 = vmatprep.mubr.msk.f32.mxu1 %vm1613_vm1, %v10833_v48 }
 0x648   : > { %v2737_v2 = vpop.f32.mrf.mxu0 }
 0x64a   : > { %v8616_v3 = vpop.f32.mrf.mxu0 }
 0x64b   : > { %v7888_v3 = vld [vmem:[%s11564_s7 + $0xa0] sm:$0xff] }
 0x6f5   : > { %v2810_v5 = vpop.f32.mrf.mxu1 }
 0x6f6   : > { %v2811_v9 = vadd.f32 %v2810_v5, %v2737_v2  ;;  %v7889_v2 = vld [vmem:[%s11564_s7 + $0xa8] sm:$0xff]  ;;  %v7887_v5 = vld [vmem:[%s11564_s7 + $0x98] sm:$0xff] }
 0x6f7   : > { %v8635_v6 = vpop.f32.mrf.mxu1 }
 0x6f8   : > { %v7886_v6 = vld [vmem:[%s11564_s7 + $0x90] sm:$0xff] }
 0x6f9   : > { %v2892_v7 = vpop.f32.mrf.mxu0 }
 0x6fa   : > { %v2896_v10 = vadd.f32 %v2892_v7, %v2811_v9  ;;  %v7885_v7 = vld [vmem:[%s11564_s7 + $0x88] sm:$0xff]  ;;  %v7915_v9 = vld [vmem:[%s11564_s7 + $0x178] sm:$0xff] }
 0x6fb   : > { %v8654_v8 = vpop.f32.mrf.mxu0 }
 0x6fc   : > { %v2904_v12 = vadd.f32 %v7873_v11, %v2896_v10  ;;  %v7884_v8 = vld [vmem:[%s11564_s7 + $0x80] sm:$0xff]  ;;  %v7914_v10 = vld [vmem:[%s11564_s7 + $0x170] sm:$0xff]  ;;  %v7913_v11 = vld [vmem:[%s11564_s7 + $0x168] sm:$0xff] }
 0x705   : > { %v2982_v13 = vpop.f32.mrf.mxu1 }
 0x706   : > { %v2986_v17 = vadd.f32 %v2982_v13, %v2904_v12  ;;  %v7912_v12 = vld [vmem:[%s11564_s7 + $0x160] sm:$0xff]  ;;  %v7911_v13 = vld [vmem:[%s11564_s7 + $0x158] sm:$0xff] }
 0x707   : > { %v8673_v53 = vpop.f32.mrf.mxu1 }
 0x708   : > { %v10774_v18 = vadd.f32 %v7875_v16, %v2986_v17  ;;  %v7910_v16 = vld [vmem:[%s11564_s7 + $0x150] sm:$0xff]  ;;  %v7909_v17 = vld [vmem:[%s11564_s7 + $0x148] sm:$0xff]  ;;  %v7908_v53 = vld [vmem:[%s11564_s7 + $0x140] sm:$0xff] }
 0x70a   : > { %v2995_v19 = vmax.f32 %v10774_v18, 0.0 }
 0x70c   : > { %8674 = vmatprep.subr.mxu0 %v2995_v19 }
 0x70d   : > { %8675 = vmatpush3.msra.mxu0 %v2995_v19  ;;  %v7907_v19 = vld [vmem:[%s11564_s7 + $0x138] sm:$0xff] }
 0x70e   : > { %8677 = vmatmul.mubr.msk.f32.vlgmr.msra.gmra.mxu0 %vm2108_vm6, %v10778_v20  ;;  %8679 = vmatprep.subr.mxu0 %v10780_v21 }
 0x70f   : > { %8680 = vmatpush3.msra.mxu0 %v10780_v21 }
 0x710   : > { %8681 = vmatprep.subr.mxu0 %v10782_v22 }
 0x711   : > { %8682 = vmatpush3.msra.mxu0 %v10782_v22 }
 0x712   : > { %8683 = vmatprep.subr.mxu0 %v10788_v23 }
 0x713   : > { %8684 = vmatpush3.msra.mxu0 %v10788_v23 }
 0x714   : > { %8685 = vmatprep.subr.mxu0 %v10792_v24 }
 0x715   : > { %8686 = vmatpush3.msra.mxu0 %v10792_v24 }
 0x716   : > { %8687 = vmatprep.subr.mxu0 %v10796_v25 }
 0x717   : > { %8688 = vmatpush3.msra.mxu0 %v10796_v25 }
 0x718   : > { %8689 = vmatprep.subr.mxu0 %v10800_v26 }
 0x719   : > { %8690 = vmatpush3.msra.mxu0 %v10800_v26 }
 0x71a   : > { %8691 = vmatprep.subr.mxu0 %v10804_v27 }
 0x71b   : > { %8692 = vmatpush3.msra.mxu0 %v10804_v27 }
 0x71c   : > { %8693 = vmatprep.subr.mxu0 %v10810_v28 }
 0x71d   : > { %8694 = vmatpush3.msra.mxu0 %v10810_v28 }
 0x71e   : > { %8747 = vmatprep.subr.mxu0 %v3345_v29 }
 0x7ce   : > { %v8678_v30 = vpop.f32.mrf.mxu0 }
 0x7d0   : > { %v3070_v31 = vpop.f32.mrf.mxu0 }
 0x7d1   : > { %8695 = vmatprep.mubr.msk.f32.mxu0 %vm2272_vm5, %v3070_v31  ;;  %v7904_v31 = vld [vmem:[%s11564_s7 + $0x120] sm:$0xff] }
 0x7d2   : > { %8696 = vmatmul.mubr.msk.f32.vlgmr.msra.gmra.mxu0 %vm2272_vm5, %v8678_v30  ;;  %v7905_v30 = vld [vmem:[%s11564_s7 + $0x128] sm:$0xff] }
 0x7d3   : > { %8748 = vmatpush3.msra.mxu0 %v3345_v29  ;;  %v7906_v29 = vld [vmem:[%s11564_s7 + $0x130] sm:$0xff] }
 0x7d4   : > { %8749 = vmatprep.subr.mxu0 %v3344_v32 }
 0x7d5   : > { %8750 = vmatpush3.msra.mxu0 %v3344_v32  ;;  %v7903_v32 = vld [vmem:[%s11564_s7 + $0x118] sm:$0xff] }
 0x7d6   : > { %8751 = vmatprep.subr.mxu0 %v3343_v33 }
 0x7d7   : > { %8752 = vmatpush3.msra.mxu0 %v3343_v33  ;;  %v7902_v33 = vld [vmem:[%s11564_s7 + $0x110] sm:$0xff] }
 0x7d8   : > { %8753 = vmatprep.subr.mxu0 %v3342_v35 }
 0x7d9   : > { %8754 = vmatpush3.msra.mxu0 %v3342_v35  ;;  %v7901_v35 = vld [vmem:[%s11564_s7 + $0x108] sm:$0xff] }
 0x7da   : > { %8755 = vmatprep.subr.mxu0 %v3341_v36 }
 0x7db   : > { %8756 = vmatpush3.msra.mxu0 %v3341_v36  ;;  %v7900_v36 = vld [vmem:[%s11564_s7 + $0x100] sm:$0xff] }
 0x7dc   : > { %8757 = vmatprep.subr.mxu0 %v3340_v37 }
 0x7dd   : > { %8758 = vmatpush3.msra.mxu0 %v3340_v37 }
 0x7de   : > { %8759 = vmatprep.subr.mxu0 %v3339_v38 }
 0x7df   : > { %8760 = vmatpush3.msra.mxu0 %v3339_v38 }
 0x7e0   : > { %8761 = vmatprep.subr.mxu0 %v3338_v39 }
 0x7e1   : > { %8762 = vmatpush3.msra.mxu0 %v3338_v39 }
 0x7e2   : > { %8763 = vmatprep.subr.mxu0 %v3337_v40 }
 0x7e3   : > { %8764 = vmatpush3.msra.mxu0 %v3337_v40 }
 0x7e4   : > { %8765 = vmatprep.subr.mxu0 %v3336_v41 }
 0x7e5   : > { %8766 = vmatpush3.msra.mxu0 %v3336_v41  ;;  %v3787_v41 = vld [vmem:[#allocation31 + $0x78] sm:$0xff] }
 0x7e6   : > { %8767 = vmatprep.subr.mxu0 %v3335_v42 }
 0x7e7   : > { %8768 = vmatpush3.msra.mxu0 %v3335_v42 }
 0x7e8   : > { %8769 = vmatprep.subr.mxu0 %v3334_v43 }
 0x7e9   : > { %8770 = vmatpush3.msra.mxu0 %v3334_v43 }
 0x7ea   : > { %8771 = vmatprep.subr.mxu0 %v3333_v44 }
 0x7eb   : > { %8772 = vmatpush3.msra.mxu0 %v3333_v44 }
 0x7ec   : > { %8773 = vmatprep.subr.mxu0 %v3332_v45 }
 0x7ed   : > { %8774 = vmatpush3.msra.mxu0 %v3332_v45 }
 0x7ee   : > { %8775 = vmatprep.subr.mxu0 %v3331_v46 }
 0x7ef   : > { %8776 = vmatpush3.msra.mxu0 %v3331_v46  ;;  %v3786_v46 = vld [vmem:[#allocation31 + $0x70] sm:$0xff] }
 0x7f0   : > { %8777 = vmatprep.subr.mxu0 %v3330_v47 }
 0x7f1   : > { %8778 = vmatpush3.msra.mxu0 %v3330_v47  ;;  %v3785_v47 = vld [vmem:[#allocation31 + $0x68] sm:$0xff] }
 0x7f2   : > { %8817 = vmatprep.subr.mxu0 %v10715_v34 }
 0x892   : > { %v10837_v49 = vpop.f32.mrf.mxu0 }
 0x893   : > { %8698 = vmatprep.subr.mxu1 %v10837_v49 }
 0x894   : > { %v3159_v50 = vpop.f32.mrf.mxu0  ;;  %8699 = vmatpush3.msra.mxu1 %v10837_v49 }
 0x895   : > { %8700 = vmatprep.subr.mxu1 %v3159_v50 }
 0x896   : > { %8701 = vmatpush3.msra.mxu1 %v3159_v50 }
 0x897   : > { %8703 = vmatmul.mubr.msk.f32.vlgmr.msra.gmra.mxu1 %vm1613_vm1, %v10841_v51  ;;  %8705 = vmatprep.subr.mxu1 %v10837_v49 }
 0x898   : > { %8706 = vmatpush3.msra.mxu1 %v10837_v49  ;;  %8709 = vmatprep.mubr.msk.f32.mxu1 %vm1613_vm1, %v10843_v52 }
 0x899   : > { %8707 = vmatprep.subr.mxu1 %v3159_v50 }
 0x89a   : > { %8708 = vmatpush3.msra.mxu1 %v3159_v50 }
 0x89b   : > { %8710 = vmatmul.mubr.msk.f32.vlgmr.msra.gmra.mxu1 %vm1613_vm1, %v10851_v54  ;;  %8712 = vmatprep.subr.mxu1 %v7899_v55 }
 0x89c   : > { %8713 = vmatpush3.msra.mxu1 %v7899_v55  ;;  %8744 = vmatprep.mubr.f32.mxu1 %v3159_v50  ;;  %v3782_v50 = vld [vmem:[#allocation31 + $0x50] sm:$0xff]  ;;  %v3781_v55 = vld [vmem:[#allocation31 + $0x48] sm:$0xff] }
 0x89d   : > { %8714 = vmatprep.subr.mxu1 %v7898_v56 }
 0x89e   : > { %8715 = vmatpush3.msra.mxu1 %v7898_v56  ;;  %v3780_v56 = vld [vmem:[#allocation31 + $0x40] sm:$0xff] }
 0x89f   : > { %8716 = vmatprep.subr.mxu1 %v7897_v57 }
 0x8a0   : > { %8717 = vmatpush3.msra.mxu1 %v7897_v57  ;;  %v3779_v57 = vld [vmem:[#allocation31 + $0x38] sm:$0xff] }
 0x8a1   : > { %8718 = vmatprep.subr.mxu1 %v7896_v58 }
 0x8a2   : > { %8719 = vmatpush3.msra.mxu1 %v7896_v58  ;;  %v3778_v58 = vld [vmem:[#allocation31 + $0x30] sm:$0xff] }
 0x8a3   : > { %8720 = vmatprep.subr.mxu1 %v7895_v59 }
 0x8a4   : > { %8721 = vmatpush3.msra.mxu1 %v7895_v59  ;;  %v3777_v59 = vld [vmem:[#allocation31 + $0x28] sm:$0xff] }
 0x8a5   : > { %8722 = vmatprep.subr.mxu1 %v7894_v60 }
 0x8a6   : > { %8723 = vmatpush3.msra.mxu1 %v7894_v60  ;;  %v3776_v60 = vld [vmem:[#allocation31 + $0x20] sm:$0xff] }
 0x8a7   : > { %8724 = vmatprep.subr.mxu1 %v7893_v61 }
 0x8a8   : > { %8725 = vmatpush3.msra.mxu1 %v7893_v61  ;;  %v3775_v61 = vld [vmem:[#allocation31 + $0x18] sm:$0xff] }
 0x8a9   : > { %8726 = vmatprep.subr.mxu1 %v7892_v62 }
 0x8aa   : > { %8727 = vmatpush3.msra.mxu1 %v7892_v62  ;;  %v3774_v62 = vld [vmem:[#allocation31 + $0x10] sm:$0xff] }
 0x8ab   : > { %8728 = vmatprep.subr.mxu1 %v7891_v63 }
 0x8ac   : > { %8729 = vmatpush3.msra.mxu1 %v7891_v63  ;;  %v3773_v63 = vld [vmem:[#allocation31 + $0x8] sm:$0xff] }
 0x8ad   : > { %8730 = vmatprep.subr.mxu1 %v7890_v1 }
 0x8ae   : > { %8731 = vmatpush3.msra.mxu1 %v7890_v1  ;;  %v3772_v1 = vld [vmem:[#allocation31] sm:$0xff] }
 0x8af   : > { %8732 = vmatprep.subr.mxu1 %v7889_v2 }
 0x8b0   : > { %8733 = vmatpush3.msra.mxu1 %v7889_v2  ;;  %v4041_v2 = vld [vmem:[#allocation25 + $0x78] sm:$0xff] }
 0x8b1   : > { %8734 = vmatprep.subr.mxu1 %v7888_v3 }
 0x8b2   : > { %8735 = vmatpush3.msra.mxu1 %v7888_v3 }
 0x8b3   : > { %8736 = vmatprep.subr.mxu1 %v7887_v5 }
 0x8b4   : > { %8737 = vmatpush3.msra.mxu1 %v7887_v5 }
 0x8b5   : > { %8738 = vmatprep.subr.mxu1 %v7886_v6 }
 0x8b6   : > { %8739 = vmatpush3.msra.mxu1 %v7886_v6  ;;  %v4040_v6 = vld [vmem:[#allocation25 + $0x70] sm:$0xff] }
 0x8b7   : > { %8740 = vmatprep.subr.mxu1 %v7885_v7 }
 0x8b8   : > { %8741 = vmatpush3.msra.mxu1 %v7885_v7  ;;  %v4039_v7 = vld [vmem:[#allocation25 + $0x68] sm:$0xff] }
 0x8b9   : > { %8742 = vmatprep.subr.mxu1 %v7884_v8 }
 0x8ba   : > { %8743 = vmatpush3.msra.mxu1 %v7884_v8  ;;  %v4038_v8 = vld [vmem:[#allocation25 + $0x60] sm:$0xff] }
 0x8bb   : > { %8745 = vmatmul.mubr.f32.vlgmr.msra.gmra.mxu1 %v10837_v49  ;;  %8782 = vmatprep.subr.mxu1 %v7915_v9  ;;  %v3783_v49 = vld [vmem:[#allocation31 + $0x58] sm:$0xff] }
 0x8bc   : > { %8783 = vmatpush3.msra.mxu1 %v7915_v9  ;;  %v4037_v9 = vld [vmem:[#allocation25 + $0x58] sm:$0xff] }
 0x8bd   : > { %8784 = vmatprep.subr.mxu1 %v7914_v10 }
 0x8be   : > { %8785 = vmatpush3.msra.mxu1 %v7914_v10  ;;  %v4036_v10 = vld [vmem:[#allocation25 + $0x50] sm:$0xff] }
 0x8bf   : > { %8786 = vmatprep.subr.mxu1 %v7913_v11 }
 0x8c0   : > { %8787 = vmatpush3.msra.mxu1 %v7913_v11  ;;  %v4035_v11 = vld [vmem:[#allocation25 + $0x48] sm:$0xff] }
 0x8c1   : > { %8788 = vmatprep.subr.mxu1 %v7912_v12 }
 0x8c2   : > { %8789 = vmatpush3.msra.mxu1 %v7912_v12  ;;  %v4034_v12 = vld [vmem:[#allocation25 + $0x40] sm:$0xff] }
 0x8c3   : > { %8790 = vmatprep.subr.mxu1 %v7911_v13 }
 0x8c4   : > { %8791 = vmatpush3.msra.mxu1 %v7911_v13  ;;  %v4033_v13 = vld [vmem:[#allocation25 + $0x38] sm:$0xff] }
 0x8c5   : > { %8792 = vmatprep.subr.mxu1 %v7910_v16 }
 0x8c6   : > { %8793 = vmatpush3.msra.mxu1 %v7910_v16  ;;  %v4032_v16 = vld [vmem:[#allocation25 + $0x30] sm:$0xff] }
 0x8c7   : > { %8794 = vmatprep.subr.mxu1 %v7909_v17 }
 0x8c8   : > { %8795 = vmatpush3.msra.mxu1 %v7909_v17  ;;  %v4031_v17 = vld [vmem:[#allocation25 + $0x28] sm:$0xff] }
 0x8c9   : > { %8796 = vmatprep.subr.mxu1 %v7908_v53 }
 0x8ca   : > { %8797 = vmatpush3.msra.mxu1 %v7908_v53  ;;  %v4030_v53 = vld [vmem:[#allocation25 + $0x20] sm:$0xff] }
 0x8cb   : > { %8798 = vmatprep.subr.mxu1 %v7907_v19 }
 0x8cc   : > { %8799 = vmatpush3.msra.mxu1 %v7907_v19  ;;  %v4029_v19 = vld [vmem:[#allocation25 + $0x18] sm:$0xff] }
 0x8cd   : > { %8800 = vmatprep.subr.mxu1 %v7906_v29 }
 0x8ce   : > { %8801 = vmatpush3.msra.mxu1 %v7906_v29  ;;  %v4028_v29 = vld [vmem:[#allocation25 + $0x10] sm:$0xff] }
 0x8cf   : > { %8802 = vmatprep.subr.mxu1 %v7905_v30 }
 0x8d0   : > { %8803 = vmatpush3.msra.mxu1 %v7905_v30  ;;  %v4027_v30 = vld [vmem:[#allocation25 + $0x8] sm:$0xff] }
 0x8d1   : > { %8804 = vmatprep.subr.mxu1 %v7904_v31 }
 0x8d2   : > { %8805 = vmatpush3.msra.mxu1 %v7904_v31  ;;  %v4026_v31 = vld [vmem:[#allocation25] sm:$0xff] }
 0x8d3   : > { %8806 = vmatprep.subr.mxu1 %v7903_v32 }
 0x8d4   : > { %8807 = vmatpush3.msra.mxu1 %v7903_v32 }
 0x8d5   : > { %8808 = vmatprep.subr.mxu1 %v7902_v33 }
 0x8d6   : > { %8809 = vmatpush3.msra.mxu1 %v7902_v33 }
 0x8d7   : > { %8810 = vmatprep.subr.mxu1 %v7901_v35 }
 0x8d8   : > { %8811 = vmatpush3.msra.mxu1 %v7901_v35 }
 0x8d9   : > { %8812 = vmatprep.subr.mxu1 %v7900_v36 }
 0x8da   : > { %8813 = vmatpush3.msra.mxu1 %v7900_v36 }
 0x957   : > { %v8704_v37 = vpop.f32.mrf.mxu1 }
 0x959   : > { %v3240_v38 = vpop.f32.mrf.mxu1 }
 0x95a   : > { %8779 = vmatprep.mubr.f32.mxu0 %v3240_v38 }
 0x95b   : > { %v8711_v39 = vpop.f32.mrf.mxu1  ;;  %8780 = vmatmul.mubr.f32.vlgmr.msra.gmra.mxu0 %v8704_v37 }
 0x95c   : > { %8818 = vmatpush3.msra.mxu0 %v10715_v34  ;;  %8819 = vmatprep.mubr.msk.f32.mxu0 %vm2108_vm6, %v10768_v4 }
 0x95d   : > { %v3321_v40 = vpop.f32.mrf.mxu1  ;;  %8822 = vmatprep.subr.mxu0 %v10780_v21 }
 0x95e   : > { %8814 = vmatprep.mubr.f32.mxu1 %v3321_v40  ;;  %v7916_v40 = vld [vmem:[%s11565_s3] ss:$0 sm:$0xff]  ;;  %s11575_s3 = sld [smem:[#allocation65_spill]] }
 0x95f   : > { %8815 = vmatmul.mubr.f32.vlgmr.msra.gmra.mxu1 %v8711_v39  ;;  %8820 = vmatmul.mubr.msk.f32.vlgmr.msra.gmra.mxu0 %vm2108_vm6, %v10778_v20 }
 0x960   : > { %8823 = vmatpush3.msra.mxu0 %v10780_v21  ;;  %8880 = vmatprep.mubr.msk.f32.mxu1 %vm1613_vm1, %v10833_v48  ;;  %v3784_v48 = vld [vmem:[#allocation31 + $0x60] sm:$0xff] }
 0x961   : > { %8824 = vmatprep.subr.mxu0 %v10782_v22 }
 0x962   : > { %8825 = vmatpush3.msra.mxu0 %v10782_v22 }
 0x963   : > { %8826 = vmatprep.subr.mxu0 %v10788_v23 }
 0x964   : > { %8827 = vmatpush3.msra.mxu0 %v10788_v23 }
 0x965   : > { %8828 = vmatprep.subr.mxu0 %v10792_v24 }
 0x966   : > { %8829 = vmatpush3.msra.mxu0 %v10792_v24 }
 0x967   : > { %8830 = vmatprep.subr.mxu0 %v10796_v25 }
 0x968   : > { %8831 = vmatpush3.msra.mxu0 %v10796_v25 }
 0x969   : > { %8832 = vmatprep.subr.mxu0 %v10800_v26 }
 0x96a   : > { %8833 = vmatpush3.msra.mxu0 %v10800_v26 }
 0x96b   : > { %8834 = vmatprep.subr.mxu0 %v10804_v27 }
 0x96c   : > { %8835 = vmatpush3.msra.mxu0 %v10804_v27 }
 0x96d   : > { %8836 = vmatprep.subr.mxu0 %v10810_v28 }
 0x96e   : > { %8837 = vmatpush3.msra.mxu0 %v10810_v28 }
 0x96f   : > { %8841 = vmatprep.subr.mxu0 %v3787_v41 }
 0x97b   : > { %v8746_v32 = vpop.f32.mrf.mxu1 }
 0x97d   : > { %v3429_v33 = vpop.f32.mrf.mxu1 }
 0xa1b   : > { %v10911_v42 = vpop.f32.mrf.mxu0 }
 0xa1c   : > { %v3510_v36 = vadd.f32 %v10911_v42, %v8746_v32  ;;  %v4212_v32 = vld [vmem:[#allocation25 + $0x110] sm:$0xff] }
 0xa1d   : > { %v10913_v43 = vpop.f32.mrf.mxu0 }
 0xa1e   : > { %v3505_v38 = vadd.f32 %v10913_v43, %v3429_v33  ;;  %v4058_v43 = vld [vmem:[#allocation25 + $0xf8] sm:$0xff]  ;;  %v4211_v33 = vld [vmem:[#allocation25 + $0x108] sm:$0xff] }
 0xa1f   : > { %v8821_v44 = vpop.f32.mrf.mxu0  ;;  %v8816_v35 = vpop.f32.mrf.mxu1 }
 0xa20   : > { %v3606_v39 = vadd.f32 %v8816_v35, %v3510_v36  ;;  %v4210_v35 = vld [vmem:[#allocation25 + $0x100] sm:$0xff] }
 0xa21   : > { %v3682_v45 = vpop.f32.mrf.mxu0  ;;  %v3596_v37 = vpop.f32.mrf.mxu1 }
 0xa22   : > { %8838 = vmatprep.mubr.msk.f32.mxu0 %vm2272_vm5, %v3682_v45 }
 0xa23   : > { %8839 = vmatmul.mubr.msk.f32.vlgmr.msra.gmra.mxu0 %vm2272_vm5, %v8821_v44  ;;  %v10921_v44 = vadd.f32 %v7916_v40, %v3606_v39 }
 0xa24   : > { %8842 = vmatpush3.msra.mxu0 %v3787_v41  ;;  %v3605_v41 = vadd.f32 %v3596_v37, %v3505_v38 }
 0xa25   : > { %8843 = vmatprep.subr.mxu0 %v3786_v46 }
 0xa26   : > { %8844 = vmatpush3.msra.mxu0 %v3786_v46  ;;  %v7921_v46 = vld [vmem:[%s11566_s22] ss:$0 sm:$0xff]  ;;  %s11576_s22 = sld [smem:[#allocation64_spill]] }
 0xa27   : > { %8845 = vmatprep.subr.mxu0 %v3785_v47 }
 0xa28   : > { %8846 = vmatpush3.msra.mxu0 %v3785_v47  ;;  %v10924_v47 = vadd.f32 %v7916_v40, %v3605_v41  ;;  %v4472_v40 = vld [vmem:[#allocation30 + $0x20] sm:$0xff]  ;;  %v4471_v41 = vld [vmem:[#allocation30 + $0x18] sm:$0xff] }
 0xa29   : > { %8847 = vmatprep.subr.mxu0 %v3784_v48 }
 0xa2a   : > { %8848 = vmatpush3.msra.mxu0 %v3784_v48 }
 0xa2b   : > { %8849 = vmatprep.subr.mxu0 %v3783_v49 }
 0xa2c   : > { %8850 = vmatpush3.msra.mxu0 %v3783_v49 }
 0xa2d   : > { %8851 = vmatprep.subr.mxu0 %v3782_v50 }
 0xa2e   : > { %8852 = vmatpush3.msra.mxu0 %v3782_v50 }
 0xa2f   : > { %8853 = vmatprep.subr.mxu0 %v3781_v55 }
 0xa30   : > { %8854 = vmatpush3.msra.mxu0 %v3781_v55 }
 0xa31   : > { %8855 = vmatprep.subr.mxu0 %v3780_v56 }
 0xa32   : > { %8856 = vmatpush3.msra.mxu0 %v3780_v56 }
 0xa33   : > { %8857 = vmatprep.subr.mxu0 %v3779_v57 }
 0xa34   : > { %8858 = vmatpush3.msra.mxu0 %v3779_v57 }
 0xa35   : > { %8859 = vmatprep.subr.mxu0 %v3778_v58 }
 0xa36   : > { %8860 = vmatpush3.msra.mxu0 %v3778_v58  ;;  %v4057_v58 = vld [vmem:[#allocation25 + $0xf0] sm:$0xff] }
 0xa37   : > { %8861 = vmatprep.subr.mxu0 %v3777_v59 }
 0xa38   : > { %8862 = vmatpush3.msra.mxu0 %v3777_v59  ;;  %v4056_v59 = vld [vmem:[#allocation25 + $0xe8] sm:$0xff] }
 0xa39   : > { %8863 = vmatprep.subr.mxu0 %v3776_v60 }
 0xa3a   : > { %8864 = vmatpush3.msra.mxu0 %v3776_v60  ;;  %v4054_v60 = vld [vmem:[#allocation25 + $0xd8] sm:$0xff] }
 0xa3b   : > { %8865 = vmatprep.subr.mxu0 %v3775_v61 }
 0xa3c   : > { %8866 = vmatpush3.msra.mxu0 %v3775_v61  ;;  %v4052_v61 = vld [vmem:[#allocation25 + $0xc8] sm:$0xff] }
 0xa3d   : > { %8867 = vmatprep.subr.mxu0 %v3774_v62 }
 0xa3e   : > { %8868 = vmatpush3.msra.mxu0 %v3774_v62  ;;  %v4051_v62 = vld [vmem:[#allocation25 + $0xc0] sm:$0xff] }
 0xa3f   : > { %8869 = vmatprep.subr.mxu0 %v3773_v63 }
 0xa40   : > { %8870 = vmatpush3.msra.mxu0 %v3773_v63  ;;  %v4049_v63 = vld [vmem:[#allocation25 + $0xb0] sm:$0xff] }
 0xa41   : > { %8871 = vmatprep.subr.mxu0 %v3772_v1 }
 0xa42   : > { %8872 = vmatpush3.msra.mxu0 %v3772_v1  ;;  %v4048_v1 = vld [vmem:[#allocation25 + $0xa8] sm:$0xff] }
 0xa43   : > { %8925 = vmatprep.subr.mxu0 %v4041_v2 }
 0xae3   : > { %v8840_v3 = vpop.f32.mrf.mxu0 }
 0xae5   : > { %v3763_v5 = vpop.f32.mrf.mxu0 }
 0xae6   : > { %8873 = vmatprep.mubr.f32.mxu0 %v3763_v5  ;;  %v4045_v5 = vld [vmem:[#allocation25 + $0x90] sm:$0xff] }
 0xae7   : > { %8874 = vmatmul.mubr.f32.vlgmr.msra.gmra.mxu0 %v8840_v3  ;;  %v4046_v3 = vld [vmem:[#allocation25 + $0x98] sm:$0xff] }
 0xae8   : > { %8926 = vmatpush3.msra.mxu0 %v4041_v2  ;;  %v4047_v2 = vld [vmem:[#allocation25 + $0xa0] sm:$0xff] }
 0xae9   : > { %8927 = vmatprep.subr.mxu0 %v4040_v6 }
 0xaea   : > { %8928 = vmatpush3.msra.mxu0 %v4040_v6  ;;  %v4044_v6 = vld [vmem:[#allocation25 + $0x88] sm:$0xff] }
 0xaeb   : > { %8929 = vmatprep.subr.mxu0 %v4039_v7 }
 0xaec   : > { %8930 = vmatpush3.msra.mxu0 %v4039_v7  ;;  %v4043_v7 = vld [vmem:[#allocation25 + $0x80] sm:$0xff] }
 0xaed   : > { %8931 = vmatprep.subr.mxu0 %v4038_v8 }
 0xaee   : > { %8932 = vmatpush3.msra.mxu0 %v4038_v8  ;;  %v4225_v8 = vld [vmem:[#allocation25 + $0x178] sm:$0xff] }
 0xaef   : > { %8933 = vmatprep.subr.mxu0 %v4037_v9 }
 0xaf0   : > { %8934 = vmatpush3.msra.mxu0 %v4037_v9  ;;  %v4224_v9 = vld [vmem:[#allocation25 + $0x170] sm:$0xff] }
 0xaf1   : > { %8935 = vmatprep.subr.mxu0 %v4036_v10 }
 0xaf2   : > { %8936 = vmatpush3.msra.mxu0 %v4036_v10  ;;  %v4223_v10 = vld [vmem:[#allocation25 + $0x168] sm:$0xff] }
 0xaf3   : > { %8937 = vmatprep.subr.mxu0 %v4035_v11 }
 0xaf4   : > { %8938 = vmatpush3.msra.mxu0 %v4035_v11  ;;  %v4222_v11 = vld [vmem:[#allocation25 + $0x160] sm:$0xff] }
 0xaf5   : > { %8939 = vmatprep.subr.mxu0 %v4034_v12 }
 0xaf6   : > { %8940 = vmatpush3.msra.mxu0 %v4034_v12  ;;  %v4221_v12 = vld [vmem:[#allocation25 + $0x158] sm:$0xff] }
 0xaf7   : > { %8941 = vmatprep.subr.mxu0 %v4033_v13 }
 0xaf8   : > { %8942 = vmatpush3.msra.mxu0 %v4033_v13  ;;  %v4220_v13 = vld [vmem:[#allocation25 + $0x150] sm:$0xff] }
 0xaf9   : > { %8943 = vmatprep.subr.mxu0 %v4032_v16 }
 0xafa   : > { %8944 = vmatpush3.msra.mxu0 %v4032_v16  ;;  %v4219_v16 = vld [vmem:[#allocation25 + $0x148] sm:$0xff] }
 0xafb   : > { %8945 = vmatprep.subr.mxu0 %v4031_v17 }
 0xafc   : > { %8946 = vmatpush3.msra.mxu0 %v4031_v17  ;;  %v4218_v17 = vld [vmem:[#allocation25 + $0x140] sm:$0xff] }
 0xafd   : > { %8947 = vmatprep.subr.mxu0 %v4030_v53 }
 0xafe   : > { %8948 = vmatpush3.msra.mxu0 %v4030_v53  ;;  %v4217_v53 = vld [vmem:[#allocation25 + $0x138] sm:$0xff] }
 0xaff   : > { %8949 = vmatprep.subr.mxu0 %v4029_v19 }
 0xb00   : > { %8950 = vmatpush3.msra.mxu0 %v4029_v19  ;;  %v4216_v19 = vld [vmem:[#allocation25 + $0x130] sm:$0xff] }
 0xb01   : > { %8951 = vmatprep.subr.mxu0 %v4028_v29 }
 0xb02   : > { %8952 = vmatpush3.msra.mxu0 %v4028_v29  ;;  %v4215_v29 = vld [vmem:[#allocation25 + $0x128] sm:$0xff] }
 0xb03   : > { %8953 = vmatprep.subr.mxu0 %v4027_v30 }
 0xb04   : > { %8954 = vmatpush3.msra.mxu0 %v4027_v30  ;;  %v4214_v30 = vld [vmem:[#allocation25 + $0x120] sm:$0xff] }
 0xb05   : > { %8955 = vmatprep.subr.mxu0 %v4026_v31 }
 0xb06   : > { %8956 = vmatpush3.msra.mxu0 %v4026_v31  ;;  %v4213_v31 = vld [vmem:[#allocation25 + $0x118] sm:$0xff] }
 0xb07   : > { %8995 = vmatprep.subr.mxu0 %v10774_v18 }
 0xba7   : > { %v8875_v45 = vpop.f32.mrf.mxu0 }
 0xba8   : > { %v3864_v48 = vadd.f32 %v8875_v45, %v10921_v44  ;;  %v4470_v45 = vld [vmem:[#allocation30 + $0x10] sm:$0xff] }
 0xba9   : > { %v3854_v49 = vpop.f32.mrf.mxu0 }
 0xbaa   : > { %v3873_v50 = vadd.f32 %v7921_v46, %v3864_v48  ;;  %v3863_v55 = vadd.f32 %v3854_v49, %v10924_v47 }
 0xbac   : > { %v10928_v56 = vmax.f32 %v3873_v50, 0.0  ;;  %v3872_v42 = vadd.f32 %v7921_v46, %v3863_v55  ;;  %v4469_v55 = vld [vmem:[#allocation30 + $0x8] sm:$0xff] }
 0xbae   : > { %v3874_v57 = vmax.f32 %v3872_v42, 0.0  ;;  %8876 = vmatprep.subr.mxu1 %v10928_v56 }
 0xbaf   : > { %8877 = vmatpush3.msra.mxu1 %v10928_v56 }
 0xbb0   : > { %8878 = vmatprep.subr.mxu1 %v3874_v57 }
 0xbb1   : > { %8879 = vmatpush3.msra.mxu1 %v3874_v57 }
 0xbb2   : > { %8881 = vmatmul.mubr.msk.f32.vlgmr.msra.gmra.mxu1 %vm1613_vm1, %v10841_v51  ;;  %8883 = vmatprep.subr.mxu1 %v10928_v56  ;;  %v4055_v51 = vld [vmem:[#allocation25 + $0xe0] sm:$0xff] }
 0xbb3   : > { %8884 = vmatpush3.msra.mxu1 %v10928_v56  ;;  %8887 = vmatprep.mubr.msk.f32.mxu1 %vm1613_vm1, %v10843_v52  ;;  %v4053_v52 = vld [vmem:[#allocation25 + $0xd0] sm:$0xff] }
 0xbb4   : > { %8885 = vmatprep.subr.mxu1 %v3874_v57 }
 0xbb5   : > { %8886 = vmatpush3.msra.mxu1 %v3874_v57 }
 0xbb6   : > { %8888 = vmatmul.mubr.msk.f32.vlgmr.msra.gmra.mxu1 %vm1613_vm1, %v10851_v54  ;;  %8890 = vmatprep.subr.mxu1 %v4058_v43  ;;  %v4050_v54 = vld [vmem:[#allocation25 + $0xb8] sm:$0xff] }
 0xbb7   : > { %8891 = vmatpush3.msra.mxu1 %v4058_v43  ;;  %8922 = vmatprep.mubr.f32.mxu1 %v3874_v57  ;;  %v4572_v43 = vld [vmem:[%s11567_s26] sm:$0xff] }
 0xbb8   : > { %8892 = vmatprep.subr.mxu1 %v4057_v58 }
 0xbb9   : > { %8893 = vmatpush3.msra.mxu1 %v4057_v58 }
 0xbba   : > { %8894 = vmatprep.subr.mxu1 %v4056_v59 }
 0xbbb   : > { %8895 = vmatpush3.msra.mxu1 %v4056_v59 }
 0xbbc   : > { %8896 = vmatprep.subr.mxu1 %v4055_v51 }
 0xbbd   : > { %8897 = vmatpush3.msra.mxu1 %v4055_v51 }
 0xbbe   : > { %8898 = vmatprep.subr.mxu1 %v4054_v60 }
 0xbbf   : > { %8899 = vmatpush3.msra.mxu1 %v4054_v60 }
 0xbc0   : > { %8900 = vmatprep.subr.mxu1 %v4053_v52 }
 0xbc1   : > { %8901 = vmatpush3.msra.mxu1 %v4053_v52 }
 0xbc2   : > { %8902 = vmatprep.subr.mxu1 %v4052_v61 }
 0xbc3   : > { %8903 = vmatpush3.msra.mxu1 %v4052_v61 }
 0xbc4   : > { %8904 = vmatprep.subr.mxu1 %v4051_v62 }
 0xbc5   : > { %8905 = vmatpush3.msra.mxu1 %v4051_v62 }
 0xbc6   : > { %8906 = vmatprep.subr.mxu1 %v4050_v54 }
 0xbc7   : > { %8907 = vmatpush3.msra.mxu1 %v4050_v54  ;;  %v7926_v54 = vld [vmem:[%s11568_s12] ss:$0 sm:$0xff]  ;;  %s11577_s12 = sld [smem:[#allocation76_spill]] }
 0xbc8   : > { %8908 = vmatprep.subr.mxu1 %v4049_v63 }
 0xbc9   : > { %8909 = vmatpush3.msra.mxu1 %v4049_v63 }
 0xbca   : > { %8910 = vmatprep.subr.mxu1 %v4048_v1 }
 0xbcb   : > { %8911 = vmatpush3.msra.mxu1 %v4048_v1 }
 0xbcc   : > { %8912 = vmatprep.subr.mxu1 %v4047_v2 }
 0xbcd   : > { %8913 = vmatpush3.msra.mxu1 %v4047_v2 }
 0xbce   : > { %8914 = vmatprep.subr.mxu1 %v4046_v3 }
 0xbcf   : > { %8915 = vmatpush3.msra.mxu1 %v4046_v3  ;;  %v7931_v3 = vld [vmem:[%s11569_s14] ss:$0 sm:$0xff]  ;;  %s11578_s14 = sld [smem:[#allocation66_spill]] }
 0xbd0   : > { %8916 = vmatprep.subr.mxu1 %v4045_v5 }
 0xbd1   : > { %8917 = vmatpush3.msra.mxu1 %v4045_v5 }
 0xbd2   : > { %8918 = vmatprep.subr.mxu1 %v4044_v6 }
 0xbd3   : > { %8919 = vmatpush3.msra.mxu1 %v4044_v6 }
 0xbd4   : > { %8920 = vmatprep.subr.mxu1 %v4043_v7 }
 0xbd5   : > { %8921 = vmatpush3.msra.mxu1 %v4043_v7 }
 0xbd6   : > { %8923 = vmatmul.mubr.f32.vlgmr.msra.gmra.mxu1 %v10928_v56  ;;  %8960 = vmatprep.subr.mxu1 %v4225_v8  ;;  %v4468_v56 = vld [vmem:[#allocation30] sm:$0xff] }
 0xbd7   : > { %8961 = vmatpush3.msra.mxu1 %v4225_v8 }
 0xbd8   : > { %8962 = vmatprep.subr.mxu1 %v4224_v9 }
 0xbd9   : > { %8963 = vmatpush3.msra.mxu1 %v4224_v9 }
 0xbda   : > { %8964 = vmatprep.subr.mxu1 %v4223_v10 }
 0xbdb   : > { %8965 = vmatpush3.msra.mxu1 %v4223_v10 }
 0xbdc   : > { %8966 = vmatprep.subr.mxu1 %v4222_v11 }
 0xbdd   : > { %8967 = vmatpush3.msra.mxu1 %v4222_v11 }
 0xbde   : > { %8968 = vmatprep.subr.mxu1 %v4221_v12 }
 0xbdf   : > { %8969 = vmatpush3.msra.mxu1 %v4221_v12 }
 0xbe0   : > { %8970 = vmatprep.subr.mxu1 %v4220_v13 }
 0xbe1   : > { %8971 = vmatpush3.msra.mxu1 %v4220_v13  ;;  %v4573_v13 = vld [vmem:[%s11567_s26 + $0x8] sm:$0xff] }
 0xbe2   : > { %8972 = vmatprep.subr.mxu1 %v4219_v16 }
 0xbe3   : > { %8973 = vmatpush3.msra.mxu1 %v4219_v16  ;;  %v4704_v16 = vld [vmem:[#allocation10 + $0xf8] sm:$0xff] }
 0xbe4   : > { %8974 = vmatprep.subr.mxu1 %v4218_v17 }
 0xbe5   : > { %8975 = vmatpush3.msra.mxu1 %v4218_v17  ;;  %v4574_v17 = vld [vmem:[%s11567_s26 + $0x10] sm:$0xff] }
 0xbe6   : > { %8976 = vmatprep.subr.mxu1 %v4217_v53 }
 0xbe7   : > { %8977 = vmatpush3.msra.mxu1 %v4217_v53  ;;  %v4703_v53 = vld [vmem:[#allocation10 + $0xf0] sm:$0xff] }
 0xbe8   : > { %8978 = vmatprep.subr.mxu1 %v4216_v19 }
 0xbe9   : > { %8979 = vmatpush3.msra.mxu1 %v4216_v19  ;;  %v4702_v19 = vld [vmem:[#allocation10 + $0xe8] sm:$0xff] }
 0xbea   : > { %8980 = vmatprep.subr.mxu1 %v4215_v29 }
 0xbeb   : > { %8981 = vmatpush3.msra.mxu1 %v4215_v29  ;;  %v4701_v29 = vld [vmem:[#allocation10 + $0xe0] sm:$0xff] }
 0xbec   : > { %8982 = vmatprep.subr.mxu1 %v4214_v30 }
 0xbed   : > { %8983 = vmatpush3.msra.mxu1 %v4214_v30  ;;  %v4575_v30 = vld [vmem:[%s11567_s26 + $0x18] sm:$0xff] }
 0xbee   : > { %8984 = vmatprep.subr.mxu1 %v4213_v31 }
 0xbef   : > { %8985 = vmatpush3.msra.mxu1 %v4213_v31  ;;  %v4700_v31 = vld [vmem:[#allocation10 + $0xd8] sm:$0xff] }
 0xbf0   : > { %8986 = vmatprep.subr.mxu1 %v4212_v32 }
 0xbf1   : > { %8987 = vmatpush3.msra.mxu1 %v4212_v32  ;;  %v4699_v32 = vld [vmem:[#allocation10 + $0xd0] sm:$0xff] }
 0xbf2   : > { %8988 = vmatprep.subr.mxu1 %v4211_v33 }
 0xbf3   : > { %8989 = vmatpush3.msra.mxu1 %v4211_v33  ;;  %v4698_v33 = vld [vmem:[#allocation10 + $0xc8] sm:$0xff] }
 0xbf4   : > { %8990 = vmatprep.subr.mxu1 %v4210_v35 }
 0xbf5   : > { %8991 = vmatpush3.msra.mxu1 %v4210_v35  ;;  %v4697_v35 = vld [vmem:[#allocation10 + $0xc0] sm:$0xff] }
 0xc72   : > { %v8882_v36 = vpop.f32.mrf.mxu1 }
 0xc74   : > { %v3942_v37 = vpop.f32.mrf.mxu1 }
 0xc75   : > { %8957 = vmatprep.mubr.f32.mxu0 %v3942_v37  ;;  %v4695_v37 = vld [vmem:[#allocation10 + $0xb0] sm:$0xff] }
 0xc76   : > { %v8889_v38 = vpop.f32.mrf.mxu1  ;;  %8958 = vmatmul.mubr.f32.vlgmr.msra.gmra.mxu0 %v8882_v36  ;;  %v4696_v36 = vld [vmem:[#allocation10 + $0xb8] sm:$0xff] }
 0xc77   : > { %8996 = vmatpush3.msra.mxu0 %v10774_v18  ;;  %8997 = vmatprep.mubr.msk.f32.mxu0 %vm2108_vm6, %v10768_v4  ;;  %v4483_v4 = vld [vmem:[#allocation30 + $0x78] sm:$0xff]  ;;  %v4482_v18 = vld [vmem:[#allocation30 + $0x70] sm:$0xff] }
 0xc78   : > { %v4017_v39 = vpop.f32.mrf.mxu1  ;;  %9000 = vmatprep.subr.mxu0 %v10780_v21  ;;  %9019 = vmatprep.subr.mxu1 %v4483_v4 }
 0xc79   : > { %8992 = vmatprep.mubr.f32.mxu1 %v4017_v39  ;;  %v4693_v39 = vld [vmem:[#allocation10 + $0xa0] sm:$0xff] }
 0xc7a   : > { %8993 = vmatmul.mubr.f32.vlgmr.msra.gmra.mxu1 %v8889_v38  ;;  %8998 = vmatmul.mubr.msk.f32.vlgmr.msra.gmra.mxu0 %vm2108_vm6, %v10778_v20  ;;  %v4481_v20 = vld [vmem:[#allocation30 + $0x68] sm:$0xff]  ;;  %v4694_v38 = vld [vmem:[#allocation10 + $0xa8] sm:$0xff] }
 0xc7b   : > { %9001 = vmatpush3.msra.mxu0 %v10780_v21  ;;  %9020 = vmatpush3.msra.mxu1 %v4483_v4  ;;  %v4480_v21 = vld [vmem:[#allocation30 + $0x60] sm:$0xff]  ;;  %v4692_v4 = vld [vmem:[#allocation10 + $0x98] sm:$0xff] }
 0xc7c   : > { %9002 = vmatprep.subr.mxu0 %v10782_v22  ;;  %9021 = vmatprep.subr.mxu1 %v4482_v18 }
 0xc7d   : > { %9003 = vmatpush3.msra.mxu0 %v10782_v22  ;;  %9022 = vmatpush3.msra.mxu1 %v4482_v18  ;;  %v4479_v22 = vld [vmem:[#allocation30 + $0x58] sm:$0xff]  ;;  %v4691_v18 = vld [vmem:[#allocation10 + $0x90] sm:$0xff] }
 0xc7e   : > { %9004 = vmatprep.subr.mxu0 %v10788_v23  ;;  %9023 = vmatprep.subr.mxu1 %v4481_v20 }
 0xc7f   : > { %9005 = vmatpush3.msra.mxu0 %v10788_v23  ;;  %9024 = vmatpush3.msra.mxu1 %v4481_v20  ;;  %v4478_v23 = vld [vmem:[#allocation30 + $0x50] sm:$0xff]  ;;  %v4690_v20 = vld [vmem:[#allocation10 + $0x88] sm:$0xff] }
 0xc80   : > { %9006 = vmatprep.subr.mxu0 %v10792_v24  ;;  %9025 = vmatprep.subr.mxu1 %v4480_v21 }
 0xc81   : > { %9007 = vmatpush3.msra.mxu0 %v10792_v24  ;;  %9026 = vmatpush3.msra.mxu1 %v4480_v21  ;;  %v4477_v24 = vld [vmem:[#allocation30 + $0x48] sm:$0xff]  ;;  %v4689_v21 = vld [vmem:[#allocation10 + $0x80] sm:$0xff] }
 0xc82   : > { %9008 = vmatprep.subr.mxu0 %v10796_v25  ;;  %9027 = vmatprep.subr.mxu1 %v4479_v22 }
 0xc83   : > { %9009 = vmatpush3.msra.mxu0 %v10796_v25  ;;  %9028 = vmatpush3.msra.mxu1 %v4479_v22  ;;  %v4476_v25 = vld [vmem:[#allocation30 + $0x40] sm:$0xff]  ;;  %v4688_v22 = vld [vmem:[#allocation10 + $0x78] sm:$0xff] }
 0xc84   : > { %9010 = vmatprep.subr.mxu0 %v10800_v26  ;;  %9029 = vmatprep.subr.mxu1 %v4478_v23 }
 0xc85   : > { %9011 = vmatpush3.msra.mxu0 %v10800_v26  ;;  %9030 = vmatpush3.msra.mxu1 %v4478_v23  ;;  %v4475_v26 = vld [vmem:[#allocation30 + $0x38] sm:$0xff]  ;;  %v4687_v23 = vld [vmem:[#allocation10 + $0x70] sm:$0xff] }
 0xc86   : > { %9012 = vmatprep.subr.mxu0 %v10804_v27  ;;  %9031 = vmatprep.subr.mxu1 %v4477_v24 }
 0xc87   : > { %9013 = vmatpush3.msra.mxu0 %v10804_v27  ;;  %9032 = vmatpush3.msra.mxu1 %v4477_v24  ;;  %v4474_v27 = vld [vmem:[#allocation30 + $0x30] sm:$0xff]  ;;  %v4686_v24 = vld [vmem:[#allocation10 + $0x68] sm:$0xff] }
 0xc88   : > { %9014 = vmatprep.subr.mxu0 %v10810_v28  ;;  %9033 = vmatprep.subr.mxu1 %v4476_v25 }
 0xc89   : > { %9015 = vmatpush3.msra.mxu0 %v10810_v28  ;;  %9034 = vmatpush3.msra.mxu1 %v4476_v25  ;;  %v4473_v28 = vld [vmem:[#allocation30 + $0x28] sm:$0xff]  ;;  %v4685_v25 = vld [vmem:[#allocation10 + $0x60] sm:$0xff] }
 0xc8a   : > { %9035 = vmatprep.subr.mxu1 %v4475_v26 }
 0xc8b   : > { %9036 = vmatpush3.msra.mxu1 %v4475_v26  ;;  %v4684_v26 = vld [vmem:[#allocation10 + $0x58] sm:$0xff] }
 0xc8c   : > { %9037 = vmatprep.subr.mxu1 %v4474_v27 }
 0xc8d   : > { %9038 = vmatpush3.msra.mxu1 %v4474_v27  ;;  %v4683_v27 = vld [vmem:[#allocation10 + $0x50] sm:$0xff] }
 0xc8e   : > { %9039 = vmatprep.subr.mxu1 %v4473_v28 }
 0xc8f   : > { %9040 = vmatpush3.msra.mxu1 %v4473_v28  ;;  %v4682_v28 = vld [vmem:[#allocation10 + $0x48] sm:$0xff] }
 0xc90   : > { %9041 = vmatprep.subr.mxu1 %v4472_v40 }
 0xc91   : > { %9042 = vmatpush3.msra.mxu1 %v4472_v40  ;;  %v4681_v40 = vld [vmem:[#allocation10 + $0x40] sm:$0xff] }
 0xc92   : > { %9043 = vmatprep.subr.mxu1 %v4471_v41 }
 0xc93   : > { %9044 = vmatpush3.msra.mxu1 %v4471_v41  ;;  %v4680_v41 = vld [vmem:[#allocation10 + $0x38] sm:$0xff] }
 0xc94   : > { %9045 = vmatprep.subr.mxu1 %v4470_v45 }
 0xc95   : > { %9046 = vmatpush3.msra.mxu1 %v4470_v45  ;;  %v4679_v45 = vld [vmem:[#allocation10 + $0x30] sm:$0xff] }
 0xc96   : > { %9047 = vmatprep.subr.mxu1 %v4469_v55  ;;  %v8924_v58 = vpop.f32.mrf.mxu1 }
 0xc97   : > { %9048 = vmatpush3.msra.mxu1 %v4469_v55  ;;  %v4674_v55 = vld [vmem:[#allocation10 + $0x8] sm:$0xff] }
 0xc98   : > { %9049 = vmatprep.subr.mxu1 %v4468_v56  ;;  %v4125_v59 = vpop.f32.mrf.mxu1 }
 0xc99   : > { %9050 = vmatpush3.msra.mxu1 %v4468_v56  ;;  %v4673_v56 = vld [vmem:[#allocation10] sm:$0xff] }
 0xd36   : > { %v8959_v46 = vpop.f32.mrf.mxu0 }
 0xd37   : > { %v4206_v60 = vadd.f32 %v8959_v46, %v8924_v58  ;;  %v4678_v46 = vld [vmem:[#allocation10 + $0x28] sm:$0xff] }
 0xd38   : > { %v4200_v48 = vpop.f32.mrf.mxu0 }
 0xd39   : > { %v4201_v61 = vadd.f32 %v4200_v48, %v4125_v59  ;;  %v4677_v48 = vld [vmem:[#allocation10 + $0x20] sm:$0xff]  ;;  %v5090_v59 = vld [vmem:[#allocation27 + $0x2e8] sm:$0xff] }
 0xd3a   : > { %v8999_v49 = vpop.f32.mrf.mxu0  ;;  %v8994_v51 = vpop.f32.mrf.mxu1 }
 0xd3b   : > { %v4302_v62 = vadd.f32 %v8994_v51, %v4206_v60  ;;  %v5089_v51 = vld [vmem:[#allocation27 + $0x2e0] sm:$0xff]  ;;  %v5088_v60 = vld [vmem:[#allocation27 + $0x2d8] sm:$0xff] }
 0xd3c   : > { %v4378_v50 = vpop.f32.mrf.mxu0  ;;  %v4292_v52 = vpop.f32.mrf.mxu1 }
 0xd3d   : > { %9016 = vmatprep.mubr.msk.f32.mxu0 %vm2272_vm5, %v4378_v50  ;;  %v4301_v63 = vadd.f32 %v4292_v52, %v4201_v61  ;;  %v4311_v1 = vadd.f32 %v7926_v54, %v4302_v62  ;;  %v4675_v50 = vld [vmem:[#allocation10 + $0x10] sm:$0xff]  ;;  %v5087_v52 = vld [vmem:[#allocation27 + $0x2d0] sm:$0xff]  ;;  %v5086_v62 = vld [vmem:[#allocation27 + $0x2c8] sm:$0xff] }
 0xd3e   : > { %9017 = vmatmul.mubr.msk.f32.vlgmr.msra.gmra.mxu0 %vm2272_vm5, %v8999_v49  ;;  %v4676_v49 = vld [vmem:[#allocation10 + $0x18] sm:$0xff] }
 0xd3f   : > { %9058 = vmatprep.mubr.msk.f32.mxu0 %vm1613_vm1, %v4572_v43  ;;  %v4310_v6 = vadd.f32 %v7926_v54, %v4301_v63  ;;  %v5091_v43 = vld [vmem:[#allocation27 + $0x2f0] sm:$0xff]  ;;  %v5085_v54 = vld [vmem:[#allocation27 + $0x2c0] sm:$0xff]  ;;  %v5084_v63 = vld [vmem:[#allocation27 + $0x2b8] sm:$0xff] }
 0xdfe   : > { %v9018_v42 = vpop.f32.mrf.mxu0 }
 0xe00   : > { %v4459_v57 = vpop.f32.mrf.mxu0 }
 0xe01   : > { %9051 = vmatprep.mubr.f32.mxu1 %v4459_v57 }
 0xe02   : > { %9052 = vmatmul.mubr.f32.vlgmr.msra.gmra.mxu1 %v9018_v42  ;;  %v5092_v42 = vld [vmem:[#allocation27 + $0x2f8] sm:$0xff] }
 0xe03   : > { %4870 = vmatprep.mubr.f32.mxu1 %v10080_v0 }
 0xec2   : > { %v9053_v2 = vpop.f32.mrf.mxu1 }
 0xec3   : > { %v4560_v5 = vadd.f32 %v9053_v2, %v4311_v1  ;;  %v5083_v1 = vld [vmem:[#allocation27 + $0x2b0] sm:$0xff] }
 0xec4   : > { %v4550_v7 = vpop.f32.mrf.mxu1 }
 0xec5   : > { %v4569_v8 = vadd.f32 %v7931_v3, %v4560_v5  ;;  %v4559_v9 = vadd.f32 %v4550_v7, %v4310_v6  ;;  %v5081_v5 = vld [vmem:[#allocation27 + $0x2a0] sm:$0xff]  ;;  %v5080_v6 = vld [vmem:[#allocation27 + $0x298] sm:$0xff]  ;;  %v5079_v7 = vld [vmem:[#allocation27 + $0x290] sm:$0xff] }
 0xec7   : > { %v4571_v10 = vmax.f32 %v4569_v8, 0.0  ;;  %v4568_v11 = vadd.f32 %v7931_v3, %v4559_v9  ;;  %v5082_v3 = vld [vmem:[#allocation27 + $0x2a8] sm:$0xff]  ;;  %v5077_v9 = vld [vmem:[#allocation27 + $0x280] sm:$0xff] }
 0xec8   : > { %v5078_v8 = vld [vmem:[#allocation27 + $0x288] sm:$0xff] }
 0xec9   : > { %v4570_v12 = vmax.f32 %v4568_v11, 0.0  ;;  %9054 = vmatprep.subr.mxu0 %v4571_v10  ;;  %v5075_v11 = vld [vmem:[#allocation27 + $0x270] sm:$0xff] }
 0xeca   : > { %9055 = vmatpush3.msra.mxu0 %v4571_v10  ;;  %v5076_v10 = vld [vmem:[#allocation27 + $0x278] sm:$0xff] }
 0xecb   : > { %9056 = vmatprep.subr.mxu0 %v4570_v12 }
 0xecc   : > { %9057 = vmatpush3.msra.mxu0 %v4570_v12  ;;  %v5074_v12 = vld [vmem:[#allocation27 + $0x268] sm:$0xff] }
 0xecd   : > { %9059 = vmatmul.mubr.msk.f32.vlgmr.msra.gmra.mxu0 %vm1613_vm1, %v4573_v13  ;;  %4705 = vmatprep.subr.mxu0 %v4704_v16  ;;  %v5073_v13 = vld [vmem:[#allocation27 + $0x260] sm:$0xff]  ;;  %v5072_v16 = vld [vmem:[#allocation27 + $0x258] sm:$0xff] }
 0xece   : > { %9061 = vmatprep.mubr.msk.f32.mxu0 %vm1613_vm1, %v4574_v17  ;;  %4706 = vmatpush1.msra.mxu0 %v4703_v53  ;;  %v5071_v17 = vld [vmem:[#allocation27 + $0x250] sm:$0xff]  ;;  %v5070_v53 = vld [vmem:[#allocation27 + $0x248] sm:$0xff] }
 0xecf   : > { %4707 = vmatprep.subr.mxu0 %v4702_v19  ;;  %v5069_v19 = vld [vmem:[#allocation27 + $0x240] sm:$0xff] }
 0xed0   : > { %4708 = vmatpush1.msra.mxu0 %v4701_v29  ;;  %v5068_v29 = vld [vmem:[#allocation27 + $0x238] sm:$0xff] }
 0xed1   : > { %9062 = vmatmul.mubr.msk.f32.gmra.mxu0 %vm1613_vm1, %v4575_v30  ;;  %4709 = vmatprep.subr.mxu0 %v4700_v31  ;;  %v5067_v30 = vld [vmem:[#allocation27 + $0x230] sm:$0xff]  ;;  %v5066_v31 = vld [vmem:[#allocation27 + $0x228] sm:$0xff] }
 0xed2   : > { %4710 = vmatpush1.msra.mxu0 %v4699_v32  ;;  %4769 = vmatprep.mubr.f32.mxu0 %v10080_v0  ;;  %v5065_v32 = vld [vmem:[#allocation27 + $0x220] sm:$0xff] }
 0xed3   : > { %4711 = vmatprep.subr.mxu0 %v4698_v33  ;;  %v5064_v33 = vld [vmem:[#allocation27 + $0x218] sm:$0xff] }
 0xed4   : > { %4712 = vmatpush1.msra.mxu0 %v4697_v35  ;;  %v5063_v35 = vld [vmem:[#allocation27 + $0x210] sm:$0xff] }
 0xed5   : > { %4713 = vmatprep.subr.mxu0 %v4696_v36  ;;  %v5062_v36 = vld [vmem:[#allocation27 + $0x208] sm:$0xff] }
 0xed6   : > { %4714 = vmatpush1.msra.mxu0 %v4695_v37  ;;  %v5061_v37 = vld [vmem:[#allocation27 + $0x200] sm:$0xff] }
 0xed7   : > { %4715 = vmatprep.subr.mxu0 %v4694_v38  ;;  %v5124_v38 = vld [vmem:[#allocation27 + $0x3f8] sm:$0xff] }
 0xed8   : > { %4716 = vmatpush1.msra.mxu0 %v4693_v39  ;;  %v5123_v39 = vld [vmem:[#allocation27 + $0x3f0] sm:$0xff] }
 0xed9   : > { %4717 = vmatprep.subr.mxu0 %v4692_v4  ;;  %v5122_v4 = vld [vmem:[#allocation27 + $0x3e8] sm:$0xff] }
 0xeda   : > { %4718 = vmatpush1.msra.mxu0 %v4691_v18  ;;  %v5121_v18 = vld [vmem:[#allocation27 + $0x3e0] sm:$0xff] }
 0xedb   : > { %4719 = vmatprep.subr.mxu0 %v4690_v20  ;;  %v5120_v20 = vld [vmem:[#allocation27 + $0x3d8] sm:$0xff] }
 0xedc   : > { %4720 = vmatpush1.msra.mxu0 %v4689_v21  ;;  %v5119_v21 = vld [vmem:[#allocation27 + $0x3d0] sm:$0xff] }
 0xedd   : > { %4721 = vmatprep.subr.mxu0 %v4688_v22  ;;  %v5118_v22 = vld [vmem:[#allocation27 + $0x3c8] sm:$0xff] }
 0xede   : > { %4722 = vmatpush1.msra.mxu0 %v4687_v23  ;;  %v5117_v23 = vld [vmem:[#allocation27 + $0x3c0] sm:$0xff] }
 0xedf   : > { %4723 = vmatprep.subr.mxu0 %v4686_v24  ;;  %v5116_v24 = vld [vmem:[#allocation27 + $0x3b8] sm:$0xff] }
 0xee0   : > { %4724 = vmatpush1.msra.mxu0 %v4685_v25  ;;  %v5115_v25 = vld [vmem:[#allocation27 + $0x3b0] sm:$0xff] }
 0xee1   : > { %4725 = vmatprep.subr.mxu0 %v4684_v26  ;;  %v5114_v26 = vld [vmem:[#allocation27 + $0x3a8] sm:$0xff] }
 0xee2   : > { %4726 = vmatpush1.msra.mxu0 %v4683_v27  ;;  %v5113_v27 = vld [vmem:[#allocation27 + $0x3a0] sm:$0xff] }
 0xee3   : > { %4727 = vmatprep.subr.mxu0 %v4682_v28  ;;  %v5112_v28 = vld [vmem:[#allocation27 + $0x398] sm:$0xff] }
 0xee4   : > { %4728 = vmatpush1.msra.mxu0 %v4681_v40  ;;  %v5111_v40 = vld [vmem:[#allocation27 + $0x390] sm:$0xff] }
 0xee5   : > { %4729 = vmatprep.subr.mxu0 %v4680_v41  ;;  %v5110_v41 = vld [vmem:[#allocation27 + $0x388] sm:$0xff] }
 0xee6   : > { %4730 = vmatpush1.msra.mxu0 %v4679_v45  ;;  %v5109_v45 = vld [vmem:[#allocation27 + $0x380] sm:$0xff] }
 0xee7   : > { %4731 = vmatprep.subr.mxu0 %v4678_v46  ;;  %v5108_v46 = vld [vmem:[#allocation27 + $0x378] sm:$0xff] }
 0xee8   : > { %4732 = vmatpush1.msra.mxu0 %v4677_v48  ;;  %v5107_v48 = vld [vmem:[#allocation27 + $0x370] sm:$0xff] }
 0xee9   : > { %4733 = vmatprep.subr.mxu0 %v4676_v49  ;;  %v5106_v49 = vld [vmem:[#allocation27 + $0x368] sm:$0xff] }
 0xeea   : > { %4734 = vmatpush1.msra.mxu0 %v4675_v50  ;;  %v5105_v50 = vld [vmem:[#allocation27 + $0x360] sm:$0xff] }
 0xeeb   : > { %4735 = vmatprep.subr.mxu0 %v4674_v55  ;;  %v5104_v55 = vld [vmem:[#allocation27 + $0x358] sm:$0xff] }
 0xeec   : > { %4736 = vmatpush1.msra.mxu0 %v4673_v56  ;;  %v5103_v56 = vld [vmem:[#allocation27 + $0x350] sm:$0xff] }
 0xeed   : > { %5125 = vmatprep.subr.mxu0 %v5092_v42  ;;  %v5102_v42 = vld [vmem:[#allocation27 + $0x348] sm:$0xff] }
 0xf8d   : > { %v9060_v57 = vpop.f32.mrf.mxu0 }
 0xf8f   : > { %v4654_v58 = vpop.f32.mrf.mxu0 }
 0xf90   : > { %4770 = vmatmul.mubr.f32.vlgmr.msra.gmra.mxu0 %v4654_v58  ;;  %v5099_v58 = vld [vmem:[#allocation27 + $0x330] sm:$0xff] }
 0xf91   : > { %4775 = vmatprep.mubr.f32.mxu0 %v10080_v0  ;;  %5126 = vmatpush1.msra.mxu0 %v5091_v43  ;;  %v9063_v61 = vpop.f32.mrf.mxu0  ;;  %v5100_v43 = vld [vmem:[#allocation27 + $0x338] sm:$0xff] }
 0xf92   : > { %5127 = vmatprep.subr.mxu0 %v5090_v59  ;;  %v5098_v59 = vld [vmem:[#allocation27 + $0x328] sm:$0xff] }
 0xf93   : > { %5128 = vmatpush1.msra.mxu0 %v5089_v51  ;;  %v4664_v2 = vpop.f32.mrf.mxu0  ;;  %v5097_v51 = vld [vmem:[#allocation27 + $0x320] sm:$0xff] }
 0xf94   : > { %4776 = vmatmul.mubr.f32.gmra.mxu0 %v9060_v57  ;;  %5129 = vmatprep.subr.mxu0 %v5088_v60  ;;  %v5101_v57 = vld [vmem:[#allocation27 + $0x340] sm:$0xff]  ;;  %v5096_v60 = vld [vmem:[#allocation27 + $0x318] sm:$0xff] }
 0xf95   : > { %4781 = vmatprep.mubr.f32.mxu0 %v10080_v0  ;;  %5130 = vmatpush1.msra.mxu0 %v5087_v52  ;;  %v5095_v52 = vld [vmem:[#allocation27 + $0x310] sm:$0xff] }
 0xf96   : > { %5131 = vmatprep.subr.mxu0 %v5086_v62  ;;  %v5093_v62 = vld [vmem:[#allocation27 + $0x300] sm:$0xff] }
 0xf97   : > { %5132 = vmatpush1.msra.mxu0 %v5085_v54  ;;  %v5335_v54 = vld [vmem:[#allocation27 + $0x4f8] sm:$0xff] }
 0xf98   : > { %4782 = vmatmul.mubr.f32.gmra.mxu0 %v4664_v2  ;;  %5133 = vmatprep.subr.mxu0 %v5084_v63  ;;  %v5334_v2 = vld [vmem:[#allocation27 + $0x4f0] sm:$0xff] }
 0xf99   : > { %4787 = vmatprep.mubr.f32.mxu0 %v10080_v0  ;;  %5134 = vmatpush1.msra.mxu0 %v5083_v1 }
 0xf9a   : > { %5135 = vmatprep.subr.mxu0 %v5082_v3  ;;  %v5333_v3 = vld [vmem:[#allocation27 + $0x4e8] sm:$0xff] }
 0xf9b   : > { %5136 = vmatpush1.msra.mxu0 %v5081_v5 }
 0xf9c   : > { %4788 = vmatmul.mubr.f32.gmra.mxu0 %v9063_v61  ;;  %5137 = vmatprep.subr.mxu0 %v5080_v6  ;;  %v5094_v61 = vld [vmem:[#allocation27 + $0x308] sm:$0xff]  ;;  %v5332_v6 = vld [vmem:[#allocation27 + $0x4e0] sm:$0xff] }
 0xf9d   : > { %5138 = vmatpush1.msra.mxu0 %v5079_v7  ;;  %v5331_v7 = vld [vmem:[#allocation27 + $0x4d8] sm:$0xff] }
 0xf9e   : > { %5139 = vmatprep.subr.mxu0 %v5078_v8 }
 0xf9f   : > { %5140 = vmatpush1.msra.mxu0 %v5077_v9  ;;  %v5330_v9 = vld [vmem:[#allocation27 + $0x4d0] sm:$0xff] }
 0xfa0   : > { %5141 = vmatprep.subr.mxu0 %v5076_v10  ;;  %v5329_v10 = vld [vmem:[#allocation27 + $0x4c8] sm:$0xff] }
 0xfa1   : > { %5142 = vmatpush1.msra.mxu0 %v5075_v11 }
 0xfa2   : > { %5143 = vmatprep.subr.mxu0 %v5074_v12  ;;  %v5328_v12 = vld [vmem:[#allocation27 + $0x4c0] sm:$0xff] }
 0xfa3   : > { %5144 = vmatpush1.msra.mxu0 %v5073_v13  ;;  %v5327_v13 = vld [vmem:[#allocation27 + $0x4b8] sm:$0xff] }
 0xfa4   : > { %5145 = vmatprep.subr.mxu0 %v5072_v16 }
 0xfa5   : > { %5146 = vmatpush1.msra.mxu0 %v5071_v17  ;;  %v5326_v17 = vld [vmem:[#allocation27 + $0x4b0] sm:$0xff] }
 0xfa6   : > { %5147 = vmatprep.subr.mxu0 %v5070_v53  ;;  %v5325_v53 = vld [vmem:[#allocation27 + $0x4a8] sm:$0xff] }
 0xfa7   : > { %5148 = vmatpush1.msra.mxu0 %v5069_v19 }
 0xfa8   : > { %5149 = vmatprep.subr.mxu0 %v5068_v29 }
 0xfa9   : > { %5150 = vmatpush1.msra.mxu0 %v5067_v30  ;;  %v5324_v30 = vld [vmem:[#allocation27 + $0x4a0] sm:$0xff] }
 0xfaa   : > { %5151 = vmatprep.subr.mxu0 %v5066_v31  ;;  %v5323_v31 = vld [vmem:[#allocation27 + $0x498] sm:$0xff] }
 0xfab   : > { %5152 = vmatpush1.msra.mxu0 %v5065_v32  ;;  %v5322_v32 = vld [vmem:[#allocation27 + $0x490] sm:$0xff] }
 0xfac   : > { %5153 = vmatprep.subr.mxu0 %v5064_v33  ;;  %v5321_v33 = vld [vmem:[#allocation27 + $0x488] sm:$0xff] }
 0xfad   : > { %5154 = vmatpush1.msra.mxu0 %v5063_v35  ;;  %v5320_v35 = vld [vmem:[#allocation27 + $0x480] sm:$0xff] }
 0xfae   : > { %5155 = vmatprep.subr.mxu0 %v5062_v36  ;;  %v5319_v36 = vld [vmem:[#allocation27 + $0x478] sm:$0xff] }
 0xfaf   : > { %5156 = vmatpush1.msra.mxu0 %v5061_v37  ;;  %v1942_v37 = vld [vmem:[#allocation19] sm:$0xff] }
 0xfb0   : > { %5157 = vmatprep.subr.mxu0 %v5124_v38  ;;  %v5318_v38 = vld [vmem:[#allocation27 + $0x470] sm:$0xff] }
 0xfb1   : > { %5158 = vmatpush2.msra.mxu0 %v5123_v39  ;;  %v5317_v39 = vld [vmem:[#allocation27 + $0x468] sm:$0xff] }
 0xfb2   : > { %5159 = vmatprep.subr.mxu0 %v5122_v4  ;;  %v1943_v4 = vld [vmem:[#allocation19 + $0x8] sm:$0xff] }
 0xfb3   : > { %5160 = vmatpush2.msra.mxu0 %v5121_v18  ;;  %v5316_v18 = vld [vmem:[#allocation27 + $0x460] sm:$0xff] }
 0xfb4   : > { %5161 = vmatprep.subr.mxu0 %v5120_v20  ;;  %v5315_v20 = vld [vmem:[#allocation27 + $0x458] sm:$0xff] }
 0xfb5   : > { %5162 = vmatpush2.msra.mxu0 %v5119_v21  ;;  %v1944_v21 = vld [vmem:[#allocation19 + $0x10] sm:$0xff] }
 0xfb6   : > { %5163 = vmatprep.subr.mxu0 %v5118_v22  ;;  %v5027_v22 = vld [vmem:[#allocation27 + $0xf8] sm:$0xff] }
 0xfb7   : > { %5164 = vmatpush2.msra.mxu0 %v5117_v23  ;;  %v5314_v23 = vld [vmem:[#allocation27 + $0x450] sm:$0xff] }
 0xfb8   : > { %5165 = vmatprep.subr.mxu0 %v5116_v24  ;;  %v5313_v24 = vld [vmem:[#allocation27 + $0x448] sm:$0xff] }
 0xfb9   : > { %5166 = vmatpush2.msra.mxu0 %v5115_v25  ;;  %v5312_v25 = vld [vmem:[#allocation27 + $0x440] sm:$0xff] }
 0xfba   : > { %5167 = vmatprep.subr.mxu0 %v5114_v26  ;;  %v1945_v26 = vld [vmem:[#allocation19 + $0x18] sm:$0xff] }
 0xfbb   : > { %5168 = vmatpush2.msra.mxu0 %v5113_v27  ;;  %v5311_v27 = vld [vmem:[#allocation27 + $0x438] sm:$0xff] }
 0xfbc   : > { %5169 = vmatprep.subr.mxu0 %v5112_v28  ;;  %v1946_v28 = vld [vmem:[#allocation21] sm:$0xff] }
 0xfbd   : > { %5170 = vmatpush2.msra.mxu0 %v5111_v40  ;;  %v5026_v40 = vld [vmem:[#allocation27 + $0xf0] sm:$0xff] }
 0xfbe   : > { %5171 = vmatprep.subr.mxu0 %v5110_v41  ;;  %v5025_v41 = vld [vmem:[#allocation27 + $0xe8] sm:$0xff] }
 0xfbf   : > { %5172 = vmatpush2.msra.mxu0 %v5109_v45  ;;  %v5024_v45 = vld [vmem:[#allocation27 + $0xe0] sm:$0xff] }
 0xfc0   : > { %5173 = vmatprep.subr.mxu0 %v5108_v46  ;;  %v5023_v46 = vld [vmem:[#allocation27 + $0xd8] sm:$0xff] }
 0xfc1   : > { %5174 = vmatpush2.msra.mxu0 %v5107_v48  ;;  %v1947_v48 = vld [vmem:[#allocation21 + $0x8] sm:$0xff] }
 0xfc2   : > { %5175 = vmatprep.subr.mxu0 %v5106_v49  ;;  %v5022_v49 = vld [vmem:[#allocation27 + $0xd0] sm:$0xff] }
 0xfc3   : > { %5176 = vmatpush2.msra.mxu0 %v5105_v50  ;;  %v5021_v50 = vld [vmem:[#allocation27 + $0xc8] sm:$0xff] }
 0xfc4   : > { %5177 = vmatprep.subr.mxu0 %v5104_v55  ;;  %v5020_v55 = vld [vmem:[#allocation27 + $0xc0] sm:$0xff] }
 0xfc5   : > { %5178 = vmatpush2.msra.mxu0 %v5103_v56  ;;  %v5019_v56 = vld [vmem:[#allocation27 + $0xb8] sm:$0xff] }
 0xfc6   : > { %5179 = vmatprep.subr.mxu0 %v5102_v42  ;;  %v1948_v42 = vld [vmem:[#allocation21 + $0x10] sm:$0xff] }
 0xfc7   : > { %5180 = vmatpush2.msra.mxu0 %v5101_v57  ;;  %v5018_v57 = vld [vmem:[#allocation27 + $0xb0] sm:$0xff] }
 0xfc8   : > { %5181 = vmatprep.subr.mxu0 %v5100_v43  ;;  %v5017_v43 = vld [vmem:[#allocation27 + $0xa8] sm:$0xff] }
 0xfc9   : > { %5182 = vmatpush2.msra.mxu0 %v5099_v58  ;;  %v5016_v58 = vld [vmem:[#allocation27 + $0xa0] sm:$0xff] }
 0xfca   : > { %5183 = vmatprep.subr.mxu0 %v5098_v59  ;;  %v5015_v59 = vld [vmem:[#allocation27 + $0x98] sm:$0xff] }
 0xfcb   : > { %5184 = vmatpush2.msra.mxu0 %v5097_v51  ;;  %v1949_v51 = vld [vmem:[#allocation21 + $0x18] sm:$0xff] }
 0xfcc   : > { %5185 = vmatprep.subr.mxu0 %v5096_v60  ;;  %v5014_v60 = vld [vmem:[#allocation27 + $0x90] sm:$0xff] }
 0xfcd   : > { %5186 = vmatpush2.msra.mxu0 %v5095_v52  ;;  %v5013_v52 = vld [vmem:[#allocation27 + $0x88] sm:$0xff] }
 0xfce   : > { %5187 = vmatprep.subr.mxu0 %v5094_v61  ;;  %v5012_v61 = vld [vmem:[#allocation27 + $0x80] sm:$0xff] }
 0xfcf   : > { %5188 = vmatpush2.msra.mxu0 %v5093_v62  ;;  %v5011_v62 = vld [vmem:[#allocation27 + $0x78] sm:$0xff] }
 0xfd0   : > { %5368 = vmatprep.subr.mxu0 %v5335_v54  ;;  %v5010_v54 = vld [vmem:[#allocation27 + $0x70] sm:$0xff] }
0x1050   : > { %v10979_v63 = vpop.f32.mrf.mxu0 }
0x1052   : > { %v10981_v1 = vpop.f32.mrf.mxu0 }
0x1053   : > { %5189 = vmatprep.mubr.f32.mxu0 %v10981_v1 }
0x1054   : > { %v10984_v5 = vpop.f32.mrf.mxu0  ;;  %5190 = vmatmul.mubr.f32.vlgmr.msra.gmra.mxu0 %v10979_v63 }
0x1055   : > { %5369 = vmatpush1.msra.mxu0 %v5334_v2  ;;  %v5007_v2 = vld [vmem:[#allocation27 + $0x58] sm:$0xff] }
0x1056   : > { %v4779_v8 = vpop.f32.mrf.mxu0  ;;  %5370 = vmatprep.subr.mxu0 %v5333_v3  ;;  %v5006_v3 = vld [vmem:[#allocation27 + $0x50] sm:$0xff] }
0x1057   : > { %5195 = vmatprep.mubr.f32.mxu0 %v4779_v8  ;;  %5371 = vmatpush1.msra.mxu0 %v5332_v6  ;;  %v5004_v6 = vld [vmem:[#allocation27 + $0x40] sm:$0xff] }
0x1058   : > { %v4783_v11 = vpop.f32.mrf.mxu0  ;;  %5196 = vmatmul.mubr.f32.gmra.mxu0 %v10984_v5  ;;  %5372 = vmatprep.subr.mxu0 %v5331_v7  ;;  %v5003_v7 = vld [vmem:[#allocation27 + $0x38] sm:$0xff] }
0x1059   : > { %5373 = vmatpush1.msra.mxu0 %v5330_v9  ;;  %v5001_v9 = vld [vmem:[#allocation27 + $0x28] sm:$0xff] }
0x105a   : > { %v4785_v16 = vpop.f32.mrf.mxu0  ;;  %5374 = vmatprep.subr.mxu0 %v5329_v10  ;;  %v5000_v10 = vld [vmem:[#allocation27 + $0x20] sm:$0xff] }
0x105b   : > { %5201 = vmatprep.mubr.f32.mxu0 %v4785_v16  ;;  %5375 = vmatpush1.msra.mxu0 %v5328_v12  ;;  %v4998_v12 = vld [vmem:[#allocation27 + $0x10] sm:$0xff] }
0x105c   : > { %v4789_v19 = vpop.f32.mrf.mxu0  ;;  %5202 = vmatmul.mubr.f32.gmra.mxu0 %v4783_v11  ;;  %5376 = vmatprep.subr.mxu0 %v5327_v13  ;;  %v4997_v13 = vld [vmem:[#allocation27 + $0x8] sm:$0xff] }
0x105d   : > { %5377 = vmatpush1.msra.mxu0 %v5326_v17  ;;  %v5059_v17 = vld [vmem:[#allocation27 + $0x1f8] sm:$0xff] }
0x105e   : > { %v4791_v29 = vpop.f32.mrf.mxu0  ;;  %5378 = vmatprep.subr.mxu0 %v5325_v53  ;;  %v5310_v53 = vld [vmem:[#allocation27 + $0x430] sm:$0xff] }
0x105f   : > { %4830 = vmatprep.subr.mxu1 %v4791_v29  ;;  %5207 = vmatprep.mubr.f32.mxu0 %v4791_v29 }
0x1060   : > { %4831 = vmatpush1.msra.mxu1 %v4789_v19  ;;  %5208 = vmatmul.mubr.f32.gmra.mxu0 %v4789_v19 }
0x1061   : > { %4832 = vmatprep.subr.mxu1 %v4785_v16  ;;  %5379 = vmatpush1.msra.mxu0 %v5324_v30  ;;  %v5057_v30 = vld [vmem:[#allocation27 + $0x1e8] sm:$0xff] }
0x1062   : > { %4833 = vmatpush1.msra.mxu1 %v4783_v11  ;;  %5380 = vmatprep.subr.mxu0 %v5323_v31  ;;  %v5308_v31 = vld [vmem:[#allocation27 + $0x420] sm:$0xff] }
0x1063   : > { %4834 = vmatprep.subr.mxu1 %v4779_v8  ;;  %5381 = vmatpush1.msra.mxu0 %v5322_v32  ;;  %v5307_v32 = vld [vmem:[#allocation27 + $0x418] sm:$0xff] }
0x1064   : > { %4835 = vmatpush1.msra.mxu1 %v10984_v5  ;;  %5382 = vmatprep.subr.mxu0 %v5321_v33  ;;  %v5056_v33 = vld [vmem:[#allocation27 + $0x1e0] sm:$0xff] }
0x1065   : > { %4836 = vmatprep.subr.mxu1 %v10981_v1  ;;  %5383 = vmatpush1.msra.mxu0 %v5320_v35  ;;  %v5055_v35 = vld [vmem:[#allocation27 + $0x1d8] sm:$0xff] }
0x1066   : > { %4837 = vmatpush1.msra.mxu1 %v10979_v63  ;;  %5384 = vmatprep.subr.mxu0 %v5319_v36  ;;  %v5306_v36 = vld [vmem:[#allocation27 + $0x410] sm:$0xff] }
0x1067   : > { %7936 = vmatmul.mubr.msk.f32.vlgmr.msra.gmra.mxu1 %vm2033_vm4, %v1942_v37  ;;  %4931 = vmatprep.subr.mxu1 %v4791_v29  ;;  %v5058_v29 = vld [vmem:[#allocation27 + $0x1f0] sm:$0xff]  ;;  %v5305_v37 = vld [vmem:[#allocation27 + $0x408] sm:$0xff] }
0x1068   : > { %4932 = vmatpush1.msra.mxu1 %v4789_v19  ;;  %4876 = vmatprep.mubr.f32.mxu1 %v10080_v0  ;;  %v5309_v19 = vld [vmem:[#allocation27 + $0x428] sm:$0xff] }
0x1069   : > { %4933 = vmatprep.subr.mxu1 %v4785_v16  ;;  %5385 = vmatpush1.msra.mxu0 %v5318_v38  ;;  %v4996_v16 = vld [vmem:[#allocation27] sm:$0xff]  ;;  %v5054_v38 = vld [vmem:[#allocation27 + $0x1d0] sm:$0xff] }
0x106a   : > { %4934 = vmatpush1.msra.mxu1 %v4783_v11  ;;  %5386 = vmatprep.subr.mxu0 %v5317_v39  ;;  %v4999_v11 = vld [vmem:[#allocation27 + $0x18] sm:$0xff]  ;;  %v5053_v39 = vld [vmem:[#allocation27 + $0x1c8] sm:$0xff] }
0x106b   : > { %7937 = vmatmul.mubr.msk.f32.gmra.mxu1 %vm2033_vm4, %v1943_v4  ;;  %4935 = vmatprep.subr.mxu1 %v4779_v8  ;;  %v5002_v8 = vld [vmem:[#allocation27 + $0x30] sm:$0xff]  ;;  %v5304_v4 = vld [vmem:[#allocation27 + $0x400] sm:$0xff] }
0x106c   : > { %4936 = vmatpush1.msra.mxu1 %v10984_v5  ;;  %4882 = vmatprep.mubr.f32.mxu1 %v10080_v0  ;;  %v5005_v5 = vld [vmem:[#allocation27 + $0x48] sm:$0xff] }
0x106d   : > { %4937 = vmatprep.subr.mxu1 %v10981_v1  ;;  %5387 = vmatpush1.msra.mxu0 %v5316_v18  ;;  %v5008_v1 = vld [vmem:[#allocation27 + $0x60] sm:$0xff]  ;;  %v5367_v18 = vld [vmem:[#allocation27 + $0x5f8] sm:$0xff] }
0x106e   : > { %4938 = vmatpush1.msra.mxu1 %v10979_v63  ;;  %5388 = vmatprep.subr.mxu0 %v5315_v20  ;;  %v5009_v63 = vld [vmem:[#allocation27 + $0x68] sm:$0xff]  ;;  %v5052_v20 = vld [vmem:[#allocation27 + $0x1c0] sm:$0xff] }
0x106f   : > { %7938 = vmatmul.mubr.msk.f32.gmra.mxu1 %vm2033_vm4, %v1944_v21  ;;  %5214 = vmatprep.subr.mxu1 %v5027_v22  ;;  %v5051_v21 = vld [vmem:[#allocation27 + $0x1b8] sm:$0xff]  ;;  %v5366_v22 = vld [vmem:[#allocation27 + $0x5f0] sm:$0xff] }
0x1070   : > { %4888 = vmatprep.mubr.f32.mxu1 %v10080_v0  ;;  %5389 = vmatpush1.msra.mxu0 %v5314_v23  ;;  %v5365_v23 = vld [vmem:[#allocation27 + $0x5e8] sm:$0xff] }
0x1071   : > { %5390 = vmatprep.subr.mxu0 %v5313_v24  ;;  %v5050_v24 = vld [vmem:[#allocation27 + $0x1b0] sm:$0xff] }
0x1072   : > { %5391 = vmatpush1.msra.mxu0 %v5312_v25  ;;  %v5049_v25 = vld [vmem:[#allocation27 + $0x1a8] sm:$0xff] }
0x1073   : > { %7939 = vmatmul.mubr.msk.f32.gmra.mxu1 %vm2033_vm4, %v1945_v26  ;;  %5392 = vmatprep.subr.mxu0 %v5311_v27  ;;  %v5364_v26 = vld [vmem:[#allocation27 + $0x5e0] sm:$0xff]  ;;  %v5363_v27 = vld [vmem:[#allocation27 + $0x5d8] sm:$0xff] }
0x1074   : > { %4971 = vmatprep.mubr.f32.mxu1 %v10080_v0  ;;  %5393 = vmatpush1.msra.mxu0 %v5310_v53  ;;  %v5345_v53 = vld [vmem:[#allocation27 + $0x548] sm:$0xff] }
0x1075   : > { %5394 = vmatprep.subr.mxu0 %v5309_v19  ;;  %v5029_v19 = vld [vmem:[#allocation27 + $0x108] sm:$0xff] }
0x1076   : > { %5395 = vmatpush1.msra.mxu0 %v5308_v31  ;;  %v5343_v31 = vld [vmem:[#allocation27 + $0x538] sm:$0xff] }
0x1077   : > { %7940 = vmatmul.mubr.msk.f32.vlgmr.msra.gmra.mxu1 %vm2033_vm4, %v1946_v28  ;;  %5396 = vmatprep.subr.mxu0 %v5307_v32  ;;  %v5048_v28 = vld [vmem:[#allocation27 + $0x1a0] sm:$0xff]  ;;  %v5342_v32 = vld [vmem:[#allocation27 + $0x530] sm:$0xff] }
0x1078   : > { %5215 = vmatpush1.msra.mxu1 %v5026_v40  ;;  %4977 = vmatprep.mubr.f32.mxu1 %v10080_v0  ;;  %v5047_v40 = vld [vmem:[#allocation27 + $0x198] sm:$0xff] }
0x1079   : > { %5216 = vmatprep.subr.mxu1 %v5025_v41  ;;  %5397 = vmatpush1.msra.mxu0 %v5306_v36  ;;  %v5362_v41 = vld [vmem:[#allocation27 + $0x5d0] sm:$0xff]  ;;  %v5339_v36 = vld [vmem:[#allocation27 + $0x518] sm:$0xff] }
0x107a   : > { %5217 = vmatpush1.msra.mxu1 %v5024_v45  ;;  %5398 = vmatprep.subr.mxu0 %v5305_v37  ;;  %v5361_v45 = vld [vmem:[#allocation27 + $0x5c8] sm:$0xff]  ;;  %v5338_v37 = vld [vmem:[#allocation27 + $0x510] sm:$0xff] }
0x107b   : > { %5218 = vmatprep.subr.mxu1 %v5023_v46  ;;  %7941 = vmatmul.mubr.msk.f32.gmra.mxu1 %vm2033_vm4, %v1947_v48  ;;  %v5046_v46 = vld [vmem:[#allocation27 + $0x190] sm:$0xff]  ;;  %v5045_v48 = vld [vmem:[#allocation27 + $0x188] sm:$0xff] }
0x107c   : > { %5219 = vmatpush1.msra.mxu1 %v5022_v49  ;;  %4983 = vmatprep.mubr.f32.mxu1 %v10080_v0  ;;  %v5360_v49 = vld [vmem:[#allocation27 + $0x5c0] sm:$0xff] }
0x107d   : > { %5220 = vmatprep.subr.mxu1 %v5021_v50  ;;  %5399 = vmatpush1.msra.mxu0 %v5304_v4  ;;  %v5359_v50 = vld [vmem:[#allocation27 + $0x5b8] sm:$0xff] }
0x107e   : > { %5221 = vmatpush1.msra.mxu1 %v5020_v55  ;;  %5400 = vmatprep.subr.mxu0 %v5367_v18  ;;  %v5358_v55 = vld [vmem:[#allocation27 + $0x5b0] sm:$0xff] }
0x107f   : > { %5222 = vmatprep.subr.mxu1 %v5019_v56  ;;  %7942 = vmatmul.mubr.msk.f32.gmra.mxu1 %vm2033_vm4, %v1948_v42  ;;  %v5044_v56 = vld [vmem:[#allocation27 + $0x180] sm:$0xff]  ;;  %v5357_v42 = vld [vmem:[#allocation27 + $0x5a8] sm:$0xff] }
0x1080   : > { %5223 = vmatpush1.msra.mxu1 %v5018_v57  ;;  %4989 = vmatprep.mubr.f32.mxu1 %v10080_v0  ;;  %v5043_v57 = vld [vmem:[#allocation27 + $0x178] sm:$0xff] }
0x1081   : > { %5224 = vmatprep.subr.mxu1 %v5017_v43  ;;  %5401 = vmatpush2.msra.mxu0 %v5366_v22  ;;  %v5356_v43 = vld [vmem:[#allocation27 + $0x5a0] sm:$0xff] }
0x1082   : > { %5225 = vmatpush1.msra.mxu1 %v5016_v58  ;;  %5402 = vmatprep.subr.mxu0 %v5365_v23  ;;  %v5042_v58 = vld [vmem:[#allocation27 + $0x170] sm:$0xff] }
0x1083   : > { %5226 = vmatprep.subr.mxu1 %v5015_v59  ;;  %7943 = vmatmul.mubr.msk.f32.gmra.mxu1 %vm2033_vm4, %v1949_v51  ;;  %v5041_v59 = vld [vmem:[#allocation27 + $0x168] sm:$0xff]  ;;  %v5040_v51 = vld [vmem:[#allocation27 + $0x160] sm:$0xff] }
0x1084   : > { %5227 = vmatpush1.msra.mxu1 %v5014_v60  ;;  %5403 = vmatpush2.msra.mxu0 %v5364_v26  ;;  %v5355_v60 = vld [vmem:[#allocation27 + $0x598] sm:$0xff] }
0x1085   : > { %5228 = vmatprep.subr.mxu1 %v5013_v52  ;;  %5404 = vmatprep.subr.mxu0 %v5363_v27  ;;  %v5354_v52 = vld [vmem:[#allocation27 + $0x590] sm:$0xff] }
0x1086   : > { %5229 = vmatpush1.msra.mxu1 %v5012_v61  ;;  %5405 = vmatpush2.msra.mxu0 %v5362_v41  ;;  %v5039_v61 = vld [vmem:[#allocation27 + $0x158] sm:$0xff]  ;;  %v5485_v27 = vld [vmem:[%s11570_s4] sm:$0xff]  ;;  %v5600_v41 = vld [vmem:[#allocation12 + $0x70] sm:$0xff] }
0x1087   : > { %5230 = vmatprep.subr.mxu1 %v5011_v62  ;;  %5406 = vmatprep.subr.mxu0 %v5361_v45  ;;  %v5038_v62 = vld [vmem:[#allocation27 + $0x150] sm:$0xff]  ;;  %v5487_v45 = vld [vmem:[%s11570_s4 + $0x10] sm:$0xff] }
0x1088   : > { %5231 = vmatpush1.msra.mxu1 %v5010_v54  ;;  %5407 = vmatpush2.msra.mxu0 %v5360_v49  ;;  %v5353_v54 = vld [vmem:[#allocation27 + $0x588] sm:$0xff]  ;;  %v5598_v49 = vld [vmem:[#allocation12 + $0x60] sm:$0xff] }
0x1089   : > { %5232 = vmatprep.subr.mxu1 %v5009_v63  ;;  %5408 = vmatprep.subr.mxu0 %v5359_v50  ;;  %v5037_v63 = vld [vmem:[#allocation27 + $0x148] sm:$0xff] }
0x108a   : > { %5233 = vmatpush1.msra.mxu1 %v5008_v1  ;;  %5409 = vmatpush2.msra.mxu0 %v5358_v55  ;;  %v5352_v1 = vld [vmem:[#allocation27 + $0x580] sm:$0xff]  ;;  %v5597_v50 = vld [vmem:[#allocation12 + $0x58] sm:$0xff] }
0x108b   : > { %5234 = vmatprep.subr.mxu1 %v5007_v2  ;;  %5410 = vmatprep.subr.mxu0 %v5357_v42  ;;  %v5036_v2 = vld [vmem:[#allocation27 + $0x140] sm:$0xff]  ;;  %v5595_v42 = vld [vmem:[#allocation12 + $0x48] sm:$0xff] }
0x108c   : > { %5235 = vmatpush1.msra.mxu1 %v5006_v3  ;;  %5411 = vmatpush2.msra.mxu0 %v5356_v43  ;;  %v5351_v3 = vld [vmem:[#allocation27 + $0x578] sm:$0xff] }
0x108d   : > { %5236 = vmatprep.subr.mxu1 %v5005_v5  ;;  %5412 = vmatprep.subr.mxu0 %v5355_v60  ;;  %v5035_v5 = vld [vmem:[#allocation27 + $0x138] sm:$0xff]  ;;  %v5592_v60 = vld [vmem:[#allocation12 + $0x30] sm:$0xff] }
0x108e   : > { %5237 = vmatpush1.msra.mxu1 %v5004_v6  ;;  %5413 = vmatpush2.msra.mxu0 %v5354_v52  ;;  %v5350_v6 = vld [vmem:[#allocation27 + $0x570] sm:$0xff]  ;;  %v5591_v52 = vld [vmem:[#allocation12 + $0x28] sm:$0xff] }
0x108f   : > { %5238 = vmatprep.subr.mxu1 %v5003_v7  ;;  %5414 = vmatprep.subr.mxu0 %v5353_v54  ;;  %v5034_v7 = vld [vmem:[#allocation27 + $0x130] sm:$0xff]  ;;  %v5589_v54 = vld [vmem:[#allocation12 + $0x18] sm:$0xff] }
0x1090   : > { %5239 = vmatpush1.msra.mxu1 %v5002_v8  ;;  %5415 = vmatpush2.msra.mxu0 %v5352_v1  ;;  %v5349_v8 = vld [vmem:[#allocation27 + $0x568] sm:$0xff]  ;;  %v5588_v1 = vld [vmem:[#allocation12 + $0x10] sm:$0xff] }
0x1091   : > { %5240 = vmatprep.subr.mxu1 %v5001_v9  ;;  %5416 = vmatprep.subr.mxu0 %v5351_v3  ;;  %v5033_v9 = vld [vmem:[#allocation27 + $0x128] sm:$0xff]  ;;  %v5586_v3 = vld [vmem:[#allocation12] sm:$0xff] }
0x1092   : > { %5241 = vmatpush1.msra.mxu1 %v5000_v10  ;;  %5417 = vmatpush2.msra.mxu0 %v5350_v6  ;;  %v5348_v10 = vld [vmem:[#allocation27 + $0x560] sm:$0xff] }
0x1093   : > { %5242 = vmatprep.subr.mxu1 %v4999_v11  ;;  %5418 = vmatprep.subr.mxu0 %v5349_v8  ;;  %v5032_v11 = vld [vmem:[#allocation27 + $0x120] sm:$0xff]  ;;  %v5905_v8 = vld [vmem:[%s11571_s16 + $0xe0] sm:$0xff] }
0x1094   : > { %5243 = vmatpush1.msra.mxu1 %v4998_v12  ;;  %5419 = vmatpush2.msra.mxu0 %v5348_v10  ;;  %v5347_v12 = vld [vmem:[#allocation27 + $0x558] sm:$0xff] }
0x1095   : > { %5244 = vmatprep.subr.mxu1 %v4997_v13  ;;  %v5346_v13 = vld [vmem:[#allocation27 + $0x550] sm:$0xff]  ;;  %5420 = vmatprep.subr.mxu0 %v5347_v12  ;;  %v5907_v6 = vld [vmem:[%s11571_s16 + $0xf0] sm:$0xff] }
0x1096   : > { %5245 = vmatpush1.msra.mxu1 %v4996_v16  ;;  %v5031_v16 = vld [vmem:[#allocation27 + $0x118] sm:$0xff]  ;;  %5421 = vmatpush2.msra.mxu0 %v5346_v13  ;;  %v5901_v12 = vld [vmem:[%s11571_s16 + $0xc0] sm:$0xff]  ;;  %v5900_v13 = vld [vmem:[%s11571_s16 + $0xb8] sm:$0xff] }
0x1097   : > { %5246 = vmatprep.subr.mxu1 %v5059_v17  ;;  %v5030_v17 = vld [vmem:[#allocation27 + $0x110] sm:$0xff]  ;;  %5422 = vmatprep.subr.mxu0 %v5345_v53  ;;  %v5903_v10 = vld [vmem:[%s11571_s16 + $0xd0] sm:$0xff] }
0x1098   : > { %5247 = vmatpush2.msra.mxu1 %v5058_v29  ;;  %v5344_v29 = vld [vmem:[#allocation27 + $0x540] sm:$0xff]  ;;  %v5897_v53 = vld [vmem:[%s11571_s16 + $0xa0] sm:$0xff] }
0x1099   : > { %5248 = vmatprep.subr.mxu1 %v5057_v30  ;;  %v5028_v30 = vld [vmem:[#allocation27 + $0x100] sm:$0xff]  ;;  %5423 = vmatpush2.msra.mxu0 %v5344_v29 }
0x109a   : > { %5249 = vmatpush2.msra.mxu1 %v5056_v33  ;;  %5424 = vmatprep.subr.mxu0 %v5343_v31  ;;  %v5341_v33 = vld [vmem:[#allocation27 + $0x528] sm:$0xff]  ;;  %v5895_v29 = vld [vmem:[%s11571_s16 + $0x90] sm:$0xff] }
0x109b   : > { %5250 = vmatprep.subr.mxu1 %v5055_v35  ;;  %5425 = vmatpush2.msra.mxu0 %v5342_v32  ;;  %v5340_v35 = vld [vmem:[#allocation27 + $0x520] sm:$0xff]  ;;  %v5893_v31 = vld [vmem:[%s11571_s16 + $0x80] sm:$0xff] }
0x109c   : > { %5251 = vmatpush2.msra.mxu1 %v5054_v38  ;;  %5426 = vmatprep.subr.mxu0 %v5341_v33  ;;  %v5337_v38 = vld [vmem:[#allocation27 + $0x508] sm:$0xff]  ;;  %v5891_v33 = vld [vmem:[%s11571_s16 + $0x70] sm:$0xff] }
0x109d   : > { %5252 = vmatprep.subr.mxu1 %v5053_v39  ;;  %5427 = vmatpush2.msra.mxu0 %v5340_v35  ;;  %v5336_v39 = vld [vmem:[#allocation27 + $0x500] sm:$0xff]  ;;  %v5890_v35 = vld [vmem:[%s11571_s16 + $0x68] sm:$0xff] }
0x109e   : > { %5253 = vmatpush2.msra.mxu1 %v5052_v20  ;;  %5428 = vmatprep.subr.mxu0 %v5339_v36  ;;  %v5601_v20 = vld [vmem:[#allocation12 + $0x78] sm:$0xff] }
0x109f   : > { %5254 = vmatprep.subr.mxu1 %v5051_v21  ;;  %5429 = vmatpush2.msra.mxu0 %v5338_v37  ;;  %v5892_v32 = vld [vmem:[%s11571_s16 + $0x78] sm:$0xff]  ;;  %v5889_v36 = vld [vmem:[%s11571_s16 + $0x60] sm:$0xff] }
0x10a0   : > { %5255 = vmatpush2.msra.mxu1 %v5050_v24  ;;  %5430 = vmatprep.subr.mxu0 %v5337_v38  ;;  %v5888_v37 = vld [vmem:[%s11571_s16 + $0x58] sm:$0xff]  ;;  %v5887_v38 = vld [vmem:[%s11571_s16 + $0x50] sm:$0xff] }
0x10a1   : > { %5256 = vmatprep.subr.mxu1 %v5049_v25  ;;  %5431 = vmatpush2.msra.mxu0 %v5336_v39  ;;  %v5886_v39 = vld [vmem:[%s11571_s16 + $0x48] sm:$0xff] }
0x10a2   : > { %5257 = vmatpush2.msra.mxu1 %v5048_v28 }
0x10a3   : > { %5258 = vmatprep.subr.mxu1 %v5047_v40  ;;  %v5486_v40 = vld [vmem:[%s11570_s4 + $0x8] sm:$0xff] }
0x10a4   : > { %5259 = vmatpush2.msra.mxu1 %v5046_v46  ;;  %v5599_v46 = vld [vmem:[#allocation12 + $0x68] sm:$0xff] }
0x10a5   : > { %5260 = vmatprep.subr.mxu1 %v5045_v48 }
0x10a6   : > { %5261 = vmatpush2.msra.mxu1 %v5044_v56  ;;  %v5596_v56 = vld [vmem:[#allocation12 + $0x50] sm:$0xff] }
0x10a7   : > { %5262 = vmatprep.subr.mxu1 %v5043_v57  ;;  %v5488_v57 = vld [vmem:[%s11570_s4 + $0x18] sm:$0xff] }
0x10a8   : > { %5263 = vmatpush2.msra.mxu1 %v5042_v58  ;;  %v5594_v58 = vld [vmem:[#allocation12 + $0x40] sm:$0xff] }
0x10a9   : > { %5264 = vmatprep.subr.mxu1 %v5041_v59  ;;  %v5593_v59 = vld [vmem:[#allocation12 + $0x38] sm:$0xff] }
0x10aa   : > { %5265 = vmatpush2.msra.mxu1 %v5040_v51 }
0x10ab   : > { %5266 = vmatprep.subr.mxu1 %v5039_v61 }
0x10ac   : > { %5267 = vmatpush2.msra.mxu1 %v5038_v62  ;;  %v5590_v62 = vld [vmem:[#allocation12 + $0x20] sm:$0xff] }
0x10ad   : > { %5268 = vmatprep.subr.mxu1 %v5037_v63 }
0x10ae   : > { %5269 = vmatpush2.msra.mxu1 %v5036_v2  ;;  %v5587_v2 = vld [vmem:[#allocation12 + $0x8] sm:$0xff] }
0x10af   : > { %5270 = vmatprep.subr.mxu1 %v5035_v5  ;;  %v5908_v5 = vld [vmem:[%s11571_s16 + $0xf8] sm:$0xff] }
0x10b0   : > { %5271 = vmatpush2.msra.mxu1 %v5034_v7  ;;  %v5906_v7 = vld [vmem:[%s11571_s16 + $0xe8] sm:$0xff]  ;;  %5941 = vmatprep.subr.mxu0 %v5908_v5  ;;  %v5913_v5 = vld [vmem:[%s11571_s16 + $0x120] sm:$0xff] }
0x10b1   : > { %5272 = vmatprep.subr.mxu1 %v5033_v9  ;;  %v5904_v9 = vld [vmem:[%s11571_s16 + $0xd8] sm:$0xff] }
0x10b2   : > { %5273 = vmatpush2.msra.mxu1 %v5032_v11  ;;  %v5902_v11 = vld [vmem:[%s11571_s16 + $0xc8] sm:$0xff] }
0x10b3   : > { %5274 = vmatprep.subr.mxu1 %v5031_v16  ;;  %v5899_v16 = vld [vmem:[%s11571_s16 + $0xb0] sm:$0xff] }
0x10b4   : > { %5275 = vmatpush2.msra.mxu1 %v5030_v17  ;;  %v5898_v17 = vld [vmem:[%s11571_s16 + $0xa8] sm:$0xff] }
0x10b5   : > { %5276 = vmatprep.subr.mxu1 %v5029_v19  ;;  %v5896_v19 = vld [vmem:[%s11571_s16 + $0x98] sm:$0xff] }
0x10b6   : > { %5277 = vmatpush2.msra.mxu1 %v5028_v30  ;;  %v5894_v30 = vld [vmem:[%s11571_s16 + $0x88] sm:$0xff] }
0x10b7   : > { %9064 = vmatprep.subr.mxu1 %v10715_v34 }
0x1127   : > { %v4872_v4 = vpop.f32.mrf.mxu1 }
0x1129   : > { %v4874_v18 = vpop.f32.mrf.mxu1 }
0x112a   : > { %5278 = vmatprep.mubr.f32.mxu1 %v4874_v18  ;;  %v5884_v18 = vld [vmem:[%s11571_s16 + $0x38] sm:$0xff] }
0x112b   : > { %v4878_v21 = vpop.f32.mrf.mxu1  ;;  %5279 = vmatmul.mubr.f32.vlgmr.msra.gmra.mxu1 %v4872_v4  ;;  %v5885_v4 = vld [vmem:[%s11571_s16 + $0x40] sm:$0xff] }
0x112c   : > { %9065 = vmatpush3.msra.mxu1 %v10715_v34 }
0x112d   : > { %v4880_v22 = vpop.f32.mrf.mxu1  ;;  %5630 = vmatprep.subr.mxu1 %v5601_v20  ;;  %v5883_v20 = vld [vmem:[%s11571_s16 + $0x30] sm:$0xff] }
0x112e   : > { %5284 = vmatprep.mubr.f32.mxu1 %v4880_v22  ;;  %v5881_v22 = vld [vmem:[%s11571_s16 + $0x20] sm:$0xff] }
0x112f   : > { %v4884_v23 = vpop.f32.mrf.mxu1  ;;  %5285 = vmatmul.mubr.f32.gmra.mxu1 %v4878_v21  ;;  %v5882_v21 = vld [vmem:[%s11571_s16 + $0x28] sm:$0xff] }
0x1131   : > { %v4886_v24 = vpop.f32.mrf.mxu1 }
0x1132   : > { %5290 = vmatprep.mubr.f32.mxu1 %v4886_v24  ;;  %v5879_v24 = vld [vmem:[%s11571_s16 + $0x10] sm:$0xff] }
0x1133   : > { %v4890_v25 = vpop.f32.mrf.mxu1  ;;  %5291 = vmatmul.mubr.f32.gmra.mxu1 %v4884_v23  ;;  %v5880_v23 = vld [vmem:[%s11571_s16 + $0x18] sm:$0xff] }
0x1135   : > { %v4892_v26 = vpop.f32.mrf.mxu1 }
0x1136   : > { %5296 = vmatprep.mubr.f32.mxu1 %v4892_v26  ;;  %v5877_v26 = vld [vmem:[%s11571_s16] sm:$0xff] }
0x1137   : > { %v4973_v28 = vpop.f32.mrf.mxu1  ;;  %5297 = vmatmul.mubr.f32.gmra.mxu1 %v4890_v25  ;;  %v5878_v25 = vld [vmem:[%s11571_s16 + $0x8] sm:$0xff] }
0x1138   : > { %9066 = vmatprep.mubr.msk.f32.mxu1 %vm2108_vm6, %v5485_v27  ;;  %v5940_v27 = vld [vmem:[%s11571_s16 + $0x1f8] sm:$0xff] }
0x1139   : > { %v4975_v34 = vpop.f32.mrf.mxu1 }
0x113a   : > { %5432 = vmatprep.mubr.f32.mxu0 %v4975_v34  ;;  %v5937_v34 = vld [vmem:[%s11571_s16 + $0x1e0] sm:$0xff] }
0x113b   : > { %v4979_v48 = vpop.f32.mrf.mxu1  ;;  %5433 = vmatmul.mubr.f32.vlgmr.msra.gmra.mxu0 %v4973_v28  ;;  %9067 = vmatmul.mubr.msk.f32.vlgmr.msra.gmra.mxu1 %vm2108_vm6, %v5486_v40  ;;  %v5939_v28 = vld [vmem:[%s11571_s16 + $0x1f0] sm:$0xff]  ;;  %v5938_v40 = vld [vmem:[%s11571_s16 + $0x1e8] sm:$0xff] }
0x113c   : > { %5631 = vmatpush1.msra.mxu1 %v5600_v41  ;;  %9069 = vmatprep.mubr.msk.f32.mxu1 %vm2108_vm6, %v5487_v45  ;;  %v5936_v41 = vld [vmem:[%s11571_s16 + $0x1d8] sm:$0xff]  ;;  %v5935_v45 = vld [vmem:[%s11571_s16 + $0x1d0] sm:$0xff] }
0x113d   : > { %5632 = vmatprep.subr.mxu1 %v5599_v46  ;;  %v4981_v55 = vpop.f32.mrf.mxu1  ;;  %5942 = vmatpush1.msra.mxu0 %v5907_v6  ;;  %v5934_v46 = vld [vmem:[%s11571_s16 + $0x1c8] sm:$0xff] }
0x113e   : > { %5633 = vmatpush1.msra.mxu1 %v5598_v49  ;;  %5438 = vmatprep.mubr.f32.mxu0 %v4981_v55  ;;  %v5932_v49 = vld [vmem:[%s11571_s16 + $0x1b8] sm:$0xff]  ;;  %v5930_v55 = vld [vmem:[%s11571_s16 + $0x1a8] sm:$0xff] }
0x113f   : > { %5634 = vmatprep.subr.mxu1 %v5597_v50  ;;  %v4985_v43 = vpop.f32.mrf.mxu1  ;;  %5439 = vmatmul.mubr.f32.gmra.mxu0 %v4979_v48  ;;  %v5933_v48 = vld [vmem:[%s11571_s16 + $0x1c0] sm:$0xff]  ;;  %v5931_v50 = vld [vmem:[%s11571_s16 + $0x1b0] sm:$0xff] }
0x1140   : > { %5635 = vmatpush1.msra.mxu1 %v5596_v56  ;;  %5943 = vmatprep.subr.mxu0 %v5906_v7  ;;  %v5929_v56 = vld [vmem:[%s11571_s16 + $0x1a0] sm:$0xff] }
0x1141   : > { %5636 = vmatprep.subr.mxu1 %v5595_v42  ;;  %v4987_v51 = vpop.f32.mrf.mxu1  ;;  %9070 = vmatmul.mubr.msk.f32.gmra.mxu1 %vm2108_vm6, %v5488_v57  ;;  %v5928_v42 = vld [vmem:[%s11571_s16 + $0x198] sm:$0xff]  ;;  %v5927_v57 = vld [vmem:[%s11571_s16 + $0x190] sm:$0xff] }
0x1142   : > { %5637 = vmatpush1.msra.mxu1 %v5594_v58  ;;  %5444 = vmatprep.mubr.f32.mxu0 %v4987_v51  ;;  %v5925_v58 = vld [vmem:[%s11571_s16 + $0x180] sm:$0xff]  ;;  %v5923_v51 = vld [vmem:[%s11571_s16 + $0x170] sm:$0xff] }
0x1143   : > { %5638 = vmatprep.subr.mxu1 %v5593_v59  ;;  %v4991_v61 = vpop.f32.mrf.mxu1  ;;  %5445 = vmatmul.mubr.f32.gmra.mxu0 %v4985_v43  ;;  %v5926_v43 = vld [vmem:[%s11571_s16 + $0x188] sm:$0xff]  ;;  %v5924_v59 = vld [vmem:[%s11571_s16 + $0x178] sm:$0xff] }
0x1144   : > { %5639 = vmatpush1.msra.mxu1 %v5592_v60  ;;  %5678 = vmatprep.mubr.f32.mxu1 %v10080_v0  ;;  %v5922_v60 = vld [vmem:[%s11571_s16 + $0x168] sm:$0xff] }
0x1145   : > { %5640 = vmatprep.subr.mxu1 %v5591_v52  ;;  %v4993_v63 = vpop.f32.mrf.mxu1  ;;  %5944 = vmatpush1.msra.mxu0 %v5905_v8  ;;  %v5921_v52 = vld [vmem:[%s11571_s16 + $0x160] sm:$0xff] }
0x1146   : > { %5641 = vmatpush1.msra.mxu1 %v5590_v62  ;;  %5450 = vmatprep.mubr.f32.mxu0 %v4993_v63  ;;  %v5919_v62 = vld [vmem:[%s11571_s16 + $0x150] sm:$0xff]  ;;  %v5917_v63 = vld [vmem:[%s11571_s16 + $0x140] sm:$0xff] }
0x1147   : > { %5642 = vmatprep.subr.mxu1 %v5589_v54  ;;  %5451 = vmatmul.mubr.f32.gmra.mxu0 %v4991_v61  ;;  %v5920_v61 = vld [vmem:[%s11571_s16 + $0x158] sm:$0xff]  ;;  %v5918_v54 = vld [vmem:[%s11571_s16 + $0x148] sm:$0xff] }
0x1148   : > { %5643 = vmatpush1.msra.mxu1 %v5588_v1  ;;  %5945 = vmatprep.subr.mxu0 %v5904_v9  ;;  %v5916_v1 = vld [vmem:[%s11571_s16 + $0x138] sm:$0xff] }
0x1149   : > { %5644 = vmatprep.subr.mxu1 %v5587_v2  ;;  %5946 = vmatpush1.msra.mxu0 %v5903_v10  ;;  %v5915_v2 = vld [vmem:[%s11571_s16 + $0x130] sm:$0xff] }
0x114a   : > { %5645 = vmatpush1.msra.mxu1 %v5586_v3  ;;  %5947 = vmatprep.subr.mxu0 %v5902_v11  ;;  %v5914_v3 = vld [vmem:[%s11571_s16 + $0x128] sm:$0xff] }
0x114b   : > { %9072 = vmatprep.subr.mxu1 %v10921_v44  ;;  %5948 = vmatpush1.msra.mxu0 %v5901_v12 }
0x114c   : > { %5949 = vmatprep.subr.mxu0 %v5900_v13 }
0x114d   : > { %5950 = vmatpush1.msra.mxu0 %v5899_v16 }
0x114e   : > { %5951 = vmatprep.subr.mxu0 %v5898_v17 }
0x114f   : > { %5952 = vmatpush1.msra.mxu0 %v5897_v53 }
0x1150   : > { %5953 = vmatprep.subr.mxu0 %v5896_v19  ;;  %v9370_v19 = vld [vmem:[#allocation10 + $0xf8] sm:$0xff] }
0x1151   : > { %5954 = vmatpush1.msra.mxu0 %v5895_v29 }
0x1152   : > { %5955 = vmatprep.subr.mxu0 %v5894_v30  ;;  %v9372_v30 = vld [vmem:[%s11567_s26 + $0x8] sm:$0xff] }
0x1153   : > { %5956 = vmatpush1.msra.mxu0 %v5893_v31  ;;  %v9374_v31 = vld [vmem:[#allocation10 + $0xf0] sm:$0xff] }
0x1154   : > { %5957 = vmatprep.subr.mxu0 %v5892_v32  ;;  %v9375_v32 = vld [vmem:[#allocation10 + $0xe8] sm:$0xff] }
0x1155   : > { %5958 = vmatpush1.msra.mxu0 %v5891_v33  ;;  %v9376_v33 = vld [vmem:[#allocation10 + $0xe0] sm:$0xff] }
0x1156   : > { %5959 = vmatprep.subr.mxu0 %v5890_v35  ;;  %v9377_v35 = vld [vmem:[%s11567_s26 + $0x18] sm:$0xff] }
0x1157   : > { %5960 = vmatpush1.msra.mxu0 %v5889_v36  ;;  %v9378_v36 = vld [vmem:[#allocation10 + $0xd8] sm:$0xff] }
0x1158   : > { %5961 = vmatprep.subr.mxu0 %v5888_v37  ;;  %v9379_v37 = vld [vmem:[#allocation10 + $0xd0] sm:$0xff] }
0x1159   : > { %5962 = vmatpush1.msra.mxu0 %v5887_v38  ;;  %v9380_v38 = vld [vmem:[#allocation10 + $0xc8] sm:$0xff] }
0x115a   : > { %5963 = vmatprep.subr.mxu0 %v5886_v39  ;;  %v9381_v39 = vld [vmem:[#allocation10 + $0xc0] sm:$0xff] }
0x115b   : > { %5964 = vmatpush1.msra.mxu0 %v5885_v4  ;;  %v9382_v4 = vld [vmem:[#allocation10 + $0xb8] sm:$0xff] }
0x115c   : > { %5965 = vmatprep.subr.mxu0 %v5884_v18  ;;  %v9383_v18 = vld [vmem:[#allocation10 + $0xb0] sm:$0xff] }
0x115d   : > { %5966 = vmatpush1.msra.mxu0 %v5883_v20  ;;  %v9384_v20 = vld [vmem:[#allocation10 + $0xa8] sm:$0xff] }
0x115e   : > { %5967 = vmatprep.subr.mxu0 %v5882_v21  ;;  %v9385_v21 = vld [vmem:[#allocation10 + $0xa0] sm:$0xff] }
0x115f   : > { %5968 = vmatpush1.msra.mxu0 %v5881_v22  ;;  %v9386_v22 = vld [vmem:[#allocation10 + $0x98] sm:$0xff] }
0x1160   : > { %5969 = vmatprep.subr.mxu0 %v5880_v23  ;;  %v9387_v23 = vld [vmem:[#allocation10 + $0x90] sm:$0xff] }
0x1161   : > { %5970 = vmatpush1.msra.mxu0 %v5879_v24  ;;  %v9388_v24 = vld [vmem:[#allocation10 + $0x88] sm:$0xff] }
0x1162   : > { %5971 = vmatprep.subr.mxu0 %v5878_v25  ;;  %v9389_v25 = vld [vmem:[#allocation10 + $0x80] sm:$0xff] }
0x1163   : > { %5972 = vmatpush1.msra.mxu0 %v5877_v26  ;;  %v9390_v26 = vld [vmem:[#allocation10 + $0x78] sm:$0xff] }
0x1164   : > { %5973 = vmatprep.subr.mxu0 %v5940_v27  ;;  %v9391_v27 = vld [vmem:[#allocation10 + $0x70] sm:$0xff] }
0x1165   : > { %5974 = vmatpush2.msra.mxu0 %v5939_v28  ;;  %v9392_v28 = vld [vmem:[#allocation10 + $0x68] sm:$0xff] }
0x1166   : > { %5975 = vmatprep.subr.mxu0 %v5938_v40  ;;  %v9393_v40 = vld [vmem:[#allocation10 + $0x60] sm:$0xff] }
0x1167   : > { %5976 = vmatpush2.msra.mxu0 %v5937_v34  ;;  %v9394_v34 = vld [vmem:[#allocation10 + $0x58] sm:$0xff] }
0x1168   : > { %5977 = vmatprep.subr.mxu0 %v5936_v41  ;;  %v9395_v41 = vld [vmem:[#allocation10 + $0x50] sm:$0xff] }
0x1169   : > { %5978 = vmatpush2.msra.mxu0 %v5935_v45  ;;  %v9396_v45 = vld [vmem:[#allocation10 + $0x48] sm:$0xff] }
0x116a   : > { %5979 = vmatprep.subr.mxu0 %v5934_v46  ;;  %v9397_v46 = vld [vmem:[#allocation10 + $0x40] sm:$0xff] }
0x116b   : > { %5980 = vmatpush2.msra.mxu0 %v5933_v48  ;;  %v9398_v48 = vld [vmem:[#allocation10 + $0x38] sm:$0xff] }
0x116c   : > { %5981 = vmatprep.subr.mxu0 %v5932_v49  ;;  %v9399_v49 = vld [vmem:[#allocation10 + $0x30] sm:$0xff] }
0x116d   : > { %5982 = vmatpush2.msra.mxu0 %v5931_v50  ;;  %v9400_v50 = vld [vmem:[#allocation10 + $0x28] sm:$0xff] }
0x116e   : > { %5983 = vmatprep.subr.mxu0 %v5930_v55  ;;  %v9401_v55 = vld [vmem:[#allocation10 + $0x20] sm:$0xff] }
0x116f   : > { %5984 = vmatpush2.msra.mxu0 %v5929_v56  ;;  %v9402_v56 = vld [vmem:[#allocation10 + $0x18] sm:$0xff] }
0x1170   : > { %5985 = vmatprep.subr.mxu0 %v5928_v42  ;;  %v9403_v42 = vld [vmem:[#allocation10 + $0x10] sm:$0xff] }
0x1171   : > { %5986 = vmatpush2.msra.mxu0 %v5927_v57  ;;  %v9404_v57 = vld [vmem:[#allocation10 + $0x8] sm:$0xff] }
0x1172   : > { %5987 = vmatprep.subr.mxu0 %v5926_v43  ;;  %v9405_v43 = vld [vmem:[#allocation10] sm:$0xff] }
0x1173   : > { %5988 = vmatpush2.msra.mxu0 %v5925_v58  ;;  %v5912_v58 = vld [vmem:[%s11571_s16 + $0x118] sm:$0xff] }
0x1174   : > { %5989 = vmatprep.subr.mxu0 %v5924_v59  ;;  %v5911_v59 = vld [vmem:[%s11571_s16 + $0x110] sm:$0xff] }
0x1175   : > { %5990 = vmatpush2.msra.mxu0 %v5923_v51  ;;  %v5910_v51 = vld [vmem:[%s11571_s16 + $0x108] sm:$0xff] }
0x1176   : > { %5991 = vmatprep.subr.mxu0 %v5922_v60  ;;  %v5909_v60 = vld [vmem:[%s11571_s16 + $0x100] sm:$0xff] }
0x1177   : > { %5992 = vmatpush2.msra.mxu0 %v5921_v52  ;;  %v6089_v52 = vld [vmem:[%s11572_s18 + $0xf8] sm:$0xff] }
0x1178   : > { %5993 = vmatprep.subr.mxu0 %v5920_v61 }
0x1179   : > { %5994 = vmatpush2.msra.mxu0 %v5919_v62 }
0x117a   : > { %5995 = vmatprep.subr.mxu0 %v5918_v54 }
0x117b   : > { %5996 = vmatpush2.msra.mxu0 %v5917_v63 }
0x117c   : > { %5997 = vmatprep.subr.mxu0 %v5916_v1 }
0x117d   : > { %5998 = vmatpush2.msra.mxu0 %v5915_v2 }
0x117e   : > { %5999 = vmatprep.subr.mxu0 %v5914_v3 }
0x117f   : > { %6000 = vmatpush2.msra.mxu0 %v5913_v5 }
0x1180   : > { %6001 = vmatprep.subr.mxu0 %v5912_v58  ;;  %v6116_v58 = vld [vmem:[%s11572_s18 + $0x1d0] sm:$0xff] }
0x1181   : > { %6002 = vmatpush2.msra.mxu0 %v5911_v59  ;;  %v6115_v59 = vld [vmem:[%s11572_s18 + $0x1c8] sm:$0xff] }
0x1182   : > { %6003 = vmatprep.subr.mxu0 %v5910_v51  ;;  %v6114_v51 = vld [vmem:[%s11572_s18 + $0x1c0] sm:$0xff] }
0x1183   : > { %6004 = vmatpush2.msra.mxu0 %v5909_v60  ;;  %v6113_v60 = vld [vmem:[%s11572_s18 + $0x1b8] sm:$0xff] }
0x11eb   : > { %v11081_v6 = vpop.f32.mrf.mxu1 }
0x11ed   : > { %v11083_v7 = vpop.f32.mrf.mxu1 }
0x11ef   : > { %v11085_v8 = vpop.f32.mrf.mxu1 }
0x11f1   : > { %v11087_v9 = vpop.f32.mrf.mxu1 }
0x11f3   : > { %v11089_v10 = vpop.f32.mrf.mxu1 }
0x11f5   : > { %v11091_v11 = vpop.f32.mrf.mxu1 }
0x11f7   : > { %v11093_v12 = vpop.f32.mrf.mxu1 }
0x11f9   : > { %v11095_v13 = vpop.f32.mrf.mxu1 }
0x11fb   : > { %v9068_v16 = vpop.f32.mrf.mxu1 }
0x11fd   : > { %v5567_v17 = vpop.f32.mrf.mxu1 }
0x11fe   : > { %7948 = vmatmul.mubr.msk.f32.vlgmr.msra.gmra.mxu1 %vm2272_vm5, %v5567_v17  ;;  %v6088_v17 = vld [vmem:[%s11572_s18 + $0xf0] sm:$0xff] }
0x11ff   : > { %9073 = vmatpush3.msra.mxu1 %v10921_v44  ;;  %5684 = vmatprep.mubr.f32.mxu1 %v10080_v0  ;;  %v9371_v44 = vld [vmem:[%s11567_s26] sm:$0xff] }
0x1200   : > { %9074 = vmatprep.subr.mxu1 %v10924_v47 }
0x1201   : > { %9075 = vmatpush3.msra.mxu1 %v10924_v47  ;;  %v9071_v53 = vpop.f32.mrf.mxu1  ;;  %v9373_v47 = vld [vmem:[%s11567_s26 + $0x10] sm:$0xff] }
0x1202   : > { %7949 = vmatmul.mubr.msk.f32.gmra.mxu1 %vm2272_vm5, %v9068_v16  ;;  %5788 = vmatprep.subr.mxu1 %v9370_v19  ;;  %v6087_v19 = vld [vmem:[%s11572_s18 + $0xe8] sm:$0xff] }
0x1203   : > { %5690 = vmatprep.mubr.f32.mxu1 %v10080_v0  ;;  %v5577_v29 = vpop.f32.mrf.mxu1 }
0x1206   : > { %7950 = vmatmul.mubr.msk.f32.gmra.mxu1 %vm2272_vm5, %v5577_v29  ;;  %v6086_v29 = vld [vmem:[%s11572_s18 + $0xe0] sm:$0xff] }
0x1207   : > { %5696 = vmatprep.mubr.f32.mxu1 %v10080_v0 }
0x120a   : > { %7951 = vmatmul.mubr.msk.f32.gmra.mxu1 %vm2272_vm5, %v9071_v53 }
0x120b   : > { %9076 = vmatprep.mubr.msk.f32.mxu1 %vm1613_vm1, %v9371_v44  ;;  %v6085_v44 = vld [vmem:[%s11572_s18 + $0xd8] sm:$0xff] }
0x120e   : > { %9077 = vmatmul.mubr.msk.f32.vlgmr.msra.gmra.mxu1 %vm1613_vm1, %v9372_v30  ;;  %v6084_v30 = vld [vmem:[%s11572_s18 + $0xd0] sm:$0xff] }
0x120f   : > { %9079 = vmatprep.mubr.msk.f32.mxu1 %vm1613_vm1, %v9373_v47  ;;  %5789 = vmatpush1.msra.mxu1 %v9374_v31  ;;  %v6083_v31 = vld [vmem:[%s11572_s18 + $0xc8] sm:$0xff] }
0x1210   : > { %5790 = vmatprep.subr.mxu1 %v9375_v32  ;;  %v6082_v32 = vld [vmem:[%s11572_s18 + $0xc0] sm:$0xff] }
0x1211   : > { %5791 = vmatpush1.msra.mxu1 %v9376_v33  ;;  %v6081_v33 = vld [vmem:[%s11572_s18 + $0xb8] sm:$0xff] }
0x1212   : > { %9080 = vmatmul.mubr.msk.f32.gmra.mxu1 %vm1613_vm1, %v9377_v35  ;;  %5792 = vmatprep.subr.mxu1 %v9378_v36  ;;  %v6080_v35 = vld [vmem:[%s11572_s18 + $0xb0] sm:$0xff] }
0x1213   : > { %5793 = vmatpush1.msra.mxu1 %v9379_v37  ;;  %5852 = vmatprep.mubr.f32.mxu1 %v10080_v0  ;;  %v6079_v37 = vld [vmem:[%s11572_s18 + $0xa8] sm:$0xff] }
0x1214   : > { %5794 = vmatprep.subr.mxu1 %v9380_v38  ;;  %v6078_v38 = vld [vmem:[%s11572_s18 + $0xa0] sm:$0xff] }
0x1215   : > { %5795 = vmatpush1.msra.mxu1 %v9381_v39  ;;  %v6077_v39 = vld [vmem:[%s11572_s18 + $0x98] sm:$0xff] }
0x1216   : > { %5796 = vmatprep.subr.mxu1 %v9382_v4  ;;  %v6076_v4 = vld [vmem:[%s11572_s18 + $0x90] sm:$0xff] }
0x1217   : > { %5797 = vmatpush1.msra.mxu1 %v9383_v18  ;;  %v6075_v18 = vld [vmem:[%s11572_s18 + $0x88] sm:$0xff] }
0x1218   : > { %5798 = vmatprep.subr.mxu1 %v9384_v20  ;;  %v6074_v20 = vld [vmem:[%s11572_s18 + $0x80] sm:$0xff] }
0x1219   : > { %5799 = vmatpush1.msra.mxu1 %v9385_v21  ;;  %v6073_v21 = vld [vmem:[%s11572_s18 + $0x78] sm:$0xff] }
0x121a   : > { %5800 = vmatprep.subr.mxu1 %v9386_v22  ;;  %v6072_v22 = vld [vmem:[%s11572_s18 + $0x70] sm:$0xff] }
0x121b   : > { %5801 = vmatpush1.msra.mxu1 %v9387_v23  ;;  %v6071_v23 = vld [vmem:[%s11572_s18 + $0x68] sm:$0xff] }
0x121c   : > { %5802 = vmatprep.subr.mxu1 %v9388_v24  ;;  %v6070_v24 = vld [vmem:[%s11572_s18 + $0x60] sm:$0xff] }
0x121d   : > { %5803 = vmatpush1.msra.mxu1 %v9389_v25  ;;  %v6069_v25 = vld [vmem:[%s11572_s18 + $0x58] sm:$0xff] }
0x121e   : > { %5804 = vmatprep.subr.mxu1 %v9390_v26  ;;  %v6068_v26 = vld [vmem:[%s11572_s18 + $0x50] sm:$0xff] }
0x121f   : > { %5805 = vmatpush1.msra.mxu1 %v9391_v27  ;;  %v6067_v27 = vld [vmem:[%s11572_s18 + $0x48] sm:$0xff] }
0x1220   : > { %5806 = vmatprep.subr.mxu1 %v9392_v28  ;;  %v6066_v28 = vld [vmem:[%s11572_s18 + $0x40] sm:$0xff] }
0x1221   : > { %5807 = vmatpush1.msra.mxu1 %v9393_v40  ;;  %v6065_v40 = vld [vmem:[%s11572_s18 + $0x38] sm:$0xff] }
0x1222   : > { %5808 = vmatprep.subr.mxu1 %v9394_v34  ;;  %v6064_v34 = vld [vmem:[%s11572_s18 + $0x30] sm:$0xff] }
0x1223   : > { %5809 = vmatpush1.msra.mxu1 %v9395_v41  ;;  %v6063_v41 = vld [vmem:[%s11572_s18 + $0x28] sm:$0xff] }
0x1224   : > { %5810 = vmatprep.subr.mxu1 %v9396_v45  ;;  %v6062_v45 = vld [vmem:[%s11572_s18 + $0x20] sm:$0xff] }
0x1225   : > { %5811 = vmatpush1.msra.mxu1 %v9397_v46  ;;  %v6061_v46 = vld [vmem:[%s11572_s18 + $0x18] sm:$0xff] }
0x1226   : > { %5812 = vmatprep.subr.mxu1 %v9398_v48  ;;  %v6060_v48 = vld [vmem:[%s11572_s18 + $0x10] sm:$0xff] }
0x1227   : > { %5813 = vmatpush1.msra.mxu1 %v9399_v49  ;;  %v6059_v49 = vld [vmem:[%s11572_s18 + $0x8] sm:$0xff] }
0x1228   : > { %5814 = vmatprep.subr.mxu1 %v9400_v50  ;;  %v6058_v50 = vld [vmem:[%s11572_s18] sm:$0xff] }
0x1229   : > { %5815 = vmatpush1.msra.mxu1 %v9401_v55  ;;  %v6121_v55 = vld [vmem:[%s11572_s18 + $0x1f8] sm:$0xff] }
0x122a   : > { %5816 = vmatprep.subr.mxu1 %v9402_v56  ;;  %v6120_v56 = vld [vmem:[%s11572_s18 + $0x1f0] sm:$0xff] }
0x122b   : > { %5817 = vmatpush1.msra.mxu1 %v9403_v42  ;;  %v6119_v42 = vld [vmem:[%s11572_s18 + $0x1e8] sm:$0xff] }
0x122c   : > { %5818 = vmatprep.subr.mxu1 %v9404_v57  ;;  %v6118_v57 = vld [vmem:[%s11572_s18 + $0x1e0] sm:$0xff] }
0x122d   : > { %5819 = vmatpush1.msra.mxu1 %v9405_v43  ;;  %v6117_v43 = vld [vmem:[%s11572_s18 + $0x1d8] sm:$0xff] }
0x122e   : > { %6122 = vmatprep.subr.mxu1 %v6089_v52  ;;  %v6112_v52 = vld [vmem:[%s11572_s18 + $0x1b0] sm:$0xff] }
0x12be   : > { %v5680_v61 = vpop.f32.mrf.mxu1 }
0x12c0   : > { %v5682_v62 = vpop.f32.mrf.mxu1 }
0x12c1   : > { %6005 = vmatprep.mubr.f32.mxu0 %v5682_v62  ;;  %v6110_v62 = vld [vmem:[%s11572_s18 + $0x1a0] sm:$0xff] }
0x12c2   : > { %v5686_v54 = vpop.f32.mrf.mxu1  ;;  %6006 = vmatmul.mubr.f32.vlgmr.msra.gmra.mxu0 %v5680_v61  ;;  %v6111_v61 = vld [vmem:[%s11572_s18 + $0x1a8] sm:$0xff] }
0x12c4   : > { %v5688_v63 = vpop.f32.mrf.mxu1 }
0x12c5   : > { %6011 = vmatprep.mubr.f32.mxu0 %v5688_v63  ;;  %v6108_v63 = vld [vmem:[%s11572_s18 + $0x190] sm:$0xff] }
0x12c6   : > { %v5692_v1 = vpop.f32.mrf.mxu1  ;;  %6012 = vmatmul.mubr.f32.gmra.mxu0 %v5686_v54  ;;  %v6109_v54 = vld [vmem:[%s11572_s18 + $0x198] sm:$0xff] }
0x12c8   : > { %v5694_v2 = vpop.f32.mrf.mxu1 }
0x12c9   : > { %6017 = vmatprep.mubr.f32.mxu0 %v5694_v2  ;;  %v6106_v2 = vld [vmem:[%s11572_s18 + $0x180] sm:$0xff] }
0x12ca   : > { %v5698_v3 = vpop.f32.mrf.mxu1  ;;  %6018 = vmatmul.mubr.f32.gmra.mxu0 %v5692_v1  ;;  %v6107_v1 = vld [vmem:[%s11572_s18 + $0x188] sm:$0xff] }
0x12cc   : > { %v5700_v5 = vpop.f32.mrf.mxu1 }
0x12cd   : > { %6023 = vmatprep.mubr.f32.mxu0 %v5700_v5  ;;  %v6104_v5 = vld [vmem:[%s11572_s18 + $0x170] sm:$0xff] }
0x12ce   : > { %v9078_v16 = vpop.f32.mrf.mxu1  ;;  %6024 = vmatmul.mubr.f32.gmra.mxu0 %v5698_v3  ;;  %v6105_v3 = vld [vmem:[%s11572_s18 + $0x178] sm:$0xff] }
0x12cf   : > { %6311 = vmatprep.mubr.f32.mxu0 %v10080_v0 }
0x12d0   : > { %v5769_v53 = vpop.f32.mrf.mxu1 }
0x12d1   : > { %5853 = vmatmul.mubr.f32.vlgmr.msra.gmra.mxu1 %v5769_v53  ;;  %v6101_v53 = vld [vmem:[%s11572_s18 + $0x158] sm:$0xff] }
0x12d2   : > { %5858 = vmatprep.mubr.f32.mxu1 %v10080_v0  ;;  %6123 = vmatpush1.msra.mxu1 %v6088_v17  ;;  %v9081_v47 = vpop.f32.mrf.mxu1  ;;  %v6102_v17 = vld [vmem:[%s11572_s18 + $0x160] sm:$0xff] }
0x12d3   : > { %6124 = vmatprep.subr.mxu1 %v6087_v19  ;;  %v6100_v19 = vld [vmem:[%s11572_s18 + $0x150] sm:$0xff] }
0x12d4   : > { %6125 = vmatpush1.msra.mxu1 %v6086_v29  ;;  %v5779_v36 = vpop.f32.mrf.mxu1  ;;  %v6099_v29 = vld [vmem:[%s11572_s18 + $0x148] sm:$0xff] }
0x12d5   : > { %5859 = vmatmul.mubr.f32.gmra.mxu1 %v9078_v16  ;;  %6126 = vmatprep.subr.mxu1 %v6085_v44  ;;  %v6103_v16 = vld [vmem:[%s11572_s18 + $0x168] sm:$0xff]  ;;  %v6098_v44 = vld [vmem:[%s11572_s18 + $0x140] sm:$0xff] }
0x12d6   : > { %5864 = vmatprep.mubr.f32.mxu1 %v10080_v0  ;;  %6127 = vmatpush1.msra.mxu1 %v6084_v30  ;;  %v6097_v30 = vld [vmem:[%s11572_s18 + $0x138] sm:$0xff] }
0x12d7   : > { %6128 = vmatprep.subr.mxu1 %v6083_v31  ;;  %v6095_v31 = vld [vmem:[%s11572_s18 + $0x128] sm:$0xff] }
0x12d8   : > { %6129 = vmatpush1.msra.mxu1 %v6082_v32  ;;  %v6094_v32 = vld [vmem:[%s11572_s18 + $0x120] sm:$0xff] }
0x12d9   : > { %5865 = vmatmul.mubr.f32.gmra.mxu1 %v5779_v36  ;;  %6130 = vmatprep.subr.mxu1 %v6081_v33  ;;  %v6093_v33 = vld [vmem:[%s11572_s18 + $0x118] sm:$0xff]  ;;  %v6091_v36 = vld [vmem:[%s11572_s18 + $0x108] sm:$0xff] }
0x12da   : > { %5870 = vmatprep.mubr.f32.mxu1 %v10080_v0  ;;  %6131 = vmatpush1.msra.mxu1 %v6080_v35  ;;  %v6092_v35 = vld [vmem:[%s11572_s18 + $0x110] sm:$0xff] }
0x12db   : > { %6132 = vmatprep.subr.mxu1 %v6079_v37  ;;  %v6090_v37 = vld [vmem:[%s11572_s18 + $0x100] sm:$0xff] }
0x12dc   : > { %6133 = vmatpush1.msra.mxu1 %v6078_v38  ;;  %v6521_v38 = vld [vmem:[#allocation28 + $0x2f8] sm:$0xff] }
0x12dd   : > { %5871 = vmatmul.mubr.f32.gmra.mxu1 %v9081_v47  ;;  %6134 = vmatprep.subr.mxu1 %v6077_v39  ;;  %v6096_v47 = vld [vmem:[%s11572_s18 + $0x130] sm:$0xff] }
0x12de   : > { %6135 = vmatpush1.msra.mxu1 %v6076_v4 }
0x12df   : > { %6136 = vmatprep.subr.mxu1 %v6075_v18  ;;  %v6520_v18 = vld [vmem:[#allocation28 + $0x2f0] sm:$0xff] }
0x12e0   : > { %6137 = vmatpush1.msra.mxu1 %v6074_v20  ;;  %v6519_v20 = vld [vmem:[#allocation28 + $0x2e8] sm:$0xff] }
0x12e1   : > { %6138 = vmatprep.subr.mxu1 %v6073_v21 }
0x12e2   : > { %6139 = vmatpush1.msra.mxu1 %v6072_v22  ;;  %v6518_v22 = vld [vmem:[#allocation28 + $0x2e0] sm:$0xff] }
0x12e3   : > { %6140 = vmatprep.subr.mxu1 %v6071_v23  ;;  %v6517_v23 = vld [vmem:[#allocation28 + $0x2d8] sm:$0xff] }
0x12e4   : > { %6141 = vmatpush1.msra.mxu1 %v6070_v24 }
0x12e5   : > { %6142 = vmatprep.subr.mxu1 %v6069_v25  ;;  %v6516_v25 = vld [vmem:[#allocation28 + $0x2d0] sm:$0xff] }
0x12e6   : > { %6143 = vmatpush1.msra.mxu1 %v6068_v26  ;;  %v6515_v26 = vld [vmem:[#allocation28 + $0x2c8] sm:$0xff] }
0x12e7   : > { %6144 = vmatprep.subr.mxu1 %v6067_v27 }
0x12e8   : > { %6145 = vmatpush1.msra.mxu1 %v6066_v28  ;;  %v6514_v28 = vld [vmem:[#allocation28 + $0x2c0] sm:$0xff] }
0x12e9   : > { %6146 = vmatprep.subr.mxu1 %v6065_v40  ;;  %v6513_v40 = vld [vmem:[#allocation28 + $0x2b8] sm:$0xff] }
0x12ea   : > { %6147 = vmatpush1.msra.mxu1 %v6064_v34 }
0x12eb   : > { %6148 = vmatprep.subr.mxu1 %v6063_v41  ;;  %v6512_v41 = vld [vmem:[#allocation28 + $0x2b0] sm:$0xff] }
0x12ec   : > { %6149 = vmatpush1.msra.mxu1 %v6062_v45  ;;  %v6511_v45 = vld [vmem:[#allocation28 + $0x2a8] sm:$0xff] }
0x12ed   : > { %6150 = vmatprep.subr.mxu1 %v6061_v46 }
0x12ee   : > { %6151 = vmatpush1.msra.mxu1 %v6060_v48  ;;  %v6510_v48 = vld [vmem:[#allocation28 + $0x2a0] sm:$0xff] }
0x12ef   : > { %6152 = vmatprep.subr.mxu1 %v6059_v49  ;;  %v6509_v49 = vld [vmem:[#allocation28 + $0x298] sm:$0xff] }
0x12f0   : > { %6153 = vmatpush1.msra.mxu1 %v6058_v50 }
0x12f1   : > { %6154 = vmatprep.subr.mxu1 %v6121_v55  ;;  %v6508_v55 = vld [vmem:[#allocation28 + $0x290] sm:$0xff] }
0x12f2   : > { %6155 = vmatpush2.msra.mxu1 %v6120_v56  ;;  %v6507_v56 = vld [vmem:[#allocation28 + $0x288] sm:$0xff] }
0x12f3   : > { %6156 = vmatprep.subr.mxu1 %v6119_v42  ;;  %v6506_v42 = vld [vmem:[#allocation28 + $0x280] sm:$0xff] }
0x12f4   : > { %6157 = vmatpush2.msra.mxu1 %v6118_v57  ;;  %v6505_v57 = vld [vmem:[#allocation28 + $0x278] sm:$0xff] }
0x12f5   : > { %6158 = vmatprep.subr.mxu1 %v6117_v43  ;;  %v6504_v43 = vld [vmem:[#allocation28 + $0x270] sm:$0xff] }
0x12f6   : > { %6159 = vmatpush2.msra.mxu1 %v6116_v58  ;;  %v6503_v58 = vld [vmem:[#allocation28 + $0x268] sm:$0xff] }
0x12f7   : > { %6160 = vmatprep.subr.mxu1 %v6115_v59  ;;  %v6502_v59 = vld [vmem:[#allocation28 + $0x260] sm:$0xff] }
0x12f8   : > { %6161 = vmatpush2.msra.mxu1 %v6114_v51  ;;  %v6501_v51 = vld [vmem:[#allocation28 + $0x258] sm:$0xff] }
0x12f9   : > { %6162 = vmatprep.subr.mxu1 %v6113_v60  ;;  %v6500_v60 = vld [vmem:[#allocation28 + $0x250] sm:$0xff] }
0x12fa   : > { %6163 = vmatpush2.msra.mxu1 %v6112_v52  ;;  %v6499_v52 = vld [vmem:[#allocation28 + $0x248] sm:$0xff] }
0x12fb   : > { %6164 = vmatprep.subr.mxu1 %v6111_v61  ;;  %v6498_v61 = vld [vmem:[#allocation28 + $0x240] sm:$0xff] }
0x12fc   : > { %6165 = vmatpush2.msra.mxu1 %v6110_v62  ;;  %v6497_v62 = vld [vmem:[#allocation28 + $0x238] sm:$0xff] }
0x12fd   : > { %6166 = vmatprep.subr.mxu1 %v6109_v54  ;;  %v6496_v54 = vld [vmem:[#allocation28 + $0x230] sm:$0xff] }
0x12fe   : > { %6167 = vmatpush2.msra.mxu1 %v6108_v63  ;;  %v6495_v63 = vld [vmem:[#allocation28 + $0x228] sm:$0xff] }
0x12ff   : > { %6168 = vmatprep.subr.mxu1 %v6107_v1  ;;  %v6494_v1 = vld [vmem:[#allocation28 + $0x220] sm:$0xff] }
0x1300   : > { %6169 = vmatpush2.msra.mxu1 %v6106_v2  ;;  %v6493_v2 = vld [vmem:[#allocation28 + $0x218] sm:$0xff] }
0x1301   : > { %6170 = vmatprep.subr.mxu1 %v6105_v3  ;;  %v6492_v3 = vld [vmem:[#allocation28 + $0x210] sm:$0xff] }
0x1302   : > { %6171 = vmatpush2.msra.mxu1 %v6104_v5  ;;  %v6491_v5 = vld [vmem:[#allocation28 + $0x208] sm:$0xff] }
0x1303   : > { %6172 = vmatprep.subr.mxu1 %v6103_v16  ;;  %v6490_v16 = vld [vmem:[#allocation28 + $0x200] sm:$0xff] }
0x1304   : > { %6173 = vmatpush2.msra.mxu1 %v6102_v17  ;;  %v6553_v17 = vld [vmem:[#allocation28 + $0x3f8] sm:$0xff] }
0x1305   : > { %6174 = vmatprep.subr.mxu1 %v6101_v53  ;;  %v6552_v53 = vld [vmem:[#allocation28 + $0x3f0] sm:$0xff] }
0x1306   : > { %6175 = vmatpush2.msra.mxu1 %v6100_v19  ;;  %v6551_v19 = vld [vmem:[#allocation28 + $0x3e8] sm:$0xff] }
0x1307   : > { %6176 = vmatprep.subr.mxu1 %v6099_v29  ;;  %v6550_v29 = vld [vmem:[#allocation28 + $0x3e0] sm:$0xff] }
0x1308   : > { %6177 = vmatpush2.msra.mxu1 %v6098_v44  ;;  %v6549_v44 = vld [vmem:[#allocation28 + $0x3d8] sm:$0xff] }
0x1309   : > { %6178 = vmatprep.subr.mxu1 %v6097_v30  ;;  %v6548_v30 = vld [vmem:[#allocation28 + $0x3d0] sm:$0xff] }
0x130a   : > { %6179 = vmatpush2.msra.mxu1 %v6096_v47  ;;  %v6547_v47 = vld [vmem:[#allocation28 + $0x3c8] sm:$0xff] }
0x130b   : > { %6180 = vmatprep.subr.mxu1 %v6095_v31  ;;  %v6546_v31 = vld [vmem:[#allocation28 + $0x3c0] sm:$0xff] }
0x130c   : > { %6181 = vmatpush2.msra.mxu1 %v6094_v32  ;;  %v6545_v32 = vld [vmem:[#allocation28 + $0x3b8] sm:$0xff] }
0x130d   : > { %6182 = vmatprep.subr.mxu1 %v6093_v33  ;;  %v6544_v33 = vld [vmem:[#allocation28 + $0x3b0] sm:$0xff] }
0x130e   : > { %6183 = vmatpush2.msra.mxu1 %v6092_v35  ;;  %v6543_v35 = vld [vmem:[#allocation28 + $0x3a8] sm:$0xff] }
0x130f   : > { %6184 = vmatprep.subr.mxu1 %v6091_v36  ;;  %v6542_v36 = vld [vmem:[#allocation28 + $0x3a0] sm:$0xff] }
0x1310   : > { %6185 = vmatpush2.msra.mxu1 %v6090_v37  ;;  %v6541_v37 = vld [vmem:[#allocation28 + $0x398] sm:$0xff] }
0x1311   : > { %6554 = vmatprep.subr.mxu1 %v6521_v38  ;;  %v6540_v38 = vld [vmem:[#allocation28 + $0x390] sm:$0xff] }
0x1391   : > { %v5854_v39 = vpop.f32.mrf.mxu1 }
0x1393   : > { %v5856_v4 = vpop.f32.mrf.mxu1 }
0x1394   : > { %6186 = vmatprep.mubr.f32.mxu1 %v5856_v4  ;;  %v6538_v4 = vld [vmem:[#allocation28 + $0x380] sm:$0xff] }
0x1395   : > { %v5860_v21 = vpop.f32.mrf.mxu1  ;;  %6187 = vmatmul.mubr.f32.vlgmr.msra.gmra.mxu1 %v5854_v39  ;;  %v6539_v39 = vld [vmem:[#allocation28 + $0x388] sm:$0xff] }
0x1396   : > { %6555 = vmatpush1.msra.mxu1 %v6520_v18  ;;  %v6537_v18 = vld [vmem:[#allocation28 + $0x378] sm:$0xff] }
0x1397   : > { %v5862_v24 = vpop.f32.mrf.mxu1  ;;  %6556 = vmatprep.subr.mxu1 %v6519_v20  ;;  %v6536_v20 = vld [vmem:[#allocation28 + $0x370] sm:$0xff] }
0x1398   : > { %6192 = vmatprep.mubr.f32.mxu1 %v5862_v24  ;;  %6557 = vmatpush1.msra.mxu1 %v6518_v22  ;;  %v6534_v22 = vld [vmem:[#allocation28 + $0x360] sm:$0xff]  ;;  %v6532_v24 = vld [vmem:[#allocation28 + $0x350] sm:$0xff] }
0x1399   : > { %v5866_v27 = vpop.f32.mrf.mxu1  ;;  %6193 = vmatmul.mubr.f32.gmra.mxu1 %v5860_v21  ;;  %6558 = vmatprep.subr.mxu1 %v6517_v23  ;;  %v6535_v21 = vld [vmem:[#allocation28 + $0x368] sm:$0xff]  ;;  %v6533_v23 = vld [vmem:[#allocation28 + $0x358] sm:$0xff] }
0x139a   : > { %6559 = vmatpush1.msra.mxu1 %v6516_v25  ;;  %v6531_v25 = vld [vmem:[#allocation28 + $0x348] sm:$0xff] }
0x139b   : > { %v5868_v34 = vpop.f32.mrf.mxu1  ;;  %6560 = vmatprep.subr.mxu1 %v6515_v26  ;;  %v6530_v26 = vld [vmem:[#allocation28 + $0x340] sm:$0xff] }
0x139c   : > { %6198 = vmatprep.mubr.f32.mxu1 %v5868_v34  ;;  %6561 = vmatpush1.msra.mxu1 %v6514_v28  ;;  %v6528_v28 = vld [vmem:[#allocation28 + $0x330] sm:$0xff]  ;;  %v6526_v34 = vld [vmem:[#allocation28 + $0x320] sm:$0xff] }
0x139d   : > { %v5872_v46 = vpop.f32.mrf.mxu1  ;;  %6199 = vmatmul.mubr.f32.gmra.mxu1 %v5866_v27  ;;  %6562 = vmatprep.subr.mxu1 %v6513_v40  ;;  %v6529_v27 = vld [vmem:[#allocation28 + $0x338] sm:$0xff]  ;;  %v6527_v40 = vld [vmem:[#allocation28 + $0x328] sm:$0xff] }
0x139e   : > { %6563 = vmatpush1.msra.mxu1 %v6512_v41  ;;  %v6525_v41 = vld [vmem:[#allocation28 + $0x318] sm:$0xff] }
0x139f   : > { %v5874_v50 = vpop.f32.mrf.mxu1  ;;  %6564 = vmatprep.subr.mxu1 %v6511_v45  ;;  %v6524_v45 = vld [vmem:[#allocation28 + $0x310] sm:$0xff] }
0x13a0   : > { %6204 = vmatprep.mubr.f32.mxu1 %v5874_v50  ;;  %6565 = vmatpush1.msra.mxu1 %v6510_v48  ;;  %v6522_v48 = vld [vmem:[#allocation28 + $0x300] sm:$0xff] }
0x13a1   : > { %6205 = vmatmul.mubr.f32.gmra.mxu1 %v5872_v46  ;;  %6566 = vmatprep.subr.mxu1 %v6509_v49  ;;  %v6523_v46 = vld [vmem:[#allocation28 + $0x308] sm:$0xff]  ;;  %v5191_v49 = vpop.f32.mrf.mxu0 }
0x13a2   : > { %6567 = vmatpush1.msra.mxu1 %v6508_v55 }
0x13a3   : > { %6568 = vmatprep.subr.mxu1 %v6507_v56  ;;  %v5193_v50 = vpop.f32.mrf.mxu0 }
0x13a4   : > { %6569 = vmatpush1.msra.mxu1 %v6506_v42 }
0x13a5   : > { %6570 = vmatprep.subr.mxu1 %v6505_v57  ;;  %v5197_v55 = vpop.f32.mrf.mxu0  ;;  %v6764_v57 = vld [vmem:[#allocation28 + $0x4f8] sm:$0xff] }
0x13a6   : > { %6571 = vmatpush1.msra.mxu1 %v6504_v43 }
0x13a7   : > { %6572 = vmatprep.subr.mxu1 %v6503_v58  ;;  %v5199_v56 = vpop.f32.mrf.mxu0 }
0x13a8   : > { %6573 = vmatpush1.msra.mxu1 %v6502_v59 }
0x13a9   : > { %6574 = vmatprep.subr.mxu1 %v6501_v51  ;;  %v5203_v42 = vpop.f32.mrf.mxu0 }
0x13aa   : > { %6575 = vmatpush1.msra.mxu1 %v6500_v60 }
0x13ab   : > { %6576 = vmatprep.subr.mxu1 %v6499_v52  ;;  %v5205_v43 = vpop.f32.mrf.mxu0 }
0x13ac   : > { %6577 = vmatpush1.msra.mxu1 %v6498_v61 }
0x13ad   : > { %6578 = vmatprep.subr.mxu1 %v6497_v62  ;;  %v5209_v58 = vpop.f32.mrf.mxu0 }
0x13ae   : > { %6579 = vmatpush1.msra.mxu1 %v6496_v54 }
0x13af   : > { %6580 = vmatprep.subr.mxu1 %v6495_v63  ;;  %v5211_v59 = vpop.f32.mrf.mxu0 }
0x13b0   : > { %6581 = vmatpush1.msra.mxu1 %v6494_v1 }
0x13b1   : > { %6582 = vmatprep.subr.mxu1 %v6493_v2  ;;  %v5434_v51 = vpop.f32.mrf.mxu0 }
0x13b2   : > { %6583 = vmatpush1.msra.mxu1 %v6492_v3 }
0x13b3   : > { %6584 = vmatprep.subr.mxu1 %v6491_v5  ;;  %v5436_v60 = vpop.f32.mrf.mxu0  ;;  %v5465_v5 = vld [vmem:[%s11573_s28] sm:$0x3]  ;;  %s11579_s28 = sadd.s32 4294967295, %s10010_s0  }
0x13b4   : > { %6585 = vmatpush1.msra.mxu1 %v6490_v16 }
0x13b5   : > { %6586 = vmatprep.subr.mxu1 %v6553_v17  ;;  %v5440_v52 = vpop.f32.mrf.mxu0  ;;  %v5281_v17 = vadd.f32 %v11081_v6, %v5191_v49 }
0x13b6   : > { %6587 = vmatpush2.msra.mxu1 %v6552_v53  ;;  %v11191_v53 = vsub.s32 1, %v10635_v14  ;;  %v5293_v14 = vadd.f32 %v11089_v10, %v5203_v42 }
0x13b7   : > { %6588 = vmatprep.subr.mxu1 %v6551_v19  ;;  %v5442_v61 = vpop.f32.mrf.mxu0  ;;  %v5283_v19 = vadd.f32 %v11083_v7, %v5193_v50 }
0x13b8   : > { %6589 = vmatpush2.msra.mxu1 %v6550_v29  ;;  %v5457_v29 = vadd.f32 %v5434_v51, %v5281_v17 }
0x13b9   : > { %6590 = vmatprep.subr.mxu1 %v6549_v44  ;;  %v5446_v62 = vpop.f32.mrf.mxu0  ;;  %v5470_v44 = vrot.slane %v5465_v5, %v10638_v15 }
0x13ba   : > { %6591 = vmatpush2.msra.mxu1 %v6548_v30 }
0x13bb   : > { %6592 = vmatprep.subr.mxu1 %v6547_v47  ;;  %v5448_v54 = vpop.f32.mrf.mxu0  ;;  %v5287_v47 = vadd.f32 %v11085_v8, %v5197_v55  ;;  %v5477_v6 = vadd.f32 %v5470_v44, %v5457_v29  ;;  %v5295_v8 = vadd.f32 %v11091_v11, %v5205_v43  ;;  %v6763_v29 = vld [vmem:[#allocation28 + $0x4f0] sm:$0xff] }
0x13bc   : > { %6593 = vmatpush2.msra.mxu1 %v6546_v31  ;;  %v5458_v31 = vadd.f32 %v5436_v60, %v5283_v19 }
0x13bd   : > { %6594 = vmatprep.subr.mxu1 %v6545_v32  ;;  %v5452_v63 = vpop.f32.mrf.mxu0  ;;  %v5474_v32 = vrot.slane %v5465_v5, %v11191_v53 }
0x13be   : > { %6595 = vmatpush2.msra.mxu1 %v6544_v33  ;;  %v6038_v33 = vld [vmem:[%s11574_s13] sm:$0x3]  ;;  %s7850_s13 = sshll.u32 %s11579_s28, 2 }
0x13bf   : > { %6596 = vmatprep.subr.mxu1 %v6543_v35  ;;  %v5454_v1 = vpop.f32.mrf.mxu0  ;;  %v5289_v35 = vadd.f32 %v11087_v9, %v5199_v56  ;;  %v5299_v9 = vadd.f32 %v11093_v12, %v5209_v58  ;;  %p1603_p4 = scmp.lt.s32.totalorder %s7850_s13, 7 }
0x13c0   : > { %6597 = vmatpush2.msra.mxu1 %v6542_v36  ;;  %v5459_v36 = vadd.f32 %v5440_v52, %v5287_v47 }
0x13c1   : > { %6598 = vmatprep.subr.mxu1 %v6541_v37  ;;  %v6007_v2 = vpop.f32.mrf.mxu0  ;;  %s11586_s13 = smov (!%p1603_p4, %s7850_s13), 7 }
0x13c2   : > { %6599 = vmatpush2.msra.mxu1 %v6540_v38  ;;  %v5460_v38 = vadd.f32 %v5442_v61, %v5289_v35  ;;  %v6030_v7 = vadd.f32 %v6007_v2, %v5477_v6  ;;  %v6761_v35 = vld [vmem:[#allocation28 + $0x4e0] sm:$0xff]  ;;  %s7851_s0 = sshll.u32 %s11586_s13, 3 }
0x13c3   : > { %6600 = vmatprep.subr.mxu1 %v6539_v39  ;;  %v6009_v3 = vpop.f32.mrf.mxu0  ;;  %v5478_v39 = vadd.f32 %v5474_v32, %v5458_v31 }
0x13c4   : > { %6601 = vmatpush2.msra.mxu1 %v6538_v4  ;;  %v6043_v4 = vrot.slane %v6038_v33, %v10638_v15 }
0x13c5   : > { %6602 = vmatprep.subr.mxu1 %v6537_v18  ;;  %v6013_v16 = vpop.f32.mrf.mxu0  ;;  %v5461_v18 = vadd.f32 %v5446_v62, %v5293_v14 }
0x13c6   : > { %6603 = vmatpush2.msra.mxu1 %v6536_v20  ;;  %v6031_v20 = vadd.f32 %v6009_v3, %v5478_v39 }
0x13c7   : > { %6604 = vmatprep.subr.mxu1 %v6535_v21  ;;  %v6015_v30 = vpop.f32.mrf.mxu0  ;;  %v5479_v21 = vadd.f32 %v5470_v44, %v5459_v36 }
0x13c8   : > { %6605 = vmatpush2.msra.mxu1 %v6534_v22  ;;  %v6219_v22 = vld [vmem:[%s10295_s21] sm:$0x3] }
0x13c9   : > { %6606 = vmatprep.subr.mxu1 %v6533_v23  ;;  %v6019_v37 = vpop.f32.mrf.mxu0  ;;  %v11204_v23 = vrot.slane %v6038_v33, %v11191_v53  ;;  %v6032_v10 = vadd.f32 %v6013_v16, %v5479_v21  ;;  %v11209_v11 = vrot.slane %v6219_v22, %v10638_v15  ;;  %v11213_v49 = vrot.slane %v6219_v22, %v11191_v53  ;;  %v6758_v22 = vld [vmem:[#allocation28 + $0x4c8] sm:$0xff] }
0x13ca   : > { %6607 = vmatpush2.msra.mxu1 %v6532_v24 }
0x13cb   : > { %6608 = vmatprep.subr.mxu1 %v6531_v25  ;;  %v6021_v24 = vpop.f32.mrf.mxu0  ;;  %v5462_v25 = vadd.f32 %v5448_v54, %v5295_v8 }
0x13cc   : > { %6609 = vmatpush2.msra.mxu1 %v6530_v26  ;;  %v5480_v26 = vadd.f32 %v5474_v32, %v5460_v38 }
0x13cd   : > { %6610 = vmatprep.subr.mxu1 %v6529_v27  ;;  %v6050_v27 = vadd.f32 %v6043_v4, %v6030_v7  ;;  %v6025_v50 = vpop.f32.mrf.mxu0  ;;  %v5482_v42 = vadd.f32 %v5474_v32, %v5462_v25 }
0x13ce   : > { %6611 = vmatpush2.msra.mxu1 %v6528_v28  ;;  %v5301_v28 = vadd.f32 %v11095_v13, %v5211_v59  ;;  %v6052_v13 = vadd.f32 %v6043_v4, %v6032_v10  ;;  %v6756_v10 = vld [vmem:[#allocation28 + $0x4b8] sm:$0xff] }
0x13cf   : > { %6612 = vmatprep.subr.mxu1 %v6527_v40  ;;  %v5463_v40 = vadd.f32 %v5452_v63, %v5299_v9  ;;  %v6035_v51 = vadd.f32 %v6021_v24, %v5482_v42  ;;  %v6027_v54 = vpop.f32.mrf.mxu0  ;;  %v6745_v42 = vld [vmem:[#allocation28 + $0x460] sm:$0xff] }
0x13d0   : > { %6613 = vmatpush2.msra.mxu1 %v6526_v34  ;;  %v5481_v34 = vadd.f32 %v5470_v44, %v5461_v18  ;;  %v5464_v12 = vadd.f32 %v5454_v1, %v5301_v28  ;;  %v6759_v18 = vld [vmem:[#allocation28 + $0x4d0] sm:$0xff] }
0x13d1   : > { %6614 = vmatprep.subr.mxu1 %v6525_v41  ;;  %v5483_v43 = vadd.f32 %v5470_v44, %v5463_v40  ;;  %v6055_v31 = vadd.f32 %v11204_v23, %v6035_v51  ;;  %v6755_v28 = vld [vmem:[#allocation28 + $0x4b0] sm:$0xff] }
0x13d2   : > { %6615 = vmatpush2.msra.mxu1 %v6524_v45  ;;  %v6033_v45 = vadd.f32 %v6015_v30, %v5480_v26  ;;  %v6034_v56 = vadd.f32 %v6019_v37, %v5481_v34  ;;  %v5484_v62 = vadd.f32 %v5474_v32, %v5464_v12  ;;  %v6762_v32 = vld [vmem:[#allocation28 + $0x4e8] sm:$0xff]  ;;  %v6760_v37 = vld [vmem:[#allocation28 + $0x4d8] sm:$0xff]  ;;  %v11256_v51 = vld [vmem:[#allocation19 + $0x10] sm:$0xff] }
0x13d3   : > { %6616 = vmatprep.subr.mxu1 %v6523_v46  ;;  %v6036_v1 = vadd.f32 %v6025_v50, %v5483_v43  ;;  %v6748_v12 = vld [vmem:[#allocation28 + $0x478] sm:$0xff]  ;;  %v6747_v50 = vld [vmem:[#allocation28 + $0x470] sm:$0xff] }
0x13d4   : > { %6617 = vmatpush2.msra.mxu1 %v6522_v48  ;;  %v6051_v48 = vadd.f32 %v11204_v23, %v6031_v20  ;;  %v6053_v61 = vadd.f32 %v11204_v23, %v6033_v45  ;;  %v6054_v5 = vadd.f32 %v6043_v4, %v6034_v56  ;;  %v6037_v44 = vadd.f32 %v6027_v54, %v5484_v62  ;;  %v6753_v45 = vld [vmem:[#allocation28 + $0x4a0] sm:$0xff]  ;;  %v6746_v56 = vld [vmem:[#allocation28 + $0x468] sm:$0xff]  ;;  %v6456_v43 = vld [vmem:[#allocation28 + $0xf8] sm:$0xff] }
0x13d5   : > { %6797 = vmatprep.subr.mxu1 %v6764_v57  ;;  %v6056_v14 = vadd.f32 %v6043_v4, %v6036_v1  ;;  %v6757_v4 = vld [vmem:[#allocation28 + $0x4c0] sm:$0xff]  ;;  %v6455_v62 = vld [vmem:[#allocation28 + $0xf0] sm:$0xff]  ;;  %v6454_v54 = vld [vmem:[#allocation28 + $0xe8] sm:$0xff] }
0x13d6   : > { %v6057_v21 = vadd.f32 %v11204_v23, %v6037_v44  ;;  %v6754_v23 = vld [vmem:[#allocation28 + $0x4a8] sm:$0xff]  ;;  %v6453_v1 = vld [vmem:[#allocation28 + $0xe0] sm:$0xff] }
0x13d7   : > { %v6446_v44 = vld [vmem:[#allocation28 + $0xa8] sm:$0xff] }
0x1455   : > { %v6188_v41 = vpop.f32.mrf.mxu1 }
0x1456   : > { %v6211_v46 = vadd.f32 %v6188_v41, %v6050_v27 }
0x1457   : > { %v6190_v55 = vpop.f32.mrf.mxu1 }
0x1458   : > { %v6212_v57 = vadd.f32 %v6190_v55, %v6051_v48  ;;  %v6231_v58 = vadd.f32 %v11209_v11, %v6211_v46  ;;  %v6752_v46 = vld [vmem:[#allocation28 + $0x498] sm:$0xff]  ;;  %v6750_v48 = vld [vmem:[#allocation28 + $0x488] sm:$0xff]  ;;  %v11242_v55 = vld [vmem:[#allocation19] sm:$0xff] }
0x1459   : > { %v6194_v59 = vpop.f32.mrf.mxu1 }
0x145a   : > { %v6232_v60 = vadd.f32 %v11213_v49, %v6212_v57  ;;  %v6213_v52 = vadd.f32 %v6194_v59, %v6052_v13  ;;  %v11220_v16 = vmax.f32 %v6231_v58, 0.0  ;;  %v11247_v57 = vld [vmem:[#allocation19 + $0x8] sm:$0xff]  ;;  %v6744_v13 = vld [vmem:[#allocation28 + $0x458] sm:$0xff]  ;;  %v6743_v58 = vld [vmem:[#allocation28 + $0x450] sm:$0xff] }
0x145b   : > { %v6196_v63 = vpop.f32.mrf.mxu1  ;;  %v6742_v59 = vld [vmem:[#allocation28 + $0x448] sm:$0xff] }
0x145c   : > { %v11218_v2 = vmax.f32 %v6232_v60, 0.0  ;;  %v6214_v3 = vadd.f32 %v6196_v63, %v6053_v61  ;;  %v6233_v17 = vadd.f32 %v11209_v11, %v6213_v52  ;;  %v6741_v60 = vld [vmem:[#allocation28 + $0x440] sm:$0xff]  ;;  %v6740_v52 = vld [vmem:[#allocation28 + $0x438] sm:$0xff] }
0x145d   : > { %v6200_v19 = vpop.f32.mrf.mxu1  ;;  %v11261_v61 = vld [vmem:[#allocation19 + $0x18] sm:$0xff]  ;;  %v11266_v63 = vld [vmem:[#allocation21] sm:$0xff] }
0x145e   : > { %v6234_v30 = vadd.f32 %v11213_v49, %v6214_v3  ;;  %v6215_v47 = vadd.f32 %v6200_v19, %v6054_v5  ;;  %6618 = vmatprep.mubr.f32.mxu1 %v11218_v2  ;;  %v11229_v38 = vmax.f32 %v6233_v17, 0.0  ;;  %v6451_v3 = vld [vmem:[#allocation28 + $0xd0] sm:$0xff]  ;;  %v6450_v5 = vld [vmem:[#allocation28 + $0xc8] sm:$0xff]  ;;  %v6449_v17 = vld [vmem:[#allocation28 + $0xc0] sm:$0xff] }
0x145f   : > { %v6202_v33 = vpop.f32.mrf.mxu1  ;;  %6619 = vmatmul.mubr.f32.vlgmr.msra.gmra.mxu1 %v11220_v16  ;;  %v6448_v19 = vld [vmem:[#allocation28 + $0xb8] sm:$0xff] }
0x1460   : > { %v11227_v36 = vmax.f32 %v6234_v30, 0.0  ;;  %v6216_v6 = vadd.f32 %v6202_v33, %v6055_v31  ;;  %6798 = vmatpush1.msra.mxu1 %v6763_v29  ;;  %v6235_v7 = vadd.f32 %v11209_v11, %v6215_v47  ;;  %v6447_v29 = vld [vmem:[#allocation28 + $0xb0] sm:$0xff]  ;;  %v6445_v47 = vld [vmem:[#allocation28 + $0xa0] sm:$0xff]  ;;  %v6444_v31 = vld [vmem:[#allocation28 + $0x98] sm:$0xff] }
0x1461   : > { %v6206_v39 = vpop.f32.mrf.mxu1  ;;  %6799 = vmatprep.subr.mxu1 %v6762_v32  ;;  %v11276_v30 = vld [vmem:[#allocation21 + $0x10] sm:$0xff]  ;;  %v6442_v33 = vld [vmem:[#allocation28 + $0x88] sm:$0xff] }
0x1462   : > { %v6236_v8 = vadd.f32 %v11213_v49, %v6216_v6  ;;  %v6217_v20 = vadd.f32 %v6206_v39, %v6056_v14  ;;  %6624 = vmatprep.mubr.f32.mxu1 %v11227_v36  ;;  %6800 = vmatpush1.msra.mxu1 %v6761_v35  ;;  %v6243_v26 = vmax.f32 %v6235_v7, 0.0  ;;  %v6443_v32 = vld [vmem:[#allocation28 + $0x90] sm:$0xff]  ;;  %v11281_v35 = vld [vmem:[#allocation21 + $0x18] sm:$0xff] }
0x1463   : > { %v6208_v9 = vpop.f32.mrf.mxu1  ;;  %6625 = vmatmul.mubr.f32.gmra.mxu1 %v11229_v38  ;;  %6801 = vmatprep.subr.mxu1 %v6760_v37  ;;  %v6440_v6 = vld [vmem:[#allocation28 + $0x78] sm:$0xff]  ;;  %v6439_v14 = vld [vmem:[#allocation28 + $0x70] sm:$0xff]  ;;  %v6438_v37 = vld [vmem:[#allocation28 + $0x68] sm:$0xff] }
0x1464   : > { %v6244_v24 = vmax.f32 %v6236_v8, 0.0  ;;  %v6218_v25 = vadd.f32 %v6208_v9, %v6057_v21  ;;  %6802 = vmatpush1.msra.mxu1 %v6759_v18  ;;  %v6237_v27 = vadd.f32 %v11209_v11, %v6217_v20  ;;  %v6751_v11 = vld [vmem:[#allocation28 + $0x490] sm:$0xff]  ;;  %v6436_v7 = vld [vmem:[#allocation28 + $0x58] sm:$0xff]  ;;  %v6434_v18 = vld [vmem:[#allocation28 + $0x48] sm:$0xff] }
0x1465   : > { %6803 = vmatprep.subr.mxu1 %v6758_v22  ;;  %v6435_v39 = vld [vmem:[#allocation28 + $0x50] sm:$0xff]  ;;  %v6433_v8 = vld [vmem:[#allocation28 + $0x40] sm:$0xff]  ;;  %v6432_v20 = vld [vmem:[#allocation28 + $0x38] sm:$0xff] }
0x1466   : > { %v6238_v40 = vadd.f32 %v11213_v49, %v6218_v25  ;;  %6630 = vmatprep.mubr.f32.mxu1 %v6244_v24  ;;  %6804 = vmatpush1.msra.mxu1 %v6757_v4  ;;  %v6245_v41 = vmax.f32 %v6237_v27, 0.0  ;;  %v6749_v49 = vld [vmem:[#allocation28 + $0x480] sm:$0xff]  ;;  %v6431_v21 = vld [vmem:[#allocation28 + $0x30] sm:$0xff]  ;;  %v6430_v22 = vld [vmem:[#allocation28 + $0x28] sm:$0xff] }
0x1467   : > { %6631 = vmatmul.mubr.f32.gmra.mxu1 %v6243_v26  ;;  %6805 = vmatprep.subr.mxu1 %v6756_v10  ;;  %v6429_v9 = vld [vmem:[#allocation28 + $0x20] sm:$0xff]  ;;  %v6428_v4 = vld [vmem:[#allocation28 + $0x18] sm:$0xff]  ;;  %v6426_v25 = vld [vmem:[#allocation28 + $0x8] sm:$0xff] }
0x1468   : > { %v6246_v34 = vmax.f32 %v6238_v40, 0.0  ;;  %6806 = vmatpush1.msra.mxu1 %v6755_v28  ;;  %v6425_v10 = vld [vmem:[#allocation28] sm:$0xff]  ;;  %v6739_v27 = vld [vmem:[#allocation28 + $0x430] sm:$0xff]  ;;  %v6738_v40 = vld [vmem:[#allocation28 + $0x428] sm:$0xff] }
0x1469   : > { %6807 = vmatprep.subr.mxu1 %v6754_v23  ;;  %v6487_v28 = vld [vmem:[#allocation28 + $0x1f0] sm:$0xff]  ;;  %v6486_v23 = vld [vmem:[#allocation28 + $0x1e8] sm:$0xff] }
0x146a   : > { %6271 = vmatprep.subr.mxu0 %v6246_v34  ;;  %6636 = vmatprep.mubr.f32.mxu1 %v6246_v34 }
0x146b   : > { %6272 = vmatpush1.msra.mxu0 %v6245_v41  ;;  %6637 = vmatmul.mubr.f32.gmra.mxu1 %v6245_v41 }
0x146c   : > { %6273 = vmatprep.subr.mxu0 %v6244_v24  ;;  %6808 = vmatpush1.msra.mxu1 %v6753_v45  ;;  %v6736_v45 = vld [vmem:[#allocation28 + $0x418] sm:$0xff] }
0x146d   : > { %6274 = vmatpush1.msra.mxu0 %v6243_v26  ;;  %6809 = vmatprep.subr.mxu1 %v6752_v46  ;;  %v6484_v46 = vld [vmem:[#allocation28 + $0x1d8] sm:$0xff] }
0x146e   : > { %6275 = vmatprep.subr.mxu0 %v11227_v36  ;;  %6810 = vmatpush1.msra.mxu1 %v6751_v11  ;;  %v6735_v11 = vld [vmem:[#allocation28 + $0x410] sm:$0xff] }
0x146f   : > { %6276 = vmatpush1.msra.mxu0 %v11229_v38  ;;  %6811 = vmatprep.subr.mxu1 %v6750_v48  ;;  %v6483_v48 = vld [vmem:[#allocation28 + $0x1d0] sm:$0xff] }
0x1470   : > { %6277 = vmatprep.subr.mxu0 %v11218_v2  ;;  %6812 = vmatpush1.msra.mxu1 %v6749_v49  ;;  %v6734_v49 = vld [vmem:[#allocation28 + $0x408] sm:$0xff] }
0x1471   : > { %6278 = vmatpush1.msra.mxu0 %v11220_v16  ;;  %6813 = vmatprep.subr.mxu1 %v6748_v12  ;;  %v6482_v12 = vld [vmem:[#allocation28 + $0x1c8] sm:$0xff] }
0x1472   : > { %7956 = vmatmul.mubr.msk.f32.vlgmr.msra.gmra.mxu0 %vm2033_vm4, %v11242_v55  ;;  %6360 = vmatprep.subr.mxu0 %v6246_v34  ;;  %v6737_v34 = vld [vmem:[#allocation28 + $0x420] sm:$0xff] }
0x1473   : > { %6361 = vmatpush1.msra.mxu0 %v6245_v41  ;;  %6317 = vmatprep.mubr.f32.mxu0 %v10080_v0  ;;  %v6485_v41 = vld [vmem:[#allocation28 + $0x1e0] sm:$0xff] }
0x1474   : > { %6362 = vmatprep.subr.mxu0 %v6244_v24  ;;  %6814 = vmatpush1.msra.mxu1 %v6747_v50  ;;  %v6427_v24 = vld [vmem:[#allocation28 + $0x10] sm:$0xff]  ;;  %v6733_v50 = vld [vmem:[#allocation28 + $0x400] sm:$0xff] }
0x1475   : > { %6363 = vmatpush1.msra.mxu0 %v6243_v26  ;;  %6815 = vmatprep.subr.mxu1 %v6746_v56  ;;  %v6488_v26 = vld [vmem:[#allocation28 + $0x1f8] sm:$0xff]  ;;  %v6481_v56 = vld [vmem:[#allocation28 + $0x1c0] sm:$0xff] }
0x1476   : > { %7957 = vmatmul.mubr.msk.f32.gmra.mxu0 %vm2033_vm4, %v11247_v57  ;;  %6364 = vmatprep.subr.mxu0 %v11227_v36  ;;  %v6441_v36 = vld [vmem:[#allocation28 + $0x80] sm:$0xff] }
0x1477   : > { %6365 = vmatpush1.msra.mxu0 %v11229_v38  ;;  %6323 = vmatprep.mubr.f32.mxu0 %v10080_v0  ;;  %v6437_v38 = vld [vmem:[#allocation28 + $0x60] sm:$0xff] }
0x1478   : > { %6366 = vmatprep.subr.mxu0 %v11218_v2  ;;  %6816 = vmatpush1.msra.mxu1 %v6745_v42  ;;  %v6452_v2 = vld [vmem:[#allocation28 + $0xd8] sm:$0xff] }
0x1479   : > { %6367 = vmatpush1.msra.mxu0 %v11220_v16  ;;  %6817 = vmatprep.subr.mxu1 %v6744_v13  ;;  %v11271_v16 = vld [vmem:[#allocation21 + $0x8] sm:$0xff]  ;;  %v6796_v42 = vld [vmem:[#allocation28 + $0x5f8] sm:$0xff] }
0x147a   : > { %7958 = vmatmul.mubr.msk.f32.gmra.mxu0 %vm2033_vm4, %v11256_v51  ;;  %6643 = vmatprep.subr.mxu0 %v6456_v43  ;;  %v6480_v13 = vld [vmem:[#allocation28 + $0x1b8] sm:$0xff]  ;;  %v6795_v43 = vld [vmem:[#allocation28 + $0x5f0] sm:$0xff] }
0x147b   : > { %6329 = vmatprep.mubr.f32.mxu0 %v10080_v0  ;;  %6818 = vmatpush1.msra.mxu1 %v6743_v58  ;;  %v6479_v58 = vld [vmem:[#allocation28 + $0x1b0] sm:$0xff] }
0x147c   : > { %6819 = vmatprep.subr.mxu1 %v6742_v59  ;;  %v6794_v59 = vld [vmem:[#allocation28 + $0x5e8] sm:$0xff] }
0x147d   : > { %6820 = vmatpush1.msra.mxu1 %v6741_v60  ;;  %v6478_v60 = vld [vmem:[#allocation28 + $0x1a8] sm:$0xff] }
0x147e   : > { %7959 = vmatmul.mubr.msk.f32.gmra.mxu0 %vm2033_vm4, %v11261_v61  ;;  %6821 = vmatprep.subr.mxu1 %v6740_v52  ;;  %v6793_v52 = vld [vmem:[#allocation28 + $0x5e0] sm:$0xff] }
0x147f   : > { %6400 = vmatprep.mubr.f32.mxu0 %v10080_v0  ;;  %6822 = vmatpush1.msra.mxu1 %v6739_v27  ;;  %v6461_v27 = vld [vmem:[#allocation28 + $0x120] sm:$0xff] }
0x1480   : > { %6823 = vmatprep.subr.mxu1 %v6738_v40  ;;  %v6775_v40 = vld [vmem:[#allocation28 + $0x550] sm:$0xff] }
0x1481   : > { %6824 = vmatpush1.msra.mxu1 %v6737_v34  ;;  %v6459_v34 = vld [vmem:[#allocation28 + $0x110] sm:$0xff] }
0x1482   : > { %7960 = vmatmul.mubr.msk.f32.vlgmr.msra.gmra.mxu0 %vm2033_vm4, %v11266_v63  ;;  %6825 = vmatprep.subr.mxu1 %v6736_v45  ;;  %v6458_v45 = vld [vmem:[#allocation28 + $0x108] sm:$0xff] }
0x1483   : > { %6406 = vmatprep.mubr.f32.mxu0 %v10080_v0  ;;  %6644 = vmatpush1.msra.mxu0 %v6455_v62  ;;  %v6477_v62 = vld [vmem:[#allocation28 + $0x1a0] sm:$0xff] }
0x1484   : > { %6645 = vmatprep.subr.mxu0 %v6454_v54  ;;  %6826 = vmatpush1.msra.mxu1 %v6735_v11  ;;  %v6792_v54 = vld [vmem:[#allocation28 + $0x5d8] sm:$0xff]  ;;  %v6457_v11 = vld [vmem:[#allocation28 + $0x100] sm:$0xff] }
0x1485   : > { %6646 = vmatpush1.msra.mxu0 %v6453_v1  ;;  %6827 = vmatprep.subr.mxu1 %v6734_v49  ;;  %v6476_v1 = vld [vmem:[#allocation28 + $0x198] sm:$0xff]  ;;  %v6771_v49 = vld [vmem:[#allocation28 + $0x530] sm:$0xff] }
0x1486   : > { %7961 = vmatmul.mubr.msk.f32.gmra.mxu0 %vm2033_vm4, %v11271_v16  ;;  %6647 = vmatprep.subr.mxu0 %v6452_v2  ;;  %v6791_v2 = vld [vmem:[#allocation28 + $0x5d0] sm:$0xff] }
0x1487   : > { %6412 = vmatprep.mubr.f32.mxu0 %v10080_v0  ;;  %6648 = vmatpush1.msra.mxu0 %v6451_v3  ;;  %v6475_v3 = vld [vmem:[#allocation28 + $0x190] sm:$0xff] }
0x1488   : > { %6649 = vmatprep.subr.mxu0 %v6450_v5  ;;  %6828 = vmatpush1.msra.mxu1 %v6733_v50  ;;  %v6790_v5 = vld [vmem:[#allocation28 + $0x5c8] sm:$0xff]  ;;  %v6769_v50 = vld [vmem:[#allocation28 + $0x520] sm:$0xff] }
0x1489   : > { %6650 = vmatpush1.msra.mxu0 %v6449_v17  ;;  %6829 = vmatprep.subr.mxu1 %v6796_v42  ;;  %v6474_v17 = vld [vmem:[#allocation28 + $0x188] sm:$0xff]  ;;  %v6767_v42 = vld [vmem:[#allocation28 + $0x510] sm:$0xff] }
0x148a   : > { %7962 = vmatmul.mubr.msk.f32.gmra.mxu0 %vm2033_vm4, %v11276_v30  ;;  %6651 = vmatprep.subr.mxu0 %v6448_v19  ;;  %v6789_v19 = vld [vmem:[#allocation28 + $0x5c0] sm:$0xff] }
0x148b   : > { %6418 = vmatprep.mubr.f32.mxu0 %v10080_v0  ;;  %6652 = vmatpush1.msra.mxu0 %v6447_v29  ;;  %v6473_v29 = vld [vmem:[#allocation28 + $0x180] sm:$0xff] }
0x148c   : > { %6653 = vmatprep.subr.mxu0 %v6446_v44  ;;  %6830 = vmatpush2.msra.mxu1 %v6795_v43  ;;  %v6788_v44 = vld [vmem:[#allocation28 + $0x5b8] sm:$0xff]  ;;  %v6765_v43 = vld [vmem:[#allocation28 + $0x500] sm:$0xff] }
0x148d   : > { %6654 = vmatpush1.msra.mxu0 %v6445_v47  ;;  %6831 = vmatprep.subr.mxu1 %v6794_v59  ;;  %v6787_v47 = vld [vmem:[#allocation28 + $0x5b0] sm:$0xff] }
0x148e   : > { %7963 = vmatmul.mubr.msk.f32.gmra.mxu0 %vm2033_vm4, %v11281_v35  ;;  %6655 = vmatprep.subr.mxu0 %v6444_v31  ;;  %v6472_v31 = vld [vmem:[#allocation28 + $0x178] sm:$0xff] }
0x148f   : > { %6656 = vmatpush1.msra.mxu0 %v6443_v32  ;;  %6832 = vmatpush2.msra.mxu1 %v6793_v52  ;;  %v6786_v32 = vld [vmem:[#allocation28 + $0x5a8] sm:$0xff] }
0x1490   : > { %6657 = vmatprep.subr.mxu0 %v6442_v33  ;;  %6833 = vmatprep.subr.mxu1 %v6792_v54  ;;  %v6471_v33 = vld [vmem:[#allocation28 + $0x170] sm:$0xff] }
0x1491   : > { %6658 = vmatpush1.msra.mxu0 %v6441_v36  ;;  %6834 = vmatpush2.msra.mxu1 %v6791_v2  ;;  %v6785_v36 = vld [vmem:[#allocation28 + $0x5a0] sm:$0xff] }
0x1492   : > { %6659 = vmatprep.subr.mxu0 %v6440_v6  ;;  %6835 = vmatprep.subr.mxu1 %v6790_v5  ;;  %v6470_v6 = vld [vmem:[#allocation28 + $0x168] sm:$0xff] }
0x1493   : > { %6660 = vmatpush1.msra.mxu0 %v6439_v14  ;;  %6836 = vmatpush2.msra.mxu1 %v6789_v19  ;;  %v6469_v14 = vld [vmem:[#allocation28 + $0x160] sm:$0xff] }
0x1494   : > { %6661 = vmatprep.subr.mxu0 %v6438_v37  ;;  %6837 = vmatprep.subr.mxu1 %v6788_v44  ;;  %v6784_v37 = vld [vmem:[#allocation28 + $0x598] sm:$0xff] }
0x1495   : > { %6662 = vmatpush1.msra.mxu0 %v6437_v38  ;;  %6838 = vmatpush2.msra.mxu1 %v6787_v47  ;;  %v6468_v38 = vld [vmem:[#allocation28 + $0x158] sm:$0xff] }
0x1496   : > { %6663 = vmatprep.subr.mxu0 %v6436_v7  ;;  %6839 = vmatprep.subr.mxu1 %v6786_v32  ;;  %v6783_v7 = vld [vmem:[#allocation28 + $0x590] sm:$0xff]  ;;  %v7171_v32 = vld [vmem:[%s11575_s3 + $0xf8] sm:$0xff] }
0x1497   : > { %6664 = vmatpush1.msra.mxu0 %v6435_v39  ;;  %6840 = vmatpush2.msra.mxu1 %v6785_v36  ;;  %v6467_v39 = vld [vmem:[#allocation28 + $0x150] sm:$0xff]  ;;  %v7170_v36 = vld [vmem:[%s11575_s3 + $0xf0] sm:$0xff] }
0x1498   : > { %6665 = vmatprep.subr.mxu0 %v6434_v18  ;;  %6841 = vmatprep.subr.mxu1 %v6784_v37  ;;  %v6782_v18 = vld [vmem:[#allocation28 + $0x588] sm:$0xff]  ;;  %v7153_v37 = vld [vmem:[%s11575_s3 + $0x68] sm:$0xff] }
0x1499   : > { %6666 = vmatpush1.msra.mxu0 %v6433_v8  ;;  %6842 = vmatpush2.msra.mxu1 %v6783_v7  ;;  %v6466_v8 = vld [vmem:[#allocation28 + $0x148] sm:$0xff] }
0x149a   : > { %6667 = vmatprep.subr.mxu0 %v6432_v20  ;;  %6843 = vmatprep.subr.mxu1 %v6782_v18  ;;  %v6781_v20 = vld [vmem:[#allocation28 + $0x580] sm:$0xff] }
0x149b   : > { %6668 = vmatpush1.msra.mxu0 %v6431_v21  ;;  %v6465_v21 = vld [vmem:[#allocation28 + $0x140] sm:$0xff]  ;;  %6844 = vmatpush2.msra.mxu1 %v6781_v20 }
0x149c   : > { %6669 = vmatprep.subr.mxu0 %v6430_v22  ;;  %v6780_v22 = vld [vmem:[#allocation28 + $0x578] sm:$0xff]  ;;  %v7167_v18 = vld [vmem:[%s11575_s3 + $0xd8] sm:$0xff] }
0x149d   : > { %6670 = vmatpush1.msra.mxu0 %v6429_v9  ;;  %v6779_v9 = vld [vmem:[#allocation28 + $0x570] sm:$0xff]  ;;  %6845 = vmatprep.subr.mxu1 %v6780_v22  ;;  %v7166_v20 = vld [vmem:[%s11575_s3 + $0xd0] sm:$0xff] }
0x149e   : > { %6671 = vmatprep.subr.mxu0 %v6428_v4  ;;  %v6464_v4 = vld [vmem:[#allocation28 + $0x138] sm:$0xff]  ;;  %6846 = vmatpush2.msra.mxu1 %v6779_v9 }
0x149f   : > { %6672 = vmatpush1.msra.mxu0 %v6427_v24  ;;  %v6463_v24 = vld [vmem:[#allocation28 + $0x130] sm:$0xff]  ;;  %v7150_v22 = vld [vmem:[%s11575_s3 + $0x50] sm:$0xff] }
0x14a0   : > { %6673 = vmatprep.subr.mxu0 %v6426_v25  ;;  %v6778_v25 = vld [vmem:[#allocation28 + $0x568] sm:$0xff]  ;;  %v7165_v9 = vld [vmem:[%s11575_s3 + $0xc8] sm:$0xff] }
0x14a1   : > { %6674 = vmatpush1.msra.mxu0 %v6425_v10  ;;  %v6462_v10 = vld [vmem:[#allocation28 + $0x128] sm:$0xff]  ;;  %6847 = vmatprep.subr.mxu1 %v6778_v25 }
0x14a2   : > { %6675 = vmatprep.subr.mxu0 %v6488_v26  ;;  %v6777_v26 = vld [vmem:[#allocation28 + $0x560] sm:$0xff] }
0x14a3   : > { %6676 = vmatpush2.msra.mxu0 %v6487_v28  ;;  %6848 = vmatpush2.msra.mxu1 %v6777_v26  ;;  %v6776_v28 = vld [vmem:[#allocation28 + $0x558] sm:$0xff]  ;;  %v7163_v26 = vld [vmem:[%s11575_s3 + $0xb8] sm:$0xff] }
0x14a4   : > { %6677 = vmatprep.subr.mxu0 %v6486_v23  ;;  %v6460_v23 = vld [vmem:[#allocation28 + $0x118] sm:$0xff]  ;;  %6849 = vmatprep.subr.mxu1 %v6776_v28 }
0x14a5   : > { %6678 = vmatpush2.msra.mxu0 %v6485_v41  ;;  %6850 = vmatpush2.msra.mxu1 %v6775_v40  ;;  %v6774_v41 = vld [vmem:[#allocation28 + $0x548] sm:$0xff]  ;;  %v7162_v28 = vld [vmem:[%s11575_s3 + $0xb0] sm:$0xff] }
0x14a6   : > { %6679 = vmatprep.subr.mxu0 %v6484_v46  ;;  %6851 = vmatprep.subr.mxu1 %v6774_v41  ;;  %v6773_v46 = vld [vmem:[#allocation28 + $0x540] sm:$0xff] }
0x14a7   : > { %6680 = vmatpush2.msra.mxu0 %v6483_v48  ;;  %6852 = vmatpush2.msra.mxu1 %v6773_v46  ;;  %v6772_v48 = vld [vmem:[#allocation28 + $0x538] sm:$0xff]  ;;  %v7160_v46 = vld [vmem:[%s11575_s3 + $0xa0] sm:$0xff] }
0x14a8   : > { %6681 = vmatprep.subr.mxu0 %v6482_v12  ;;  %6853 = vmatprep.subr.mxu1 %v6772_v48  ;;  %v6770_v12 = vld [vmem:[#allocation28 + $0x528] sm:$0xff] }
0x14a9   : > { %6682 = vmatpush2.msra.mxu0 %v6481_v56  ;;  %6854 = vmatpush2.msra.mxu1 %v6771_v49  ;;  %v6768_v56 = vld [vmem:[#allocation28 + $0x518] sm:$0xff]  ;;  %v7144_v49 = vld [vmem:[%s11575_s3 + $0x20] sm:$0xff] }
0x14aa   : > { %6683 = vmatprep.subr.mxu0 %v6480_v13  ;;  %6855 = vmatprep.subr.mxu1 %v6770_v12  ;;  %v6766_v13 = vld [vmem:[#allocation28 + $0x508] sm:$0xff] }
0x14ab   : > { %6684 = vmatpush2.msra.mxu0 %v6479_v58  ;;  %6856 = vmatpush2.msra.mxu1 %v6769_v50  ;;  %v7159_v12 = vld [vmem:[%s11575_s3 + $0x98] sm:$0xff] }
0x14ac   : > { %6685 = vmatprep.subr.mxu0 %v6478_v60  ;;  %6857 = vmatprep.subr.mxu1 %v6768_v56  ;;  %v7143_v50 = vld [vmem:[%s11575_s3 + $0x18] sm:$0xff]  ;;  %v7158_v56 = vld [vmem:[%s11575_s3 + $0x90] sm:$0xff] }
0x14ad   : > { %6686 = vmatpush2.msra.mxu0 %v6477_v62  ;;  %6858 = vmatpush2.msra.mxu1 %v6767_v42 }
0x14ae   : > { %6687 = vmatprep.subr.mxu0 %v6476_v1  ;;  %6859 = vmatprep.subr.mxu1 %v6766_v13 }
0x14af   : > { %6688 = vmatpush2.msra.mxu0 %v6475_v3  ;;  %6860 = vmatpush2.msra.mxu1 %v6765_v43  ;;  %v7142_v43 = vld [vmem:[%s11575_s3 + $0x10] sm:$0xff] }
0x14b0   : > { %6689 = vmatprep.subr.mxu0 %v6474_v17  ;;  %8389 = vmatprep.subr.mxu1 %v7171_v32 }
0x14b1   : > { %6690 = vmatpush2.msra.mxu0 %v6473_v29 }
0x14b2   : > { %6691 = vmatprep.subr.mxu0 %v6472_v31 }
0x14b3   : > { %6692 = vmatpush2.msra.mxu0 %v6471_v33  ;;  %v7155_v33 = vld [vmem:[%s11575_s3 + $0x78] sm:$0xff] }
0x14b4   : > { %6693 = vmatprep.subr.mxu0 %v6470_v6  ;;  %v7154_v6 = vld [vmem:[%s11575_s3 + $0x70] sm:$0xff] }
0x14b5   : > { %6694 = vmatpush2.msra.mxu0 %v6469_v14  ;;  %v7169_v14 = vld [vmem:[%s11575_s3 + $0xe8] sm:$0xff] }
0x14b6   : > { %6695 = vmatprep.subr.mxu0 %v6468_v38  ;;  %v7168_v38 = vld [vmem:[%s11575_s3 + $0xe0] sm:$0xff] }
0x14b7   : > { %6696 = vmatpush2.msra.mxu0 %v6467_v39  ;;  %v7152_v39 = vld [vmem:[%s11575_s3 + $0x60] sm:$0xff] }
0x14b8   : > { %6697 = vmatprep.subr.mxu0 %v6466_v8  ;;  %v7151_v8 = vld [vmem:[%s11575_s3 + $0x58] sm:$0xff] }
0x14b9   : > { %6698 = vmatpush2.msra.mxu0 %v6465_v21 }
0x14ba   : > { %6699 = vmatprep.subr.mxu0 %v6464_v4  ;;  %v7149_v4 = vld [vmem:[%s11575_s3 + $0x48] sm:$0xff] }
0x14bb   : > { %6700 = vmatpush2.msra.mxu0 %v6463_v24  ;;  %v7164_v24 = vld [vmem:[%s11575_s3 + $0xc0] sm:$0xff] }
0x14bc   : > { %6701 = vmatprep.subr.mxu0 %v6462_v10  ;;  %v7148_v10 = vld [vmem:[%s11575_s3 + $0x40] sm:$0xff] }
0x14bd   : > { %6702 = vmatpush2.msra.mxu0 %v6461_v27  ;;  %v7147_v27 = vld [vmem:[%s11575_s3 + $0x38] sm:$0xff] }
0x14be   : > { %6703 = vmatprep.subr.mxu0 %v6460_v23  ;;  %v7146_v23 = vld [vmem:[%s11575_s3 + $0x30] sm:$0xff] }
0x14bf   : > { %6704 = vmatpush2.msra.mxu0 %v6459_v34  ;;  %v7161_v34 = vld [vmem:[%s11575_s3 + $0xa8] sm:$0xff] }
0x14c0   : > { %6705 = vmatprep.subr.mxu0 %v6458_v45  ;;  %v7145_v45 = vld [vmem:[%s11575_s3 + $0x28] sm:$0xff] }
0x14c1   : > { %6706 = vmatpush2.msra.mxu0 %v6457_v11 }
0x151f   : > { %v11293_v7 = vpop.f32.mrf.mxu1 }
0x1521   : > { %v11299_v21 = vpop.f32.mrf.mxu1 }
0x1523   : > { %v6626_v25 = vpop.f32.mrf.mxu1 }
0x1525   : > { %v6628_v40 = vpop.f32.mrf.mxu1 }
0x1527   : > { %v6632_v11 = vpop.f32.mrf.mxu1 }
0x1529   : > { %v6634_v42 = vpop.f32.mrf.mxu1 }
0x1532   : > { %v6313_v58 = vpop.f32.mrf.mxu0 }
0x1534   : > { %v6315_v59 = vpop.f32.mrf.mxu0 }
0x1535   : > { %6707 = vmatprep.mubr.f32.mxu0 %v6315_v59 }
0x1536   : > { %v6319_v60 = vpop.f32.mrf.mxu0  ;;  %6708 = vmatmul.mubr.f32.vlgmr.msra.gmra.mxu0 %v6313_v58  ;;  %v6638_v58 = vpop.f32.mrf.mxu1 }
0x1538   : > { %v6321_v52 = vpop.f32.mrf.mxu0 }
0x1539   : > { %6713 = vmatprep.mubr.f32.mxu0 %v6321_v52 }
0x153a   : > { %v6325_v62 = vpop.f32.mrf.mxu0  ;;  %6714 = vmatmul.mubr.f32.gmra.mxu0 %v6319_v60  ;;  %v6640_v60 = vpop.f32.mrf.mxu1 }
0x153c   : > { %v6327_v54 = vpop.f32.mrf.mxu0 }
0x153d   : > { %6719 = vmatprep.mubr.f32.mxu0 %v6327_v54 }
0x153e   : > { %v6331_v1 = vpop.f32.mrf.mxu0  ;;  %6720 = vmatmul.mubr.f32.gmra.mxu0 %v6325_v62 }
0x1540   : > { %v6333_v2 = vpop.f32.mrf.mxu0 }
0x1541   : > { %6725 = vmatprep.mubr.f32.mxu0 %v6333_v2 }
0x1542   : > { %v6402_v3 = vpop.f32.mrf.mxu0  ;;  %6726 = vmatmul.mubr.f32.gmra.mxu0 %v6331_v1 }
0x1543   : > { %7026 = vmatprep.mubr.f32.mxu0 %v10080_v0 }
0x1544   : > { %v6404_v5 = vpop.f32.mrf.mxu0 }
0x1545   : > { %6861 = vmatprep.mubr.f32.mxu1 %v6404_v5 }
0x1546   : > { %v6408_v17 = vpop.f32.mrf.mxu0  ;;  %6862 = vmatmul.mubr.f32.vlgmr.msra.gmra.mxu1 %v6402_v3 }
0x1547   : > { %8390 = vmatpush3.msra.mxu1 %v7155_v33 }
0x1548   : > { %v6410_v19 = vpop.f32.mrf.mxu0  ;;  %8391 = vmatprep.subr.mxu1 %v7170_v36 }
0x1549   : > { %6867 = vmatprep.mubr.f32.mxu1 %v6410_v19  ;;  %8392 = vmatpush3.msra.mxu1 %v7154_v6 }
0x154a   : > { %v6414_v29 = vpop.f32.mrf.mxu0  ;;  %6868 = vmatmul.mubr.f32.gmra.mxu1 %v6408_v17  ;;  %8393 = vmatprep.subr.mxu1 %v7169_v14 }
0x154b   : > { %8394 = vmatpush3.msra.mxu1 %v7153_v37 }
0x154c   : > { %v6416_v44 = vpop.f32.mrf.mxu0  ;;  %8395 = vmatprep.subr.mxu1 %v7168_v38  ;;  %v6914_v38 = vld [vmem:[%s10300_s9] sm:$0x3] }
0x154d   : > { %6873 = vmatprep.mubr.f32.mxu1 %v6416_v44  ;;  %8396 = vmatpush3.msra.mxu1 %v7152_v39 }
0x154e   : > { %v6420_v47 = vpop.f32.mrf.mxu0  ;;  %6874 = vmatmul.mubr.f32.gmra.mxu1 %v6414_v29  ;;  %8397 = vmatprep.subr.mxu1 %v7167_v18 }
0x154f   : > { %8398 = vmatpush3.msra.mxu1 %v7151_v8 }
0x1550   : > { %v6422_v31 = vpop.f32.mrf.mxu0  ;;  %8399 = vmatprep.subr.mxu1 %v7166_v20 }
0x1551   : > { %6879 = vmatprep.mubr.f32.mxu1 %v6422_v31  ;;  %8400 = vmatpush3.msra.mxu1 %v7150_v22 }
0x1552   : > { %6880 = vmatmul.mubr.f32.gmra.mxu1 %v6420_v47  ;;  %8401 = vmatprep.subr.mxu1 %v7165_v9  ;;  %v6894_v47 = vld [vmem:[%s11576_s22] sm:$0x3]  ;;  %s11580_s22 = sld [smem:[#allocation77_spill]] }
0x1553   : > { %8402 = vmatpush3.msra.mxu1 %v7149_v4  ;;  %v6903_v33 = vrot.slane %v6894_v47, %v11191_v53  ;;  %v6899_v20 = vrot.slane %v6894_v47, %v10638_v15 }
0x1554   : > { %8403 = vmatprep.subr.mxu1 %v7164_v24 }
0x1555   : > { %8404 = vmatpush3.msra.mxu1 %v7148_v10 }
0x1556   : > { %8405 = vmatprep.subr.mxu1 %v7163_v26 }
0x1557   : > { %8406 = vmatpush3.msra.mxu1 %v7147_v27  ;;  %v6919_v27 = vrot.slane %v6914_v38, %v10638_v15 }
0x1558   : > { %8407 = vmatprep.subr.mxu1 %v7162_v28 }
0x1559   : > { %8408 = vmatpush3.msra.mxu1 %v7146_v23  ;;  %v6923_v23 = vrot.slane %v6914_v38, %v11191_v53  ;;  %v7998_v38 = vld [vmem:[%s11575_s3 + $0x1d0] sm:$0xff] }
0x155a   : > { %8409 = vmatprep.subr.mxu1 %v7161_v34 }
0x155b   : > { %8410 = vmatpush3.msra.mxu1 %v7145_v45 }
0x155c   : > { %8411 = vmatprep.subr.mxu1 %v7160_v46 }
0x155d   : > { %8412 = vmatpush3.msra.mxu1 %v7144_v49 }
0x155e   : > { %8413 = vmatprep.subr.mxu1 %v7159_v12 }
0x155f   : > { %8414 = vmatpush3.msra.mxu1 %v7143_v50 }
0x1560   : > { %8415 = vmatprep.subr.mxu1 %v7158_v56 }
0x1561   : > { %8416 = vmatpush3.msra.mxu1 %v7142_v43 }
0x15f6   : > { %v6709_v41 = vpop.f32.mrf.mxu0 }
0x15f7   : > { %v6710_v8 = vadd.f32 %v6709_v41, %v11293_v7 }
0x15f8   : > { %v6711_v48 = vpop.f32.mrf.mxu0 }
0x15f9   : > { %v6712_v14 = vadd.f32 %v6711_v48, %v11299_v21 }
0x15fa   : > { %v6715_v13 = vpop.f32.mrf.mxu0 }
0x15fb   : > { %v6716_v31 = vadd.f32 %v6715_v13, %v6626_v25 }
0x15fc   : > { %v6717_v59 = vpop.f32.mrf.mxu0 }
0x15fd   : > { %v6718_v29 = vadd.f32 %v6717_v59, %v6628_v40  ;;  %v6934_v40 = vld [vmem:[%s11577_s12] sm:$0x3]  ;;  %s1606_s12 = scalar_lea.vmem %s11580_s22, %s7851_s0 }
0x15fe   : > { %v6721_v52 = vpop.f32.mrf.mxu0  ;;  %v6939_v50 = vrot.slane %v6934_v40, %v10638_v15  ;;  %v6943_v43 = vrot.slane %v6934_v40, %v11191_v53  ;;  %v7973_v40 = vld [vmem:[%s11575_s3 + $0x108] sm:$0xff] }
0x15ff   : > { %v6722_v17 = vadd.f32 %v6721_v52, %v6632_v11 }
0x1600   : > { %v6723_v54 = vpop.f32.mrf.mxu0 }
0x1601   : > { %v6724_v44 = vadd.f32 %v6723_v54, %v6634_v42 }
0x1602   : > { %v6727_v3 = vpop.f32.mrf.mxu0 }
0x1603   : > { %v6728_v37 = vadd.f32 %v6727_v3, %v6638_v58 }
0x1604   : > { %v6729_v32 = vpop.f32.mrf.mxu0 }
0x1605   : > { %v6730_v4 = vadd.f32 %v6729_v32, %v6640_v60 }
0x1606   : > { %v6863_v62 = vpop.f32.mrf.mxu1 }
0x1607   : > { %v6886_v26 = vadd.f32 %v6863_v62, %v6710_v8  ;;  %v7996_v8 = vld [vmem:[%s11575_s3 + $0x1c0] sm:$0xff] }
0x1608   : > { %v6865_v1 = vpop.f32.mrf.mxu1 }
0x1609   : > { %v6887_v24 = vadd.f32 %v6865_v1, %v6712_v14  ;;  %v6906_v12 = vadd.f32 %v6899_v20, %v6886_v26  ;;  %v7984_v14 = vld [vmem:[%s11575_s3 + $0x160] sm:$0xff]  ;;  %v7975_v26 = vld [vmem:[%s11575_s3 + $0x118] sm:$0xff] }
0x160a   : > { %v6869_v2 = vpop.f32.mrf.mxu1 }
0x160b   : > { %v6888_v22 = vadd.f32 %v6869_v2, %v6716_v31  ;;  %v6907_v41 = vadd.f32 %v6903_v33, %v6887_v24  ;;  %v6926_v54 = vmul.f32 %v6919_v27, %v6906_v12  ;;  %v7992_v24 = vld [vmem:[%s11575_s3 + $0x1a0] sm:$0xff] }
0x160c   : > { %v6871_v5 = vpop.f32.mrf.mxu1  ;;  %v8016_v12 = vld [vmem:[%s11575_s3 + $0x260] sm:$0xff] }
0x160d   : > { %v6889_v39 = vadd.f32 %v6871_v5, %v6718_v29  ;;  %v6908_v7 = vadd.f32 %v6899_v20, %v6888_v22  ;;  %v6927_v60 = vmul.f32 %v6923_v23, %v6907_v41  ;;  %v6946_v29 = vadd.f32 %v6939_v50, %v6926_v54  ;;  %v7994_v22 = vld [vmem:[%s11575_s3 + $0x1b0] sm:$0xff]  ;;  %v7140_v54 = vld [vmem:[%s11575_s3] sm:$0xff] }
0x160e   : > { %v6875_v19 = vpop.f32.mrf.mxu1  ;;  %v8018_v41 = vld [vmem:[%s11575_s3 + $0x270] sm:$0xff] }
0x160f   : > { %v6890_v36 = vadd.f32 %v6875_v19, %v6722_v17  ;;  %v6909_v34 = vadd.f32 %v6903_v33, %v6889_v39  ;;  %v6928_v58 = vmul.f32 %v6919_v27, %v6908_v7  ;;  %v6947_v19 = vadd.f32 %v6943_v43, %v6927_v60  ;;  %v7982_v39 = vld [vmem:[%s11575_s3 + $0x150] sm:$0xff]  ;;  %v8013_v60 = vld [vmem:[%s11575_s3 + $0x248] sm:$0xff] }
0x1610   : > { %v6877_v6 = vpop.f32.mrf.mxu1  ;;  %v11346_v32 = vmax.f32 %v6946_v29, 0.0  ;;  %v8034_v7 = vld [vmem:[%s11575_s3 + $0x2f0] sm:$0xff]  ;;  %v8024_v29 = vld [vmem:[%s11575_s3 + $0x2a0] sm:$0xff] }
0x1611   : > { %v6891_v18 = vadd.f32 %v6877_v6, %v6724_v44  ;;  %v6910_v28 = vadd.f32 %v6899_v20, %v6890_v36  ;;  %v6929_v42 = vmul.f32 %v6923_v23, %v6909_v34  ;;  %v6948_v5 = vadd.f32 %v6939_v50, %v6928_v58  ;;  %v7986_v36 = vld [vmem:[%s11575_s3 + $0x170] sm:$0xff]  ;;  %v7985_v6 = vld [vmem:[%s11575_s3 + $0x168] sm:$0xff]  ;;  %v7972_v34 = vld [vmem:[%s11575_s3 + $0x100] sm:$0xff] }
0x1612   : > { %v6881_v9 = vpop.f32.mrf.mxu1  ;;  %v6955_v31 = vmax.f32 %v6947_v19, 0.0  ;;  %v8029_v58 = vld [vmem:[%s11575_s3 + $0x2c8] sm:$0xff] }
0x1613   : > { %v6911_v25 = vadd.f32 %v6903_v33, %v6891_v18  ;;  %v6892_v10 = vadd.f32 %v6881_v9, %v6728_v37  ;;  %v6930_v56 = vmul.f32 %v6919_v27, %v6910_v28  ;;  %v6949_v3 = vadd.f32 %v6943_v43, %v6929_v42  ;;  %v7983_v37 = vld [vmem:[%s11575_s3 + $0x158] sm:$0xff]  ;;  %v7981_v18 = vld [vmem:[%s11575_s3 + $0x148] sm:$0xff]  ;;  %v7978_v9 = vld [vmem:[%s11575_s3 + $0x130] sm:$0xff] }
0x1614   : > { %v6883_v21 = vpop.f32.mrf.mxu1  ;;  %v11342_v47 = vmax.f32 %v6948_v5, 0.0  ;;  %v7974_v28 = vld [vmem:[%s11575_s3 + $0x110] sm:$0xff]  ;;  %v8009_v19 = vld [vmem:[%s11575_s3 + $0x228] sm:$0xff] }
0x1615   : > { %v6912_v45 = vadd.f32 %v6899_v20, %v6892_v10  ;;  %v6893_v46 = vadd.f32 %v6883_v21, %v6730_v4  ;;  %v6931_v11 = vmul.f32 %v6923_v23, %v6911_v25  ;;  %v6950_v1 = vadd.f32 %v6939_v50, %v6930_v56  ;;  %v7995_v20 = vld [vmem:[%s11575_s3 + $0x1b8] sm:$0xff]  ;;  %v7993_v4 = vld [vmem:[%s11575_s3 + $0x1a8] sm:$0xff]  ;;  %v7976_v25 = vld [vmem:[%s11575_s3 + $0x120] sm:$0xff] }
0x1616   : > { %v11340_v44 = vmax.f32 %v6949_v3, 0.0  ;;  %v7991_v10 = vld [vmem:[%s11575_s3 + $0x198] sm:$0xff]  ;;  %v7989_v21 = vld [vmem:[%s11575_s3 + $0x188] sm:$0xff]  ;;  %v8030_v42 = vld [vmem:[%s11575_s3 + $0x2d0] sm:$0xff] }
0x1617   : > { %v6932_v48 = vmul.f32 %v6919_v27, %v6912_v45  ;;  %v6913_v49 = vadd.f32 %v6903_v33, %v6893_v46  ;;  %v6951_v62 = vadd.f32 %v6943_v43, %v6931_v11  ;;  %v11336_v53 = vmax.f32 %v6950_v1, 0.0  ;;  %v8002_v33 = vld [vmem:[%s11575_s3 + $0x1f0] sm:$0xff]  ;;  %v8035_v45 = vld [vmem:[%s11575_s3 + $0x2f8] sm:$0xff]  ;;  %v8033_v11 = vld [vmem:[%s11575_s3 + $0x2e8] sm:$0xff] }
0x1618   : > { %v7990_v27 = vld [vmem:[%s11575_s3 + $0x190] sm:$0xff]  ;;  %v8019_v46 = vld [vmem:[%s11575_s3 + $0x278] sm:$0xff]  ;;  %v8012_v1 = vld [vmem:[%s11575_s3 + $0x240] sm:$0xff] }
0x1619   : > { %v6933_v13 = vmul.f32 %v6923_v23, %v6913_v49  ;;  %v6952_v59 = vadd.f32 %v6939_v50, %v6932_v48  ;;  %v11334_v15 = vmax.f32 %v6951_v62, 0.0  ;;  %v7988_v23 = vld [vmem:[%s11575_s3 + $0x180] sm:$0xff]  ;;  %v8017_v48 = vld [vmem:[%s11575_s3 + $0x268] sm:$0xff]  ;;  %v8031_v50 = vld [vmem:[%s11575_s3 + $0x2d8] sm:$0xff] }
0x161a   : > { %v8032_v49 = vld [vmem:[%s11575_s3 + $0x2e0] sm:$0xff]  ;;  %v8015_v56 = vld [vmem:[%s11575_s3 + $0x258] sm:$0xff]  ;;  %v8026_v5 = vld [vmem:[%s11575_s3 + $0x2b0] sm:$0xff] }
0x161b   : > { %v6953_v52 = vadd.f32 %v6943_v43, %v6933_v13  ;;  %v11331_v17 = vmax.f32 %v6952_v59, 0.0  ;;  %v8014_v13 = vld [vmem:[%s11575_s3 + $0x250] sm:$0xff]  ;;  %v7157_v43 = vld [vmem:[%s11575_s3 + $0x88] sm:$0xff]  ;;  %v8028_v62 = vld [vmem:[%s11575_s3 + $0x2c0] sm:$0xff] }
0x161c   : > { %v7141_v59 = vld [vmem:[%s11575_s3 + $0x8] sm:$0xff]  ;;  %8417 = vmatprep.subr.mxu1 %v7157_v43  ;;  %v8011_v3 = vld [vmem:[%s11575_s3 + $0x238] sm:$0xff] }
0x161d   : > { %v11329_v2 = vmax.f32 %v6953_v52, 0.0  ;;  %8418 = vmatpush3.msra.mxu1 %v7141_v59  ;;  %v7156_v52 = vld [vmem:[%s11575_s3 + $0x80] sm:$0xff] }
0x161e   : > { %8419 = vmatprep.subr.mxu1 %v7156_v52 }
0x161f   : > { %6986 = vmatprep.subr.mxu0 %v11329_v2  ;;  %8420 = vmatpush3.msra.mxu1 %v7140_v54 }
0x1620   : > { %6987 = vmatpush1.msra.mxu0 %v11331_v17 }
0x1621   : > { %6988 = vmatprep.subr.mxu0 %v11334_v15 }
0x1622   : > { %6989 = vmatpush1.msra.mxu0 %v11336_v53 }
0x1623   : > { %6990 = vmatprep.subr.mxu0 %v11340_v44 }
0x1624   : > { %6991 = vmatpush1.msra.mxu0 %v11342_v47 }
0x1625   : > { %6992 = vmatprep.subr.mxu0 %v6955_v31 }
0x1626   : > { %6993 = vmatpush1.msra.mxu0 %v11346_v32 }
0x1627   : > { %7964 = vmatmul.mubr.msk.f32.vlgmr.msra.gmra.mxu0 %vm2033_vm4, %v11242_v55  ;;  %7075 = vmatprep.subr.mxu0 %v11329_v2  ;;  %v8003_v55 = vld [vmem:[%s11575_s3 + $0x1f8] sm:$0xff] }
0x1628   : > { %7076 = vmatpush1.msra.mxu0 %v11331_v17  ;;  %7032 = vmatprep.mubr.f32.mxu0 %v10080_v0 }
0x1629   : > { %7077 = vmatprep.subr.mxu0 %v11334_v15 }
0x162a   : > { %7078 = vmatpush1.msra.mxu0 %v11336_v53 }
0x162b   : > { %7965 = vmatmul.mubr.msk.f32.gmra.mxu0 %vm2033_vm4, %v11247_v57  ;;  %7079 = vmatprep.subr.mxu0 %v11340_v44  ;;  %v7987_v57 = vld [vmem:[%s11575_s3 + $0x178] sm:$0xff] }
0x162c   : > { %7080 = vmatpush1.msra.mxu0 %v11342_v47  ;;  %7038 = vmatprep.mubr.f32.mxu0 %v10080_v0 }
0x162d   : > { %7081 = vmatprep.subr.mxu0 %v6955_v31 }
0x162e   : > { %7082 = vmatpush1.msra.mxu0 %v11346_v32 }
0x162f   : > { %7966 = vmatmul.mubr.msk.f32.gmra.mxu0 %vm2033_vm4, %v11256_v51  ;;  %8345 = vmatprep.subr.mxu0 %v8003_v55  ;;  %v8001_v51 = vld [vmem:[%s11575_s3 + $0x1e8] sm:$0xff] }
0x1630   : > { %7044 = vmatprep.mubr.f32.mxu0 %v10080_v0  ;;  %v8021_v55 = vld [vmem:[%s11575_s3 + $0x288] sm:$0xff] }
0x1633   : > { %7967 = vmatmul.mubr.msk.f32.gmra.mxu0 %vm2033_vm4, %v11261_v61  ;;  %v8000_v61 = vld [vmem:[%s11575_s3 + $0x1e0] sm:$0xff] }
0x1634   : > { %7115 = vmatprep.mubr.f32.mxu0 %v10080_v0 }
0x1637   : > { %7968 = vmatmul.mubr.msk.f32.vlgmr.msra.gmra.mxu0 %vm2033_vm4, %v11266_v63  ;;  %v7999_v63 = vld [vmem:[%s11575_s3 + $0x1d8] sm:$0xff] }
0x1638   : > { %8346 = vmatpush3.msra.mxu0 %v7987_v57  ;;  %7121 = vmatprep.mubr.f32.mxu0 %v10080_v0  ;;  %v8005_v57 = vld [vmem:[%s11575_s3 + $0x208] sm:$0xff] }
0x1639   : > { %8347 = vmatprep.subr.mxu0 %v8002_v33  ;;  %v8020_v33 = vld [vmem:[%s11575_s3 + $0x280] sm:$0xff] }
0x163a   : > { %8348 = vmatpush3.msra.mxu0 %v7986_v36  ;;  %v8004_v36 = vld [vmem:[%s11575_s3 + $0x200] sm:$0xff] }
0x163b   : > { %8349 = vmatprep.subr.mxu0 %v8001_v51  ;;  %7969 = vmatmul.mubr.msk.f32.gmra.mxu0 %vm2033_vm4, %v11271_v16  ;;  %v7997_v16 = vld [vmem:[%s11575_s3 + $0x1c8] sm:$0xff] }
0x163c   : > { %8350 = vmatpush3.msra.mxu0 %v7985_v6  ;;  %7127 = vmatprep.mubr.f32.mxu0 %v10080_v0 }
0x163d   : > { %8351 = vmatprep.subr.mxu0 %v8000_v61 }
0x163e   : > { %8352 = vmatpush3.msra.mxu0 %v7984_v14 }
0x163f   : > { %8353 = vmatprep.subr.mxu0 %v7999_v63  ;;  %7970 = vmatmul.mubr.msk.f32.gmra.mxu0 %vm2033_vm4, %v11276_v30  ;;  %v7980_v30 = vld [vmem:[%s11575_s3 + $0x140] sm:$0xff] }
0x1640   : > { %8354 = vmatpush3.msra.mxu0 %v7983_v37  ;;  %7133 = vmatprep.mubr.f32.mxu0 %v10080_v0  ;;  %v7979_v0 = vld [vmem:[%s11575_s3 + $0x138] sm:$0xff] }
0x1641   : > { %8355 = vmatprep.subr.mxu0 %v7998_v38 }
0x1642   : > { %8356 = vmatpush3.msra.mxu0 %v7982_v39 }
0x1643   : > { %8357 = vmatprep.subr.mxu0 %v7997_v16  ;;  %7971 = vmatmul.mubr.msk.f32.gmra.mxu0 %vm2033_vm4, %v11281_v35  ;;  %v7977_v35 = vld [vmem:[%s11575_s3 + $0x128] sm:$0xff] }
0x1644   : > { %8358 = vmatpush3.msra.mxu0 %v7981_v18  ;;  %7269 = vmatprep.mubr.f32.mxu0 %v6955_v31  ;;  %v8022_v31 = vld [vmem:[%s11575_s3 + $0x290] sm:$0xff] }
0x1645   : > { %8359 = vmatprep.subr.mxu0 %v7996_v8 }
0x1646   : > { %8360 = vmatpush3.msra.mxu0 %v7980_v30 }
0x1647   : > { %8361 = vmatprep.subr.mxu0 %v7995_v20 }
0x1648   : > { %8362 = vmatpush3.msra.mxu0 %v7979_v0 }
0x1649   : > { %8363 = vmatprep.subr.mxu0 %v7994_v22 }
0x164a   : > { %8364 = vmatpush3.msra.mxu0 %v7978_v9 }
0x164b   : > { %8365 = vmatprep.subr.mxu0 %v7993_v4 }
0x164c   : > { %8366 = vmatpush3.msra.mxu0 %v7977_v35 }
0x164d   : > { %8367 = vmatprep.subr.mxu0 %v7992_v24 }
0x164e   : > { %8368 = vmatpush3.msra.mxu0 %v7976_v25 }
0x164f   : > { %8369 = vmatprep.subr.mxu0 %v7991_v10 }
0x1650   : > { %8370 = vmatpush3.msra.mxu0 %v7975_v26 }
0x1651   : > { %8371 = vmatprep.subr.mxu0 %v7990_v27 }
0x1652   : > { %8372 = vmatpush3.msra.mxu0 %v7974_v28 }
0x1653   : > { %8373 = vmatprep.subr.mxu0 %v7989_v21 }
0x1654   : > { %8374 = vmatpush3.msra.mxu0 %v7973_v40 }
0x1655   : > { %8375 = vmatprep.subr.mxu0 %v7988_v23 }
0x1656   : > { %8376 = vmatpush3.msra.mxu0 %v7972_v34 }
0x1657   : > { %7270 = vmatmul.mubr.f32.vlgmr.msra.gmra.mxu0 %v11346_v32  ;;  %8433 = vmatprep.subr.mxu0 %v8035_v45  ;;  %v8006_v32 = vld [vmem:[%s11575_s3 + $0x210] sm:$0xff] }
0x1658   : > { %7274 = vmatprep.mubr.f32.mxu0 %v11340_v44  ;;  %8434 = vmatpush3.msra.mxu0 %v8019_v46  ;;  %v8023_v44 = vld [vmem:[%s11575_s3 + $0x298] sm:$0xff] }
0x1659   : > { %8435 = vmatprep.subr.mxu0 %v8034_v7 }
0x165a   : > { %8436 = vmatpush3.msra.mxu0 %v8018_v41 }
0x165b   : > { %7275 = vmatmul.mubr.f32.gmra.mxu0 %v11342_v47  ;;  %8437 = vmatprep.subr.mxu0 %v8033_v11  ;;  %v8007_v47 = vld [vmem:[%s11575_s3 + $0x218] sm:$0xff] }
0x165c   : > { %7279 = vmatprep.mubr.f32.mxu0 %v11334_v15  ;;  %8438 = vmatpush3.msra.mxu0 %v8017_v48  ;;  %v8025_v15 = vld [vmem:[%s11575_s3 + $0x2a8] sm:$0xff] }
0x165d   : > { %8439 = vmatprep.subr.mxu0 %v8032_v49 }
0x165e   : > { %8440 = vmatpush3.msra.mxu0 %v8016_v12 }
0x165f   : > { %7280 = vmatmul.mubr.f32.gmra.mxu0 %v11336_v53  ;;  %8441 = vmatprep.subr.mxu0 %v8031_v50  ;;  %v8008_v53 = vld [vmem:[%s11575_s3 + $0x220] sm:$0xff] }
0x1660   : > { %7284 = vmatprep.mubr.f32.mxu0 %v11329_v2  ;;  %8442 = vmatpush3.msra.mxu0 %v8015_v56  ;;  %v8027_v2 = vld [vmem:[%s11575_s3 + $0x2b8] sm:$0xff] }
0x1661   : > { %8443 = vmatprep.subr.mxu0 %v8030_v42  ;;  %v8036_v42 = vld [vmem:[%s11578_s14] ss:$0 sm:$0xff] }
0x1662   : > { %8444 = vmatpush3.msra.mxu0 %v8014_v13 }
0x1663   : > { %7285 = vmatmul.mubr.f32.gmra.mxu0 %v11331_v17  ;;  %8445 = vmatprep.subr.mxu0 %v8029_v58  ;;  %v8010_v17 = vld [vmem:[%s11575_s3 + $0x230] sm:$0xff] }
0x1664   : > { %8446 = vmatpush3.msra.mxu0 %v8013_v60 }
0x1665   : > { %8447 = vmatprep.subr.mxu0 %v8028_v62 }
0x1666   : > { %8448 = vmatpush3.msra.mxu0 %v8012_v1 }
0x1667   : > { %8449 = vmatprep.subr.mxu0 %v8027_v2 }
0x1668   : > { %8450 = vmatpush3.msra.mxu0 %v8011_v3 }
0x1669   : > { %8451 = vmatprep.subr.mxu0 %v8026_v5 }
0x166a   : > { %8452 = vmatpush3.msra.mxu0 %v8010_v17 }
0x166b   : > { %8453 = vmatprep.subr.mxu0 %v8025_v15 }
0x166c   : > { %8454 = vmatpush3.msra.mxu0 %v8009_v19 }
0x166d   : > { %8455 = vmatprep.subr.mxu0 %v8024_v29 }
0x166e   : > { %8456 = vmatpush3.msra.mxu0 %v8008_v53 }
0x166f   : > { %8457 = vmatprep.subr.mxu0 %v8023_v44 }
0x1670   : > { %8458 = vmatpush3.msra.mxu0 %v8007_v47 }
0x1671   : > { %8459 = vmatprep.subr.mxu0 %v8022_v31 }
0x1672   : > { %8460 = vmatpush3.msra.mxu0 %v8006_v32 }
0x1673   : > { %8461 = vmatprep.subr.mxu0 %v8021_v55 }
0x1674   : > { %8462 = vmatpush3.msra.mxu0 %v8005_v57 }
0x1675   : > { %8463 = vmatprep.subr.mxu0 %v8020_v33 }
0x1676   : > { %8464 = vmatpush3.msra.mxu0 %v8004_v36 }
0x16e7   : > { %v7028_v51 = vpop.f32.mrf.mxu0 }
0x16e9   : > { %v7030_v6 = vpop.f32.mrf.mxu0 }
0x16ea   : > { %7354 = vmatprep.mubr.f32.mxu1 %v7030_v6 }
0x16eb   : > { %v7034_v61 = vpop.f32.mrf.mxu0  ;;  %7355 = vmatmul.mubr.f32.vlgmr.msra.gmra.mxu1 %v7028_v51 }
0x16ed   : > { %v7036_v14 = vpop.f32.mrf.mxu0 }
0x16ee   : > { %7359 = vmatprep.mubr.f32.mxu1 %v7036_v14 }
0x16ef   : > { %v7040_v63 = vpop.f32.mrf.mxu0  ;;  %7360 = vmatmul.mubr.f32.gmra.mxu1 %v7034_v61 }
0x16f1   : > { %v7042_v37 = vpop.f32.mrf.mxu0 }
0x16f2   : > { %7364 = vmatprep.mubr.f32.mxu1 %v7042_v37 }
0x16f3   : > { %v7046_v38 = vpop.f32.mrf.mxu0  ;;  %7365 = vmatmul.mubr.f32.gmra.mxu1 %v7040_v63 }
0x16f5   : > { %v7048_v39 = vpop.f32.mrf.mxu0 }
0x16f6   : > { %7369 = vmatprep.mubr.f32.mxu1 %v7048_v39 }
0x16f7   : > { %v7117_v16 = vpop.f32.mrf.mxu0  ;;  %7370 = vmatmul.mubr.f32.gmra.mxu1 %v7046_v38 }
0x16f9   : > { %v7119_v18 = vpop.f32.mrf.mxu0 }
0x16fa   : > { %7472 = vmatprep.mubr.f32.mxu0 %v7119_v18 }
0x16fb   : > { %v7123_v8 = vpop.f32.mrf.mxu0  ;;  %7473 = vmatmul.mubr.f32.vlgmr.msra.gmra.mxu0 %v7117_v16 }
0x16fd   : > { %v7125_v30 = vpop.f32.mrf.mxu0 }
0x16fe   : > { %7477 = vmatprep.mubr.f32.mxu0 %v7125_v30 }
0x16ff   : > { %v7129_v20 = vpop.f32.mrf.mxu0  ;;  %7478 = vmatmul.mubr.f32.gmra.mxu0 %v7123_v8 }
0x1701   : > { %v7131_v0 = vpop.f32.mrf.mxu0 }
0x1702   : > { %7482 = vmatprep.mubr.f32.mxu0 %v7131_v0 }
0x1703   : > { %v7135_v22 = vpop.f32.mrf.mxu0  ;;  %7483 = vmatmul.mubr.f32.gmra.mxu0 %v7129_v20 }
0x1705   : > { %v7137_v9 = vpop.f32.mrf.mxu0 }
0x1706   : > { %7487 = vmatprep.mubr.f32.mxu0 %v7137_v9 }
0x1707   : > { %7488 = vmatmul.mubr.f32.gmra.mxu0 %v7135_v22 }
0x1717   : > { %v8377_v4 = vpop.f32.mrf.mxu0 }
0x1719   : > { %v8378_v35 = vpop.f32.mrf.mxu0 }
0x171a   : > { %v8379_v11 = vadd.f32 %v8378_v35, %v8377_v4 }
0x171b   : > { %v8380_v24 = vpop.f32.mrf.mxu0 }
0x171d   : > { %v8381_v25 = vpop.f32.mrf.mxu0 }
0x171e   : > { %v8382_v43 = vadd.f32 %v8381_v25, %v8380_v24 }
0x171f   : > { %v8383_v26 = vpop.f32.mrf.mxu0 }
0x1721   : > { %v8384_v21 = vpop.f32.mrf.mxu0 }
0x1722   : > { %v8385_v3 = vadd.f32 %v8384_v21, %v8383_v26 }
0x1723   : > { %v8386_v23 = vpop.f32.mrf.mxu0 }
0x1725   : > { %v8387_v45 = vpop.f32.mrf.mxu0 }
0x1726   : > { %v8388_v47 = vadd.f32 %v8387_v45, %v8386_v23 }
0x17ab   : > { %v8421_v10 = vpop.f32.mrf.mxu1 }
0x17ad   : > { %v8422_v27 = vpop.f32.mrf.mxu1 }
0x17ae   : > { %v8423_v46 = vadd.f32 %v8422_v27, %v8421_v10 }
0x17af   : > { %v8424_v28 = vpop.f32.mrf.mxu1 }
0x17b0   : > { %v7357_v49 = vadd.f32 %v8423_v46, %v8379_v11 }
0x17b1   : > { %v8425_v40 = vpop.f32.mrf.mxu1 }
0x17b2   : > { %v8426_v12 = vadd.f32 %v8425_v40, %v8424_v28 }
0x17b3   : > { %v8427_v34 = vpop.f32.mrf.mxu1 }
0x17b4   : > { %v7362_v60 = vadd.f32 %v8426_v12, %v8382_v43 }
0x17b5   : > { %v8428_v7 = vpop.f32.mrf.mxu1 }
0x17b6   : > { %v8429_v52 = vadd.f32 %v8428_v7, %v8427_v34 }
0x17b7   : > { %v8430_v56 = vpop.f32.mrf.mxu1 }
0x17b8   : > { %v7367_v15 = vadd.f32 %v8429_v52, %v8385_v3 }
0x17b9   : > { %v8431_v1 = vpop.f32.mrf.mxu1 }
0x17ba   : > { %v8432_v19 = vadd.f32 %v8431_v1, %v8430_v56 }
0x17bb   : > { %v8465_v41 = vpop.f32.mrf.mxu0 }
0x17bc   : > { %v7372_v55 = vadd.f32 %v8432_v19, %v8388_v47 }
0x17bd   : > { %v8466_v48 = vpop.f32.mrf.mxu0 }
0x17be   : > { %v8467_v50 = vadd.f32 %v8466_v48, %v8465_v41 }
0x17bf   : > { %v8468_v13 = vpop.f32.mrf.mxu0 }
0x17c0   : > { %v7493_v58 = vadd.f32 %v8467_v50, %v7357_v49 }
0x17c1   : > { %v8469_v59 = vpop.f32.mrf.mxu0 }
0x17c2   : > { %v7504_v62 = vadd.f32 %v8036_v42, %v7493_v58  ;;  %v8470_v54 = vadd.f32 %v8469_v59, %v8468_v13 }
0x17c3   : > { %v8471_v2 = vpop.f32.mrf.mxu0 }
0x17c4   : > { %9362 = vtanh.f32 %v7504_v62  ;;  %v7494_v5 = vadd.f32 %v8470_v54, %v7362_v60 }
0x17c5   : > { %v8472_v17 = vpop.f32.mrf.mxu0 }
0x17c6   : > { %v7505_v29 = vadd.f32 %v8036_v42, %v7494_v5  ;;  %v8473_v53 = vadd.f32 %v8472_v17, %v8471_v2 }
0x17c7   : > { %v8474_v44 = vpop.f32.mrf.mxu0 }
0x17c8   : > { %9364 = vtanh.f32 %v7505_v29  ;;  %v7495_v31 = vadd.f32 %v8473_v53, %v7367_v15 }
0x17c9   : > { %v8475_v32 = vpop.f32.mrf.mxu0 }
0x17ca   : > { %v7506_v57 = vadd.f32 %v8036_v42, %v7495_v31  ;;  %v8476_v33 = vadd.f32 %v8475_v32, %v8474_v44 }
0x17cc   : > { %9366 = vtanh.f32 %v7506_v57  ;;  %v7496_v36 = vadd.f32 %v8476_v33, %v7372_v55 }
0x17ce   : > { %v7507_v51 = vadd.f32 %v8036_v42, %v7496_v36 }
0x17d0   : > { %9368 = vtanh.f32 %v7507_v51 }
0x17d1   : > { %v9363_v6 = vpop.eup %9362 }
0x17d2   : > { %7513 = vst.msk [vmem:[%s1606_s12] sm:$0xff] %vm7512_vm7, %v9363_v6 }
0x17d5   : > { %v9365_v61 = vpop.eup %9364 }
0x17d6   : > { %7514 = vst.msk [vmem:[%s1606_s12 + $0x8] sm:$0xff] %vm7512_vm7, %v9365_v61 }
0x17d9   : > { %v9367_v14 = vpop.eup %9366 }
0x17da   : > { %7515 = vst.msk [vmem:[%s1606_s12 + $0x10] sm:$0xff] %vm7512_vm7, %v9367_v14 }
0x17dd   : > { %v9369_v63 = vpop.eup %9368 }
0x17de   : > { %7516 = vst.msk [vmem:[%s1606_s12 + $0x18] sm:$0xff] %vm7512_vm7, %v9369_v63 }
0x17df PF: > { %p109_p11 = scmp.ge.s32.totalorder %s10517_s23, 4   ;;  %s11581_s28 = smov %s10002_s1 }
0x17e0   : > { %s11582_s1 = smov %s10006_s2  ;;  %s11583_s2 = smov %s10528_s5 }
0x17e1   : > { %s11584_s0 = smov %s10517_s23  ;;  %111 = sbr.rel (!%p109_p11) target bundleno = 100 (0x64), region = 376 }
0x17e6   :  { %7539 = vsyncpa [#allocation3], 1 }
0x17e7   :  { %7541 = vsyncpa [#allocation3 + $0x1], 1 }
0x17e8   :  { %7542 = vsyncpa [#allocation5], 1 }
0x17e9   :  { %7543 = vsyncpa [#allocation8], 1 }
0x17ea   :  { %7544 = vsyncpa [#allocation11], 1 }
0x17eb   :  { %7545 = vsyncpa [#allocation14], 1 }
0x17ec   :  { %7546 = vsyncpa [#allocation17], 1 }
0x17ed   :  { %7547 = vsyncpa [#allocation20], 1 }
0x17ee   :  { %7548 = vsyncpa [#allocation23], 1 }
0x17ef   :  { %7549 = vsyncpa [#allocation26], 1 }
0x17f0   :  { %7550 = vsyncpa [#allocation29], 1 }
0x17f1   :  { %7551 = vsyncpa [#allocation32], 1 }

</bundles_post_ra>
